<compile_context>
chip_gen: v7x
topology: tpu7x:2x2x1
jax: 0.10.0
libtpu: 0.0.40
codegen_flags: <defaults>
</compile_context>

<pallas_src>
import numpy as np
import jax
import jax.numpy as jnp
from jax.experimental import pallas as pl
from jax.experimental.pallas import tpu as pltpu

EPS = 1e-5
K = 4  # ConvTranspose2d kernel size


# ----------------------- static operator construction (one-time) -----------------------

def _build_sel_matrices(B, H, W):
    """0/1 scatter operators Sel[k, out_row, in_row] for tap k = kh*4 + kw.

    out_row = b*OH*OW + oh*OW + ow,  in_row = b*H*W + ih*W + iw,
    with oh = 2*ih - 1 + kh, ow = 2*iw - 1 + kw (ConvTranspose2d, stride 2, padding 1).
    """
    OH, OW = 2 * H, 2 * W
    sel = np.zeros((K * K, B * OH * OW, B * H * W), np.float32)
    for kh in range(K):
        for kw in range(K):
            k = kh * K + kw
            for oh in range(OH):
                t = oh + 1 - kh
                if t % 2 != 0:
                    continue
                ih = t // 2
                if not (0 <= ih < H):
                    continue
                for ow in range(OW):
                    u = ow + 1 - kw
                    if u % 2 != 0:
                        continue
                    iw = u // 2
                    if not (0 <= iw < W):
                        continue
                    for b in range(B):
                        sel[k, b * OH * OW + oh * OW + ow, b * H * W + ih * W + iw] = 1.0
    return sel


def prepare_decoder_operands(params, channels, out_channels, initial_size, batch):
    """One-time (hoisted) preprocessing: per-tap weight matrices, Sel scatter operators, and
    the fc weight/bias permuted so the fc output is already the NHWC-flat first activation."""
    S = initial_size
    S2 = S * S
    C0 = channels[0]
    latent = params["fc_w"].shape[1]

    fc_w = jnp.asarray(params["fc_w"], jnp.float32)   # (C0*S2, latent), row o = c*S2 + s
    fc_b = jnp.asarray(params["fc_b"], jnp.float32)
    ch_base = jnp.arange(C0) * S2
    # fcw_cat[(s, l), c] = fc_w[c*S2 + s, l]
    fcw_cat = jnp.stack([fc_w[ch_base + s, :].T for s in range(S2)]).reshape(S2 * latent, C0)
    # fcb_x0[(b, s), c] = fc_b[c*S2 + s]
    fcb_x0 = jnp.tile(fc_b.reshape(C0, S2).T, (batch, 1))

    io_ch = list(channels) + [out_channels]
    layers = []
    Hcur = S
    for li in range(len(io_ch) - 1):
        cout = io_ch[li + 1]
        Wt = jnp.asarray(params["deconv_w"][li], jnp.float32)                 # (cin, cout, 4, 4)
        wtaps = jnp.stack([Wt[:, :, kh, kw] for kh in range(K) for kw in range(K)])  # (16, cin, cout)
        entry = {
            "sel": jnp.asarray(_build_sel_matrices(batch, Hcur, Hcur)),
            "w": wtaps,
            "b": jnp.asarray(params["deconv_b"][li], jnp.float32).reshape(1, cout),
        }
        if li < len(io_ch) - 2:
            entry["gamma"] = jnp.asarray(params["bn_gamma"][li], jnp.float32).reshape(1, cout)
            entry["beta"] = jnp.asarray(params["bn_beta"][li], jnp.float32).reshape(1, cout)
        layers.append(entry)
        Hcur *= 2
    return {
        "fcw": fcw_cat, "fcb": fcb_x0, "layers": layers,
        "batch": batch, "s2": S2, "latent": latent,
        "final_hw": Hcur, "out_channels": out_channels,
    }


# --------------------------------- fused Pallas kernel ---------------------------------

def _make_fused_kernel(n_layers):
    def kernel(*refs):
        zblk_ref, fcw_ref, fcb_ref = refs[0], refs[1], refs[2]
        pos = 3

        # fc + NCHW->NHWC "view" (weights pre-permuted): rows = (b, ih, iw), lanes = channels.
        x = fcb_ref[...] + jnp.dot(zblk_ref[...], fcw_ref[...],
                                   preferred_element_type=jnp.float32)

        for li in range(n_layers):
            sel_ref, w_ref, b_ref = refs[pos], refs[pos + 1], refs[pos + 2]
            last = li == n_layers - 1
            if last:
                pos += 3
            else:
                gamma_ref, beta_ref = refs[pos + 3], refs[pos + 4]
                pos += 5

            n_taps, m_out, _ = sel_ref.shape
            cout = w_ref.shape[2]

            # ConvTranspose2d(4, stride=2, padding=1) as 16 tap matmuls, all in VMEM:
            #   Y = bias + sum_k Sel_k @ (X @ W_k)
            y = jnp.zeros((m_out, cout), jnp.float32) + b_ref[...]
            for k in range(n_taps):
                t = jnp.dot(x, w_ref[k], preferred_element_type=jnp.float32)
                y = y + jnp.dot(sel_ref[k], t, preferred_element_type=jnp.float32)

            if last:
                refs[pos][...] = jnp.tanh(y)          # out_ref
            else:
                # BatchNorm2d (training-mode batch statistics) + ReLU
                mean = jnp.mean(y, axis=0, keepdims=True)
                var = jnp.mean(jnp.square(y - mean), axis=0, keepdims=True)
                y = gamma_ref[...] * ((y - mean) * jax.lax.rsqrt(var + EPS)) + beta_ref[...]
                x = jnp.maximum(y, 0.0)
    return kernel


def attribute_decoder_forward(z, ops):
    B, S2, latent = ops["batch"], ops["s2"], ops["latent"]
    n_layers = len(ops["layers"])
    HW, C = ops["final_hw"], ops["out_channels"]

    # Tiny input-side block expansion (one XLA op on a (B, latent) tensor) so the in-kernel fc
    # is a single dense matmul that directly produces the NHWC-flat activation, avoiding any
    # in-kernel reshape/transpose.
    eye = jnp.eye(S2, dtype=jnp.float32)
    zblk = jnp.einsum("bl,st->bstl", z.astype(jnp.float32), eye).reshape(B * S2, S2 * latent)

    inputs = [zblk, ops["fcw"], ops["fcb"]]
    for li, layer in enumerate(ops["layers"]):
        inputs += [layer["sel"], layer["w"], layer["b"]]
        if li < n_layers - 1:
            inputs += [layer["gamma"], layer["beta"]]

    vmem = pl.BlockSpec(memory_space=pltpu.MemorySpace.VMEM)
    y = pl.pallas_call(
        _make_fused_kernel(n_layers),
        out_shape=jax.ShapeDtypeStruct((B * HW * HW, C), jnp.float32),
        in_specs=[vmem] * len(inputs),
        out_specs=vmem,
        compiler_params=pltpu.CompilerParams(vmem_limit_bytes=32 * 1024 * 1024),
    )(*inputs)
    # NHWC-flat -> NCHW to match the PyTorch module's output layout (tiny glue on the output).
    return y.reshape(B, HW, HW, C).transpose(0, 3, 1, 2)


# ------------------------------ numpy reference ------------------------------

def _ref_conv_transpose(x, W, b):  # x NCHW, W (Cin, Cout, 4, 4)
    B, Cin, H, Wd = x.shape
    Cout = W.shape[1]
    OH, OW = 2 * H, 2 * Wd
    y = np.zeros((B, Cout, OH, OW), np.float32)
    for ih in range(H):
        for iw in range(Wd):
            for kh in range(K):
                for kw in range(K):
                    oh = 2 * ih - 1 + kh
                    ow = 2 * iw - 1 + kw
                    if 0 <= oh < OH and 0 <= ow < OW:
                        y[:, :, oh, ow] += np.einsum(
                            "bi,io->bo", x[:, :, ih, iw], W[:, :, kh, kw]
                        )
    return y + b[None, :, None, None]


def _ref_forward(z, params, channels, initial_size):
    B = z.shape[0]
    h = z @ np.asarray(params["fc_w"]).T + np.asarray(params["fc_b"])
    x = h.reshape(B, channels[0], initial_size, initial_size)
    n_layers = len(params["deconv_w"])
    for i in range(n_layers):
        x = _ref_conv_transpose(
            x, np.asarray(params["deconv_w"][i]), np.asarray(params["deconv_b"][i])
        )
        if i < n_layers - 1:
            mean = x.mean(axis=(0, 2, 3), keepdims=True)
            var = x.var(axis=(0, 2, 3), keepdims=True)  # biased, like PyTorch training BN
            g = np.asarray(params["bn_gamma"][i])[None, :, None, None]
            bta = np.asarray(params["bn_beta"][i])[None, :, None, None]
            x = np.maximum(g * (x - mean) / np.sqrt(var + EPS) + bta, 0.0)
        else:
            x = np.tanh(x)
    return x


# ----------------------------------- main ------------------------------------

if __name__ == "__main__":
    LATENT_DIM = 32
    OUT_CHANNELS = 3
    CHANNELS = (32, 16, 8)
    INITIAL_SIZE = 2
    BATCH = 2

    key = jax.random.PRNGKey(0)
    keys = jax.random.split(key, 16)
    kidx = iter(range(16))

    fc_out = CHANNELS[0] * INITIAL_SIZE * INITIAL_SIZE
    params = {
        "fc_w": 0.1 * jax.random.normal(keys[next(kidx)], (fc_out, LATENT_DIM), jnp.float32),
        "fc_b": 0.1 * jax.random.normal(keys[next(kidx)], (fc_out,), jnp.float32),
        "deconv_w": [],
        "deconv_b": [],
        "bn_gamma": [],
        "bn_beta": [],
    }

    io_channels = list(CHANNELS) + [OUT_CHANNELS]
    for li in range(len(io_channels) - 1):
        cin, cout = io_channels[li], io_channels[li + 1]
        params["deconv_w"].append(
            0.1 * jax.random.normal(keys[next(kidx)], (cin, cout, K, K), jnp.float32)
        )
        params["deconv_b"].append(
            0.1 * jax.random.normal(keys[next(kidx)], (cout,), jnp.float32)
        )
        if li < len(io_channels) - 2:  # BN only for hidden deconv layers
            params["bn_gamma"].append(
                1.0 + 0.1 * jax.random.normal(keys[next(kidx)], (cout,), jnp.float32)
            )
            params["bn_beta"].append(
                0.05 * jax.random.normal(keys[next(kidx)], (cout,), jnp.float32)
            )

    z = jax.random.normal(keys[next(kidx)], (BATCH, LATENT_DIM), jnp.float32)

    # One-time weight / operator preparation (hoisted out of the forward path).
    ops = prepare_decoder_operands(params, CHANNELS, OUT_CHANNELS, INITIAL_SIZE, BATCH)
    fwd = jax.jit(lambda zz: attribute_decoder_forward(zz, ops))

    out = jax.block_until_ready(fwd(z))

    expected_spatial = INITIAL_SIZE * (2 ** (len(io_channels) - 1))
    assert out.shape == (BATCH, OUT_CHANNELS, expected_spatial, expected_spatial), out.shape

    ref = _ref_forward(np.asarray(z), params, CHANNELS, INITIAL_SIZE)
    np.testing.assert_allclose(np.asarray(out), ref, rtol=2e-3, atol=2e-3)

    print("KERNEL_OK")
</pallas_src>

<mosaic_0001>
module attributes {stable_mosaic.version = 11 : i64} {
  func.func @kernel(%arg0: memref<8x128xf32, #tpu.memory_space<vmem>>, %arg1: memref<128x32xf32, #tpu.memory_space<vmem>>, %arg2: memref<8x32xf32, #tpu.memory_space<vmem>>, %arg3: memref<16x32x8xf32, #tpu.memory_space<vmem>>, %arg4: memref<16x32x16xf32, #tpu.memory_space<vmem>>, %arg5: memref<1x16xf32, #tpu.memory_space<vmem>>, %arg6: memref<1x16xf32, #tpu.memory_space<vmem>>, %arg7: memref<1x16xf32, #tpu.memory_space<vmem>>, %arg8: memref<16x128x32xf32, #tpu.memory_space<vmem>>, %arg9: memref<16x16x8xf32, #tpu.memory_space<vmem>>, %arg10: memref<1x8xf32, #tpu.memory_space<vmem>>, %arg11: memref<1x8xf32, #tpu.memory_space<vmem>>, %arg12: memref<1x8xf32, #tpu.memory_space<vmem>>, %arg13: memref<16x512x128xf32, #tpu.memory_space<vmem>>, %arg14: memref<16x8x3xf32, #tpu.memory_space<vmem>>, %arg15: memref<1x3xf32, #tpu.memory_space<vmem>>, %arg16: memref<512x3xf32, #tpu.memory_space<vmem>>) attributes {dimension_semantics = [], scalar_prefetch = 0 : i64, scratch_operands = 0 : i64, tpu.core_type = #tpu.core_type<tc>} {
    %c0 = arith.constant 0 : index
    %c0_0 = arith.constant 0 : index
    %0 = vector.load %arg2[%c0, %c0_0] : memref<8x32xf32, #tpu.memory_space<vmem>>, vector<8x32xf32>
    %c0_1 = arith.constant 0 : index
    %c0_2 = arith.constant 0 : index
    %1 = vector.load %arg0[%c0_1, %c0_2] : memref<8x128xf32, #tpu.memory_space<vmem>>, vector<8x128xf32>
    %c0_3 = arith.constant 0 : index
    %c0_4 = arith.constant 0 : index
    %2 = vector.load %arg1[%c0_3, %c0_4] : memref<128x32xf32, #tpu.memory_space<vmem>>, vector<128x32xf32>
    %cst = arith.constant dense<0.000000e+00> : vector<8x32xf32>
    %3 = tpu.matmul %1, %2, %cst {dimension_numbers = #tpu.dot_dimension_numbers<[1], [0], [0], [1], [0, 0, 1, 1], [], []>} : vector<8x128xf32>, vector<128x32xf32>, vector<8x32xf32> -> vector<8x32xf32>
    %4 = arith.addf %0, %3 : vector<8x32xf32>
    %cst_5 = arith.constant 0.000000e+00 : f32
    %5 = vector.broadcast %cst_5 : f32 to vector<32x16xf32>
    %c0_6 = arith.constant 0 : index
    %c0_7 = arith.constant 0 : index
    %6 = vector.load %arg5[%c0_6, %c0_7] : memref<1x16xf32, #tpu.memory_space<vmem>>, vector<1x16xf32>
    %7 = vector.broadcast %6 : vector<1x16xf32> to vector<32x16xf32>
    %8 = arith.addf %5, %7 : vector<32x16xf32>
    %c0_8 = arith.constant 0 : index
    %c0_9 = arith.constant 0 : index
    %c0_10 = arith.constant 0 : index
    %9 = vector.load %arg4[%c0_8, %c0_9, %c0_10] : memref<16x32x16xf32, #tpu.memory_space<vmem>>, vector<1x32x16xf32>
    %10 = vector.shape_cast %9 : vector<1x32x16xf32> to vector<32x16xf32>
    %cst_11 = arith.constant dense<0.000000e+00> : vector<8x16xf32>
    %11 = tpu.matmul %4, %10, %cst_11 {dimension_numbers = #tpu.dot_dimension_numbers<[1], [0], [0], [1], [0, 0, 1, 1], [], []>} : vector<8x32xf32>, vector<32x16xf32>, vector<8x16xf32> -> vector<8x16xf32>
    %c0_12 = arith.constant 0 : index
    %c0_13 = arith.constant 0 : index
    %c0_14 = arith.constant 0 : index
    %12 = vector.load %arg3[%c0_12, %c0_13, %c0_14] : memref<16x32x8xf32, #tpu.memory_space<vmem>>, vector<1x32x8xf32>
    %13 = vector.shape_cast %12 : vector<1x32x8xf32> to vector<32x8xf32>
    %cst_15 = arith.constant dense<0.000000e+00> : vector<32x16xf32>
    %14 = tpu.matmul %13, %11, %cst_15 {dimension_numbers = #tpu.dot_dimension_numbers<[1], [0], [0], [1], [0, 0, 1, 1], [], []>} : vector<32x8xf32>, vector<8x16xf32>, vector<32x16xf32> -> vector<32x16xf32>
    %15 = arith.addf %8, %14 : vector<32x16xf32>
    %c1 = arith.constant 1 : index
    %c0_16 = arith.constant 0 : index
    %c0_17 = arith.constant 0 : index
    %16 = vector.load %arg4[%c1, %c0_16, %c0_17] : memref<16x32x16xf32, #tpu.memory_space<vmem>>, vector<1x32x16xf32>
    %17 = vector.shape_cast %16 : vector<1x32x16xf32> to vector<32x16xf32>
    %cst_18 = arith.constant dense<0.000000e+00> : vector<8x16xf32>
    %18 = tpu.matmul %4, %17, %cst_18 {dimension_numbers = #tpu.dot_dimension_numbers<[1], [0], [0], [1], [0, 0, 1, 1], [], []>} : vector<8x32xf32>, vector<32x16xf32>, vector<8x16xf32> -> vector<8x16xf32>
    %c1_19 = arith.constant 1 : index
    %c0_20 = arith.constant 0 : index
    %c0_21 = arith.constant 0 : index
    %19 = vector.load %arg3[%c1_19, %c0_20, %c0_21] : memref<16x32x8xf32, #tpu.memory_space<vmem>>, vector<1x32x8xf32>
    %20 = vector.shape_cast %19 : vector<1x32x8xf32> to vector<32x8xf32>
    %cst_22 = arith.constant dense<0.000000e+00> : vector<32x16xf32>
    %21 = tpu.matmul %20, %18, %cst_22 {dimension_numbers = #tpu.dot_dimension_numbers<[1], [0], [0], [1], [0, 0, 1, 1], [], []>} : vector<32x8xf32>, vector<8x16xf32>, vector<32x16xf32> -> vector<32x16xf32>
    %22 = arith.addf %15, %21 : vector<32x16xf32>
    %c2 = arith.constant 2 : index
    %c0_23 = arith.constant 0 : index
    %c0_24 = arith.constant 0 : index
    %23 = vector.load %arg4[%c2, %c0_23, %c0_24] : memref<16x32x16xf32, #tpu.memory_space<vmem>>, vector<1x32x16xf32>
    %24 = vector.shape_cast %23 : vector<1x32x16xf32> to vector<32x16xf32>
    %cst_25 = arith.constant dense<0.000000e+00> : vector<8x16xf32>
    %25 = tpu.matmul %4, %24, %cst_25 {dimension_numbers = #tpu.dot_dimension_numbers<[1], [0], [0], [1], [0, 0, 1, 1], [], []>} : vector<8x32xf32>, vector<32x16xf32>, vector<8x16xf32> -> vector<8x16xf32>
    %c2_26 = arith.constant 2 : index
    %c0_27 = arith.constant 0 : index
    %c0_28 = arith.constant 0 : index
    %26 = vector.load %arg3[%c2_26, %c0_27, %c0_28] : memref<16x32x8xf32, #tpu.memory_space<vmem>>, vector<1x32x8xf32>
    %27 = vector.shape_cast %26 : vector<1x32x8xf32> to vector<32x8xf32>
    %cst_29 = arith.constant dense<0.000000e+00> : vector<32x16xf32>
    %28 = tpu.matmul %27, %25, %cst_29 {dimension_numbers = #tpu.dot_dimension_numbers<[1], [0], [0], [1], [0, 0, 1, 1], [], []>} : vector<32x8xf32>, vector<8x16xf32>, vector<32x16xf32> -> vector<32x16xf32>
    %29 = arith.addf %22, %28 : vector<32x16xf32>
    %c3 = arith.constant 3 : index
    %c0_30 = arith.constant 0 : index
    %c0_31 = arith.constant 0 : index
    %30 = vector.load %arg4[%c3, %c0_30, %c0_31] : memref<16x32x16xf32, #tpu.memory_space<vmem>>, vector<1x32x16xf32>
    %31 = vector.shape_cast %30 : vector<1x32x16xf32> to vector<32x16xf32>
    %cst_32 = arith.constant dense<0.000000e+00> : vector<8x16xf32>
    %32 = tpu.matmul %4, %31, %cst_32 {dimension_numbers = #tpu.dot_dimension_numbers<[1], [0], [0], [1], [0, 0, 1, 1], [], []>} : vector<8x32xf32>, vector<32x16xf32>, vector<8x16xf32> -> vector<8x16xf32>
    %c3_33 = arith.constant 3 : index
    %c0_34 = arith.constant 0 : index
    %c0_35 = arith.constant 0 : index
    %33 = vector.load %arg3[%c3_33, %c0_34, %c0_35] : memref<16x32x8xf32, #tpu.memory_space<vmem>>, vector<1x32x8xf32>
    %34 = vector.shape_cast %33 : vector<1x32x8xf32> to vector<32x8xf32>
    %cst_36 = arith.constant dense<0.000000e+00> : vector<32x16xf32>
    %35 = tpu.matmul %34, %32, %cst_36 {dimension_numbers = #tpu.dot_dimension_numbers<[1], [0], [0], [1], [0, 0, 1, 1], [], []>} : vector<32x8xf32>, vector<8x16xf32>, vector<32x16xf32> -> vector<32x16xf32>
    %36 = arith.addf %29, %35 : vector<32x16xf32>
    %c4 = arith.constant 4 : index
    %c0_37 = arith.constant 0 : index
    %c0_38 = arith.constant 0 : index
    %37 = vector.load %arg4[%c4, %c0_37, %c0_38] : memref<16x32x16xf32, #tpu.memory_space<vmem>>, vector<1x32x16xf32>
    %38 = vector.shape_cast %37 : vector<1x32x16xf32> to vector<32x16xf32>
    %cst_39 = arith.constant dense<0.000000e+00> : vector<8x16xf32>
    %39 = tpu.matmul %4, %38, %cst_39 {dimension_numbers = #tpu.dot_dimension_numbers<[1], [0], [0], [1], [0, 0, 1, 1], [], []>} : vector<8x32xf32>, vector<32x16xf32>, vector<8x16xf32> -> vector<8x16xf32>
    %c4_40 = arith.constant 4 : index
    %c0_41 = arith.constant 0 : index
    %c0_42 = arith.constant 0 : index
    %40 = vector.load %arg3[%c4_40, %c0_41, %c0_42] : memref<16x32x8xf32, #tpu.memory_space<vmem>>, vector<1x32x8xf32>
    %41 = vector.shape_cast %40 : vector<1x32x8xf32> to vector<32x8xf32>
    %cst_43 = arith.constant dense<0.000000e+00> : vector<32x16xf32>
    %42 = tpu.matmul %41, %39, %cst_43 {dimension_numbers = #tpu.dot_dimension_numbers<[1], [0], [0], [1], [0, 0, 1, 1], [], []>} : vector<32x8xf32>, vector<8x16xf32>, vector<32x16xf32> -> vector<32x16xf32>
    %43 = arith.addf %36, %42 : vector<32x16xf32>
    %c5 = arith.constant 5 : index
    %c0_44 = arith.constant 0 : index
    %c0_45 = arith.constant 0 : index
    %44 = vector.load %arg4[%c5, %c0_44, %c0_45] : memref<16x32x16xf32, #tpu.memory_space<vmem>>, vector<1x32x16xf32>
    %45 = vector.shape_cast %44 : vector<1x32x16xf32> to vector<32x16xf32>
    %cst_46 = arith.constant dense<0.000000e+00> : vector<8x16xf32>
    %46 = tpu.matmul %4, %45, %cst_46 {dimension_numbers = #tpu.dot_dimension_numbers<[1], [0], [0], [1], [0, 0, 1, 1], [], []>} : vector<8x32xf32>, vector<32x16xf32>, vector<8x16xf32> -> vector<8x16xf32>
    %c5_47 = arith.constant 5 : index
    %c0_48 = arith.constant 0 : index
    %c0_49 = arith.constant 0 : index
    %47 = vector.load %arg3[%c5_47, %c0_48, %c0_49] : memref<16x32x8xf32, #tpu.memory_space<vmem>>, vector<1x32x8xf32>
    %48 = vector.shape_cast %47 : vector<1x32x8xf32> to vector<32x8xf32>
    %cst_50 = arith.constant dense<0.000000e+00> : vector<32x16xf32>
    %49 = tpu.matmul %48, %46, %cst_50 {dimension_numbers = #tpu.dot_dimension_numbers<[1], [0], [0], [1], [0, 0, 1, 1], [], []>} : vector<32x8xf32>, vector<8x16xf32>, vector<32x16xf32> -> vector<32x16xf32>
    %50 = arith.addf %43, %49 : vector<32x16xf32>
    %c6 = arith.constant 6 : index
    %c0_51 = arith.constant 0 : index
    %c0_52 = arith.constant 0 : index
    %51 = vector.load %arg4[%c6, %c0_51, %c0_52] : memref<16x32x16xf32, #tpu.memory_space<vmem>>, vector<1x32x16xf32>
    %52 = vector.shape_cast %51 : vector<1x32x16xf32> to vector<32x16xf32>
    %cst_53 = arith.constant dense<0.000000e+00> : vector<8x16xf32>
    %53 = tpu.matmul %4, %52, %cst_53 {dimension_numbers = #tpu.dot_dimension_numbers<[1], [0], [0], [1], [0, 0, 1, 1], [], []>} : vector<8x32xf32>, vector<32x16xf32>, vector<8x16xf32> -> vector<8x16xf32>
    %c6_54 = arith.constant 6 : index
    %c0_55 = arith.constant 0 : index
    %c0_56 = arith.constant 0 : index
    %54 = vector.load %arg3[%c6_54, %c0_55, %c0_56] : memref<16x32x8xf32, #tpu.memory_space<vmem>>, vector<1x32x8xf32>
    %55 = vector.shape_cast %54 : vector<1x32x8xf32> to vector<32x8xf32>
    %cst_57 = arith.constant dense<0.000000e+00> : vector<32x16xf32>
    %56 = tpu.matmul %55, %53, %cst_57 {dimension_numbers = #tpu.dot_dimension_numbers<[1], [0], [0], [1], [0, 0, 1, 1], [], []>} : vector<32x8xf32>, vector<8x16xf32>, vector<32x16xf32> -> vector<32x16xf32>
    %57 = arith.addf %50, %56 : vector<32x16xf32>
    %c7 = arith.constant 7 : index
    %c0_58 = arith.constant 0 : index
    %c0_59 = arith.constant 0 : index
    %58 = vector.load %arg4[%c7, %c0_58, %c0_59] : memref<16x32x16xf32, #tpu.memory_space<vmem>>, vector<1x32x16xf32>
    %59 = vector.shape_cast %58 : vector<1x32x16xf32> to vector<32x16xf32>
    %cst_60 = arith.constant dense<0.000000e+00> : vector<8x16xf32>
    %60 = tpu.matmul %4, %59, %cst_60 {dimension_numbers = #tpu.dot_dimension_numbers<[1], [0], [0], [1], [0, 0, 1, 1], [], []>} : vector<8x32xf32>, vector<32x16xf32>, vector<8x16xf32> -> vector<8x16xf32>
    %c7_61 = arith.constant 7 : index
    %c0_62 = arith.constant 0 : index
    %c0_63 = arith.constant 0 : index
    %61 = vector.load %arg3[%c7_61, %c0_62, %c0_63] : memref<16x32x8xf32, #tpu.memory_space<vmem>>, vector<1x32x8xf32>
    %62 = vector.shape_cast %61 : vector<1x32x8xf32> to vector<32x8xf32>
    %cst_64 = arith.constant dense<0.000000e+00> : vector<32x16xf32>
    %63 = tpu.matmul %62, %60, %cst_64 {dimension_numbers = #tpu.dot_dimension_numbers<[1], [0], [0], [1], [0, 0, 1, 1], [], []>} : vector<32x8xf32>, vector<8x16xf32>, vector<32x16xf32> -> vector<32x16xf32>
    %64 = arith.addf %57, %63 : vector<32x16xf32>
    %c8 = arith.constant 8 : index
    %c0_65 = arith.constant 0 : index
    %c0_66 = arith.constant 0 : index
    %65 = vector.load %arg4[%c8, %c0_65, %c0_66] : memref<16x32x16xf32, #tpu.memory_space<vmem>>, vector<1x32x16xf32>
    %66 = vector.shape_cast %65 : vector<1x32x16xf32> to vector<32x16xf32>
    %cst_67 = arith.constant dense<0.000000e+00> : vector<8x16xf32>
    %67 = tpu.matmul %4, %66, %cst_67 {dimension_numbers = #tpu.dot_dimension_numbers<[1], [0], [0], [1], [0, 0, 1, 1], [], []>} : vector<8x32xf32>, vector<32x16xf32>, vector<8x16xf32> -> vector<8x16xf32>
    %c8_68 = arith.constant 8 : index
    %c0_69 = arith.constant 0 : index
    %c0_70 = arith.constant 0 : index
    %68 = vector.load %arg3[%c8_68, %c0_69, %c0_70] : memref<16x32x8xf32, #tpu.memory_space<vmem>>, vector<1x32x8xf32>
    %69 = vector.shape_cast %68 : vector<1x32x8xf32> to vector<32x8xf32>
    %cst_71 = arith.constant dense<0.000000e+00> : vector<32x16xf32>
    %70 = tpu.matmul %69, %67, %cst_71 {dimension_numbers = #tpu.dot_dimension_numbers<[1], [0], [0], [1], [0, 0, 1, 1], [], []>} : vector<32x8xf32>, vector<8x16xf32>, vector<32x16xf32> -> vector<32x16xf32>
    %71 = arith.addf %64, %70 : vector<32x16xf32>
    %c9 = arith.constant 9 : index
    %c0_72 = arith.constant 0 : index
    %c0_73 = arith.constant 0 : index
    %72 = vector.load %arg4[%c9, %c0_72, %c0_73] : memref<16x32x16xf32, #tpu.memory_space<vmem>>, vector<1x32x16xf32>
    %73 = vector.shape_cast %72 : vector<1x32x16xf32> to vector<32x16xf32>
    %cst_74 = arith.constant dense<0.000000e+00> : vector<8x16xf32>
    %74 = tpu.matmul %4, %73, %cst_74 {dimension_numbers = #tpu.dot_dimension_numbers<[1], [0], [0], [1], [0, 0, 1, 1], [], []>} : vector<8x32xf32>, vector<32x16xf32>, vector<8x16xf32> -> vector<8x16xf32>
    %c9_75 = arith.constant 9 : index
    %c0_76 = arith.constant 0 : index
    %c0_77 = arith.constant 0 : index
    %75 = vector.load %arg3[%c9_75, %c0_76, %c0_77] : memref<16x32x8xf32, #tpu.memory_space<vmem>>, vector<1x32x8xf32>
    %76 = vector.shape_cast %75 : vector<1x32x8xf32> to vector<32x8xf32>
    %cst_78 = arith.constant dense<0.000000e+00> : vector<32x16xf32>
    %77 = tpu.matmul %76, %74, %cst_78 {dimension_numbers = #tpu.dot_dimension_numbers<[1], [0], [0], [1], [0, 0, 1, 1], [], []>} : vector<32x8xf32>, vector<8x16xf32>, vector<32x16xf32> -> vector<32x16xf32>
    %78 = arith.addf %71, %77 : vector<32x16xf32>
    %c10 = arith.constant 10 : index
    %c0_79 = arith.constant 0 : index
    %c0_80 = arith.constant 0 : index
    %79 = vector.load %arg4[%c10, %c0_79, %c0_80] : memref<16x32x16xf32, #tpu.memory_space<vmem>>, vector<1x32x16xf32>
    %80 = vector.shape_cast %79 : vector<1x32x16xf32> to vector<32x16xf32>
    %cst_81 = arith.constant dense<0.000000e+00> : vector<8x16xf32>
    %81 = tpu.matmul %4, %80, %cst_81 {dimension_numbers = #tpu.dot_dimension_numbers<[1], [0], [0], [1], [0, 0, 1, 1], [], []>} : vector<8x32xf32>, vector<32x16xf32>, vector<8x16xf32> -> vector<8x16xf32>
    %c10_82 = arith.constant 10 : index
    %c0_83 = arith.constant 0 : index
    %c0_84 = arith.constant 0 : index
    %82 = vector.load %arg3[%c10_82, %c0_83, %c0_84] : memref<16x32x8xf32, #tpu.memory_space<vmem>>, vector<1x32x8xf32>
    %83 = vector.shape_cast %82 : vector<1x32x8xf32> to vector<32x8xf32>
    %cst_85 = arith.constant dense<0.000000e+00> : vector<32x16xf32>
    %84 = tpu.matmul %83, %81, %cst_85 {dimension_numbers = #tpu.dot_dimension_numbers<[1], [0], [0], [1], [0, 0, 1, 1], [], []>} : vector<32x8xf32>, vector<8x16xf32>, vector<32x16xf32> -> vector<32x16xf32>
    %85 = arith.addf %78, %84 : vector<32x16xf32>
    %c11 = arith.constant 11 : index
    %c0_86 = arith.constant 0 : index
    %c0_87 = arith.constant 0 : index
    %86 = vector.load %arg4[%c11, %c0_86, %c0_87] : memref<16x32x16xf32, #tpu.memory_space<vmem>>, vector<1x32x16xf32>
    %87 = vector.shape_cast %86 : vector<1x32x16xf32> to vector<32x16xf32>
    %cst_88 = arith.constant dense<0.000000e+00> : vector<8x16xf32>
    %88 = tpu.matmul %4, %87, %cst_88 {dimension_numbers = #tpu.dot_dimension_numbers<[1], [0], [0], [1], [0, 0, 1, 1], [], []>} : vector<8x32xf32>, vector<32x16xf32>, vector<8x16xf32> -> vector<8x16xf32>
    %c11_89 = arith.constant 11 : index
    %c0_90 = arith.constant 0 : index
    %c0_91 = arith.constant 0 : index
    %89 = vector.load %arg3[%c11_89, %c0_90, %c0_91] : memref<16x32x8xf32, #tpu.memory_space<vmem>>, vector<1x32x8xf32>
    %90 = vector.shape_cast %89 : vector<1x32x8xf32> to vector<32x8xf32>
    %cst_92 = arith.constant dense<0.000000e+00> : vector<32x16xf32>
    %91 = tpu.matmul %90, %88, %cst_92 {dimension_numbers = #tpu.dot_dimension_numbers<[1], [0], [0], [1], [0, 0, 1, 1], [], []>} : vector<32x8xf32>, vector<8x16xf32>, vector<32x16xf32> -> vector<32x16xf32>
    %92 = arith.addf %85, %91 : vector<32x16xf32>
    %c12 = arith.constant 12 : index
    %c0_93 = arith.constant 0 : index
    %c0_94 = arith.constant 0 : index
    %93 = vector.load %arg4[%c12, %c0_93, %c0_94] : memref<16x32x16xf32, #tpu.memory_space<vmem>>, vector<1x32x16xf32>
    %94 = vector.shape_cast %93 : vector<1x32x16xf32> to vector<32x16xf32>
    %cst_95 = arith.constant dense<0.000000e+00> : vector<8x16xf32>
    %95 = tpu.matmul %4, %94, %cst_95 {dimension_numbers = #tpu.dot_dimension_numbers<[1], [0], [0], [1], [0, 0, 1, 1], [], []>} : vector<8x32xf32>, vector<32x16xf32>, vector<8x16xf32> -> vector<8x16xf32>
    %c12_96 = arith.constant 12 : index
    %c0_97 = arith.constant 0 : index
    %c0_98 = arith.constant 0 : index
    %96 = vector.load %arg3[%c12_96, %c0_97, %c0_98] : memref<16x32x8xf32, #tpu.memory_space<vmem>>, vector<1x32x8xf32>
    %97 = vector.shape_cast %96 : vector<1x32x8xf32> to vector<32x8xf32>
    %cst_99 = arith.constant dense<0.000000e+00> : vector<32x16xf32>
    %98 = tpu.matmul %97, %95, %cst_99 {dimension_numbers = #tpu.dot_dimension_numbers<[1], [0], [0], [1], [0, 0, 1, 1], [], []>} : vector<32x8xf32>, vector<8x16xf32>, vector<32x16xf32> -> vector<32x16xf32>
    %99 = arith.addf %92, %98 : vector<32x16xf32>
    %c13 = arith.constant 13 : index
    %c0_100 = arith.constant 0 : index
    %c0_101 = arith.constant 0 : index
    %100 = vector.load %arg4[%c13, %c0_100, %c0_101] : memref<16x32x16xf32, #tpu.memory_space<vmem>>, vector<1x32x16xf32>
    %101 = vector.shape_cast %100 : vector<1x32x16xf32> to vector<32x16xf32>
    %cst_102 = arith.constant dense<0.000000e+00> : vector<8x16xf32>
    %102 = tpu.matmul %4, %101, %cst_102 {dimension_numbers = #tpu.dot_dimension_numbers<[1], [0], [0], [1], [0, 0, 1, 1], [], []>} : vector<8x32xf32>, vector<32x16xf32>, vector<8x16xf32> -> vector<8x16xf32>
    %c13_103 = arith.constant 13 : index
    %c0_104 = arith.constant 0 : index
    %c0_105 = arith.constant 0 : index
    %103 = vector.load %arg3[%c13_103, %c0_104, %c0_105] : memref<16x32x8xf32, #tpu.memory_space<vmem>>, vector<1x32x8xf32>
    %104 = vector.shape_cast %103 : vector<1x32x8xf32> to vector<32x8xf32>
    %cst_106 = arith.constant dense<0.000000e+00> : vector<32x16xf32>
    %105 = tpu.matmul %104, %102, %cst_106 {dimension_numbers = #tpu.dot_dimension_numbers<[1], [0], [0], [1], [0, 0, 1, 1], [], []>} : vector<32x8xf32>, vector<8x16xf32>, vector<32x16xf32> -> vector<32x16xf32>
    %106 = arith.addf %99, %105 : vector<32x16xf32>
    %c14 = arith.constant 14 : index
    %c0_107 = arith.constant 0 : index
    %c0_108 = arith.constant 0 : index
    %107 = vector.load %arg4[%c14, %c0_107, %c0_108] : memref<16x32x16xf32, #tpu.memory_space<vmem>>, vector<1x32x16xf32>
    %108 = vector.shape_cast %107 : vector<1x32x16xf32> to vector<32x16xf32>
    %cst_109 = arith.constant dense<0.000000e+00> : vector<8x16xf32>
    %109 = tpu.matmul %4, %108, %cst_109 {dimension_numbers = #tpu.dot_dimension_numbers<[1], [0], [0], [1], [0, 0, 1, 1], [], []>} : vector<8x32xf32>, vector<32x16xf32>, vector<8x16xf32> -> vector<8x16xf32>
    %c14_110 = arith.constant 14 : index
    %c0_111 = arith.constant 0 : index
    %c0_112 = arith.constant 0 : index
    %110 = vector.load %arg3[%c14_110, %c0_111, %c0_112] : memref<16x32x8xf32, #tpu.memory_space<vmem>>, vector<1x32x8xf32>
    %111 = vector.shape_cast %110 : vector<1x32x8xf32> to vector<32x8xf32>
    %cst_113 = arith.constant dense<0.000000e+00> : vector<32x16xf32>
    %112 = tpu.matmul %111, %109, %cst_113 {dimension_numbers = #tpu.dot_dimension_numbers<[1], [0], [0], [1], [0, 0, 1, 1], [], []>} : vector<32x8xf32>, vector<8x16xf32>, vector<32x16xf32> -> vector<32x16xf32>
    %113 = arith.addf %106, %112 : vector<32x16xf32>
    %c15 = arith.constant 15 : index
    %c0_114 = arith.constant 0 : index
    %c0_115 = arith.constant 0 : index
    %114 = vector.load %arg4[%c15, %c0_114, %c0_115] : memref<16x32x16xf32, #tpu.memory_space<vmem>>, vector<1x32x16xf32>
    %115 = vector.shape_cast %114 : vector<1x32x16xf32> to vector<32x16xf32>
    %cst_116 = arith.constant dense<0.000000e+00> : vector<8x16xf32>
    %116 = tpu.matmul %4, %115, %cst_116 {dimension_numbers = #tpu.dot_dimension_numbers<[1], [0], [0], [1], [0, 0, 1, 1], [], []>} : vector<8x32xf32>, vector<32x16xf32>, vector<8x16xf32> -> vector<8x16xf32>
    %c15_117 = arith.constant 15 : index
    %c0_118 = arith.constant 0 : index
    %c0_119 = arith.constant 0 : index
    %117 = vector.load %arg3[%c15_117, %c0_118, %c0_119] : memref<16x32x8xf32, #tpu.memory_space<vmem>>, vector<1x32x8xf32>
    %118 = vector.shape_cast %117 : vector<1x32x8xf32> to vector<32x8xf32>
    %cst_120 = arith.constant dense<0.000000e+00> : vector<32x16xf32>
    %119 = tpu.matmul %118, %116, %cst_120 {dimension_numbers = #tpu.dot_dimension_numbers<[1], [0], [0], [1], [0, 0, 1, 1], [], []>} : vector<32x8xf32>, vector<8x16xf32>, vector<32x16xf32> -> vector<32x16xf32>
    %120 = arith.addf %113, %119 : vector<32x16xf32>
    %cst_121 = arith.constant dense<0.000000e+00> : vector<16xf32>
    %121 = vector.multi_reduction <add>, %120, %cst_121 [0] : vector<32x16xf32> to vector<16xf32>
    %122 = vector.shape_cast %121 : vector<16xf32> to vector<1x16xf32>
    %cst_122 = arith.constant 3.200000e+01 : f32
    %123 = vector.broadcast %cst_122 : f32 to vector<1x16xf32>
    %124 = arith.divf %122, %123 : vector<1x16xf32>
    %125 = vector.broadcast %124 : vector<1x16xf32> to vector<32x16xf32>
    %126 = arith.subf %120, %125 : vector<32x16xf32>
    %127 = arith.mulf %126, %126 : vector<32x16xf32>
    %cst_123 = arith.constant dense<0.000000e+00> : vector<16xf32>
    %128 = vector.multi_reduction <add>, %127, %cst_123 [0] : vector<32x16xf32> to vector<16xf32>
    %129 = vector.shape_cast %128 : vector<16xf32> to vector<1x16xf32>
    %cst_124 = arith.constant 3.200000e+01 : f32
    %130 = vector.broadcast %cst_124 : f32 to vector<1x16xf32>
    %131 = arith.divf %129, %130 : vector<1x16xf32>
    %c0_125 = arith.constant 0 : index
    %c0_126 = arith.constant 0 : index
    %132 = vector.load %arg6[%c0_125, %c0_126] : memref<1x16xf32, #tpu.memory_space<vmem>>, vector<1x16xf32>
    %133 = vector.broadcast %124 : vector<1x16xf32> to vector<32x16xf32>
    %134 = arith.subf %120, %133 : vector<32x16xf32>
    %cst_127 = arith.constant 9.99999974E-6 : f32
    %135 = vector.broadcast %cst_127 : f32 to vector<1x16xf32>
    %136 = arith.addf %131, %135 : vector<1x16xf32>
    %137 = math.rsqrt %136 : vector<1x16xf32>
    %138 = vector.broadcast %137 : vector<1x16xf32> to vector<32x16xf32>
    %139 = arith.mulf %134, %138 : vector<32x16xf32>
    %140 = vector.broadcast %132 : vector<1x16xf32> to vector<32x16xf32>
    %141 = arith.mulf %140, %139 : vector<32x16xf32>
    %c0_128 = arith.constant 0 : index
    %c0_129 = arith.constant 0 : index
    %142 = vector.load %arg7[%c0_128, %c0_129] : memref<1x16xf32, #tpu.memory_space<vmem>>, vector<1x16xf32>
    %143 = vector.broadcast %142 : vector<1x16xf32> to vector<32x16xf32>
    %144 = arith.addf %141, %143 : vector<32x16xf32>
    %cst_130 = arith.constant 0.000000e+00 : f32
    %145 = vector.broadcast %cst_130 : f32 to vector<32x16xf32>
    %146 = arith.maximumf %144, %145 : vector<32x16xf32>
    %cst_131 = arith.constant 0.000000e+00 : f32
    %147 = vector.broadcast %cst_131 : f32 to vector<128x8xf32>
    %c0_132 = arith.constant 0 : index
    %c0_133 = arith.constant 0 : index
    %148 = vector.load %arg10[%c0_132, %c0_133] : memref<1x8xf32, #tpu.memory_space<vmem>>, vector<1x8xf32>
    %149 = vector.broadcast %148 : vector<1x8xf32> to vector<128x8xf32>
    %150 = arith.addf %147, %149 : vector<128x8xf32>
    %c0_134 = arith.constant 0 : index
    %c0_135 = arith.constant 0 : index
    %c0_136 = arith.constant 0 : index
    %151 = vector.load %arg9[%c0_134, %c0_135, %c0_136] : memref<16x16x8xf32, #tpu.memory_space<vmem>>, vector<1x16x8xf32>
    %152 = vector.shape_cast %151 : vector<1x16x8xf32> to vector<16x8xf32>
    %cst_137 = arith.constant dense<0.000000e+00> : vector<32x8xf32>
    %153 = tpu.matmul %146, %152, %cst_137 {dimension_numbers = #tpu.dot_dimension_numbers<[1], [0], [0], [1], [0, 0, 1, 1], [], []>} : vector<32x16xf32>, vector<16x8xf32>, vector<32x8xf32> -> vector<32x8xf32>
    %c0_138 = arith.constant 0 : index
    %c0_139 = arith.constant 0 : index
    %c0_140 = arith.constant 0 : index
    %154 = vector.load %arg8[%c0_138, %c0_139, %c0_140] : memref<16x128x32xf32, #tpu.memory_space<vmem>>, vector<1x128x32xf32>
    %155 = vector.shape_cast %154 : vector<1x128x32xf32> to vector<128x32xf32>
    %cst_141 = arith.constant dense<0.000000e+00> : vector<128x8xf32>
    %156 = tpu.matmul %155, %153, %cst_141 {dimension_numbers = #tpu.dot_dimension_numbers<[1], [0], [0], [1], [0, 0, 1, 1], [], []>} : vector<128x32xf32>, vector<32x8xf32>, vector<128x8xf32> -> vector<128x8xf32>
    %157 = arith.addf %150, %156 : vector<128x8xf32>
    %c1_142 = arith.constant 1 : index
    %c0_143 = arith.constant 0 : index
    %c0_144 = arith.constant 0 : index
    %158 = vector.load %arg9[%c1_142, %c0_143, %c0_144] : memref<16x16x8xf32, #tpu.memory_space<vmem>>, vector<1x16x8xf32>
    %159 = vector.shape_cast %158 : vector<1x16x8xf32> to vector<16x8xf32>
    %cst_145 = arith.constant dense<0.000000e+00> : vector<32x8xf32>
    %160 = tpu.matmul %146, %159, %cst_145 {dimension_numbers = #tpu.dot_dimension_numbers<[1], [0], [0], [1], [0, 0, 1, 1], [], []>} : vector<32x16xf32>, vector<16x8xf32>, vector<32x8xf32> -> vector<32x8xf32>
    %c1_146 = arith.constant 1 : index
    %c0_147 = arith.constant 0 : index
    %c0_148 = arith.constant 0 : index
    %161 = vector.load %arg8[%c1_146, %c0_147, %c0_148] : memref<16x128x32xf32, #tpu.memory_space<vmem>>, vector<1x128x32xf32>
    %162 = vector.shape_cast %161 : vector<1x128x32xf32> to vector<128x32xf32>
    %cst_149 = arith.constant dense<0.000000e+00> : vector<128x8xf32>
    %163 = tpu.matmul %162, %160, %cst_149 {dimension_numbers = #tpu.dot_dimension_numbers<[1], [0], [0], [1], [0, 0, 1, 1], [], []>} : vector<128x32xf32>, vector<32x8xf32>, vector<128x8xf32> -> vector<128x8xf32>
    %164 = arith.addf %157, %163 : vector<128x8xf32>
    %c2_150 = arith.constant 2 : index
    %c0_151 = arith.constant 0 : index
    %c0_152 = arith.constant 0 : index
    %165 = vector.load %arg9[%c2_150, %c0_151, %c0_152] : memref<16x16x8xf32, #tpu.memory_space<vmem>>, vector<1x16x8xf32>
    %166 = vector.shape_cast %165 : vector<1x16x8xf32> to vector<16x8xf32>
    %cst_153 = arith.constant dense<0.000000e+00> : vector<32x8xf32>
    %167 = tpu.matmul %146, %166, %cst_153 {dimension_numbers = #tpu.dot_dimension_numbers<[1], [0], [0], [1], [0, 0, 1, 1], [], []>} : vector<32x16xf32>, vector<16x8xf32>, vector<32x8xf32> -> vector<32x8xf32>
    %c2_154 = arith.constant 2 : index
    %c0_155 = arith.constant 0 : index
    %c0_156 = arith.constant 0 : index
    %168 = vector.load %arg8[%c2_154, %c0_155, %c0_156] : memref<16x128x32xf32, #tpu.memory_space<vmem>>, vector<1x128x32xf32>
    %169 = vector.shape_cast %168 : vector<1x128x32xf32> to vector<128x32xf32>
    %cst_157 = arith.constant dense<0.000000e+00> : vector<128x8xf32>
    %170 = tpu.matmul %169, %167, %cst_157 {dimension_numbers = #tpu.dot_dimension_numbers<[1], [0], [0], [1], [0, 0, 1, 1], [], []>} : vector<128x32xf32>, vector<32x8xf32>, vector<128x8xf32> -> vector<128x8xf32>
    %171 = arith.addf %164, %170 : vector<128x8xf32>
    %c3_158 = arith.constant 3 : index
    %c0_159 = arith.constant 0 : index
    %c0_160 = arith.constant 0 : index
    %172 = vector.load %arg9[%c3_158, %c0_159, %c0_160] : memref<16x16x8xf32, #tpu.memory_space<vmem>>, vector<1x16x8xf32>
    %173 = vector.shape_cast %172 : vector<1x16x8xf32> to vector<16x8xf32>
    %cst_161 = arith.constant dense<0.000000e+00> : vector<32x8xf32>
    %174 = tpu.matmul %146, %173, %cst_161 {dimension_numbers = #tpu.dot_dimension_numbers<[1], [0], [0], [1], [0, 0, 1, 1], [], []>} : vector<32x16xf32>, vector<16x8xf32>, vector<32x8xf32> -> vector<32x8xf32>
    %c3_162 = arith.constant 3 : index
    %c0_163 = arith.constant 0 : index
    %c0_164 = arith.constant 0 : index
    %175 = vector.load %arg8[%c3_162, %c0_163, %c0_164] : memref<16x128x32xf32, #tpu.memory_space<vmem>>, vector<1x128x32xf32>
    %176 = vector.shape_cast %175 : vector<1x128x32xf32> to vector<128x32xf32>
    %cst_165 = arith.constant dense<0.000000e+00> : vector<128x8xf32>
    %177 = tpu.matmul %176, %174, %cst_165 {dimension_numbers = #tpu.dot_dimension_numbers<[1], [0], [0], [1], [0, 0, 1, 1], [], []>} : vector<128x32xf32>, vector<32x8xf32>, vector<128x8xf32> -> vector<128x8xf32>
    %178 = arith.addf %171, %177 : vector<128x8xf32>
    %c4_166 = arith.constant 4 : index
    %c0_167 = arith.constant 0 : index
    %c0_168 = arith.constant 0 : index
    %179 = vector.load %arg9[%c4_166, %c0_167, %c0_168] : memref<16x16x8xf32, #tpu.memory_space<vmem>>, vector<1x16x8xf32>
    %180 = vector.shape_cast %179 : vector<1x16x8xf32> to vector<16x8xf32>
    %cst_169 = arith.constant dense<0.000000e+00> : vector<32x8xf32>
    %181 = tpu.matmul %146, %180, %cst_169 {dimension_numbers = #tpu.dot_dimension_numbers<[1], [0], [0], [1], [0, 0, 1, 1], [], []>} : vector<32x16xf32>, vector<16x8xf32>, vector<32x8xf32> -> vector<32x8xf32>
    %c4_170 = arith.constant 4 : index
    %c0_171 = arith.constant 0 : index
    %c0_172 = arith.constant 0 : index
    %182 = vector.load %arg8[%c4_170, %c0_171, %c0_172] : memref<16x128x32xf32, #tpu.memory_space<vmem>>, vector<1x128x32xf32>
    %183 = vector.shape_cast %182 : vector<1x128x32xf32> to vector<128x32xf32>
    %cst_173 = arith.constant dense<0.000000e+00> : vector<128x8xf32>
    %184 = tpu.matmul %183, %181, %cst_173 {dimension_numbers = #tpu.dot_dimension_numbers<[1], [0], [0], [1], [0, 0, 1, 1], [], []>} : vector<128x32xf32>, vector<32x8xf32>, vector<128x8xf32> -> vector<128x8xf32>
    %185 = arith.addf %178, %184 : vector<128x8xf32>
    %c5_174 = arith.constant 5 : index
    %c0_175 = arith.constant 0 : index
    %c0_176 = arith.constant 0 : index
    %186 = vector.load %arg9[%c5_174, %c0_175, %c0_176] : memref<16x16x8xf32, #tpu.memory_space<vmem>>, vector<1x16x8xf32>
    %187 = vector.shape_cast %186 : vector<1x16x8xf32> to vector<16x8xf32>
    %cst_177 = arith.constant dense<0.000000e+00> : vector<32x8xf32>
    %188 = tpu.matmul %146, %187, %cst_177 {dimension_numbers = #tpu.dot_dimension_numbers<[1], [0], [0], [1], [0, 0, 1, 1], [], []>} : vector<32x16xf32>, vector<16x8xf32>, vector<32x8xf32> -> vector<32x8xf32>
    %c5_178 = arith.constant 5 : index
    %c0_179 = arith.constant 0 : index
    %c0_180 = arith.constant 0 : index
    %189 = vector.load %arg8[%c5_178, %c0_179, %c0_180] : memref<16x128x32xf32, #tpu.memory_space<vmem>>, vector<1x128x32xf32>
    %190 = vector.shape_cast %189 : vector<1x128x32xf32> to vector<128x32xf32>
    %cst_181 = arith.constant dense<0.000000e+00> : vector<128x8xf32>
    %191 = tpu.matmul %190, %188, %cst_181 {dimension_numbers = #tpu.dot_dimension_numbers<[1], [0], [0], [1], [0, 0, 1, 1], [], []>} : vector<128x32xf32>, vector<32x8xf32>, vector<128x8xf32> -> vector<128x8xf32>
    %192 = arith.addf %185, %191 : vector<128x8xf32>
    %c6_182 = arith.constant 6 : index
    %c0_183 = arith.constant 0 : index
    %c0_184 = arith.constant 0 : index
    %193 = vector.load %arg9[%c6_182, %c0_183, %c0_184] : memref<16x16x8xf32, #tpu.memory_space<vmem>>, vector<1x16x8xf32>
    %194 = vector.shape_cast %193 : vector<1x16x8xf32> to vector<16x8xf32>
    %cst_185 = arith.constant dense<0.000000e+00> : vector<32x8xf32>
    %195 = tpu.matmul %146, %194, %cst_185 {dimension_numbers = #tpu.dot_dimension_numbers<[1], [0], [0], [1], [0, 0, 1, 1], [], []>} : vector<32x16xf32>, vector<16x8xf32>, vector<32x8xf32> -> vector<32x8xf32>
    %c6_186 = arith.constant 6 : index
    %c0_187 = arith.constant 0 : index
    %c0_188 = arith.constant 0 : index
    %196 = vector.load %arg8[%c6_186, %c0_187, %c0_188] : memref<16x128x32xf32, #tpu.memory_space<vmem>>, vector<1x128x32xf32>
    %197 = vector.shape_cast %196 : vector<1x128x32xf32> to vector<128x32xf32>
    %cst_189 = arith.constant dense<0.000000e+00> : vector<128x8xf32>
    %198 = tpu.matmul %197, %195, %cst_189 {dimension_numbers = #tpu.dot_dimension_numbers<[1], [0], [0], [1], [0, 0, 1, 1], [], []>} : vector<128x32xf32>, vector<32x8xf32>, vector<128x8xf32> -> vector<128x8xf32>
    %199 = arith.addf %192, %198 : vector<128x8xf32>
    %c7_190 = arith.constant 7 : index
    %c0_191 = arith.constant 0 : index
    %c0_192 = arith.constant 0 : index
    %200 = vector.load %arg9[%c7_190, %c0_191, %c0_192] : memref<16x16x8xf32, #tpu.memory_space<vmem>>, vector<1x16x8xf32>
    %201 = vector.shape_cast %200 : vector<1x16x8xf32> to vector<16x8xf32>
    %cst_193 = arith.constant dense<0.000000e+00> : vector<32x8xf32>
    %202 = tpu.matmul %146, %201, %cst_193 {dimension_numbers = #tpu.dot_dimension_numbers<[1], [0], [0], [1], [0, 0, 1, 1], [], []>} : vector<32x16xf32>, vector<16x8xf32>, vector<32x8xf32> -> vector<32x8xf32>
    %c7_194 = arith.constant 7 : index
    %c0_195 = arith.constant 0 : index
    %c0_196 = arith.constant 0 : index
    %203 = vector.load %arg8[%c7_194, %c0_195, %c0_196] : memref<16x128x32xf32, #tpu.memory_space<vmem>>, vector<1x128x32xf32>
    %204 = vector.shape_cast %203 : vector<1x128x32xf32> to vector<128x32xf32>
    %cst_197 = arith.constant dense<0.000000e+00> : vector<128x8xf32>
    %205 = tpu.matmul %204, %202, %cst_197 {dimension_numbers = #tpu.dot_dimension_numbers<[1], [0], [0], [1], [0, 0, 1, 1], [], []>} : vector<128x32xf32>, vector<32x8xf32>, vector<128x8xf32> -> vector<128x8xf32>
    %206 = arith.addf %199, %205 : vector<128x8xf32>
    %c8_198 = arith.constant 8 : index
    %c0_199 = arith.constant 0 : index
    %c0_200 = arith.constant 0 : index
    %207 = vector.load %arg9[%c8_198, %c0_199, %c0_200] : memref<16x16x8xf32, #tpu.memory_space<vmem>>, vector<1x16x8xf32>
    %208 = vector.shape_cast %207 : vector<1x16x8xf32> to vector<16x8xf32>
    %cst_201 = arith.constant dense<0.000000e+00> : vector<32x8xf32>
    %209 = tpu.matmul %146, %208, %cst_201 {dimension_numbers = #tpu.dot_dimension_numbers<[1], [0], [0], [1], [0, 0, 1, 1], [], []>} : vector<32x16xf32>, vector<16x8xf32>, vector<32x8xf32> -> vector<32x8xf32>
    %c8_202 = arith.constant 8 : index
    %c0_203 = arith.constant 0 : index
    %c0_204 = arith.constant 0 : index
    %210 = vector.load %arg8[%c8_202, %c0_203, %c0_204] : memref<16x128x32xf32, #tpu.memory_space<vmem>>, vector<1x128x32xf32>
    %211 = vector.shape_cast %210 : vector<1x128x32xf32> to vector<128x32xf32>
    %cst_205 = arith.constant dense<0.000000e+00> : vector<128x8xf32>
    %212 = tpu.matmul %211, %209, %cst_205 {dimension_numbers = #tpu.dot_dimension_numbers<[1], [0], [0], [1], [0, 0, 1, 1], [], []>} : vector<128x32xf32>, vector<32x8xf32>, vector<128x8xf32> -> vector<128x8xf32>
    %213 = arith.addf %206, %212 : vector<128x8xf32>
    %c9_206 = arith.constant 9 : index
    %c0_207 = arith.constant 0 : index
    %c0_208 = arith.constant 0 : index
    %214 = vector.load %arg9[%c9_206, %c0_207, %c0_208] : memref<16x16x8xf32, #tpu.memory_space<vmem>>, vector<1x16x8xf32>
    %215 = vector.shape_cast %214 : vector<1x16x8xf32> to vector<16x8xf32>
    %cst_209 = arith.constant dense<0.000000e+00> : vector<32x8xf32>
    %216 = tpu.matmul %146, %215, %cst_209 {dimension_numbers = #tpu.dot_dimension_numbers<[1], [0], [0], [1], [0, 0, 1, 1], [], []>} : vector<32x16xf32>, vector<16x8xf32>, vector<32x8xf32> -> vector<32x8xf32>
    %c9_210 = arith.constant 9 : index
    %c0_211 = arith.constant 0 : index
    %c0_212 = arith.constant 0 : index
    %217 = vector.load %arg8[%c9_210, %c0_211, %c0_212] : memref<16x128x32xf32, #tpu.memory_space<vmem>>, vector<1x128x32xf32>
    %218 = vector.shape_cast %217 : vector<1x128x32xf32> to vector<128x32xf32>
    %cst_213 = arith.constant dense<0.000000e+00> : vector<128x8xf32>
    %219 = tpu.matmul %218, %216, %cst_213 {dimension_numbers = #tpu.dot_dimension_numbers<[1], [0], [0], [1], [0, 0, 1, 1], [], []>} : vector<128x32xf32>, vector<32x8xf32>, vector<128x8xf32> -> vector<128x8xf32>
    %220 = arith.addf %213, %219 : vector<128x8xf32>
    %c10_214 = arith.constant 10 : index
    %c0_215 = arith.constant 0 : index
    %c0_216 = arith.constant 0 : index
    %221 = vector.load %arg9[%c10_214, %c0_215, %c0_216] : memref<16x16x8xf32, #tpu.memory_space<vmem>>, vector<1x16x8xf32>
    %222 = vector.shape_cast %221 : vector<1x16x8xf32> to vector<16x8xf32>
    %cst_217 = arith.constant dense<0.000000e+00> : vector<32x8xf32>
    %223 = tpu.matmul %146, %222, %cst_217 {dimension_numbers = #tpu.dot_dimension_numbers<[1], [0], [0], [1], [0, 0, 1, 1], [], []>} : vector<32x16xf32>, vector<16x8xf32>, vector<32x8xf32> -> vector<32x8xf32>
    %c10_218 = arith.constant 10 : index
    %c0_219 = arith.constant 0 : index
    %c0_220 = arith.constant 0 : index
    %224 = vector.load %arg8[%c10_218, %c0_219, %c0_220] : memref<16x128x32xf32, #tpu.memory_space<vmem>>, vector<1x128x32xf32>
    %225 = vector.shape_cast %224 : vector<1x128x32xf32> to vector<128x32xf32>
    %cst_221 = arith.constant dense<0.000000e+00> : vector<128x8xf32>
    %226 = tpu.matmul %225, %223, %cst_221 {dimension_numbers = #tpu.dot_dimension_numbers<[1], [0], [0], [1], [0, 0, 1, 1], [], []>} : vector<128x32xf32>, vector<32x8xf32>, vector<128x8xf32> -> vector<128x8xf32>
    %227 = arith.addf %220, %226 : vector<128x8xf32>
    %c11_222 = arith.constant 11 : index
    %c0_223 = arith.constant 0 : index
    %c0_224 = arith.constant 0 : index
    %228 = vector.load %arg9[%c11_222, %c0_223, %c0_224] : memref<16x16x8xf32, #tpu.memory_space<vmem>>, vector<1x16x8xf32>
    %229 = vector.shape_cast %228 : vector<1x16x8xf32> to vector<16x8xf32>
    %cst_225 = arith.constant dense<0.000000e+00> : vector<32x8xf32>
    %230 = tpu.matmul %146, %229, %cst_225 {dimension_numbers = #tpu.dot_dimension_numbers<[1], [0], [0], [1], [0, 0, 1, 1], [], []>} : vector<32x16xf32>, vector<16x8xf32>, vector<32x8xf32> -> vector<32x8xf32>
    %c11_226 = arith.constant 11 : index
    %c0_227 = arith.constant 0 : index
    %c0_228 = arith.constant 0 : index
    %231 = vector.load %arg8[%c11_226, %c0_227, %c0_228] : memref<16x128x32xf32, #tpu.memory_space<vmem>>, vector<1x128x32xf32>
    %232 = vector.shape_cast %231 : vector<1x128x32xf32> to vector<128x32xf32>
    %cst_229 = arith.constant dense<0.000000e+00> : vector<128x8xf32>
    %233 = tpu.matmul %232, %230, %cst_229 {dimension_numbers = #tpu.dot_dimension_numbers<[1], [0], [0], [1], [0, 0, 1, 1], [], []>} : vector<128x32xf32>, vector<32x8xf32>, vector<128x8xf32> -> vector<128x8xf32>
    %234 = arith.addf %227, %233 : vector<128x8xf32>
    %c12_230 = arith.constant 12 : index
    %c0_231 = arith.constant 0 : index
    %c0_232 = arith.constant 0 : index
    %235 = vector.load %arg9[%c12_230, %c0_231, %c0_232] : memref<16x16x8xf32, #tpu.memory_space<vmem>>, vector<1x16x8xf32>
    %236 = vector.shape_cast %235 : vector<1x16x8xf32> to vector<16x8xf32>
    %cst_233 = arith.constant dense<0.000000e+00> : vector<32x8xf32>
    %237 = tpu.matmul %146, %236, %cst_233 {dimension_numbers = #tpu.dot_dimension_numbers<[1], [0], [0], [1], [0, 0, 1, 1], [], []>} : vector<32x16xf32>, vector<16x8xf32>, vector<32x8xf32> -> vector<32x8xf32>
    %c12_234 = arith.constant 12 : index
    %c0_235 = arith.constant 0 : index
    %c0_236 = arith.constant 0 : index
    %238 = vector.load %arg8[%c12_234, %c0_235, %c0_236] : memref<16x128x32xf32, #tpu.memory_space<vmem>>, vector<1x128x32xf32>
    %239 = vector.shape_cast %238 : vector<1x128x32xf32> to vector<128x32xf32>
    %cst_237 = arith.constant dense<0.000000e+00> : vector<128x8xf32>
    %240 = tpu.matmul %239, %237, %cst_237 {dimension_numbers = #tpu.dot_dimension_numbers<[1], [0], [0], [1], [0, 0, 1, 1], [], []>} : vector<128x32xf32>, vector<32x8xf32>, vector<128x8xf32> -> vector<128x8xf32>
    %241 = arith.addf %234, %240 : vector<128x8xf32>
    %c13_238 = arith.constant 13 : index
    %c0_239 = arith.constant 0 : index
    %c0_240 = arith.constant 0 : index
    %242 = vector.load %arg9[%c13_238, %c0_239, %c0_240] : memref<16x16x8xf32, #tpu.memory_space<vmem>>, vector<1x16x8xf32>
    %243 = vector.shape_cast %242 : vector<1x16x8xf32> to vector<16x8xf32>
    %cst_241 = arith.constant dense<0.000000e+00> : vector<32x8xf32>
    %244 = tpu.matmul %146, %243, %cst_241 {dimension_numbers = #tpu.dot_dimension_numbers<[1], [0], [0], [1], [0, 0, 1, 1], [], []>} : vector<32x16xf32>, vector<16x8xf32>, vector<32x8xf32> -> vector<32x8xf32>
    %c13_242 = arith.constant 13 : index
    %c0_243 = arith.constant 0 : index
    %c0_244 = arith.constant 0 : index
    %245 = vector.load %arg8[%c13_242, %c0_243, %c0_244] : memref<16x128x32xf32, #tpu.memory_space<vmem>>, vector<1x128x32xf32>
    %246 = vector.shape_cast %245 : vector<1x128x32xf32> to vector<128x32xf32>
    %cst_245 = arith.constant dense<0.000000e+00> : vector<128x8xf32>
    %247 = tpu.matmul %246, %244, %cst_245 {dimension_numbers = #tpu.dot_dimension_numbers<[1], [0], [0], [1], [0, 0, 1, 1], [], []>} : vector<128x32xf32>, vector<32x8xf32>, vector<128x8xf32> -> vector<128x8xf32>
    %248 = arith.addf %241, %247 : vector<128x8xf32>
    %c14_246 = arith.constant 14 : index
    %c0_247 = arith.constant 0 : index
    %c0_248 = arith.constant 0 : index
    %249 = vector.load %arg9[%c14_246, %c0_247, %c0_248] : memref<16x16x8xf32, #tpu.memory_space<vmem>>, vector<1x16x8xf32>
    %250 = vector.shape_cast %249 : vector<1x16x8xf32> to vector<16x8xf32>
    %cst_249 = arith.constant dense<0.000000e+00> : vector<32x8xf32>
    %251 = tpu.matmul %146, %250, %cst_249 {dimension_numbers = #tpu.dot_dimension_numbers<[1], [0], [0], [1], [0, 0, 1, 1], [], []>} : vector<32x16xf32>, vector<16x8xf32>, vector<32x8xf32> -> vector<32x8xf32>
    %c14_250 = arith.constant 14 : index
    %c0_251 = arith.constant 0 : index
    %c0_252 = arith.constant 0 : index
    %252 = vector.load %arg8[%c14_250, %c0_251, %c0_252] : memref<16x128x32xf32, #tpu.memory_space<vmem>>, vector<1x128x32xf32>
    %253 = vector.shape_cast %252 : vector<1x128x32xf32> to vector<128x32xf32>
    %cst_253 = arith.constant dense<0.000000e+00> : vector<128x8xf32>
    %254 = tpu.matmul %253, %251, %cst_253 {dimension_numbers = #tpu.dot_dimension_numbers<[1], [0], [0], [1], [0, 0, 1, 1], [], []>} : vector<128x32xf32>, vector<32x8xf32>, vector<128x8xf32> -> vector<128x8xf32>
    %255 = arith.addf %248, %254 : vector<128x8xf32>
    %c15_254 = arith.constant 15 : index
    %c0_255 = arith.constant 0 : index
    %c0_256 = arith.constant 0 : index
    %256 = vector.load %arg9[%c15_254, %c0_255, %c0_256] : memref<16x16x8xf32, #tpu.memory_space<vmem>>, vector<1x16x8xf32>
    %257 = vector.shape_cast %256 : vector<1x16x8xf32> to vector<16x8xf32>
    %cst_257 = arith.constant dense<0.000000e+00> : vector<32x8xf32>
    %258 = tpu.matmul %146, %257, %cst_257 {dimension_numbers = #tpu.dot_dimension_numbers<[1], [0], [0], [1], [0, 0, 1, 1], [], []>} : vector<32x16xf32>, vector<16x8xf32>, vector<32x8xf32> -> vector<32x8xf32>
    %c15_258 = arith.constant 15 : index
    %c0_259 = arith.constant 0 : index
    %c0_260 = arith.constant 0 : index
    %259 = vector.load %arg8[%c15_258, %c0_259, %c0_260] : memref<16x128x32xf32, #tpu.memory_space<vmem>>, vector<1x128x32xf32>
    %260 = vector.shape_cast %259 : vector<1x128x32xf32> to vector<128x32xf32>
    %cst_261 = arith.constant dense<0.000000e+00> : vector<128x8xf32>
    %261 = tpu.matmul %260, %258, %cst_261 {dimension_numbers = #tpu.dot_dimension_numbers<[1], [0], [0], [1], [0, 0, 1, 1], [], []>} : vector<128x32xf32>, vector<32x8xf32>, vector<128x8xf32> -> vector<128x8xf32>
    %262 = arith.addf %255, %261 : vector<128x8xf32>
    %cst_262 = arith.constant dense<0.000000e+00> : vector<8xf32>
    %263 = vector.multi_reduction <add>, %262, %cst_262 [0] : vector<128x8xf32> to vector<8xf32>
    %264 = vector.shape_cast %263 : vector<8xf32> to vector<1x8xf32>
    %cst_263 = arith.constant 1.280000e+02 : f32
    %265 = vector.broadcast %cst_263 : f32 to vector<1x8xf32>
    %266 = arith.divf %264, %265 : vector<1x8xf32>
    %267 = vector.broadcast %266 : vector<1x8xf32> to vector<128x8xf32>
    %268 = arith.subf %262, %267 : vector<128x8xf32>
    %269 = arith.mulf %268, %268 : vector<128x8xf32>
    %cst_264 = arith.constant dense<0.000000e+00> : vector<8xf32>
    %270 = vector.multi_reduction <add>, %269, %cst_264 [0] : vector<128x8xf32> to vector<8xf32>
    %271 = vector.shape_cast %270 : vector<8xf32> to vector<1x8xf32>
    %cst_265 = arith.constant 1.280000e+02 : f32
    %272 = vector.broadcast %cst_265 : f32 to vector<1x8xf32>
    %273 = arith.divf %271, %272 : vector<1x8xf32>
    %c0_266 = arith.constant 0 : index
    %c0_267 = arith.constant 0 : index
    %274 = vector.load %arg11[%c0_266, %c0_267] : memref<1x8xf32, #tpu.memory_space<vmem>>, vector<1x8xf32>
    %275 = vector.broadcast %266 : vector<1x8xf32> to vector<128x8xf32>
    %276 = arith.subf %262, %275 : vector<128x8xf32>
    %cst_268 = arith.constant 9.99999974E-6 : f32
    %277 = vector.broadcast %cst_268 : f32 to vector<1x8xf32>
    %278 = arith.addf %273, %277 : vector<1x8xf32>
    %279 = math.rsqrt %278 : vector<1x8xf32>
    %280 = vector.broadcast %279 : vector<1x8xf32> to vector<128x8xf32>
    %281 = arith.mulf %276, %280 : vector<128x8xf32>
    %282 = vector.broadcast %274 : vector<1x8xf32> to vector<128x8xf32>
    %283 = arith.mulf %282, %281 : vector<128x8xf32>
    %c0_269 = arith.constant 0 : index
    %c0_270 = arith.constant 0 : index
    %284 = vector.load %arg12[%c0_269, %c0_270] : memref<1x8xf32, #tpu.memory_space<vmem>>, vector<1x8xf32>
    %285 = vector.broadcast %284 : vector<1x8xf32> to vector<128x8xf32>
    %286 = arith.addf %283, %285 : vector<128x8xf32>
    %cst_271 = arith.constant 0.000000e+00 : f32
    %287 = vector.broadcast %cst_271 : f32 to vector<128x8xf32>
    %288 = arith.maximumf %286, %287 : vector<128x8xf32>
    %cst_272 = arith.constant 0.000000e+00 : f32
    %289 = vector.broadcast %cst_272 : f32 to vector<512x3xf32>
    %c0_273 = arith.constant 0 : index
    %c0_274 = arith.constant 0 : index
    %290 = vector.load %arg15[%c0_273, %c0_274] : memref<1x3xf32, #tpu.memory_space<vmem>>, vector<1x3xf32>
    %291 = vector.broadcast %290 : vector<1x3xf32> to vector<512x3xf32>
    %292 = arith.addf %289, %291 : vector<512x3xf32>
    %c0_275 = arith.constant 0 : index
    %c0_276 = arith.constant 0 : index
    %c0_277 = arith.constant 0 : index
    %293 = vector.load %arg14[%c0_275, %c0_276, %c0_277] : memref<16x8x3xf32, #tpu.memory_space<vmem>>, vector<1x8x3xf32>
    %294 = vector.shape_cast %293 : vector<1x8x3xf32> to vector<8x3xf32>
    %cst_278 = arith.constant dense<0.000000e+00> : vector<128x3xf32>
    %295 = tpu.matmul %288, %294, %cst_278 {dimension_numbers = #tpu.dot_dimension_numbers<[1], [0], [0], [1], [0, 0, 1, 1], [], []>} : vector<128x8xf32>, vector<8x3xf32>, vector<128x3xf32> -> vector<128x3xf32>
    %c0_279 = arith.constant 0 : index
    %c0_280 = arith.constant 0 : index
    %c0_281 = arith.constant 0 : index
    %296 = vector.load %arg13[%c0_279, %c0_280, %c0_281] : memref<16x512x128xf32, #tpu.memory_space<vmem>>, vector<1x512x128xf32>
    %297 = vector.shape_cast %296 : vector<1x512x128xf32> to vector<512x128xf32>
    %cst_282 = arith.constant dense<0.000000e+00> : vector<512x3xf32>
    %298 = tpu.matmul %297, %295, %cst_282 {dimension_numbers = #tpu.dot_dimension_numbers<[1], [0], [0], [1], [0, 0, 1, 1], [], []>} : vector<512x128xf32>, vector<128x3xf32>, vector<512x3xf32> -> vector<512x3xf32>
    %299 = arith.addf %292, %298 : vector<512x3xf32>
    %c1_283 = arith.constant 1 : index
    %c0_284 = arith.constant 0 : index
    %c0_285 = arith.constant 0 : index
    %300 = vector.load %arg14[%c1_283, %c0_284, %c0_285] : memref<16x8x3xf32, #tpu.memory_space<vmem>>, vector<1x8x3xf32>
    %301 = vector.shape_cast %300 : vector<1x8x3xf32> to vector<8x3xf32>
    %cst_286 = arith.constant dense<0.000000e+00> : vector<128x3xf32>
    %302 = tpu.matmul %288, %301, %cst_286 {dimension_numbers = #tpu.dot_dimension_numbers<[1], [0], [0], [1], [0, 0, 1, 1], [], []>} : vector<128x8xf32>, vector<8x3xf32>, vector<128x3xf32> -> vector<128x3xf32>
    %c1_287 = arith.constant 1 : index
    %c0_288 = arith.constant 0 : index
    %c0_289 = arith.constant 0 : index
    %303 = vector.load %arg13[%c1_287, %c0_288, %c0_289] : memref<16x512x128xf32, #tpu.memory_space<vmem>>, vector<1x512x128xf32>
    %304 = vector.shape_cast %303 : vector<1x512x128xf32> to vector<512x128xf32>
    %cst_290 = arith.constant dense<0.000000e+00> : vector<512x3xf32>
    %305 = tpu.matmul %304, %302, %cst_290 {dimension_numbers = #tpu.dot_dimension_numbers<[1], [0], [0], [1], [0, 0, 1, 1], [], []>} : vector<512x128xf32>, vector<128x3xf32>, vector<512x3xf32> -> vector<512x3xf32>
    %306 = arith.addf %299, %305 : vector<512x3xf32>
    %c2_291 = arith.constant 2 : index
    %c0_292 = arith.constant 0 : index
    %c0_293 = arith.constant 0 : index
    %307 = vector.load %arg14[%c2_291, %c0_292, %c0_293] : memref<16x8x3xf32, #tpu.memory_space<vmem>>, vector<1x8x3xf32>
    %308 = vector.shape_cast %307 : vector<1x8x3xf32> to vector<8x3xf32>
    %cst_294 = arith.constant dense<0.000000e+00> : vector<128x3xf32>
    %309 = tpu.matmul %288, %308, %cst_294 {dimension_numbers = #tpu.dot_dimension_numbers<[1], [0], [0], [1], [0, 0, 1, 1], [], []>} : vector<128x8xf32>, vector<8x3xf32>, vector<128x3xf32> -> vector<128x3xf32>
    %c2_295 = arith.constant 2 : index
    %c0_296 = arith.constant 0 : index
    %c0_297 = arith.constant 0 : index
    %310 = vector.load %arg13[%c2_295, %c0_296, %c0_297] : memref<16x512x128xf32, #tpu.memory_space<vmem>>, vector<1x512x128xf32>
    %311 = vector.shape_cast %310 : vector<1x512x128xf32> to vector<512x128xf32>
    %cst_298 = arith.constant dense<0.000000e+00> : vector<512x3xf32>
    %312 = tpu.matmul %311, %309, %cst_298 {dimension_numbers = #tpu.dot_dimension_numbers<[1], [0], [0], [1], [0, 0, 1, 1], [], []>} : vector<512x128xf32>, vector<128x3xf32>, vector<512x3xf32> -> vector<512x3xf32>
    %313 = arith.addf %306, %312 : vector<512x3xf32>
    %c3_299 = arith.constant 3 : index
    %c0_300 = arith.constant 0 : index
    %c0_301 = arith.constant 0 : index
    %314 = vector.load %arg14[%c3_299, %c0_300, %c0_301] : memref<16x8x3xf32, #tpu.memory_space<vmem>>, vector<1x8x3xf32>
    %315 = vector.shape_cast %314 : vector<1x8x3xf32> to vector<8x3xf32>
    %cst_302 = arith.constant dense<0.000000e+00> : vector<128x3xf32>
    %316 = tpu.matmul %288, %315, %cst_302 {dimension_numbers = #tpu.dot_dimension_numbers<[1], [0], [0], [1], [0, 0, 1, 1], [], []>} : vector<128x8xf32>, vector<8x3xf32>, vector<128x3xf32> -> vector<128x3xf32>
    %c3_303 = arith.constant 3 : index
    %c0_304 = arith.constant 0 : index
    %c0_305 = arith.constant 0 : index
    %317 = vector.load %arg13[%c3_303, %c0_304, %c0_305] : memref<16x512x128xf32, #tpu.memory_space<vmem>>, vector<1x512x128xf32>
    %318 = vector.shape_cast %317 : vector<1x512x128xf32> to vector<512x128xf32>
    %cst_306 = arith.constant dense<0.000000e+00> : vector<512x3xf32>
    %319 = tpu.matmul %318, %316, %cst_306 {dimension_numbers = #tpu.dot_dimension_numbers<[1], [0], [0], [1], [0, 0, 1, 1], [], []>} : vector<512x128xf32>, vector<128x3xf32>, vector<512x3xf32> -> vector<512x3xf32>
    %320 = arith.addf %313, %319 : vector<512x3xf32>
    %c4_307 = arith.constant 4 : index
    %c0_308 = arith.constant 0 : index
    %c0_309 = arith.constant 0 : index
    %321 = vector.load %arg14[%c4_307, %c0_308, %c0_309] : memref<16x8x3xf32, #tpu.memory_space<vmem>>, vector<1x8x3xf32>
    %322 = vector.shape_cast %321 : vector<1x8x3xf32> to vector<8x3xf32>
    %cst_310 = arith.constant dense<0.000000e+00> : vector<128x3xf32>
    %323 = tpu.matmul %288, %322, %cst_310 {dimension_numbers = #tpu.dot_dimension_numbers<[1], [0], [0], [1], [0, 0, 1, 1], [], []>} : vector<128x8xf32>, vector<8x3xf32>, vector<128x3xf32> -> vector<128x3xf32>
    %c4_311 = arith.constant 4 : index
    %c0_312 = arith.constant 0 : index
    %c0_313 = arith.constant 0 : index
    %324 = vector.load %arg13[%c4_311, %c0_312, %c0_313] : memref<16x512x128xf32, #tpu.memory_space<vmem>>, vector<1x512x128xf32>
    %325 = vector.shape_cast %324 : vector<1x512x128xf32> to vector<512x128xf32>
    %cst_314 = arith.constant dense<0.000000e+00> : vector<512x3xf32>
    %326 = tpu.matmul %325, %323, %cst_314 {dimension_numbers = #tpu.dot_dimension_numbers<[1], [0], [0], [1], [0, 0, 1, 1], [], []>} : vector<512x128xf32>, vector<128x3xf32>, vector<512x3xf32> -> vector<512x3xf32>
    %327 = arith.addf %320, %326 : vector<512x3xf32>
    %c5_315 = arith.constant 5 : index
    %c0_316 = arith.constant 0 : index
    %c0_317 = arith.constant 0 : index
    %328 = vector.load %arg14[%c5_315, %c0_316, %c0_317] : memref<16x8x3xf32, #tpu.memory_space<vmem>>, vector<1x8x3xf32>
    %329 = vector.shape_cast %328 : vector<1x8x3xf32> to vector<8x3xf32>
    %cst_318 = arith.constant dense<0.000000e+00> : vector<128x3xf32>
    %330 = tpu.matmul %288, %329, %cst_318 {dimension_numbers = #tpu.dot_dimension_numbers<[1], [0], [0], [1], [0, 0, 1, 1], [], []>} : vector<128x8xf32>, vector<8x3xf32>, vector<128x3xf32> -> vector<128x3xf32>
    %c5_319 = arith.constant 5 : index
    %c0_320 = arith.constant 0 : index
    %c0_321 = arith.constant 0 : index
    %331 = vector.load %arg13[%c5_319, %c0_320, %c0_321] : memref<16x512x128xf32, #tpu.memory_space<vmem>>, vector<1x512x128xf32>
    %332 = vector.shape_cast %331 : vector<1x512x128xf32> to vector<512x128xf32>
    %cst_322 = arith.constant dense<0.000000e+00> : vector<512x3xf32>
    %333 = tpu.matmul %332, %330, %cst_322 {dimension_numbers = #tpu.dot_dimension_numbers<[1], [0], [0], [1], [0, 0, 1, 1], [], []>} : vector<512x128xf32>, vector<128x3xf32>, vector<512x3xf32> -> vector<512x3xf32>
    %334 = arith.addf %327, %333 : vector<512x3xf32>
    %c6_323 = arith.constant 6 : index
    %c0_324 = arith.constant 0 : index
    %c0_325 = arith.constant 0 : index
    %335 = vector.load %arg14[%c6_323, %c0_324, %c0_325] : memref<16x8x3xf32, #tpu.memory_space<vmem>>, vector<1x8x3xf32>
    %336 = vector.shape_cast %335 : vector<1x8x3xf32> to vector<8x3xf32>
    %cst_326 = arith.constant dense<0.000000e+00> : vector<128x3xf32>
    %337 = tpu.matmul %288, %336, %cst_326 {dimension_numbers = #tpu.dot_dimension_numbers<[1], [0], [0], [1], [0, 0, 1, 1], [], []>} : vector<128x8xf32>, vector<8x3xf32>, vector<128x3xf32> -> vector<128x3xf32>
    %c6_327 = arith.constant 6 : index
    %c0_328 = arith.constant 0 : index
    %c0_329 = arith.constant 0 : index
    %338 = vector.load %arg13[%c6_327, %c0_328, %c0_329] : memref<16x512x128xf32, #tpu.memory_space<vmem>>, vector<1x512x128xf32>
    %339 = vector.shape_cast %338 : vector<1x512x128xf32> to vector<512x128xf32>
    %cst_330 = arith.constant dense<0.000000e+00> : vector<512x3xf32>
    %340 = tpu.matmul %339, %337, %cst_330 {dimension_numbers = #tpu.dot_dimension_numbers<[1], [0], [0], [1], [0, 0, 1, 1], [], []>} : vector<512x128xf32>, vector<128x3xf32>, vector<512x3xf32> -> vector<512x3xf32>
    %341 = arith.addf %334, %340 : vector<512x3xf32>
    %c7_331 = arith.constant 7 : index
    %c0_332 = arith.constant 0 : index
    %c0_333 = arith.constant 0 : index
    %342 = vector.load %arg14[%c7_331, %c0_332, %c0_333] : memref<16x8x3xf32, #tpu.memory_space<vmem>>, vector<1x8x3xf32>
    %343 = vector.shape_cast %342 : vector<1x8x3xf32> to vector<8x3xf32>
    %cst_334 = arith.constant dense<0.000000e+00> : vector<128x3xf32>
    %344 = tpu.matmul %288, %343, %cst_334 {dimension_numbers = #tpu.dot_dimension_numbers<[1], [0], [0], [1], [0, 0, 1, 1], [], []>} : vector<128x8xf32>, vector<8x3xf32>, vector<128x3xf32> -> vector<128x3xf32>
    %c7_335 = arith.constant 7 : index
    %c0_336 = arith.constant 0 : index
    %c0_337 = arith.constant 0 : index
    %345 = vector.load %arg13[%c7_335, %c0_336, %c0_337] : memref<16x512x128xf32, #tpu.memory_space<vmem>>, vector<1x512x128xf32>
    %346 = vector.shape_cast %345 : vector<1x512x128xf32> to vector<512x128xf32>
    %cst_338 = arith.constant dense<0.000000e+00> : vector<512x3xf32>
    %347 = tpu.matmul %346, %344, %cst_338 {dimension_numbers = #tpu.dot_dimension_numbers<[1], [0], [0], [1], [0, 0, 1, 1], [], []>} : vector<512x128xf32>, vector<128x3xf32>, vector<512x3xf32> -> vector<512x3xf32>
    %348 = arith.addf %341, %347 : vector<512x3xf32>
    %c8_339 = arith.constant 8 : index
    %c0_340 = arith.constant 0 : index
    %c0_341 = arith.constant 0 : index
    %349 = vector.load %arg14[%c8_339, %c0_340, %c0_341] : memref<16x8x3xf32, #tpu.memory_space<vmem>>, vector<1x8x3xf32>
    %350 = vector.shape_cast %349 : vector<1x8x3xf32> to vector<8x3xf32>
    %cst_342 = arith.constant dense<0.000000e+00> : vector<128x3xf32>
    %351 = tpu.matmul %288, %350, %cst_342 {dimension_numbers = #tpu.dot_dimension_numbers<[1], [0], [0], [1], [0, 0, 1, 1], [], []>} : vector<128x8xf32>, vector<8x3xf32>, vector<128x3xf32> -> vector<128x3xf32>
    %c8_343 = arith.constant 8 : index
    %c0_344 = arith.constant 0 : index
    %c0_345 = arith.constant 0 : index
    %352 = vector.load %arg13[%c8_343, %c0_344, %c0_345] : memref<16x512x128xf32, #tpu.memory_space<vmem>>, vector<1x512x128xf32>
    %353 = vector.shape_cast %352 : vector<1x512x128xf32> to vector<512x128xf32>
    %cst_346 = arith.constant dense<0.000000e+00> : vector<512x3xf32>
    %354 = tpu.matmul %353, %351, %cst_346 {dimension_numbers = #tpu.dot_dimension_numbers<[1], [0], [0], [1], [0, 0, 1, 1], [], []>} : vector<512x128xf32>, vector<128x3xf32>, vector<512x3xf32> -> vector<512x3xf32>
    %355 = arith.addf %348, %354 : vector<512x3xf32>
    %c9_347 = arith.constant 9 : index
    %c0_348 = arith.constant 0 : index
    %c0_349 = arith.constant 0 : index
    %356 = vector.load %arg14[%c9_347, %c0_348, %c0_349] : memref<16x8x3xf32, #tpu.memory_space<vmem>>, vector<1x8x3xf32>
    %357 = vector.shape_cast %356 : vector<1x8x3xf32> to vector<8x3xf32>
    %cst_350 = arith.constant dense<0.000000e+00> : vector<128x3xf32>
    %358 = tpu.matmul %288, %357, %cst_350 {dimension_numbers = #tpu.dot_dimension_numbers<[1], [0], [0], [1], [0, 0, 1, 1], [], []>} : vector<128x8xf32>, vector<8x3xf32>, vector<128x3xf32> -> vector<128x3xf32>
    %c9_351 = arith.constant 9 : index
    %c0_352 = arith.constant 0 : index
    %c0_353 = arith.constant 0 : index
    %359 = vector.load %arg13[%c9_351, %c0_352, %c0_353] : memref<16x512x128xf32, #tpu.memory_space<vmem>>, vector<1x512x128xf32>
    %360 = vector.shape_cast %359 : vector<1x512x128xf32> to vector<512x128xf32>
    %cst_354 = arith.constant dense<0.000000e+00> : vector<512x3xf32>
    %361 = tpu.matmul %360, %358, %cst_354 {dimension_numbers = #tpu.dot_dimension_numbers<[1], [0], [0], [1], [0, 0, 1, 1], [], []>} : vector<512x128xf32>, vector<128x3xf32>, vector<512x3xf32> -> vector<512x3xf32>
    %362 = arith.addf %355, %361 : vector<512x3xf32>
    %c10_355 = arith.constant 10 : index
    %c0_356 = arith.constant 0 : index
    %c0_357 = arith.constant 0 : index
    %363 = vector.load %arg14[%c10_355, %c0_356, %c0_357] : memref<16x8x3xf32, #tpu.memory_space<vmem>>, vector<1x8x3xf32>
    %364 = vector.shape_cast %363 : vector<1x8x3xf32> to vector<8x3xf32>
    %cst_358 = arith.constant dense<0.000000e+00> : vector<128x3xf32>
    %365 = tpu.matmul %288, %364, %cst_358 {dimension_numbers = #tpu.dot_dimension_numbers<[1], [0], [0], [1], [0, 0, 1, 1], [], []>} : vector<128x8xf32>, vector<8x3xf32>, vector<128x3xf32> -> vector<128x3xf32>
    %c10_359 = arith.constant 10 : index
    %c0_360 = arith.constant 0 : index
    %c0_361 = arith.constant 0 : index
    %366 = vector.load %arg13[%c10_359, %c0_360, %c0_361] : memref<16x512x128xf32, #tpu.memory_space<vmem>>, vector<1x512x128xf32>
    %367 = vector.shape_cast %366 : vector<1x512x128xf32> to vector<512x128xf32>
    %cst_362 = arith.constant dense<0.000000e+00> : vector<512x3xf32>
    %368 = tpu.matmul %367, %365, %cst_362 {dimension_numbers = #tpu.dot_dimension_numbers<[1], [0], [0], [1], [0, 0, 1, 1], [], []>} : vector<512x128xf32>, vector<128x3xf32>, vector<512x3xf32> -> vector<512x3xf32>
    %369 = arith.addf %362, %368 : vector<512x3xf32>
    %c11_363 = arith.constant 11 : index
    %c0_364 = arith.constant 0 : index
    %c0_365 = arith.constant 0 : index
    %370 = vector.load %arg14[%c11_363, %c0_364, %c0_365] : memref<16x8x3xf32, #tpu.memory_space<vmem>>, vector<1x8x3xf32>
    %371 = vector.shape_cast %370 : vector<1x8x3xf32> to vector<8x3xf32>
    %cst_366 = arith.constant dense<0.000000e+00> : vector<128x3xf32>
    %372 = tpu.matmul %288, %371, %cst_366 {dimension_numbers = #tpu.dot_dimension_numbers<[1], [0], [0], [1], [0, 0, 1, 1], [], []>} : vector<128x8xf32>, vector<8x3xf32>, vector<128x3xf32> -> vector<128x3xf32>
    %c11_367 = arith.constant 11 : index
    %c0_368 = arith.constant 0 : index
    %c0_369 = arith.constant 0 : index
    %373 = vector.load %arg13[%c11_367, %c0_368, %c0_369] : memref<16x512x128xf32, #tpu.memory_space<vmem>>, vector<1x512x128xf32>
    %374 = vector.shape_cast %373 : vector<1x512x128xf32> to vector<512x128xf32>
    %cst_370 = arith.constant dense<0.000000e+00> : vector<512x3xf32>
    %375 = tpu.matmul %374, %372, %cst_370 {dimension_numbers = #tpu.dot_dimension_numbers<[1], [0], [0], [1], [0, 0, 1, 1], [], []>} : vector<512x128xf32>, vector<128x3xf32>, vector<512x3xf32> -> vector<512x3xf32>
    %376 = arith.addf %369, %375 : vector<512x3xf32>
    %c12_371 = arith.constant 12 : index
    %c0_372 = arith.constant 0 : index
    %c0_373 = arith.constant 0 : index
    %377 = vector.load %arg14[%c12_371, %c0_372, %c0_373] : memref<16x8x3xf32, #tpu.memory_space<vmem>>, vector<1x8x3xf32>
    %378 = vector.shape_cast %377 : vector<1x8x3xf32> to vector<8x3xf32>
    %cst_374 = arith.constant dense<0.000000e+00> : vector<128x3xf32>
    %379 = tpu.matmul %288, %378, %cst_374 {dimension_numbers = #tpu.dot_dimension_numbers<[1], [0], [0], [1], [0, 0, 1, 1], [], []>} : vector<128x8xf32>, vector<8x3xf32>, vector<128x3xf32> -> vector<128x3xf32>
    %c12_375 = arith.constant 12 : index
    %c0_376 = arith.constant 0 : index
    %c0_377 = arith.constant 0 : index
    %380 = vector.load %arg13[%c12_375, %c0_376, %c0_377] : memref<16x512x128xf32, #tpu.memory_space<vmem>>, vector<1x512x128xf32>
    %381 = vector.shape_cast %380 : vector<1x512x128xf32> to vector<512x128xf32>
    %cst_378 = arith.constant dense<0.000000e+00> : vector<512x3xf32>
    %382 = tpu.matmul %381, %379, %cst_378 {dimension_numbers = #tpu.dot_dimension_numbers<[1], [0], [0], [1], [0, 0, 1, 1], [], []>} : vector<512x128xf32>, vector<128x3xf32>, vector<512x3xf32> -> vector<512x3xf32>
    %383 = arith.addf %376, %382 : vector<512x3xf32>
    %c13_379 = arith.constant 13 : index
    %c0_380 = arith.constant 0 : index
    %c0_381 = arith.constant 0 : index
    %384 = vector.load %arg14[%c13_379, %c0_380, %c0_381] : memref<16x8x3xf32, #tpu.memory_space<vmem>>, vector<1x8x3xf32>
    %385 = vector.shape_cast %384 : vector<1x8x3xf32> to vector<8x3xf32>
    %cst_382 = arith.constant dense<0.000000e+00> : vector<128x3xf32>
    %386 = tpu.matmul %288, %385, %cst_382 {dimension_numbers = #tpu.dot_dimension_numbers<[1], [0], [0], [1], [0, 0, 1, 1], [], []>} : vector<128x8xf32>, vector<8x3xf32>, vector<128x3xf32> -> vector<128x3xf32>
    %c13_383 = arith.constant 13 : index
    %c0_384 = arith.constant 0 : index
    %c0_385 = arith.constant 0 : index
    %387 = vector.load %arg13[%c13_383, %c0_384, %c0_385] : memref<16x512x128xf32, #tpu.memory_space<vmem>>, vector<1x512x128xf32>
    %388 = vector.shape_cast %387 : vector<1x512x128xf32> to vector<512x128xf32>
    %cst_386 = arith.constant dense<0.000000e+00> : vector<512x3xf32>
    %389 = tpu.matmul %388, %386, %cst_386 {dimension_numbers = #tpu.dot_dimension_numbers<[1], [0], [0], [1], [0, 0, 1, 1], [], []>} : vector<512x128xf32>, vector<128x3xf32>, vector<512x3xf32> -> vector<512x3xf32>
    %390 = arith.addf %383, %389 : vector<512x3xf32>
    %c14_387 = arith.constant 14 : index
    %c0_388 = arith.constant 0 : index
    %c0_389 = arith.constant 0 : index
    %391 = vector.load %arg14[%c14_387, %c0_388, %c0_389] : memref<16x8x3xf32, #tpu.memory_space<vmem>>, vector<1x8x3xf32>
    %392 = vector.shape_cast %391 : vector<1x8x3xf32> to vector<8x3xf32>
    %cst_390 = arith.constant dense<0.000000e+00> : vector<128x3xf32>
    %393 = tpu.matmul %288, %392, %cst_390 {dimension_numbers = #tpu.dot_dimension_numbers<[1], [0], [0], [1], [0, 0, 1, 1], [], []>} : vector<128x8xf32>, vector<8x3xf32>, vector<128x3xf32> -> vector<128x3xf32>
    %c14_391 = arith.constant 14 : index
    %c0_392 = arith.constant 0 : index
    %c0_393 = arith.constant 0 : index
    %394 = vector.load %arg13[%c14_391, %c0_392, %c0_393] : memref<16x512x128xf32, #tpu.memory_space<vmem>>, vector<1x512x128xf32>
    %395 = vector.shape_cast %394 : vector<1x512x128xf32> to vector<512x128xf32>
    %cst_394 = arith.constant dense<0.000000e+00> : vector<512x3xf32>
    %396 = tpu.matmul %395, %393, %cst_394 {dimension_numbers = #tpu.dot_dimension_numbers<[1], [0], [0], [1], [0, 0, 1, 1], [], []>} : vector<512x128xf32>, vector<128x3xf32>, vector<512x3xf32> -> vector<512x3xf32>
    %397 = arith.addf %390, %396 : vector<512x3xf32>
    %c15_395 = arith.constant 15 : index
    %c0_396 = arith.constant 0 : index
    %c0_397 = arith.constant 0 : index
    %398 = vector.load %arg14[%c15_395, %c0_396, %c0_397] : memref<16x8x3xf32, #tpu.memory_space<vmem>>, vector<1x8x3xf32>
    %399 = vector.shape_cast %398 : vector<1x8x3xf32> to vector<8x3xf32>
    %cst_398 = arith.constant dense<0.000000e+00> : vector<128x3xf32>
    %400 = tpu.matmul %288, %399, %cst_398 {dimension_numbers = #tpu.dot_dimension_numbers<[1], [0], [0], [1], [0, 0, 1, 1], [], []>} : vector<128x8xf32>, vector<8x3xf32>, vector<128x3xf32> -> vector<128x3xf32>
    %c15_399 = arith.constant 15 : index
    %c0_400 = arith.constant 0 : index
    %c0_401 = arith.constant 0 : index
    %401 = vector.load %arg13[%c15_399, %c0_400, %c0_401] : memref<16x512x128xf32, #tpu.memory_space<vmem>>, vector<1x512x128xf32>
    %402 = vector.shape_cast %401 : vector<1x512x128xf32> to vector<512x128xf32>
    %cst_402 = arith.constant dense<0.000000e+00> : vector<512x3xf32>
    %403 = tpu.matmul %402, %400, %cst_402 {dimension_numbers = #tpu.dot_dimension_numbers<[1], [0], [0], [1], [0, 0, 1, 1], [], []>} : vector<512x128xf32>, vector<128x3xf32>, vector<512x3xf32> -> vector<512x3xf32>
    %404 = arith.addf %397, %403 : vector<512x3xf32>
    %405 = math.tanh %404 : vector<512x3xf32>
    %c0_403 = arith.constant 0 : index
    %c0_404 = arith.constant 0 : index
    %406 = vector.load %arg16[%c0_403, %c0_404] : memref<512x3xf32, #tpu.memory_space<vmem>>, vector<512x3xf32>
    tpu.vector_store %arg16[%c0_403, %c0_404], %405 {strides = array<i32>} : memref<512x3xf32, #tpu.memory_space<vmem>>, vector<512x3xf32>,
    return
  }
}

</mosaic_0001>

<bundles_post_ra>
// kernel: _lambda_.1
= control target key start
LH: loop header
LB: loop body
LE: loop exit
PB: predicated region body
PF: predicated region fallthrough
CT: control target
= control target key end

     0   :  { %s30826_s0 = inlined_call_operand.vmem [shape: f32[8,128], index: 0, kind: input, shape index: {}]   ;;  %s30827_s1 = inlined_call_operand.hbm [shape: f32[128,32], index: 1, kind: input, shape index: {}]   ;;  %s30828_s2 = inlined_call_operand.hbm [shape: f32[8,32], index: 2, kind: input, shape index: {}]   ;;  %s30829_s3 = inlined_call_operand.hbm [shape: f32[16,32,8], index: 3, kind: input, shape index: {}]   ;;  %s30830_s4 = inlined_call_operand.hbm [shape: f32[16,32,16], index: 4, kind: input, shape index: {}]   ;;  %s30831_s5 = inlined_call_operand.hbm [shape: f32[1,16], index: 5, kind: input, shape index: {}]   ;;  %s30832_s6 = inlined_call_operand.hbm [shape: f32[1,16], index: 6, kind: input, shape index: {}]   ;;  %s30833_s7 = inlined_call_operand.hbm [shape: f32[1,16], index: 7, kind: input, shape index: {}]   ;;  %s30834_s8 = inlined_call_operand.hbm [shape: f32[16,128,32], index: 8, kind: input, shape index: {}]   ;;  %s30835_s9 = inlined_call_operand.hbm [shape: f32[16,16,8], index: 9, kind: input, shape index: {}]   ;;  %s30836_s10 = inlined_call_operand.hbm [shape: f32[1,8], index: 10, kind: input, shape index: {}]   ;;  %s30837_s11 = inlined_call_operand.hbm [shape: f32[1,8], index: 11, kind: input, shape index: {}]   ;;  %s30838_s12 = inlined_call_operand.hbm [shape: f32[1,8], index: 12, kind: input, shape index: {}]   ;;  %s30839_s13 = inlined_call_operand.hbm [shape: f32[16,512,128], index: 13, kind: input, shape index: {}]   ;;  %s30840_s14 = inlined_call_operand.hbm [shape: f32[16,8,3], index: 14, kind: input, shape index: {}]   ;;  %s30841_s15 = inlined_call_operand.hbm [shape: f32[1,3], index: 15, kind: input, shape index: {}]   ;;  %s30842_s16 = inlined_call_operand.vmem [shape: f32[512,3], index: 16, kind: output, shape index: {}]  }
   0x1   :  { %30843 = sst [smem:[#allocation94_spill]] %s30826_s0 }
   0x2   :  { %21 = vsyncpa [#allocation3], 0 }
   0x3   :  { %22 = vsyncpa [#allocation5], 0 }
   0x4   :  { %23 = vsyncpa [#allocation8], 0 }
   0x5   :  { %24 = vsyncpa [#allocation11], 0 }
   0x6   :  { %25 = vsyncpa [#allocation14], 0 }
   0x7   :  { %26 = vsyncpa [#allocation17], 0 }
   0x8   :  { %27 = vsyncpa [#allocation20], 0 }
   0x9   :  { %28 = vsyncpa [#allocation23], 0  ;;  %s28273_s21 = smov [#allocation4]   ;;  %s27927_s25 = scalar_lea.hbm %s30828_s2, 128 }
   0xa   :  { %s49_s22 = sshll.u32 %s28273_s21, 4  ;;  %p27928_p0 = scmp.ne.s32.totalorder %s30828_s2, %s27927_s25  ;;  %s50_s22 = int_to_ptr.vmem [resolvable:$true] %s49_s22 }
   0xb   :  { %p27931_p1 = scmp.lt.u32.totalorder %s27927_s25, %s30828_s2 }
   0xd   :  { %p27933_p2 = pnand %p27931_p1, %p27928_p0 }
   0xf   :  { %27936 = shalt.err (!%p27933_p2)
}
  0x10   :  { %s27937_s30 = scalar_lea.vmem %s50_s22, 128  ;;  %p27942_p4 = scmp.lt.s32.totalorder %s50_s22, %s50_s22 }
  0x11   :  { %p27938_p3 = scmp.ne.s32.totalorder %s50_s22, %s27937_s30  ;;  %p27943_p5 = scmp.lt.s32.totalorder %s27937_s30, %s27937_s30 }
  0x13   :  { %p27944_p6 = por %p27943_p5, %p27942_p4 }
  0x15   :  { %p27945_p7 = pnand %p27944_p6, %p27938_p3 }
  0x17   :  { %27948 = shalt.err (!%p27945_p7)
}
  0x18   :  { %52 = dma.hbm_to_vmem [thread:$0]  %s30828_s2, 128, %s50_s22, [#allocation5]  }
  0x19   :  { %s28274_s18 = smov [#allocation7]   ;;  %s28275_s20 = smov [#allocation10]  }
  0x1a   :  { %s70_s19 = sshll.u32 %s28274_s18, 4  ;;  %s93_s21 = sshll.u32 %s28275_s20, 4  ;;  %s71_s19 = int_to_ptr.vmem [resolvable:$true] %s70_s19  ;;  %s94_s21 = int_to_ptr.vmem [resolvable:$true] %s93_s21 }
  0x1b   :  { %s27949_s25 = scalar_lea.hbm %s30830_s4, 8192 }
  0x1c   :  { %p27950_p8 = scmp.ne.s32.totalorder %s30830_s4, %s27949_s25  ;;  %p27953_p9 = scmp.lt.u32.totalorder %s27949_s25, %s30830_s4 }
  0x1e   :  { %p27955_p10 = pnand %p27953_p9, %p27950_p8 }
  0x20   :  { %27958 = shalt.err (!%p27955_p10)
}
  0x21   :  { %s27959_s2 = scalar_lea.vmem %s71_s19, 8192  ;;  %p27964_p12 = scmp.lt.s32.totalorder %s71_s19, %s71_s19 }
  0x22   :  { %p27960_p11 = scmp.ne.s32.totalorder %s71_s19, %s27959_s2  ;;  %p27965_p13 = scmp.lt.s32.totalorder %s27959_s2, %s27959_s2 }
  0x24   :  { %p27966_p0 = por %p27965_p13, %p27964_p12 }
  0x26   :  { %p27967_p1 = pnand %p27966_p0, %p27960_p11 }
  0x28   :  { %27970 = shalt.err (!%p27967_p1)
}
  0x29   :  { %s28276_s22 = smov 128   ;;  %s28277_s30 = smov 8  }
  0x2a   :  { %76 = dma.hbm_to_vmem [thread:$0]  %s30830_s4, 8192, %s71_s19, [#allocation8], %s28276_s22, %s28276_s22, %s28277_s30  }
  0x2b   :  { %s27971_s23 = scalar_lea.hbm %s30832_s6, 16 }
  0x2c   :  { %p27972_p2 = scmp.ne.s32.totalorder %s30832_s6, %s27971_s23  ;;  %p27975_p3 = scmp.lt.u32.totalorder %s27971_s23, %s30832_s6 }
  0x2e   :  { %p27977_p4 = pnand %p27975_p3, %p27972_p2 }
  0x30   :  { %27980 = shalt.err (!%p27977_p4)
}
  0x31   :  { %s27981_s28 = scalar_lea.vmem %s94_s21, 16  ;;  %s27985_s29 = scalar_lea.vmem %s94_s21, 32 }
  0x32   :  { %p27982_p5 = scmp.ne.s32.totalorder %s94_s21, %s27981_s28  ;;  %p27986_p6 = scmp.lt.s32.totalorder %s94_s21, %s94_s21 }
  0x33   :  { %p27987_p7 = scmp.lt.s32.totalorder %s27985_s29, %s27981_s28 }
  0x35   :  { %p27988_p8 = por %p27987_p7, %p27986_p6 }
  0x37   :  { %p27989_p9 = pnand %p27988_p8, %p27982_p5 }
  0x39   :  { %27992 = shalt.err (!%p27989_p9)
}
  0x3a   :  { %96 = dma.hbm_to_vmem [thread:$0]  %s30832_s6, 16, %s94_s21, [#allocation11]  }
  0x3b   :  { %s28278_s2 = smov [#allocation13]   ;;  %s28279_s17 = smov [#allocation16]  }
  0x3c   :  { %s112_s0 = sshll.u32 %s28278_s2, 4  ;;  %s137_s18 = sshll.u32 %s28279_s17, 4  ;;  %s113_s0 = int_to_ptr.vmem [resolvable:$true] %s112_s0  ;;  %s138_s18 = int_to_ptr.vmem [resolvable:$true] %s137_s18 }
  0x3d   :  { %s27993_s24 = scalar_lea.hbm %s30834_s8, 32768 }
  0x3e   :  { %p27994_p10 = scmp.ne.s32.totalorder %s30834_s8, %s27993_s24  ;;  %p27997_p11 = scmp.lt.u32.totalorder %s27993_s24, %s30834_s8 }
  0x40   :  { %p27999_p12 = pnand %p27997_p11, %p27994_p10 }
  0x42   :  { %28002 = shalt.err (!%p27999_p12)
}
  0x43   :  { %s28003_s6 = scalar_lea.vmem %s113_s0, 32768  ;;  %p28008_p0 = scmp.lt.s32.totalorder %s113_s0, %s113_s0 }
  0x44   :  { %p28004_p13 = scmp.ne.s32.totalorder %s113_s0, %s28003_s6  ;;  %p28009_p1 = scmp.lt.s32.totalorder %s28003_s6, %s28003_s6 }
  0x46   :  { %p28010_p2 = por %p28009_p1, %p28008_p0 }
  0x48   :  { %p28011_p3 = pnand %p28010_p2, %p28004_p13 }
  0x4a   :  { %28014 = shalt.err (!%p28011_p3)
}
  0x4b   :  { %118 = dma.hbm_to_vmem [thread:$0]  %s30834_s8, 32768, %s113_s0, [#allocation14], %s28276_s22, %s28276_s22, %s28277_s30  }
  0x4c   :  { %s28015_s2 = scalar_lea.hbm %s30836_s10, 16 }
  0x4d   :  { %p28016_p4 = scmp.ne.s32.totalorder %s30836_s10, %s28015_s2  ;;  %p28019_p5 = scmp.lt.u32.totalorder %s28015_s2, %s30836_s10 }
  0x4f   :  { %p28021_p6 = pnand %p28019_p5, %p28016_p4 }
  0x51   :  { %28024 = shalt.err (!%p28021_p6)
}
  0x52   :  { %s28025_s25 = scalar_lea.vmem %s138_s18, 16  ;;  %s28029_s26 = scalar_lea.vmem %s138_s18, 32 }
  0x53   :  { %p28026_p7 = scmp.ne.s32.totalorder %s138_s18, %s28025_s25  ;;  %p28030_p8 = scmp.lt.s32.totalorder %s138_s18, %s138_s18 }
  0x54   :  { %p28031_p9 = scmp.lt.s32.totalorder %s28029_s26, %s28025_s25 }
  0x56   :  { %p28032_p10 = por %p28031_p9, %p28030_p8 }
  0x58   :  { %p28033_p11 = pnand %p28032_p10, %p28026_p7 }
  0x5a   :  { %28036 = shalt.err (!%p28033_p11)
}
  0x5b   :  { %140 = dma.hbm_to_vmem [thread:$0]  %s30836_s10, 16, %s138_s18, [#allocation17]  }
  0x5c   :  { %s28280_s27 = smov [#allocation19]   ;;  %s28281_s6 = smov [#allocation22]  }
  0x5d   :  { %s157_s28 = sshll.u32 %s28280_s27, 4  ;;  %s178_s21 = sshll.u32 %s28281_s6, 4  ;;  %s158_s28 = int_to_ptr.vmem [resolvable:$true] %s157_s28  ;;  %s179_s21 = int_to_ptr.vmem [resolvable:$true] %s178_s21 }
  0x5e   :  { %s28037_s19 = scalar_lea.hbm %s30838_s12, 16 }
  0x5f   :  { %p28038_p12 = scmp.ne.s32.totalorder %s30838_s12, %s28037_s19  ;;  %p28041_p13 = scmp.lt.u32.totalorder %s28037_s19, %s30838_s12 }
  0x61   :  { %p28043_p0 = pnand %p28041_p13, %p28038_p12 }
  0x63   :  { %28046 = shalt.err (!%p28043_p0)
}
  0x64   :  { %s28047_s10 = scalar_lea.vmem %s158_s28, 16  ;;  %s28051_s18 = scalar_lea.vmem %s158_s28, 32 }
  0x65   :  { %p28048_p1 = scmp.ne.s32.totalorder %s158_s28, %s28047_s10  ;;  %p28052_p2 = scmp.lt.s32.totalorder %s158_s28, %s158_s28 }
  0x66   :  { %p28053_p3 = scmp.lt.s32.totalorder %s28051_s18, %s28047_s10 }
  0x68   :  { %p28054_p4 = por %p28053_p3, %p28052_p2 }
  0x6a   :  { %p28055_p5 = pnand %p28054_p4, %p28048_p1 }
  0x6c   :  { %28058 = shalt.err (!%p28055_p5)
}
  0x6d   :  { %160 = dma.hbm_to_vmem [thread:$0]  %s30838_s12, 16, %s158_s28, [#allocation20]  }
  0x6e   :  { %s28059_s0 = scalar_lea.hbm %s30840_s14, 2048 }
  0x6f   :  { %p28060_p6 = scmp.ne.s32.totalorder %s30840_s14, %s28059_s0  ;;  %p28063_p7 = scmp.lt.u32.totalorder %s28059_s0, %s30840_s14 }
  0x71   :  { %p28065_p8 = pnand %p28063_p7, %p28060_p6 }
  0x73   :  { %28068 = shalt.err (!%p28065_p8)
}
  0x74   :  { %s28069_s19 = scalar_lea.vmem %s179_s21, 2048  ;;  %p28074_p10 = scmp.lt.s32.totalorder %s179_s21, %s179_s21 }
  0x75   :  { %p28070_p9 = scmp.ne.s32.totalorder %s179_s21, %s28069_s19  ;;  %p28075_p11 = scmp.lt.s32.totalorder %s28069_s19, %s28069_s19 }
  0x77   :  { %p28076_p12 = por %p28075_p11, %p28074_p10 }
  0x79   :  { %p28077_p13 = pnand %p28076_p12, %p28070_p9 }
  0x7b   :  { %28080 = shalt.err (!%p28077_p13)
}
  0x7c   :  { %184 = dma.hbm_to_vmem [thread:$0]  %s30840_s14, 2048, %s179_s21, [#allocation23], %s28276_s22, %s28276_s22, %s28277_s30  }
  0x7d   :  { %s28282_s2 = smov [#allocation2]   ;;  %s28283_s20 = smov [#allocation6]  }
  0x7e   :  { %s36_s17 = sshll.u32 %s28282_s2, 4  ;;  %s58_s23 = sshll.u32 %s28283_s20, 4  ;;  %s37_s17 = int_to_ptr.vmem [resolvable:$true] %s36_s17  ;;  %s59_s23 = int_to_ptr.vmem [resolvable:$true] %s58_s23 }
  0x7f   :  { %s28081_s24 = scalar_lea.hbm %s30827_s1, 2048 }
  0x80   :  { %p28082_p0 = scmp.ne.s32.totalorder %s30827_s1, %s28081_s24  ;;  %p28085_p1 = scmp.lt.u32.totalorder %s28081_s24, %s30827_s1 }
  0x82   :  { %p28087_p2 = pnand %p28085_p1, %p28082_p0 }
  0x84   :  { %28090 = shalt.err (!%p28087_p2)
}
  0x85   :  { %s28091_s14 = scalar_lea.vmem %s37_s17, 2048  ;;  %p28096_p4 = scmp.lt.s32.totalorder %s37_s17, %s37_s17 }
  0x86   :  { %p28092_p3 = scmp.ne.s32.totalorder %s37_s17, %s28091_s14  ;;  %p28097_p5 = scmp.lt.s32.totalorder %s28091_s14, %s28091_s14 }
  0x88   :  { %p28098_p6 = por %p28097_p5, %p28096_p4 }
  0x8a   :  { %p28099_p7 = pnand %p28098_p6, %p28092_p3 }
  0x8c   :  { %28102 = shalt.err (!%p28099_p7)
}
  0x8d   :  { %42 = dma.hbm_to_vmem [thread:$0]  %s30827_s1, 2048, %s37_s17, [#allocation3], %s28276_s22, %s28276_s22, %s28277_s30  }
  0x8e   :  { %s28103_s4 = scalar_lea.hbm %s30829_s3, 8192 }
  0x8f   :  { %p28104_p8 = scmp.ne.s32.totalorder %s30829_s3, %s28103_s4  ;;  %p28107_p9 = scmp.lt.u32.totalorder %s28103_s4, %s30829_s3 }
  0x91   :  { %p28109_p10 = pnand %p28107_p9, %p28104_p8 }
  0x93   :  { %28112 = shalt.err (!%p28109_p10)
}
  0x94   :  { %s28113_s20 = scalar_lea.vmem %s59_s23, 8192  ;;  %p28118_p12 = scmp.lt.s32.totalorder %s59_s23, %s59_s23 }
  0x95   :  { %p28114_p11 = scmp.ne.s32.totalorder %s59_s23, %s28113_s20  ;;  %p28119_p13 = scmp.lt.s32.totalorder %s28113_s20, %s28113_s20 }
  0x97   :  { %p28120_p0 = por %p28119_p13, %p28118_p12 }
  0x99   :  { %p28121_p1 = pnand %p28120_p0, %p28114_p11 }
  0x9b   :  { %28124 = shalt.err (!%p28121_p1)
}
  0x9c   :  { %64 = dma.hbm_to_vmem [thread:$0]  %s30829_s3, 8192, %s59_s23, [#allocation5], %s28276_s22, %s28276_s22, %s28277_s30  }
  0x9d   :  { %s28284_s10 = smov [#allocation9]   ;;  %s28285_s24 = smov [#allocation12]  }
  0x9e   :  { %s83_s18 = sshll.u32 %s28284_s10, 4  ;;  %s103_s25 = sshll.u32 %s28285_s24, 4  ;;  %s84_s18 = int_to_ptr.vmem [resolvable:$true] %s83_s18  ;;  %s104_s25 = int_to_ptr.vmem [resolvable:$true] %s103_s25 }
  0x9f   :  { %s28125_s0 = scalar_lea.hbm %s30831_s5, 16 }
  0xa0   :  { %p28126_p2 = scmp.ne.s32.totalorder %s30831_s5, %s28125_s0  ;;  %p28129_p3 = scmp.lt.u32.totalorder %s28125_s0, %s30831_s5 }
  0xa2   :  { %p28131_p4 = pnand %p28129_p3, %p28126_p2 }
  0xa4   :  { %28134 = shalt.err (!%p28131_p4)
}
  0xa5   :  { %s28135_s3 = scalar_lea.vmem %s84_s18, 16  ;;  %s28139_s23 = scalar_lea.vmem %s84_s18, 32 }
  0xa6   :  { %p28136_p5 = scmp.ne.s32.totalorder %s84_s18, %s28135_s3  ;;  %p28140_p6 = scmp.lt.s32.totalorder %s84_s18, %s84_s18 }
  0xa7   :  { %p28141_p7 = scmp.lt.s32.totalorder %s28139_s23, %s28135_s3 }
  0xa9   :  { %p28142_p8 = por %p28141_p7, %p28140_p6 }
  0xab   :  { %p28143_p9 = pnand %p28142_p8, %p28136_p5 }
  0xad   :  { %28146 = shalt.err (!%p28143_p9)
}
  0xae   :  { %86 = dma.hbm_to_vmem [thread:$0]  %s30831_s5, 16, %s84_s18, [#allocation8]  }
  0xaf   :  { %s28147_s28 = scalar_lea.hbm %s30833_s7, 16 }
  0xb0   :  { %p28148_p10 = scmp.ne.s32.totalorder %s30833_s7, %s28147_s28  ;;  %p28151_p11 = scmp.lt.u32.totalorder %s28147_s28, %s30833_s7 }
  0xb2   :  { %p28153_p12 = pnand %p28151_p11, %p28148_p10 }
  0xb4   :  { %28156 = shalt.err (!%p28153_p12)
}
  0xb5   :  { %s28157_s10 = scalar_lea.vmem %s104_s25, 16  ;;  %s28161_s24 = scalar_lea.vmem %s104_s25, 32 }
  0xb6   :  { %p28158_p13 = scmp.ne.s32.totalorder %s104_s25, %s28157_s10  ;;  %p28162_p0 = scmp.lt.s32.totalorder %s104_s25, %s104_s25 }
  0xb7   :  { %p28163_p1 = scmp.lt.s32.totalorder %s28161_s24, %s28157_s10 }
  0xb9   :  { %p28164_p2 = por %p28163_p1, %p28162_p0 }
  0xbb   :  { %p28165_p3 = pnand %p28164_p2, %p28158_p13 }
  0xbd   :  { %28168 = shalt.err (!%p28165_p3)
}
  0xbe   :  { %106 = dma.hbm_to_vmem [thread:$0]  %s30833_s7, 16, %s104_s25, [#allocation11]  }
  0xbf   :  { %s28286_s26 = smov [#allocation15]   ;;  %s28287_s0 = smov [#allocation18]  }
  0xc0   :  { %s124_s8 = sshll.u32 %s28286_s26, 4  ;;  %s147_s14 = sshll.u32 %s28287_s0, 4  ;;  %s125_s8 = int_to_ptr.vmem [resolvable:$true] %s124_s8  ;;  %s148_s14 = int_to_ptr.vmem [resolvable:$true] %s147_s14 }
  0xc1   :  { %s28169_s6 = scalar_lea.hbm %s30835_s9, 4096 }
  0xc2   :  { %p28170_p4 = scmp.ne.s32.totalorder %s30835_s9, %s28169_s6  ;;  %p28173_p5 = scmp.lt.u32.totalorder %s28169_s6, %s30835_s9 }
  0xc4   :  { %p28175_p6 = pnand %p28173_p5, %p28170_p4 }
  0xc6   :  { %28178 = shalt.err (!%p28175_p6)
}
  0xc7   :  { %s28179_s7 = scalar_lea.vmem %s125_s8, 4096  ;;  %p28184_p8 = scmp.lt.s32.totalorder %s125_s8, %s125_s8 }
  0xc8   :  { %p28180_p7 = scmp.ne.s32.totalorder %s125_s8, %s28179_s7  ;;  %p28185_p9 = scmp.lt.s32.totalorder %s28179_s7, %s28179_s7 }
  0xca   :  { %p28186_p10 = por %p28185_p9, %p28184_p8 }
  0xcc   :  { %p28187_p11 = pnand %p28186_p10, %p28180_p7 }
  0xce   :  { %28190 = shalt.err (!%p28187_p11)
}
  0xcf   :  { %130 = dma.hbm_to_vmem [thread:$0]  %s30835_s9, 4096, %s125_s8, [#allocation14], %s28276_s22, %s28276_s22, %s28277_s30  }
  0xd0   :  { %s28191_s2 = scalar_lea.hbm %s30837_s11, 16 }
  0xd1   :  { %p28192_p12 = scmp.ne.s32.totalorder %s30837_s11, %s28191_s2  ;;  %p28195_p13 = scmp.lt.u32.totalorder %s28191_s2, %s30837_s11 }
  0xd3   :  { %p28197_p0 = pnand %p28195_p13, %p28192_p12 }
  0xd5   :  { %28200 = shalt.err (!%p28197_p0)
}
  0xd6   :  { %s28201_s24 = scalar_lea.vmem %s148_s14, 16  ;;  %s28205_s5 = scalar_lea.vmem %s148_s14, 32 }
  0xd7   :  { %p28202_p1 = scmp.ne.s32.totalorder %s148_s14, %s28201_s24  ;;  %p28206_p2 = scmp.lt.s32.totalorder %s148_s14, %s148_s14 }
  0xd8   :  { %p28207_p3 = scmp.lt.s32.totalorder %s28205_s5, %s28201_s24 }
  0xda   :  { %p28208_p4 = por %p28207_p3, %p28206_p2 }
  0xdc   :  { %p28209_p5 = pnand %p28208_p4, %p28202_p1 }
  0xde   :  { %28212 = shalt.err (!%p28209_p5)
}
  0xdf   :  { %150 = dma.hbm_to_vmem [thread:$0]  %s30837_s11, 16, %s148_s14, [#allocation17]  }
  0xe0   :  { %s28288_s26 = smov [#allocation21]   ;;  %s28289_s0 = smov [#allocation24]  }
  0xe1   :  { %s166_s8 = sshll.u32 %s28288_s26, 4  ;;  %s191_s21 = sshll.u32 %s28289_s0, 4  ;;  %s167_s8 = int_to_ptr.vmem [resolvable:$true] %s166_s8  ;;  %s192_s21 = int_to_ptr.vmem [resolvable:$true] %s191_s21 }
  0xe2   :  { %s28213_s3 = scalar_lea.hbm %s30839_s13, 131072 }
  0xe3   :  { %p28214_p6 = scmp.ne.s32.totalorder %s30839_s13, %s28213_s3  ;;  %p28217_p7 = scmp.lt.u32.totalorder %s28213_s3, %s30839_s13 }
  0xe5   :  { %p28219_p8 = pnand %p28217_p7, %p28214_p6 }
  0xe7   :  { %28222 = shalt.err (!%p28219_p8)
}
  0xe8   :  { %s28223_s11 = scalar_lea.vmem %s167_s8, 131072  ;;  %p28228_p10 = scmp.lt.s32.totalorder %s167_s8, %s167_s8 }
  0xe9   :  { %p28224_p9 = scmp.ne.s32.totalorder %s167_s8, %s28223_s11  ;;  %p28229_p11 = scmp.lt.s32.totalorder %s28223_s11, %s28223_s11 }
  0xeb   :  { %p28230_p12 = por %p28229_p11, %p28228_p10 }
  0xed   :  { %p28231_p13 = pnand %p28230_p12, %p28224_p9 }
  0xef   :  { %28234 = shalt.err (!%p28231_p13)
}
  0xf0   :  { %172 = dma.hbm_to_vmem [thread:$0]  %s30839_s13, 131072, %s167_s8, [#allocation20], %s28276_s22, %s28276_s22, %s28277_s30  }
  0xf1   :  { %s28235_s28 = scalar_lea.hbm %s30841_s15, 16 }
  0xf2   :  { %p28236_p0 = scmp.ne.s32.totalorder %s30841_s15, %s28235_s28  ;;  %p28239_p1 = scmp.lt.u32.totalorder %s28235_s28, %s30841_s15 }
  0xf4   :  { %p28241_p2 = pnand %p28239_p1, %p28236_p0 }
  0xf6   :  { %28244 = shalt.err (!%p28241_p2)
}
  0xf7   :  { %s28245_s10 = scalar_lea.vmem %s192_s21, 16  ;;  %s28249_s24 = scalar_lea.vmem %s192_s21, 32 }
  0xf8   :  { %p28246_p3 = scmp.ne.s32.totalorder %s192_s21, %s28245_s10  ;;  %p28250_p4 = scmp.lt.s32.totalorder %s192_s21, %s192_s21 }
  0xf9   :  { %p28251_p5 = scmp.lt.s32.totalorder %s28249_s24, %s28245_s10 }
  0xfb   :  { %p28252_p6 = por %p28251_p5, %p28250_p4 }
  0xfd   :  { %p28253_p7 = pnand %p28252_p6, %p28246_p3 }
  0xff   :  { %28256 = shalt.err (!%p28253_p7)
}
 0x100   :  { %194 = dma.hbm_to_vmem [thread:$0]  %s30841_s15, 16, %s192_s21, [#allocation23]  }
 0x101   :  { %28257 = dma.done.wait [#allocation3], 2048  }
 0x102   :  { %28258 = vsyncadd [#allocation3], 4294965248 }
 0x103   :  { %28259 = dma.done.wait [#allocation5], 8320  }
 0x104   :  { %28260 = vsyncadd [#allocation5], 4294958976 }
 0x105   :  { %28261 = dma.done.wait [#allocation8], 8208  }
 0x106   :  { %28262 = vsyncadd [#allocation8], 4294959088 }
 0x107   :  { %28263 = dma.done.wait [#allocation11], 32  }
 0x108   :  { %28264 = vsyncadd [#allocation11], 4294967264 }
 0x109   :  { %28265 = dma.done.wait [#allocation14], 36864  }
 0x10a   :  { %28266 = vsyncadd [#allocation14], 4294930432 }
 0x10b   :  { %28267 = dma.done.wait [#allocation17], 32  }
 0x10c   :  { %28268 = vsyncadd [#allocation17], 4294967264 }
 0x10d   :  { %28269 = dma.done.wait [#allocation20], 131088  }
 0x10e   :  { %28270 = vsyncadd [#allocation20], 4294836208 }
 0x10f   :  { %28271 = dma.done.wait [#allocation23], 2064  }
 0x110   :  { %28272 = vsyncadd [#allocation23], 4294965232  ;;  %v28290_v0 = vmov 0.0|0.0   ;;  %vm28291_vm0 = vmmov 0   ;;  %v28292_v1 = vmov 0.0   ;;  %v242_v2 = vld [vmem:[#allocation2] sm:$0xff] }
 0x111   :  { %25591 = vmatprep.subr.bf16.mxu0 %v28290_v0  ;;  %22148 = vmatprep.mubr.msk.f32.mxu0 %vm28291_vm0, %v28292_v1  ;;  %v243_v3 = vld [vmem:[#allocation2 + $0x8] sm:$0xff]  ;;  %v244_v4 = vld [vmem:[#allocation2 + $0x10] sm:$0xff]  ;;  %v245_v6 = vld [vmem:[#allocation2 + $0x18] sm:$0xff]  ;;  %s30844_s5 = sld [smem:[#allocation94_spill]]  ;;  %vm341_vm1 = vcmask 261120   ;;  %vm419_vm2 = vcmask 64512  }
 0x112   :  { %25615 = vmatprep.subr.bf16.mxu1 %v28290_v0  ;;  %22159 = vmatprep.mubr.msk.f32.mxu1 %vm28291_vm0, %v28292_v1  ;;  %v25592_v5 = vpack.c.bf16 %v243_v3, %v242_v2  ;;  %v25595_v7 = vpack.c.bf16 %v245_v6, %v244_v4  ;;  %v246_v8 = vld [vmem:[#allocation2 + $0x20] sm:$0xff]  ;;  %v247_v9 = vld [vmem:[#allocation2 + $0x28] sm:$0xff]  ;;  %v338_v11 = vld [vmem:[#allocation7 + $0x8] sm:$0xff]  ;;  %vm3236_vm3 = vcmask 130048   ;;  %vm19231_vm4 = vcmask 23552  }
 0x113   :  { %v337_v10 = vld [vmem:[#allocation7] sm:$0xff]  ;;  %v25598_v12 = vpack.c.bf16 %v247_v9, %v246_v8  ;;  %v248_v14 = vld [vmem:[#allocation2 + $0x30] sm:$0xff]  ;;  %v249_v15 = vld [vmem:[#allocation2 + $0x38] sm:$0xff] }
 0x114   :  { %25593 = vmatpush3.bf16.msra.mxu0 %v25592_v5  ;;  %v25616_v13 = vpack.c.bf16 %v338_v11, %v337_v10  ;;  %v25601_v16 = vpack.c.bf16 %v249_v15, %v248_v14  ;;  %v250_v17 = vld [vmem:[#allocation2 + $0x40] sm:$0xff]  ;;  %v251_v18 = vld [vmem:[#allocation2 + $0x48] sm:$0xff]  ;;  %v252_v20 = vld [vmem:[#allocation2 + $0x50] sm:$0xff] }
 0x115   :  { %25594 = vmatprep.subr.bf16.mxu0 %v28290_v0  ;;  %v25604_v19 = vpack.c.bf16 %v251_v18, %v250_v17  ;;  %v253_v21 = vld [vmem:[#allocation2 + $0x58] sm:$0xff]  ;;  %v254_v23 = vld [vmem:[#allocation2 + $0x60] sm:$0xff]  ;;  %v255_v24 = vld [vmem:[#allocation2 + $0x68] sm:$0xff] }
 0x116   :  { %25617 = vmatpush3.bf16.msra.mxu1 %v25616_v13  ;;  %v25607_v22 = vpack.c.bf16 %v253_v21, %v252_v20  ;;  %v25610_v25 = vpack.c.bf16 %v255_v24, %v254_v23  ;;  %v256_v26 = vld [vmem:[#allocation2 + $0x70] sm:$0xff]  ;;  %v257_v27 = vld [vmem:[#allocation2 + $0x78] sm:$0xff]  ;;  %v884_v29 = vld [vmem:[#allocation7 + $0x60] sm:$0xff] }
 0x117   :  { %25618 = vmatprep.subr.bf16.mxu1 %v28290_v0  ;;  %v25613_v28 = vpack.c.bf16 %v257_v27, %v256_v26  ;;  %v885_v30 = vld [vmem:[#allocation7 + $0x68] sm:$0xff]  ;;  %v241_v31 = vld [vmem:[%s30844_s5] sm:$0xff]  ;;  %v886_v33 = vld [vmem:[#allocation7 + $0x70] sm:$0xff] }
 0x118   :  { %25596 = vmatpush3.bf16.msra.mxu0 %v25595_v7  ;;  %v25634_v32 = vpack.c.bf16 %v885_v30, %v884_v29  ;;  %v887_v34 = vld [vmem:[#allocation7 + $0x78] sm:$0xff]  ;;  %v339_v36 = vld [vmem:[#allocation7 + $0x10] sm:$0xff]  ;;  %v1065_v39 = vld [vmem:[#allocation7 + $0x80] sm:$0xff] }
 0x119   :  { %25597 = vmatprep.subr.bf16.mxu0 %v28290_v0  ;;  %v25637_v35 = vpack.c.bf16 %v887_v34, %v886_v33  ;;  %v340_v37 = vld [vmem:[#allocation7 + $0x18] sm:$0xff]  ;;  %v1066_v40 = vld [vmem:[#allocation7 + $0x88] sm:$0xff]  ;;  %v1067_v46 = vld [vmem:[#allocation7 + $0x90] sm:$0xff] }
 0x11a   :  { %v25619_v38 = vpack.c.bf16 %v340_v37, %v339_v36  ;;  %v240_v41 = vld [vmem:[#allocation4] sm:$0xff]  ;;  %v25640_v43 = vpack.c.bf16 %v1066_v40, %v1065_v39  ;;  %v1246_v49 = vld [vmem:[#allocation7 + $0xa0] sm:$0xff]  ;;  %v1247_v50 = vld [vmem:[#allocation7 + $0xa8] sm:$0xff] }
 0x11b   :  { %v1068_v47 = vld [vmem:[#allocation7 + $0x98] sm:$0xff]  ;;  %v25646_v51 = vpack.c.bf16 %v1247_v50, %v1246_v49  ;;  %v1248_v52 = vld [vmem:[#allocation7 + $0xb0] sm:$0xff]  ;;  %v1427_v55 = vld [vmem:[#allocation7 + $0xc0] sm:$0xff] }
 0x11c   :  { %25599 = vmatpush3.bf16.msra.mxu0 %v25598_v12  ;;  %25620 = vmatpush3.bf16.msra.mxu1 %v25619_v38  ;;  %v25643_v48 = vpack.c.bf16 %v1068_v47, %v1067_v46  ;;  %v1249_v53 = vld [vmem:[#allocation7 + $0xb8] sm:$0xff]  ;;  %v1428_v56 = vld [vmem:[#allocation7 + $0xc8] sm:$0xff]  ;;  %v1429_v58 = vld [vmem:[#allocation7 + $0xd0] sm:$0xff] }
 0x11d   :  { %25600 = vmatprep.subr.bf16.mxu0 %v28290_v0  ;;  %v25649_v54 = vpack.c.bf16 %v1249_v53, %v1248_v52  ;;  %v25652_v57 = vpack.c.bf16 %v1428_v56, %v1427_v55  ;;  %v1430_v59 = vld [vmem:[#allocation7 + $0xd8] sm:$0xff]  ;;  %v1608_v61 = vld [vmem:[#allocation7 + $0xe0] sm:$0xff]  ;;  %v1609_v62 = vld [vmem:[#allocation7 + $0xe8] sm:$0xff] }
 0x11e   :  { %v25655_v60 = vpack.c.bf16 %v1430_v59, %v1429_v58  ;;  %v25658_v63 = vpack.c.bf16 %v1609_v62, %v1608_v61  ;;  %v1610_v2 = vld [vmem:[#allocation7 + $0xf0] sm:$0xff]  ;;  %v1611_v3 = vld [vmem:[#allocation7 + $0xf8] sm:$0xff]  ;;  %v1789_v5 = vld [vmem:[#allocation7 + $0x100] sm:$0xff] }
 0x11f   :  { %v25661_v4 = vpack.c.bf16 %v1611_v3, %v1610_v2  ;;  %v1790_v6 = vld [vmem:[#allocation7 + $0x108] sm:$0xff]  ;;  %v1791_v8 = vld [vmem:[#allocation7 + $0x110] sm:$0xff]  ;;  %v1792_v9 = vld [vmem:[#allocation7 + $0x118] sm:$0xff] }
 0x120   :  { %25602 = vmatpush3.bf16.msra.mxu0 %v25601_v16  ;;  %v25664_v7 = vpack.c.bf16 %v1790_v6, %v1789_v5  ;;  %v25667_v10 = vpack.c.bf16 %v1792_v9, %v1791_v8  ;;  %v1970_v11 = vld [vmem:[#allocation7 + $0x120] sm:$0xff]  ;;  %v1971_v12 = vld [vmem:[#allocation7 + $0x128] sm:$0xff]  ;;  %v1972_v14 = vld [vmem:[#allocation7 + $0x130] sm:$0xff] }
 0x121   :  { %25603 = vmatprep.subr.bf16.mxu0 %v28290_v0  ;;  %v25670_v13 = vpack.c.bf16 %v1971_v12, %v1970_v11  ;;  %v1973_v15 = vld [vmem:[#allocation7 + $0x138] sm:$0xff]  ;;  %v2151_v17 = vld [vmem:[#allocation7 + $0x140] sm:$0xff]  ;;  %v2152_v18 = vld [vmem:[#allocation7 + $0x148] sm:$0xff] }
 0x122   :  { %v25673_v16 = vpack.c.bf16 %v1973_v15, %v1972_v14  ;;  %v2153_v20 = vld [vmem:[#allocation7 + $0x150] sm:$0xff]  ;;  %v2154_v21 = vld [vmem:[#allocation7 + $0x158] sm:$0xff]  ;;  %v2332_v23 = vld [vmem:[#allocation7 + $0x160] sm:$0xff] }
 0x123   :  { %v2333_v24 = vld [vmem:[#allocation7 + $0x168] sm:$0xff]  ;;  %v2334_v26 = vld [vmem:[#allocation7 + $0x170] sm:$0xff]  ;;  %v2335_v27 = vld [vmem:[#allocation7 + $0x178] sm:$0xff] }
 0x124   :  { %25605 = vmatpush3.bf16.msra.mxu0 %v25604_v19  ;;  %v25676_v19 = vpack.c.bf16 %v2152_v18, %v2151_v17  ;;  %v2513_v29 = vld [vmem:[#allocation7 + $0x180] sm:$0xff]  ;;  %v2514_v30 = vld [vmem:[#allocation7 + $0x188] sm:$0xff]  ;;  %v2516_v33 = vld [vmem:[#allocation7 + $0x198] sm:$0xff] }
 0x125   :  { %25606 = vmatprep.subr.bf16.mxu0 %v28290_v0  ;;  %v2695_v36 = vld [vmem:[#allocation7 + $0x1a8] sm:$0xff]  ;;  %v2696_v38 = vld [vmem:[#allocation7 + $0x1b0] sm:$0xff]  ;;  %v2697_v39 = vld [vmem:[#allocation7 + $0x1b8] sm:$0xff] }
 0x126   :  { %v25697_v40 = vpack.c.bf16 %v2697_v39, %v2696_v38  ;;  %v2878_v46 = vld [vmem:[#allocation7 + $0x1d8] sm:$0xff]  ;;  %v3057_v49 = vld [vmem:[#allocation7 + $0x1e8] sm:$0xff]  ;;  %v3058_v52 = vld [vmem:[#allocation7 + $0x1f0] sm:$0xff] }
 0x127   :  { %v3059_v53 = vld [vmem:[#allocation7 + $0x1f8] sm:$0xff]  ;;  %v522_v55 = vld [vmem:[#allocation7 + $0x20] sm:$0xff]  ;;  %v523_v56 = vld [vmem:[#allocation7 + $0x28] sm:$0xff] }
 0x128   :  { %25608 = vmatpush3.bf16.msra.mxu0 %v25607_v22  ;;  %v25679_v22 = vpack.c.bf16 %v2154_v21, %v2153_v20  ;;  %v416_v59 = vld [vmem:[#allocation6 + $0x8] sm:$0xff]  ;;  %v524_v2 = vld [vmem:[#allocation7 + $0x30] sm:$0xff]  ;;  %v525_v3 = vld [vmem:[#allocation7 + $0x38] sm:$0xff] }
 0x129   :  { %25609 = vmatprep.subr.bf16.mxu0 %v28290_v0  ;;  %v25625_v5 = vpack.c.bf16 %v525_v3, %v524_v2  ;;  %v705_v38 = vld [vmem:[#allocation7 + $0x50] sm:$0xff]  ;;  %v706_v39 = vld [vmem:[#allocation7 + $0x58] sm:$0xff] }
 0x12a   :  { %v1685_v2 = vld [vmem:[#allocation6 + $0xf0] sm:$0xff]  ;;  %v1686_v3 = vld [vmem:[#allocation6 + $0xf8] sm:$0xff] }
 0x12c   :  { %25611 = vmatpush3.bf16.msra.mxu0 %v25610_v25  ;;  %v25682_v25 = vpack.c.bf16 %v2333_v24, %v2332_v23 }
 0x12d   :  { %25612 = vmatprep.subr.bf16.mxu0 %v28290_v0 }
 0x130   :  { %25614 = vmatpush3.bf16.msra.mxu0 %v25613_v28  ;;  %v25685_v28 = vpack.c.bf16 %v2335_v27, %v2334_v26 }
 0x131   :  { %25633 = vmatprep.subr.bf16.mxu0 %v28290_v0 }
 0x133   :  { %22149 = vmatmul.mubr.f32.vlgmr.msra.gmra.mrb[0].mxu0 %v241_v31  ;;  %v25688_v31 = vpack.c.bf16 %v2514_v30, %v2513_v29  ;;  %v597_v29 = vld [vmem:[#allocation6 + $0x20] sm:$0xff] }
 0x134   :  { %25635 = vmatpush3.bf16.msra.mxu0 %v25634_v32  ;;  %22216 = vmatprep.mubr.msk.f32.mxu0 %vm28291_vm0, %v28292_v1  ;;  %v2515_v32 = vld [vmem:[#allocation7 + $0x190] sm:$0xff] }
 0x135   :  { %25636 = vmatprep.subr.bf16.mxu0 %v28290_v0  ;;  %v25691_v34 = vpack.c.bf16 %v2516_v33, %v2515_v32  ;;  %v704_v32 = vld [vmem:[#allocation7 + $0x48] sm:$0xff] }
 0x138   :  { %25638 = vmatpush3.bf16.msra.mxu0 %v25637_v35  ;;  %v2694_v35 = vld [vmem:[#allocation7 + $0x1a0] sm:$0xff] }
 0x139   :  { %25639 = vmatprep.subr.bf16.mxu0 %v28290_v0  ;;  %v25694_v37 = vpack.c.bf16 %v2695_v36, %v2694_v35 }
 0x206   :  { %v324_v42 = vpop.f32.mrb[0].mxu0 }
 0x207   :  { %v28601_v44 = vadd.f32 %v324_v42, %v240_v41  ;;  %v22150_v45 = vpop.f32.mrb[1].mxu0  ;;  %v2875_v41 = vld [vmem:[#allocation7 + $0x1c0] sm:$0xff]  ;;  %v2876_v42 = vld [vmem:[#allocation7 + $0x1c8] sm:$0xff] }
 0x208   :  { %v2877_v45 = vld [vmem:[#allocation7 + $0x1d0] sm:$0xff] }
 0x209   :  { %22160 = vmatmul.mubr.msk.f32.vlgmr.msra.gmra.mrb[0].mxu1 %vm341_vm1, %v28601_v44  ;;  %22217 = vmatmul.mubr.msk.f32.vlgmr.msra.gmra.mrb[2].mxu0 %vm341_vm1, %v28601_v44  ;;  %v25703_v47 = vpack.c.bf16 %v2878_v46, %v2877_v45  ;;  %v779_v45 = vld [vmem:[#allocation6 + $0x48] sm:$0xff] }
 0x20a   :  { %25641 = vmatpush3.bf16.msra.mxu0 %v25640_v43  ;;  %22235 = vmatprep.mubr.msk.f32.mxu0 %vm28291_vm0, %v28292_v1  ;;  %v25700_v43 = vpack.c.bf16 %v2876_v42, %v2875_v41  ;;  %v25631_v41 = vpack.c.bf16 %v706_v39, %v705_v38  ;;  %v778_v42 = vld [vmem:[#allocation6 + $0x40] sm:$0xff]  ;;  %v3315_v38 = vld [vmem:[#allocation15 + $0x8] sm:$0xff] }
 0x20b   :  { %25642 = vmatprep.subr.bf16.mxu0 %v28290_v0 }
 0x20e   :  { %25644 = vmatpush3.bf16.msra.mxu0 %v25643_v48  ;;  %v3056_v48 = vld [vmem:[#allocation7 + $0x1e0] sm:$0xff] }
 0x20f   :  { %25645 = vmatprep.subr.bf16.mxu0 %v28290_v0  ;;  %v25706_v50 = vpack.c.bf16 %v3057_v49, %v3056_v48  ;;  %v961_v48 = vld [vmem:[#allocation6 + $0x70] sm:$0xff]  ;;  %v962_v49 = vld [vmem:[#allocation6 + $0x78] sm:$0xff] }
 0x211   :  { %22236 = vmatmul.mubr.msk.f32.vlgmr.msra.gmra.mrb[4].mxu0 %vm341_vm1, %v28601_v44 }
 0x212   :  { %25647 = vmatpush3.bf16.msra.mxu0 %v25646_v51  ;;  %22254 = vmatprep.mubr.msk.f32.mxu0 %vm28291_vm0, %v28292_v1  ;;  %v415_v51 = vld [vmem:[#allocation6] sm:$0xff] }
 0x213   :  { %25648 = vmatprep.subr.bf16.mxu0 %v28290_v0  ;;  %22164 = vmatprep.mubr.msk.f32.mxu1 %vm419_vm2, %v415_v51  ;;  %v1141_v51 = vld [vmem:[#allocation6 + $0x88] sm:$0xff] }
 0x216   :  { %25650 = vmatpush3.bf16.msra.mxu0 %v25649_v54  ;;  %v25709_v54 = vpack.c.bf16 %v3059_v53, %v3058_v52  ;;  %v1142_v52 = vld [vmem:[#allocation6 + $0x90] sm:$0xff]  ;;  %v1143_v53 = vld [vmem:[#allocation6 + $0x98] sm:$0xff] }
 0x217   :  { %25651 = vmatprep.subr.bf16.mxu0 %v28290_v0 }
 0x219   :  { %22255 = vmatmul.mubr.msk.f32.vlgmr.msra.gmra.mrb[6].mxu0 %vm341_vm1, %v28601_v44 }
 0x21a   :  { %25653 = vmatpush3.bf16.msra.mxu0 %v25652_v57  ;;  %22273 = vmatprep.mubr.msk.f32.mxu0 %vm28291_vm0, %v28292_v1 }
 0x21b   :  { %25654 = vmatprep.subr.bf16.mxu0 %v28290_v0 }
 0x21e   :  { %25656 = vmatpush3.bf16.msra.mxu0 %v25655_v60  ;;  %v25622_v60 = vpack.c.bf16 %v523_v56, %v522_v55  ;;  %v1322_v55 = vld [vmem:[#allocation6 + $0xa8] sm:$0xff]  ;;  %v1323_v56 = vld [vmem:[#allocation6 + $0xb0] sm:$0xff] }
 0x21f   :  { %25657 = vmatprep.subr.bf16.mxu0 %v28290_v0 }
 0x221   :  { %22274 = vmatmul.mubr.msk.f32.vlgmr.msra.gmra.mrb[8].mxu0 %vm341_vm1, %v28601_v44 }
 0x222   :  { %25659 = vmatpush3.bf16.msra.mxu0 %v25658_v63  ;;  %22292 = vmatprep.mubr.msk.f32.mxu0 %vm28291_vm0, %v28292_v1  ;;  %v417_v63 = vld [vmem:[#allocation6 + $0x10] sm:$0xff] }
 0x223   :  { %25660 = vmatprep.subr.bf16.mxu0 %v28290_v0 }
 0x226   :  { %25662 = vmatpush3.bf16.msra.mxu0 %v25661_v4  ;;  %v418_v4 = vld [vmem:[#allocation6 + $0x18] sm:$0xff] }
 0x227   :  { %25663 = vmatprep.subr.bf16.mxu0 %v28290_v0 }
 0x229   :  { %22293 = vmatmul.mubr.msk.f32.vlgmr.msra.gmra.mrb[10].mxu0 %vm341_vm1, %v28601_v44 }
 0x22a   :  { %25665 = vmatpush3.bf16.msra.mxu0 %v25664_v7  ;;  %22311 = vmatprep.mubr.msk.f32.mxu0 %vm28291_vm0, %v28292_v1 }
 0x22b   :  { %25666 = vmatprep.subr.bf16.mxu0 %v28290_v0 }
 0x22e   :  { %25668 = vmatpush3.bf16.msra.mxu0 %v25667_v10 }
 0x22f   :  { %25669 = vmatprep.subr.bf16.mxu0 %v28290_v0 }
 0x231   :  { %22312 = vmatmul.mubr.msk.f32.vlgmr.msra.gmra.mrb[12].mxu0 %vm341_vm1, %v28601_v44 }
 0x232   :  { %25671 = vmatpush3.bf16.msra.mxu0 %v25670_v13  ;;  %22330 = vmatprep.mubr.msk.f32.mxu0 %vm28291_vm0, %v28292_v1 }
 0x233   :  { %25672 = vmatprep.subr.bf16.mxu0 %v28290_v0 }
 0x236   :  { %25674 = vmatpush3.bf16.msra.mxu0 %v25673_v16 }
 0x237   :  { %25675 = vmatprep.subr.bf16.mxu0 %v28290_v0 }
 0x239   :  { %22331 = vmatmul.mubr.msk.f32.vlgmr.msra.gmra.mrb[14].mxu0 %vm341_vm1, %v28601_v44 }
 0x23a   :  { %25677 = vmatpush3.bf16.msra.mxu0 %v25676_v19  ;;  %22349 = vmatprep.mubr.msk.f32.mxu0 %vm28291_vm0, %v28292_v1 }
 0x23b   :  { %25678 = vmatprep.subr.bf16.mxu0 %v28290_v0 }
 0x23e   :  { %25680 = vmatpush3.bf16.msra.mxu0 %v25679_v22 }
 0x23f   :  { %25681 = vmatprep.subr.bf16.mxu0 %v28290_v0 }
 0x241   :  { %22350 = vmatmul.mubr.msk.f32.vlgmr.msra.gmra.mrb[16].mxu0 %vm341_vm1, %v28601_v44 }
 0x242   :  { %25683 = vmatpush3.bf16.msra.mxu0 %v25682_v25  ;;  %22368 = vmatprep.mubr.msk.f32.mxu0 %vm28291_vm0, %v28292_v1 }
 0x243   :  { %25684 = vmatprep.subr.bf16.mxu0 %v28290_v0 }
 0x246   :  { %25686 = vmatpush3.bf16.msra.mxu0 %v25685_v28 }
 0x247   :  { %25687 = vmatprep.subr.bf16.mxu0 %v28290_v0 }
 0x249   :  { %22369 = vmatmul.mubr.msk.f32.vlgmr.msra.gmra.mrb[18].mxu0 %vm341_vm1, %v28601_v44 }
 0x24a   :  { %25689 = vmatpush3.bf16.msra.mxu0 %v25688_v31  ;;  %22387 = vmatprep.mubr.msk.f32.mxu0 %vm28291_vm0, %v28292_v1  ;;  %v703_v31 = vld [vmem:[#allocation7 + $0x40] sm:$0xff] }
 0x24b   :  { %25690 = vmatprep.subr.bf16.mxu0 %v28290_v0  ;;  %v25628_v35 = vpack.c.bf16 %v704_v32, %v703_v31  ;;  %v2951_v31 = vld [vmem:[#allocation6 + $0x1c8] sm:$0xff]  ;;  %v2952_v32 = vld [vmem:[#allocation6 + $0x1d0] sm:$0xff] }
 0x24e   :  { %25692 = vmatpush3.bf16.msra.mxu0 %v25691_v34  ;;  %v598_v34 = vld [vmem:[#allocation6 + $0x28] sm:$0xff] }
 0x24f   :  { %25693 = vmatprep.subr.bf16.mxu0 %v28290_v0 }
 0x251   :  { %22388 = vmatmul.mubr.msk.f32.vlgmr.msra.gmra.mrb[20].mxu0 %vm341_vm1, %v28601_v44 }
 0x252   :  { %25695 = vmatpush3.bf16.msra.mxu0 %v25694_v37  ;;  %22406 = vmatprep.mubr.msk.f32.mxu0 %vm28291_vm0, %v28292_v1  ;;  %v599_v37 = vld [vmem:[#allocation6 + $0x30] sm:$0xff] }
 0x253   :  { %25696 = vmatprep.subr.bf16.mxu0 %v28290_v0 }
 0x256   :  { %25698 = vmatpush3.bf16.msra.mxu0 %v25697_v40  ;;  %v600_v40 = vld [vmem:[#allocation6 + $0x38] sm:$0xff] }
 0x257   :  { %25699 = vmatprep.subr.bf16.mxu0 %v28290_v0 }
 0x259   :  { %22407 = vmatmul.mubr.msk.f32.vlgmr.msra.gmra.mrb[22].mxu0 %vm341_vm1, %v28601_v44 }
 0x25a   :  { %25701 = vmatpush3.bf16.msra.mxu0 %v25700_v43  ;;  %22425 = vmatprep.mubr.msk.f32.mxu0 %vm28291_vm0, %v28292_v1 }
 0x25b   :  { %25702 = vmatprep.subr.bf16.mxu0 %v28290_v0 }
 0x25e   :  { %25704 = vmatpush3.bf16.msra.mxu0 %v25703_v47  ;;  %v780_v47 = vld [vmem:[#allocation6 + $0x50] sm:$0xff] }
 0x25f   :  { %25705 = vmatprep.subr.bf16.mxu0 %v28290_v0 }
 0x261   :  { %22426 = vmatmul.mubr.msk.f32.vlgmr.msra.gmra.mrb[24].mxu0 %vm341_vm1, %v28601_v44 }
 0x262   :  { %25707 = vmatpush3.bf16.msra.mxu0 %v25706_v50  ;;  %22444 = vmatprep.mubr.msk.f32.mxu0 %vm28291_vm0, %v28292_v1  ;;  %v1140_v50 = vld [vmem:[#allocation6 + $0x80] sm:$0xff] }
 0x263   :  { %25708 = vmatprep.subr.bf16.mxu0 %v28290_v0 }
 0x266   :  { %25710 = vmatpush3.bf16.msra.mxu0 %v25709_v54  ;;  %v1321_v54 = vld [vmem:[#allocation6 + $0xa0] sm:$0xff] }
 0x269   :  { %22445 = vmatmul.mubr.msk.f32.vlgmr.msra.gmra.mrb[26].mxu0 %vm341_vm1, %v28601_v44 }
 0x2dc   :  { %v411_v57 = vpop.f32.mrb[0].mxu1  ;;  %v28679_v58 = vpop.f32.mrb[2].mxu0 }
 0x2dd   :  { %v22161_v61 = vpop.f32.mrb[1].mxu1  ;;  %22162 = vmatprep.subr.mxu1 %v411_v57  ;;  %v22218_v62 = vpop.f32.mrb[3].mxu0 }
 0x2de   :  { %22163 = vmatpush3.msra.mxu1 %v411_v57  ;;  %v1324_v57 = vld [vmem:[#allocation6 + $0xb8] sm:$0xff]  ;;  %v1683_v62 = vld [vmem:[#allocation6 + $0xe0] sm:$0xff] }
 0x2df   :  { %22165 = vmatmul.mubr.msk.f32.vlgmr.msra.gmra.mrb[2].mxu1 %vm419_vm2, %v416_v59  ;;  %25621 = vmatprep.subr.bf16.mxu1 %v28290_v0  ;;  %v1503_v59 = vld [vmem:[#allocation6 + $0xc8] sm:$0xff]  ;;  %v1505_v61 = vld [vmem:[#allocation6 + $0xd8] sm:$0xff] }
 0x2e0   :  { %25623 = vmatpush3.bf16.msra.mxu1 %v25622_v60  ;;  %22167 = vmatprep.mubr.msk.f32.mxu1 %vm419_vm2, %v417_v63  ;;  %v1504_v60 = vld [vmem:[#allocation6 + $0xd0] sm:$0xff]  ;;  %v1684_v63 = vld [vmem:[#allocation6 + $0xe8] sm:$0xff] }
 0x2e1   :  { %25624 = vmatprep.subr.bf16.mxu1 %v28290_v0 }
 0x2e3   :  { %22168 = vmatmul.mubr.msk.f32.gmra.mrb[4].mxu1 %vm419_vm2, %v418_v4  ;;  %v1864_v4 = vld [vmem:[#allocation6 + $0x100] sm:$0xff] }
 0x2e4   :  { %v28686_v6 = vpop.f32.mrb[4].mxu0  ;;  %25626 = vmatpush3.bf16.msra.mxu1 %v25625_v5  ;;  %22178 = vmatprep.mubr.msk.f32.mxu1 %vm28291_vm0, %v28292_v1  ;;  %v1865_v5 = vld [vmem:[#allocation6 + $0x108] sm:$0xff] }
 0x2e5   :  { %v22237_v7 = vpop.f32.mrb[5].mxu0 }
 0x2e6   :  { %v1867_v7 = vld [vmem:[#allocation6 + $0x118] sm:$0xff] }
 0x2e7   :  { %22179 = vmatmul.mubr.msk.f32.vlgmr.msra.gmra.mrb[6].mxu1 %vm341_vm1, %v28601_v44 }
 0x2e8   :  { %22183 = vmatprep.mubr.msk.f32.mxu1 %vm419_vm2, %v597_v29  ;;  %v2771_v29 = vld [vmem:[#allocation6 + $0x1b0] sm:$0xff] }
 0x2ec   :  { %v28692_v8 = vpop.f32.mrb[6].mxu0 }
 0x2ed   :  { %v22256_v9 = vpop.f32.mrb[7].mxu0 }
 0x2ee   :  { %v2046_v9 = vld [vmem:[#allocation6 + $0x128] sm:$0xff] }
 0x2f4   :  { %v28694_v10 = vpop.f32.mrb[8].mxu0 }
 0x2f5   :  { %v22275_v11 = vpop.f32.mrb[9].mxu0 }
 0x2f6   :  { %v2048_v11 = vld [vmem:[#allocation6 + $0x138] sm:$0xff] }
 0x2fc   :  { %v28696_v12 = vpop.f32.mrb[10].mxu0 }
 0x2fd   :  { %v22294_v13 = vpop.f32.mrb[11].mxu0 }
 0x2fe   :  { %v2227_v13 = vld [vmem:[#allocation6 + $0x148] sm:$0xff] }
 0x304   :  { %v28698_v14 = vpop.f32.mrb[12].mxu0 }
 0x305   :  { %v22313_v15 = vpop.f32.mrb[13].mxu0 }
 0x306   :  { %v2229_v15 = vld [vmem:[#allocation6 + $0x158] sm:$0xff] }
 0x30c   :  { %v28700_v16 = vpop.f32.mrb[14].mxu0 }
 0x30d   :  { %v22332_v17 = vpop.f32.mrb[15].mxu0 }
 0x30e   :  { %v2408_v17 = vld [vmem:[#allocation6 + $0x168] sm:$0xff] }
 0x314   :  { %v28702_v18 = vpop.f32.mrb[16].mxu0 }
 0x315   :  { %v22351_v19 = vpop.f32.mrb[17].mxu0 }
 0x316   :  { %v2410_v19 = vld [vmem:[#allocation6 + $0x178] sm:$0xff] }
 0x31c   :  { %v28704_v20 = vpop.f32.mrb[18].mxu0 }
 0x31d   :  { %v22370_v21 = vpop.f32.mrb[19].mxu0 }
 0x31e   :  { %v2589_v21 = vld [vmem:[#allocation6 + $0x188] sm:$0xff] }
 0x324   :  { %v28706_v22 = vpop.f32.mrb[20].mxu0 }
 0x325   :  { %v22389_v23 = vpop.f32.mrb[21].mxu0 }
 0x326   :  { %v2590_v23 = vld [vmem:[#allocation6 + $0x190] sm:$0xff] }
 0x32c   :  { %v28708_v24 = vpop.f32.mrb[22].mxu0 }
 0x32d   :  { %v22408_v25 = vpop.f32.mrb[23].mxu0 }
 0x32e   :  { %v2591_v25 = vld [vmem:[#allocation6 + $0x198] sm:$0xff] }
 0x334   :  { %v28710_v26 = vpop.f32.mrb[24].mxu0 }
 0x335   :  { %v22427_v27 = vpop.f32.mrb[25].mxu0 }
 0x336   :  { %v2770_v27 = vld [vmem:[#allocation6 + $0x1a8] sm:$0xff] }
 0x33c   :  { %v28712_v28 = vpop.f32.mrb[26].mxu0 }
 0x33d   :  { %v22446_v30 = vpop.f32.mrb[27].mxu0 }
 0x33e   :  { %v2772_v30 = vld [vmem:[#allocation6 + $0x1b8] sm:$0xff] }
 0x3ba   :  { %v592_v33 = vpop.f32.mrb[6].mxu1 }
 0x3bb   :  { %v22180_v36 = vpop.f32.mrb[7].mxu1  ;;  %22181 = vmatprep.subr.mxu1 %v592_v33 }
 0x3bc   :  { %22182 = vmatpush3.msra.mxu1 %v592_v33  ;;  %v2953_v33 = vld [vmem:[#allocation6 + $0x1d8] sm:$0xff] }
 0x3bd   :  { %22184 = vmatmul.mubr.msk.f32.vlgmr.msra.gmra.mrb[2].mxu1 %vm419_vm2, %v598_v34  ;;  %25627 = vmatprep.subr.bf16.mxu1 %v28290_v0  ;;  %v3132_v34 = vld [vmem:[#allocation6 + $0x1e8] sm:$0xff]  ;;  %v3134_v36 = vld [vmem:[#allocation6 + $0x1f8] sm:$0xff] }
 0x3be   :  { %25629 = vmatpush3.bf16.msra.mxu1 %v25628_v35  ;;  %22186 = vmatprep.mubr.msk.f32.mxu1 %vm419_vm2, %v599_v37  ;;  %v3133_v35 = vld [vmem:[#allocation6 + $0x1f0] sm:$0xff]  ;;  %v3314_v37 = vld [vmem:[#allocation15] sm:$0xff] }
 0x3bf   :  { %25630 = vmatprep.subr.bf16.mxu1 %v28290_v0  ;;  %v781_v0 = vld [vmem:[#allocation6 + $0x58] sm:$0xff]  ;;  %v25711_v39 = vpack.c.bf16 %v3315_v38, %v3314_v37 }
 0x3c1   :  { %22187 = vmatmul.mubr.msk.f32.gmra.mrb[4].mxu1 %vm419_vm2, %v600_v40  ;;  %v3640_v40 = vld [vmem:[#allocation15 + $0x18] sm:$0xff]  ;;  %25712 = vmatprep.subr.bf16.mxu0 %v25711_v39 }
 0x3c2   :  { %25632 = vmatpush3.bf16.msra.mxu1 %v25631_v41  ;;  %22197 = vmatprep.mubr.msk.f32.mxu1 %vm28291_vm0, %v28292_v1  ;;  %v959_v1 = vld [vmem:[#allocation6 + $0x60] sm:$0xff] }
 0x3c3   :  { %25714 = vmatpush3.bf16.msra.mxu0 %v25711_v39 }
 0x3c5   :  { %22198 = vmatmul.mubr.msk.f32.vlgmr.msra.gmra.mrb[8].mxu1 %vm341_vm1, %v28601_v44  ;;  %v960_v44 = vld [vmem:[#allocation6 + $0x68] sm:$0xff] }
 0x3c6   :  { %22202 = vmatprep.mubr.msk.f32.mxu1 %vm419_vm2, %v778_v42  ;;  %v3953_v42 = vld [vmem:[#allocation15 + $0x20] sm:$0xff] }
 0x498   :  { %v773_v43 = vpop.f32.mrb[8].mxu1 }
 0x499   :  { %v22199_v46 = vpop.f32.mrb[9].mxu1  ;;  %22200 = vmatprep.subr.mxu1 %v773_v43 }
 0x49a   :  { %22201 = vmatpush3.msra.mxu1 %v773_v43  ;;  %v3954_v43 = vld [vmem:[#allocation15 + $0x28] sm:$0xff]  ;;  %v19308_v46 = vld [vmem:[#allocation9] ss:$0 sm:$0xff] }
 0x49b   :  { %22203 = vmatmul.mubr.msk.f32.vlgmr.msra.gmra.mrb[2].mxu1 %vm419_vm2, %v779_v45  ;;  %22219 = vmatprep.subr.mxu1 %v28679_v58  ;;  %v28806_v45 = vpack.c.bf16 %v3954_v43, %v3953_v42  ;;  %v4268_v42 = vld [vmem:[#allocation15 + $0x38] sm:$0xff] }
 0x49c   :  { %22220 = vmatpush3.msra.mxu1 %v28679_v58  ;;  %22205 = vmatprep.mubr.msk.f32.mxu1 %vm419_vm2, %v780_v47  ;;  %v1502_v58 = vld [vmem:[#allocation6 + $0xc0] sm:$0xff] }
 0x49d   :  { %22238 = vmatprep.subr.mxu1 %v28686_v6 }
 0x49f   :  { %22206 = vmatmul.mubr.msk.f32.gmra.mrb[4].mxu1 %vm419_vm2, %v781_v0 }
 0x4a0   :  { %22221 = vmatprep.mubr.msk.f32.mxu1 %vm419_vm2, %v959_v1 }
 0x4a3   :  { %22222 = vmatmul.mubr.msk.f32.vlgmr.msra.gmra.mrb[2].mxu1 %vm419_vm2, %v960_v44 }
 0x4a4   :  { %22239 = vmatpush3.msra.mxu1 %v28686_v6  ;;  %22224 = vmatprep.mubr.msk.f32.mxu1 %vm419_vm2, %v961_v48  ;;  %v1866_v6 = vld [vmem:[#allocation6 + $0x110] sm:$0xff] }
 0x4a5   :  { %22257 = vmatprep.subr.mxu1 %v28692_v8 }
 0x4a7   :  { %22225 = vmatmul.mubr.msk.f32.gmra.mrb[4].mxu1 %vm419_vm2, %v962_v49 }
 0x4a8   :  { %22240 = vmatprep.mubr.msk.f32.mxu1 %vm419_vm2, %v1140_v50 }
 0x4ab   :  { %22241 = vmatmul.mubr.msk.f32.vlgmr.msra.gmra.mrb[2].mxu1 %vm419_vm2, %v1141_v51 }
 0x4ac   :  { %22258 = vmatpush3.msra.mxu1 %v28692_v8  ;;  %22243 = vmatprep.mubr.msk.f32.mxu1 %vm419_vm2, %v1142_v52  ;;  %v2045_v8 = vld [vmem:[#allocation6 + $0x120] sm:$0xff] }
 0x4ad   :  { %22276 = vmatprep.subr.mxu1 %v28694_v10 }
 0x4af   :  { %22244 = vmatmul.mubr.msk.f32.gmra.mrb[4].mxu1 %vm419_vm2, %v1143_v53 }
 0x4b0   :  { %22259 = vmatprep.mubr.msk.f32.mxu1 %vm419_vm2, %v1321_v54 }
 0x4b3   :  { %22260 = vmatmul.mubr.msk.f32.vlgmr.msra.gmra.mrb[2].mxu1 %vm419_vm2, %v1322_v55 }
 0x4b4   :  { %22277 = vmatpush3.msra.mxu1 %v28694_v10  ;;  %22262 = vmatprep.mubr.msk.f32.mxu1 %vm419_vm2, %v1323_v56  ;;  %v2047_v10 = vld [vmem:[#allocation6 + $0x130] sm:$0xff] }
 0x4b5   :  { %22295 = vmatprep.subr.mxu1 %v28696_v12 }
 0x4b7   :  { %22263 = vmatmul.mubr.msk.f32.gmra.mrb[4].mxu1 %vm419_vm2, %v1324_v57 }
 0x4b8   :  { %22278 = vmatprep.mubr.msk.f32.mxu1 %vm419_vm2, %v1502_v58 }
 0x4bb   :  { %22279 = vmatmul.mubr.msk.f32.vlgmr.msra.gmra.mrb[2].mxu1 %vm419_vm2, %v1503_v59 }
 0x4bc   :  { %22296 = vmatpush3.msra.mxu1 %v28696_v12  ;;  %22281 = vmatprep.mubr.msk.f32.mxu1 %vm419_vm2, %v1504_v60  ;;  %v2226_v12 = vld [vmem:[#allocation6 + $0x140] sm:$0xff] }
 0x4bd   :  { %22314 = vmatprep.subr.mxu1 %v28698_v14 }
 0x4bf   :  { %22282 = vmatmul.mubr.msk.f32.gmra.mrb[4].mxu1 %vm419_vm2, %v1505_v61 }
 0x4c0   :  { %22297 = vmatprep.mubr.msk.f32.mxu1 %vm419_vm2, %v1683_v62 }
 0x4c3   :  { %22298 = vmatmul.mubr.msk.f32.vlgmr.msra.gmra.mrb[2].mxu1 %vm419_vm2, %v1684_v63 }
 0x4c4   :  { %22315 = vmatpush3.msra.mxu1 %v28698_v14  ;;  %22300 = vmatprep.mubr.msk.f32.mxu1 %vm419_vm2, %v1685_v2  ;;  %v2228_v14 = vld [vmem:[#allocation6 + $0x150] sm:$0xff] }
 0x4c5   :  { %22333 = vmatprep.subr.mxu1 %v28700_v16 }
 0x4c7   :  { %22301 = vmatmul.mubr.msk.f32.gmra.mrb[4].mxu1 %vm419_vm2, %v1686_v3 }
 0x4c8   :  { %22316 = vmatprep.mubr.msk.f32.mxu1 %vm419_vm2, %v1864_v4 }
 0x4cb   :  { %22317 = vmatmul.mubr.msk.f32.vlgmr.msra.gmra.mrb[2].mxu1 %vm419_vm2, %v1865_v5 }
 0x4cc   :  { %22334 = vmatpush3.msra.mxu1 %v28700_v16  ;;  %22319 = vmatprep.mubr.msk.f32.mxu1 %vm419_vm2, %v1866_v6  ;;  %v2407_v16 = vld [vmem:[#allocation6 + $0x160] sm:$0xff] }
 0x4cd   :  { %22352 = vmatprep.subr.mxu1 %v28702_v18 }
 0x4cf   :  { %22320 = vmatmul.mubr.msk.f32.gmra.mrb[4].mxu1 %vm419_vm2, %v1867_v7 }
 0x4d0   :  { %22335 = vmatprep.mubr.msk.f32.mxu1 %vm419_vm2, %v2045_v8 }
 0x4d3   :  { %22336 = vmatmul.mubr.msk.f32.vlgmr.msra.gmra.mrb[2].mxu1 %vm419_vm2, %v2046_v9 }
 0x4d4   :  { %22353 = vmatpush3.msra.mxu1 %v28702_v18  ;;  %22338 = vmatprep.mubr.msk.f32.mxu1 %vm419_vm2, %v2047_v10  ;;  %v2409_v18 = vld [vmem:[#allocation6 + $0x170] sm:$0xff] }
 0x4d5   :  { %22371 = vmatprep.subr.mxu1 %v28704_v20 }
 0x4d7   :  { %22339 = vmatmul.mubr.msk.f32.gmra.mrb[4].mxu1 %vm419_vm2, %v2048_v11 }
 0x4d8   :  { %22354 = vmatprep.mubr.msk.f32.mxu1 %vm419_vm2, %v2226_v12 }
 0x4db   :  { %22355 = vmatmul.mubr.msk.f32.vlgmr.msra.gmra.mrb[2].mxu1 %vm419_vm2, %v2227_v13 }
 0x4dc   :  { %22372 = vmatpush3.msra.mxu1 %v28704_v20  ;;  %22357 = vmatprep.mubr.msk.f32.mxu1 %vm419_vm2, %v2228_v14  ;;  %v2588_v20 = vld [vmem:[#allocation6 + $0x180] sm:$0xff] }
 0x4dd   :  { %22390 = vmatprep.subr.mxu1 %v28706_v22 }
 0x4df   :  { %22358 = vmatmul.mubr.msk.f32.gmra.mrb[4].mxu1 %vm419_vm2, %v2229_v15 }
 0x4e0   :  { %22373 = vmatprep.mubr.msk.f32.mxu1 %vm419_vm2, %v2407_v16 }
 0x4e3   :  { %22374 = vmatmul.mubr.msk.f32.vlgmr.msra.gmra.mrb[2].mxu1 %vm419_vm2, %v2408_v17 }
 0x4e4   :  { %22391 = vmatpush3.msra.mxu1 %v28706_v22  ;;  %22376 = vmatprep.mubr.msk.f32.mxu1 %vm419_vm2, %v2409_v18  ;;  %v2769_v22 = vld [vmem:[#allocation6 + $0x1a0] sm:$0xff] }
 0x4e5   :  { %22409 = vmatprep.subr.mxu1 %v28708_v24 }
 0x4e7   :  { %22377 = vmatmul.mubr.msk.f32.gmra.mrb[4].mxu1 %vm419_vm2, %v2410_v19 }
 0x4e8   :  { %22392 = vmatprep.mubr.msk.f32.mxu1 %vm419_vm2, %v2588_v20 }
 0x4eb   :  { %22393 = vmatmul.mubr.msk.f32.vlgmr.msra.gmra.mrb[2].mxu1 %vm419_vm2, %v2589_v21 }
 0x4ec   :  { %22410 = vmatpush3.msra.mxu1 %v28708_v24  ;;  %22395 = vmatprep.mubr.msk.f32.mxu1 %vm419_vm2, %v2590_v23  ;;  %v2950_v24 = vld [vmem:[#allocation6 + $0x1c0] sm:$0xff] }
 0x4ed   :  { %22428 = vmatprep.subr.mxu1 %v28710_v26 }
 0x4ef   :  { %22396 = vmatmul.mubr.msk.f32.gmra.mrb[4].mxu1 %vm419_vm2, %v2591_v25 }
 0x4f0   :  { %22411 = vmatprep.mubr.msk.f32.mxu1 %vm419_vm2, %v2769_v22 }
 0x4f3   :  { %22412 = vmatmul.mubr.msk.f32.vlgmr.msra.gmra.mrb[2].mxu1 %vm419_vm2, %v2770_v27 }
 0x4f4   :  { %22429 = vmatpush3.msra.mxu1 %v28710_v26  ;;  %22414 = vmatprep.mubr.msk.f32.mxu1 %vm419_vm2, %v2771_v29  ;;  %v3131_v26 = vld [vmem:[#allocation6 + $0x1e0] sm:$0xff] }
 0x4f5   :  { %22447 = vmatprep.subr.mxu1 %v28712_v28 }
 0x4f7   :  { %22415 = vmatmul.mubr.msk.f32.gmra.mrb[4].mxu1 %vm419_vm2, %v2772_v30 }
 0x4f8   :  { %22430 = vmatprep.mubr.msk.f32.mxu1 %vm419_vm2, %v2950_v24  ;;  %v19389_v24 = vld [vmem:[#allocation10] ss:$0 sm:$0xff] }
 0x4fb   :  { %22431 = vmatmul.mubr.msk.f32.vlgmr.msra.gmra.mrb[2].mxu1 %vm419_vm2, %v2951_v31 }
 0x4fc   :  { %22448 = vmatpush3.msra.mxu1 %v28712_v28  ;;  %22433 = vmatprep.mubr.msk.f32.mxu1 %vm419_vm2, %v2952_v32  ;;  %v3639_v28 = vld [vmem:[#allocation15 + $0x10] sm:$0xff] }
 0x4fd   :  { %v25723_v41 = vpack.c.bf16 %v3640_v40, %v3639_v28 }
 0x4ff   :  { %22434 = vmatmul.mubr.msk.f32.gmra.mrb[4].mxu1 %vm419_vm2, %v2953_v33  ;;  %25724 = vmatprep.subr.bf16.mxu1 %v25723_v41 }
 0x500   :  { %22449 = vmatprep.mubr.msk.f32.mxu1 %vm419_vm2, %v3131_v26 }
 0x503   :  { %22450 = vmatmul.mubr.msk.f32.vlgmr.msra.gmra.mrb[2].mxu1 %vm419_vm2, %v3132_v34  ;;  %v19390_v34 = vld [vmem:[#allocation12] ss:$0 sm:$0xff] }
 0x504   :  { %22452 = vmatprep.mubr.msk.f32.mxu1 %vm419_vm2, %v3133_v35  ;;  %25726 = vmatpush3.bf16.msra.mxu1 %v25723_v41  ;;  %v4267_v41 = vld [vmem:[#allocation15 + $0x30] sm:$0xff] }
 0x505   :  { %25736 = vmatprep.subr.bf16.mxu1 %v28806_v45 }
 0x507   :  { %22453 = vmatmul.mubr.msk.f32.gmra.mrb[4].mxu1 %vm419_vm2, %v3134_v36 }
 0x5d6   :  { %v22451_v47 = vpop.f32.mrb[2].mxu1 }
 0x5d7   :  { %v26431_v0 = vadd.f32 %v22451_v47, %v19308_v46  ;;  %v3213_v1 = vpop.f32.mrb[3].mxu1 }
 0x5d8   :  { %v26432_v44 = vadd.f32 %v19308_v46, %v3213_v1  ;;  %v25747_v1 = vpack.c.bf16 %v4268_v42, %v4267_v41  ;;  %v3416_v41 = vld [vmem:[#allocation13 + $0x18] sm:$0xff] }
 0x5d9   :  { %v3238_v48 = vsel %vm3236_vm3, %v26431_v0, 0.0 }
 0x5da   :  { %v3237_v49 = vsel %vm3236_vm3, %v26432_v44, 0.0  ;;  %v22454_v50 = vpop.f32.mrb[4].mxu1 }
 0x5db   :  { %v3239_v51 = vadd.f32 %v3238_v48, %v3237_v49  ;;  %v3223_v52 = vpop.f32.mrb[5].mxu1  ;;  %v26433_v53 = vadd.f32 %v22454_v50, %v19308_v46  ;;  %v4581_v48 = vld [vmem:[#allocation15 + $0x40] sm:$0xff]  ;;  %v4582_v49 = vld [vmem:[#allocation15 + $0x48] sm:$0xff] }
 0x5dc   :  { %v26434_v54 = vadd.f32 %v19308_v46, %v3223_v52  ;;  %v25759_v50 = vpack.c.bf16 %v4582_v49, %v4581_v48 }
 0x5dd   :  { %v3242_v57 = vsel %vm3236_vm3, %v26433_v53, 0.0 }
 0x5de   :  { %v3240_v55 = vsel %vm3236_vm3, %v26434_v54, 0.0 }
 0x5df   :  { %v3241_v56 = vadd.f32 %v3240_v55, %v3239_v51  ;;  %v4896_v51 = vld [vmem:[#allocation15 + $0x58] sm:$0xff] }
 0x5e1   :  { %v3243_v58 = vadd.f32 %v3242_v57, %v3241_v56  ;;  %v5523_v56 = vld [vmem:[#allocation15 + $0x70] sm:$0xff]  ;;  %v5524_v57 = vld [vmem:[#allocation15 + $0x78] sm:$0xff] }
 0x5e3   :  { %v3244_v59 = vrot.slane %v3243_v58, 4 }
 0x5e5   :  { %v3245_v60 = vadd.f32 %v3244_v59, %v3243_v58  ;;  %v25795_v58 = vpack.c.bf16 %v5524_v57, %v5523_v56  ;;  %v5837_v59 = vld [vmem:[#allocation15 + $0x80] sm:$0xff]  ;;  %v3423_v56 = vld [vmem:[#allocation13 + $0x50] sm:$0xff] }
 0x5e7   :  { %v3246_v61 = vrot.slane %v3245_v60, 2 }
 0x5e9   :  { %v3247_v62 = vadd.f32 %v3246_v61, %v3245_v60  ;;  %v5838_v60 = vld [vmem:[#allocation15 + $0x88] sm:$0xff] }
 0x5ea   :  { %v25807_v61 = vpack.c.bf16 %v5838_v60, %v5837_v59  ;;  %v3424_v59 = vld [vmem:[#allocation13 + $0x58] sm:$0xff] }
 0x5eb   :  { %v3248_v63 = vrot.slane %v3247_v62, 1 }
 0x5ed   :  { %v3249_v2 = vadd.f32 %v3248_v63, %v3247_v62  ;;  %v6151_v62 = vld [vmem:[#allocation15 + $0x90] sm:$0xff]  ;;  %v6152_v63 = vld [vmem:[#allocation15 + $0x98] sm:$0xff] }
 0x5ef   :  { %v3251_v3 = vmul.f32 0.03125, %v3249_v2  ;;  %v25819_v2 = vpack.c.bf16 %v6152_v63, %v6151_v62 }
 0x5f1   :  { %v3252_v4 = vsub.f32 %v26432_v44, %v3251_v3  ;;  %v3253_v5 = vsub.f32 %v26431_v0, %v3251_v3  ;;  %v3254_v6 = vsub.f32 %v26434_v54, %v3251_v3  ;;  %v3255_v7 = vsub.f32 %v26433_v53, %v3251_v3  ;;  %v5209_v53 = vld [vmem:[#allocation15 + $0x60] sm:$0xff]  ;;  %v5210_v54 = vld [vmem:[#allocation15 + $0x68] sm:$0xff] }
 0x5f2   :  { %v25783_v55 = vpack.c.bf16 %v5210_v54, %v5209_v53  ;;  %v6465_v3 = vld [vmem:[#allocation15 + $0xa0] sm:$0xff]  ;;  %v3422_v54 = vld [vmem:[#allocation13 + $0x48] sm:$0xff] }
 0x5f3   :  { %v3256_v8 = vmul.f32 %v3252_v4, %v3252_v4  ;;  %v3257_v9 = vmul.f32 %v3253_v5, %v3253_v5  ;;  %v3258_v10 = vmul.f32 %v3254_v6, %v3254_v6  ;;  %v3259_v11 = vmul.f32 %v3255_v7, %v3255_v7 }
 0x5f5   :  { %v3260_v12 = vsel %vm3236_vm3, %v3256_v8, 0.0  ;;  %v3261_v13 = vsel %vm3236_vm3, %v3257_v9, 0.0  ;;  %v3263_v15 = vsel %vm3236_vm3, %v3258_v10, 0.0  ;;  %v3265_v17 = vsel %vm3236_vm3, %v3259_v11, 0.0  ;;  %v7093_v9 = vld [vmem:[#allocation15 + $0xc0] sm:$0xff]  ;;  %v7094_v10 = vld [vmem:[#allocation15 + $0xc8] sm:$0xff] }
 0x5f6   :  { %v3262_v14 = vadd.f32 %v3261_v13, %v3260_v12  ;;  %v25855_v11 = vpack.c.bf16 %v7094_v10, %v7093_v9  ;;  %v7407_v12 = vld [vmem:[#allocation15 + $0xd0] sm:$0xff]  ;;  %v7408_v13 = vld [vmem:[#allocation15 + $0xd8] sm:$0xff]  ;;  %v3727_v9 = vld [vmem:[#allocation13 + $0x80] sm:$0xff] }
 0x5f8   :  { %v3264_v16 = vadd.f32 %v3263_v15, %v3262_v14  ;;  %v25867_v14 = vpack.c.bf16 %v7408_v13, %v7407_v12  ;;  %v7721_v15 = vld [vmem:[#allocation15 + $0xe0] sm:$0xff]  ;;  %v3728_v12 = vld [vmem:[#allocation13 + $0x88] sm:$0xff] }
 0x5fa   :  { %v3266_v18 = vadd.f32 %v3265_v17, %v3264_v16  ;;  %v7722_v16 = vld [vmem:[#allocation15 + $0xe8] sm:$0xff] }
 0x5fb   :  { %v25879_v17 = vpack.c.bf16 %v7722_v16, %v7721_v15 }
 0x5fc   :  { %v3267_v19 = vrot.slane %v3266_v18, 4 }
 0x5fe   :  { %v3268_v20 = vadd.f32 %v3267_v19, %v3266_v18  ;;  %v8035_v18 = vld [vmem:[#allocation15 + $0xf0] sm:$0xff]  ;;  %v8036_v19 = vld [vmem:[#allocation15 + $0xf8] sm:$0xff] }
 0x600   :  { %v3269_v21 = vrot.slane %v3268_v20, 2 }
 0x602   :  { %v3270_v23 = vadd.f32 %v3269_v21, %v3268_v20  ;;  %v3413_v20 = vld [vmem:[#allocation13] sm:$0xff]  ;;  %v25891_v21 = vpack.c.bf16 %v8036_v19, %v8035_v18 }
 0x603   :  { %v3731_v19 = vld [vmem:[#allocation13 + $0xa0] sm:$0xff] }
 0x604   :  { %v3271_v25 = vrot.slane %v3270_v23, 1 }
 0x606   :  { %v3272_v22 = vadd.f32 %v3271_v25, %v3270_v23 }
 0x608   :  { %v3273_v27 = vmul.f32 0.03125, %v3272_v22 }
 0x60a   :  { %v3275_v29 = vadd.f32 1e-05, %v3273_v27 }
 0x60c   :  { %27795 = vrsqrt.f32 %v3275_v29 }
 0x616   :  { %v27796_v30 = vpop.eup %27795 }
 0x617   :  { %v3277_v31 = vmul.f32 %v27796_v30, %v3252_v4  ;;  %v3278_v32 = vmul.f32 %v27796_v30, %v3253_v5  ;;  %v3279_v33 = vmul.f32 %v27796_v30, %v3254_v6  ;;  %v3280_v26 = vmul.f32 %v27796_v30, %v3255_v7  ;;  %v6466_v4 = vld [vmem:[#allocation15 + $0xa8] sm:$0xff]  ;;  %v6779_v6 = vld [vmem:[#allocation15 + $0xb0] sm:$0xff]  ;;  %v6780_v7 = vld [vmem:[#allocation15 + $0xb8] sm:$0xff] }
 0x618   :  { %v25831_v5 = vpack.c.bf16 %v6466_v4, %v6465_v3  ;;  %v25843_v8 = vpack.c.bf16 %v6780_v7, %v6779_v6  ;;  %v3427_v4 = vld [vmem:[#allocation13 + $0x70] sm:$0xff]  ;;  %v3428_v7 = vld [vmem:[#allocation13 + $0x78] sm:$0xff] }
 0x619   :  { %v3287_v35 = vmul.f32 %v19389_v24, %v3277_v31  ;;  %v3288_v36 = vmul.f32 %v19389_v24, %v3278_v32  ;;  %v3289_v37 = vmul.f32 %v19389_v24, %v3279_v33  ;;  %v3290_v38 = vmul.f32 %v19389_v24, %v3280_v26 }
 0x61b   :  { %v3298_v28 = vadd.f32 %v19390_v34, %v3287_v35  ;;  %v3299_v39 = vadd.f32 %v19390_v34, %v3288_v36  ;;  %v3300_v40 = vadd.f32 %v19390_v34, %v3289_v37  ;;  %v3301_v47 = vadd.f32 %v19390_v34, %v3290_v38  ;;  %v3414_v37 = vld [vmem:[#allocation13 + $0x8] sm:$0xff] }
 0x61d   :  { %v28817_v43 = vmax.f32 %v3298_v28, 0.0  ;;  %v28819_v46 = vmax.f32 %v3299_v39, 0.0  ;;  %v28821_v0 = vmax.f32 %v3300_v40, 0.0  ;;  %v28835_v44 = vmax.f32 %v3301_v47, 0.0  ;;  %v3415_v28 = vld [vmem:[#allocation13 + $0x10] sm:$0xff] }
 0x61f   :  { %22459 = vmatprep.mubr.msk.f32.mxu0 %vm3236_vm3, %v28817_v43  ;;  %22501 = vmatprep.mubr.msk.f32.mxu1 %vm3236_vm3, %v28817_v43 }
 0x620   :  { %22460 = vmatmul.mubr.msk.f32.vlgmr.msra.gmra.mrb[28].mxu0 %vm3236_vm3, %v28819_v46  ;;  %22502 = vmatmul.mubr.msk.f32.vlgmr.msra.gmra.mrb[10].mxu1 %vm3236_vm3, %v28819_v46 }
 0x621   :  { %22462 = vmatprep.mubr.msk.f32.mxu0 %vm3236_vm3, %v28821_v0  ;;  %22504 = vmatprep.mubr.msk.f32.mxu1 %vm3236_vm3, %v28821_v0 }
 0x622   :  { %25738 = vmatpush3.bf16.msra.mxu1 %v28806_v45  ;;  %v4895_v45 = vld [vmem:[#allocation15 + $0x50] sm:$0xff] }
 0x623   :  { %25748 = vmatprep.subr.bf16.mxu1 %v25747_v1  ;;  %v25771_v52 = vpack.c.bf16 %v4896_v51, %v4895_v45  ;;  %v3421_v51 = vld [vmem:[#allocation13 + $0x40] sm:$0xff] }
 0x624   :  { %22463 = vmatmul.mubr.msk.f32.gmra.mrb[30].mxu0 %vm3236_vm3, %v28835_v44  ;;  %22505 = vmatmul.mubr.msk.f32.gmra.mrb[12].mxu1 %vm3236_vm3, %v28835_v44 }
 0x625   :  { %22543 = vmatprep.mubr.msk.f32.mxu1 %vm3236_vm3, %v28817_v43  ;;  %22473 = vmatprep.mubr.msk.f32.mxu0 %vm341_vm1, %v3413_v20 }
 0x628   :  { %22544 = vmatmul.mubr.msk.f32.vlgmr.msra.gmra.mrb[14].mxu1 %vm3236_vm3, %v28819_v46 }
 0x629   :  { %22546 = vmatprep.mubr.msk.f32.mxu1 %vm3236_vm3, %v28821_v0  ;;  %25750 = vmatpush3.bf16.msra.mxu1 %v25747_v1 }
 0x62a   :  { %25760 = vmatprep.subr.bf16.mxu1 %v25759_v50 }
 0x62c   :  { %22547 = vmatmul.mubr.msk.f32.gmra.mrb[16].mxu1 %vm3236_vm3, %v28835_v44 }
 0x62d   :  { %22585 = vmatprep.mubr.msk.f32.mxu1 %vm3236_vm3, %v28817_v43 }
 0x630   :  { %22586 = vmatmul.mubr.msk.f32.vlgmr.msra.gmra.mrb[18].mxu1 %vm3236_vm3, %v28819_v46 }
 0x631   :  { %22588 = vmatprep.mubr.msk.f32.mxu1 %vm3236_vm3, %v28821_v0  ;;  %25762 = vmatpush3.bf16.msra.mxu1 %v25759_v50  ;;  %v3420_v50 = vld [vmem:[#allocation13 + $0x38] sm:$0xff] }
 0x632   :  { %25772 = vmatprep.subr.bf16.mxu1 %v25771_v52 }
 0x634   :  { %22589 = vmatmul.mubr.msk.f32.gmra.mrb[20].mxu1 %vm3236_vm3, %v28835_v44 }
 0x635   :  { %22627 = vmatprep.mubr.msk.f32.mxu1 %vm3236_vm3, %v28817_v43 }
 0x638   :  { %22628 = vmatmul.mubr.msk.f32.vlgmr.msra.gmra.mrb[22].mxu1 %vm3236_vm3, %v28819_v46 }
 0x639   :  { %22630 = vmatprep.mubr.msk.f32.mxu1 %vm3236_vm3, %v28821_v0  ;;  %25774 = vmatpush3.bf16.msra.mxu1 %v25771_v52 }
 0x63a   :  { %25784 = vmatprep.subr.bf16.mxu1 %v25783_v55 }
 0x63c   :  { %22631 = vmatmul.mubr.msk.f32.gmra.mrb[24].mxu1 %vm3236_vm3, %v28835_v44 }
 0x63d   :  { %22669 = vmatprep.mubr.msk.f32.mxu1 %vm3236_vm3, %v28817_v43 }
 0x640   :  { %22670 = vmatmul.mubr.msk.f32.vlgmr.msra.gmra.mrb[26].mxu1 %vm3236_vm3, %v28819_v46 }
 0x641   :  { %22672 = vmatprep.mubr.msk.f32.mxu1 %vm3236_vm3, %v28821_v0  ;;  %25786 = vmatpush3.bf16.msra.mxu1 %v25783_v55 }
 0x642   :  { %25796 = vmatprep.subr.bf16.mxu1 %v25795_v58 }
 0x644   :  { %22673 = vmatmul.mubr.msk.f32.gmra.mrb[28].mxu1 %vm3236_vm3, %v28835_v44 }
 0x645   :  { %22711 = vmatprep.mubr.msk.f32.mxu1 %vm3236_vm3, %v28817_v43 }
 0x648   :  { %22712 = vmatmul.mubr.msk.f32.vlgmr.msra.gmra.mrb[30].mxu1 %vm3236_vm3, %v28819_v46 }
 0x649   :  { %22714 = vmatprep.mubr.msk.f32.mxu1 %vm3236_vm3, %v28821_v0  ;;  %25798 = vmatpush3.bf16.msra.mxu1 %v25795_v58 }
 0x64a   :  { %25808 = vmatprep.subr.bf16.mxu1 %v25807_v61 }
 0x64c   :  { %22715 = vmatmul.mubr.msk.f32.gmra.mrb[32].mxu1 %vm3236_vm3, %v28835_v44 }
 0x64d   :  { %22753 = vmatprep.mubr.msk.f32.mxu1 %vm3236_vm3, %v28817_v43 }
 0x650   :  { %22754 = vmatmul.mubr.msk.f32.vlgmr.msra.gmra.mrb[34].mxu1 %vm3236_vm3, %v28819_v46 }
 0x651   :  { %22756 = vmatprep.mubr.msk.f32.mxu1 %vm3236_vm3, %v28821_v0  ;;  %25810 = vmatpush3.bf16.msra.mxu1 %v25807_v61  ;;  %v3425_v61 = vld [vmem:[#allocation13 + $0x60] sm:$0xff] }
 0x652   :  { %25820 = vmatprep.subr.bf16.mxu1 %v25819_v2 }
 0x654   :  { %22757 = vmatmul.mubr.msk.f32.gmra.mrb[36].mxu1 %vm3236_vm3, %v28835_v44 }
 0x655   :  { %22795 = vmatprep.mubr.msk.f32.mxu1 %vm3236_vm3, %v28817_v43 }
 0x658   :  { %22796 = vmatmul.mubr.msk.f32.vlgmr.msra.gmra.mrb[38].mxu1 %vm3236_vm3, %v28819_v46 }
 0x659   :  { %22798 = vmatprep.mubr.msk.f32.mxu1 %vm3236_vm3, %v28821_v0  ;;  %25822 = vmatpush3.bf16.msra.mxu1 %v25819_v2  ;;  %v3426_v2 = vld [vmem:[#allocation13 + $0x68] sm:$0xff] }
 0x65a   :  { %25832 = vmatprep.subr.bf16.mxu1 %v25831_v5 }
 0x65c   :  { %22799 = vmatmul.mubr.msk.f32.gmra.mrb[40].mxu1 %vm3236_vm3, %v28835_v44 }
 0x65d   :  { %22837 = vmatprep.mubr.msk.f32.mxu1 %vm3236_vm3, %v28817_v43 }
 0x660   :  { %22838 = vmatmul.mubr.msk.f32.vlgmr.msra.gmra.mrb[42].mxu1 %vm3236_vm3, %v28819_v46 }
 0x661   :  { %22840 = vmatprep.mubr.msk.f32.mxu1 %vm3236_vm3, %v28821_v0  ;;  %25834 = vmatpush3.bf16.msra.mxu1 %v25831_v5 }
 0x662   :  { %25844 = vmatprep.subr.bf16.mxu1 %v25843_v8 }
 0x664   :  { %22841 = vmatmul.mubr.msk.f32.gmra.mrb[44].mxu1 %vm3236_vm3, %v28835_v44 }
 0x665   :  { %22879 = vmatprep.mubr.msk.f32.mxu1 %vm3236_vm3, %v28817_v43 }
 0x668   :  { %22880 = vmatmul.mubr.msk.f32.vlgmr.msra.gmra.mrb[46].mxu1 %vm3236_vm3, %v28819_v46 }
 0x669   :  { %22882 = vmatprep.mubr.msk.f32.mxu1 %vm3236_vm3, %v28821_v0  ;;  %25846 = vmatpush3.bf16.msra.mxu1 %v25843_v8 }
 0x66a   :  { %25856 = vmatprep.subr.bf16.mxu1 %v25855_v11 }
 0x66c   :  { %22883 = vmatmul.mubr.msk.f32.gmra.mrb[48].mxu1 %vm3236_vm3, %v28835_v44 }
 0x66d   :  { %22921 = vmatprep.mubr.msk.f32.mxu1 %vm3236_vm3, %v28817_v43 }
 0x670   :  { %22922 = vmatmul.mubr.msk.f32.vlgmr.msra.gmra.mrb[50].mxu1 %vm3236_vm3, %v28819_v46 }
 0x671   :  { %22924 = vmatprep.mubr.msk.f32.mxu1 %vm3236_vm3, %v28821_v0  ;;  %25858 = vmatpush3.bf16.msra.mxu1 %v25855_v11 }
 0x672   :  { %25868 = vmatprep.subr.bf16.mxu1 %v25867_v14 }
 0x674   :  { %22925 = vmatmul.mubr.msk.f32.gmra.mrb[52].mxu1 %vm3236_vm3, %v28835_v44 }
 0x675   :  { %22963 = vmatprep.mubr.msk.f32.mxu1 %vm3236_vm3, %v28817_v43 }
 0x678   :  { %22964 = vmatmul.mubr.msk.f32.vlgmr.msra.gmra.mrb[54].mxu1 %vm3236_vm3, %v28819_v46 }
 0x679   :  { %22966 = vmatprep.mubr.msk.f32.mxu1 %vm3236_vm3, %v28821_v0  ;;  %25870 = vmatpush3.bf16.msra.mxu1 %v25867_v14  ;;  %v3729_v14 = vld [vmem:[#allocation13 + $0x90] sm:$0xff] }
 0x67a   :  { %25880 = vmatprep.subr.bf16.mxu1 %v25879_v17 }
 0x67c   :  { %22967 = vmatmul.mubr.msk.f32.gmra.mrb[56].mxu1 %vm3236_vm3, %v28835_v44 }
 0x67d   :  { %23005 = vmatprep.mubr.msk.f32.mxu1 %vm3236_vm3, %v28817_v43 }
 0x680   :  { %23006 = vmatmul.mubr.msk.f32.vlgmr.msra.gmra.mrb[58].mxu1 %vm3236_vm3, %v28819_v46 }
 0x681   :  { %23008 = vmatprep.mubr.msk.f32.mxu1 %vm3236_vm3, %v28821_v0  ;;  %25882 = vmatpush3.bf16.msra.mxu1 %v25879_v17  ;;  %v3730_v17 = vld [vmem:[#allocation13 + $0x98] sm:$0xff] }
 0x682   :  { %25892 = vmatprep.subr.bf16.mxu1 %v25891_v21 }
 0x684   :  { %23009 = vmatmul.mubr.msk.f32.gmra.mrb[60].mxu1 %vm3236_vm3, %v28835_v44 }
 0x685   :  { %23047 = vmatprep.mubr.msk.f32.mxu1 %vm3236_vm3, %v28817_v43 }
 0x688   :  { %23048 = vmatmul.mubr.msk.f32.vlgmr.msra.gmra.mrb[62].mxu1 %vm3236_vm3, %v28819_v46 }
 0x689   :  { %23050 = vmatprep.mubr.msk.f32.mxu1 %vm3236_vm3, %v28821_v0  ;;  %25894 = vmatpush3.bf16.msra.mxu1 %v25891_v21 }
 0x68c   :  { %23051 = vmatmul.mubr.msk.f32.gmra.mrb[64].mxu1 %vm3236_vm3, %v28835_v44 }
 0x68d   :  { %23089 = vmatprep.mubr.msk.f32.mxu1 %vm3236_vm3, %v28817_v43  ;;  %v3417_v43 = vld [vmem:[#allocation13 + $0x20] sm:$0xff] }
 0x690   :  { %23090 = vmatmul.mubr.msk.f32.vlgmr.msra.gmra.mrb[66].mxu1 %vm3236_vm3, %v28819_v46 }
 0x691   :  { %23092 = vmatprep.mubr.msk.f32.mxu1 %vm3236_vm3, %v28821_v0  ;;  %v3418_v0 = vld [vmem:[#allocation13 + $0x28] sm:$0xff] }
 0x694   :  { %23093 = vmatmul.mubr.msk.f32.gmra.mrb[68].mxu1 %vm3236_vm3, %v28835_v44  ;;  %v3419_v44 = vld [vmem:[#allocation13 + $0x30] sm:$0xff] }
 0x6f3   :  { %v22461_v23 = vpop.f32.mrb[28].mxu0  ;;  %v22503_v25 = vpop.f32.mrb[10].mxu1 }
 0x6f4   :  { %v3394_v22 = vpop.f32.mrb[29].mxu0  ;;  %v3707_v27 = vpop.f32.mrb[11].mxu1 }
 0x6f5   :  { %v25715_v29 = vpack.c.bf16 %v22461_v23, %v3394_v22  ;;  %v25727_v30 = vpack.c.bf16 %v22503_v25, %v3707_v27  ;;  %v3732_v23 = vld [vmem:[#allocation13 + $0xa8] sm:$0xff]  ;;  %v3733_v22 = vld [vmem:[#allocation13 + $0xb0] sm:$0xff] }
 0x6f7   :  { %v22464_v24 = vpop.f32.mrb[30].mxu0  ;;  %25716 = vmatprep.subr.bf16.mxu0 %v25715_v29  ;;  %v22506_v31 = vpop.f32.mrb[12].mxu1 }
 0x6f8   :  { %v3404_v32 = vpop.f32.mrb[31].mxu0  ;;  %25718 = vmatpush3.bf16.msra.mxu0 %v25715_v29  ;;  %v3717_v33 = vpop.f32.mrb[13].mxu1 }
 0x6f9   :  { %v25719_v26 = vpack.c.bf16 %v22464_v24, %v3404_v32  ;;  %v25731_v34 = vpack.c.bf16 %v22506_v31, %v3717_v33  ;;  %v3735_v31 = vld [vmem:[#allocation13 + $0xc0] sm:$0xff] }
 0x6fb   :  { %25720 = vmatprep.subr.bf16.mxu0 %v25719_v26  ;;  %v22545_v35 = vpop.f32.mrb[14].mxu1 }
 0x6fc   :  { %25722 = vmatpush3.bf16.msra.mxu0 %v25719_v26  ;;  %v4021_v36 = vpop.f32.mrb[15].mxu1  ;;  %v3736_v26 = vld [vmem:[#allocation13 + $0xc8] sm:$0xff] }
 0x6fd   :  { %v28955_v38 = vpack.c.bf16 %v22545_v35, %v4021_v36  ;;  %25728 = vmatprep.subr.bf16.mxu0 %v25727_v30  ;;  %v3737_v35 = vld [vmem:[#allocation13 + $0xd0] sm:$0xff] }
 0x6ff   :  { %22474 = vmatmul.mubr.msk.f32.vlgmr.msra.gmra.mrb[32].mxu0 %vm341_vm1, %v3414_v37  ;;  %v22548_v39 = vpop.f32.mrb[16].mxu1 }
 0x700   :  { %25730 = vmatpush3.bf16.msra.mxu0 %v25727_v30  ;;  %v4031_v40 = vpop.f32.mrb[17].mxu1  ;;  %22476 = vmatprep.mubr.msk.f32.mxu0 %vm341_vm1, %v3415_v28  ;;  %v3734_v30 = vld [vmem:[#allocation13 + $0xb8] sm:$0xff] }
 0x701   :  { %v28959_v42 = vpack.c.bf16 %v22548_v39, %v4031_v40  ;;  %25732 = vmatprep.subr.bf16.mxu0 %v25731_v34  ;;  %v3739_v39 = vld [vmem:[#allocation13 + $0xe0] sm:$0xff] }
 0x703   :  { %22477 = vmatmul.mubr.msk.f32.gmra.mrb[34].mxu0 %vm341_vm1, %v3416_v41  ;;  %v22587_v46 = vpop.f32.mrb[18].mxu1 }
 0x704   :  { %25734 = vmatpush3.bf16.msra.mxu0 %v25731_v34  ;;  %v4335_v47 = vpop.f32.mrb[19].mxu1  ;;  %22479 = vmatprep.mubr.msk.f32.mxu0 %vm341_vm1, %v3417_v43 }
 0x705   :  { %v28963_v1 = vpack.c.bf16 %v22587_v46, %v4335_v47  ;;  %25740 = vmatprep.subr.bf16.mxu0 %v28955_v38  ;;  %v3741_v46 = vld [vmem:[#allocation13 + $0xf0] sm:$0xff] }
 0x707   :  { %22480 = vmatmul.mubr.msk.f32.gmra.mrb[36].mxu0 %vm341_vm1, %v3418_v0  ;;  %v22590_v48 = vpop.f32.mrb[20].mxu1 }
 0x708   :  { %v4345_v49 = vpop.f32.mrb[21].mxu1  ;;  %22482 = vmatprep.mubr.msk.f32.mxu0 %vm341_vm1, %v3419_v44  ;;  %v3742_v44 = vld [vmem:[#allocation13 + $0xf8] sm:$0xff] }
 0x709   :  { %v28968_v45 = vpack.c.bf16 %v22590_v48, %v4345_v49  ;;  %v4041_v49 = vld [vmem:[#allocation13 + $0x100] sm:$0xff] }
 0x70b   :  { %22483 = vmatmul.mubr.msk.f32.gmra.mrb[38].mxu0 %vm341_vm1, %v3420_v50  ;;  %v22629_v52 = vpop.f32.mrb[22].mxu1 }
 0x70c   :  { %v4649_v53 = vpop.f32.mrb[23].mxu1  ;;  %22485 = vmatprep.mubr.msk.f32.mxu0 %vm341_vm1, %v3421_v51 }
 0x70d   :  { %v28972_v55 = vpack.c.bf16 %v22629_v52, %v4649_v53  ;;  %v4042_v52 = vld [vmem:[#allocation13 + $0x108] sm:$0xff] }
 0x70f   :  { %22486 = vmatmul.mubr.msk.f32.gmra.mrb[40].mxu0 %vm341_vm1, %v3422_v54  ;;  %v22632_v57 = vpop.f32.mrb[24].mxu1  ;;  %v4043_v54 = vld [vmem:[#allocation13 + $0x110] sm:$0xff] }
 0x710   :  { %v4659_v58 = vpop.f32.mrb[25].mxu1  ;;  %22488 = vmatprep.mubr.msk.f32.mxu0 %vm341_vm1, %v3423_v56 }
 0x711   :  { %v28976_v60 = vpack.c.bf16 %v22632_v57, %v4659_v58  ;;  %v4044_v58 = vld [vmem:[#allocation13 + $0x118] sm:$0xff] }
 0x713   :  { %22489 = vmatmul.mubr.msk.f32.gmra.mrb[42].mxu0 %vm341_vm1, %v3424_v59  ;;  %v22671_v62 = vpop.f32.mrb[26].mxu1 }
 0x714   :  { %v4963_v63 = vpop.f32.mrb[27].mxu1  ;;  %22491 = vmatprep.mubr.msk.f32.mxu0 %vm341_vm1, %v3425_v61  ;;  %v4045_v61 = vld [vmem:[#allocation13 + $0x120] sm:$0xff] }
 0x715   :  { %v28980_v3 = vpack.c.bf16 %v22671_v62, %v4963_v63 }
 0x717   :  { %22492 = vmatmul.mubr.msk.f32.gmra.mrb[44].mxu0 %vm341_vm1, %v3426_v2  ;;  %v22674_v5 = vpop.f32.mrb[28].mxu1  ;;  %v4046_v2 = vld [vmem:[#allocation13 + $0x128] sm:$0xff] }
 0x718   :  { %v4973_v6 = vpop.f32.mrb[29].mxu1  ;;  %22494 = vmatprep.mubr.msk.f32.mxu0 %vm341_vm1, %v3427_v4  ;;  %v4047_v4 = vld [vmem:[#allocation13 + $0x130] sm:$0xff] }
 0x719   :  { %v28984_v8 = vpack.c.bf16 %v22674_v5, %v4973_v6 }
 0x71b   :  { %22495 = vmatmul.mubr.msk.f32.gmra.mrb[46].mxu0 %vm341_vm1, %v3428_v7  ;;  %v22713_v10 = vpop.f32.mrb[30].mxu1  ;;  %v4048_v7 = vld [vmem:[#allocation13 + $0x138] sm:$0xff] }
 0x71c   :  { %v5277_v11 = vpop.f32.mrb[31].mxu1  ;;  %22515 = vmatprep.mubr.msk.f32.mxu0 %vm341_vm1, %v3727_v9 }
 0x71d   :  { %v28988_v13 = vpack.c.bf16 %v22713_v10, %v5277_v11  ;;  %v4049_v10 = vld [vmem:[#allocation13 + $0x140] sm:$0xff] }
 0x71f   :  { %22516 = vmatmul.mubr.msk.f32.vlgmr.msra.gmra.mrb[32].mxu0 %vm341_vm1, %v3728_v12  ;;  %v22716_v15 = vpop.f32.mrb[32].mxu1  ;;  %v4050_v12 = vld [vmem:[#allocation13 + $0x148] sm:$0xff] }
 0x720   :  { %25742 = vmatpush3.bf16.msra.mxu0 %v28955_v38  ;;  %v5287_v16 = vpop.f32.mrb[33].mxu1  ;;  %22518 = vmatprep.mubr.msk.f32.mxu0 %vm341_vm1, %v3729_v14  ;;  %v3738_v38 = vld [vmem:[#allocation13 + $0xd8] sm:$0xff] }
 0x721   :  { %25744 = vmatprep.subr.bf16.mxu0 %v28959_v42  ;;  %v28994_v18 = vpack.c.bf16 %v22716_v15, %v5287_v16  ;;  %v4051_v15 = vld [vmem:[#allocation13 + $0x150] sm:$0xff] }
 0x723   :  { %22519 = vmatmul.mubr.msk.f32.gmra.mrb[34].mxu0 %vm341_vm1, %v3730_v17  ;;  %v22755_v20 = vpop.f32.mrb[34].mxu1 }
 0x724   :  { %25746 = vmatpush3.bf16.msra.mxu0 %v28959_v42  ;;  %v5591_v21 = vpop.f32.mrb[35].mxu1  ;;  %22521 = vmatprep.mubr.msk.f32.mxu0 %vm341_vm1, %v3731_v19  ;;  %v3740_v42 = vld [vmem:[#allocation13 + $0xe8] sm:$0xff]  ;;  %v4052_v19 = vld [vmem:[#allocation13 + $0x158] sm:$0xff] }
 0x725   :  { %25752 = vmatprep.subr.bf16.mxu0 %v28963_v1  ;;  %v29000_v25 = vpack.c.bf16 %v22755_v20, %v5591_v21  ;;  %v4053_v21 = vld [vmem:[#allocation13 + $0x160] sm:$0xff] }
 0x727   :  { %22522 = vmatmul.mubr.msk.f32.gmra.mrb[36].mxu0 %vm341_vm1, %v3732_v23  ;;  %v22758_v27 = vpop.f32.mrb[36].mxu1 }
 0x728   :  { %v5601_v29 = vpop.f32.mrb[37].mxu1  ;;  %22524 = vmatprep.mubr.msk.f32.mxu0 %vm341_vm1, %v3733_v22 }
 0x729   :  { %v29004_v24 = vpack.c.bf16 %v22758_v27, %v5601_v29  ;;  %v4054_v27 = vld [vmem:[#allocation13 + $0x168] sm:$0xff] }
 0x72b   :  { %22525 = vmatmul.mubr.msk.f32.gmra.mrb[38].mxu0 %vm341_vm1, %v3734_v30  ;;  %v22797_v32 = vpop.f32.mrb[38].mxu1  ;;  %v4055_v30 = vld [vmem:[#allocation13 + $0x170] sm:$0xff] }
 0x72c   :  { %v5905_v33 = vpop.f32.mrb[39].mxu1  ;;  %22527 = vmatprep.mubr.msk.f32.mxu0 %vm341_vm1, %v3735_v31 }
 0x72d   :  { %v29008_v34 = vpack.c.bf16 %v22797_v32, %v5905_v33  ;;  %v4056_v33 = vld [vmem:[#allocation13 + $0x178] sm:$0xff] }
 0x72f   :  { %22528 = vmatmul.mubr.msk.f32.gmra.mrb[40].mxu0 %vm341_vm1, %v3736_v26  ;;  %v22800_v36 = vpop.f32.mrb[40].mxu1 }
 0x730   :  { %v5915_v37 = vpop.f32.mrb[41].mxu1  ;;  %22530 = vmatprep.mubr.msk.f32.mxu0 %vm341_vm1, %v3737_v35  ;;  %v4355_v35 = vld [vmem:[#allocation13 + $0x180] sm:$0xff] }
 0x731   :  { %v29012_v28 = vpack.c.bf16 %v22800_v36, %v5915_v37 }
 0x733   :  { %22531 = vmatmul.mubr.msk.f32.gmra.mrb[42].mxu0 %vm341_vm1, %v3738_v38  ;;  %v22839_v40 = vpop.f32.mrb[42].mxu1  ;;  %v4356_v38 = vld [vmem:[#allocation13 + $0x188] sm:$0xff] }
 0x734   :  { %v6219_v41 = vpop.f32.mrb[43].mxu1  ;;  %22533 = vmatprep.mubr.msk.f32.mxu0 %vm341_vm1, %v3739_v39 }
 0x735   :  { %v29016_v43 = vpack.c.bf16 %v22839_v40, %v6219_v41  ;;  %v4357_v40 = vld [vmem:[#allocation13 + $0x190] sm:$0xff] }
 0x737   :  { %22534 = vmatmul.mubr.msk.f32.gmra.mrb[44].mxu0 %vm341_vm1, %v3740_v42  ;;  %v22842_v47 = vpop.f32.mrb[44].mxu1 }
 0x738   :  { %v6229_v0 = vpop.f32.mrb[45].mxu1  ;;  %22536 = vmatprep.mubr.msk.f32.mxu0 %vm341_vm1, %v3741_v46  ;;  %v4358_v46 = vld [vmem:[#allocation13 + $0x198] sm:$0xff] }
 0x739   :  { %v29020_v48 = vpack.c.bf16 %v22842_v47, %v6229_v0  ;;  %v4359_v0 = vld [vmem:[#allocation13 + $0x1a0] sm:$0xff] }
 0x73b   :  { %22537 = vmatmul.mubr.msk.f32.gmra.mrb[46].mxu0 %vm341_vm1, %v3742_v44  ;;  %v22881_v50 = vpop.f32.mrb[46].mxu1 }
 0x73c   :  { %v6533_v51 = vpop.f32.mrb[47].mxu1  ;;  %22557 = vmatprep.mubr.msk.f32.mxu0 %vm341_vm1, %v4041_v49 }
 0x73d   :  { %v29024_v53 = vpack.c.bf16 %v22881_v50, %v6533_v51  ;;  %v4360_v50 = vld [vmem:[#allocation13 + $0x1a8] sm:$0xff]  ;;  %v4361_v51 = vld [vmem:[#allocation13 + $0x1b0] sm:$0xff] }
 0x73f   :  { %22558 = vmatmul.mubr.msk.f32.vlgmr.msra.gmra.mrb[32].mxu0 %vm341_vm1, %v4042_v52  ;;  %v22884_v56 = vpop.f32.mrb[48].mxu1 }
 0x740   :  { %25754 = vmatpush3.bf16.msra.mxu0 %v28963_v1  ;;  %v6543_v57 = vpop.f32.mrb[49].mxu1  ;;  %22560 = vmatprep.mubr.msk.f32.mxu0 %vm341_vm1, %v4043_v54 }
 0x741   :  { %25756 = vmatprep.subr.bf16.mxu0 %v28968_v45  ;;  %v29030_v59 = vpack.c.bf16 %v22884_v56, %v6543_v57  ;;  %v4362_v56 = vld [vmem:[#allocation13 + $0x1b8] sm:$0xff] }
 0x743   :  { %22561 = vmatmul.mubr.msk.f32.gmra.mrb[34].mxu0 %vm341_vm1, %v4044_v58  ;;  %v22923_v62 = vpop.f32.mrb[50].mxu1  ;;  %v4363_v58 = vld [vmem:[#allocation13 + $0x1c0] sm:$0xff] }
 0x744   :  { %25758 = vmatpush3.bf16.msra.mxu0 %v28968_v45  ;;  %v6847_v63 = vpop.f32.mrb[51].mxu1  ;;  %22563 = vmatprep.mubr.msk.f32.mxu0 %vm341_vm1, %v4045_v61  ;;  %v4365_v61 = vld [vmem:[#allocation13 + $0x1d0] sm:$0xff] }
 0x745   :  { %25764 = vmatprep.subr.bf16.mxu0 %v28972_v55  ;;  %v29036_v1 = vpack.c.bf16 %v22923_v62, %v6847_v63  ;;  %v4366_v62 = vld [vmem:[#allocation13 + $0x1d8] sm:$0xff]  ;;  %v4367_v63 = vld [vmem:[#allocation13 + $0x1e0] sm:$0xff] }
 0x747   :  { %22564 = vmatmul.mubr.msk.f32.gmra.mrb[36].mxu0 %vm341_vm1, %v4046_v2  ;;  %v22926_v5 = vpop.f32.mrb[52].mxu1  ;;  %v4368_v2 = vld [vmem:[#allocation13 + $0x1e8] sm:$0xff] }
 0x748   :  { %v6857_v6 = vpop.f32.mrb[53].mxu1  ;;  %22566 = vmatprep.mubr.msk.f32.mxu0 %vm341_vm1, %v4047_v4  ;;  %v4369_v4 = vld [vmem:[#allocation13 + $0x1f0] sm:$0xff] }
 0x749   :  { %v29040_v9 = vpack.c.bf16 %v22926_v5, %v6857_v6  ;;  %v4370_v5 = vld [vmem:[#allocation13 + $0x1f8] sm:$0xff]  ;;  %v4669_v6 = vld [vmem:[#allocation13 + $0x200] sm:$0xff] }
 0x74b   :  { %22567 = vmatmul.mubr.msk.f32.gmra.mrb[38].mxu0 %vm341_vm1, %v4048_v7  ;;  %v22965_v45 = vpop.f32.mrb[54].mxu1  ;;  %v4670_v7 = vld [vmem:[#allocation13 + $0x208] sm:$0xff] }
 0x74c   :  { %v7161_v11 = vpop.f32.mrb[55].mxu1  ;;  %22569 = vmatprep.mubr.msk.f32.mxu0 %vm341_vm1, %v4049_v10  ;;  %v4671_v10 = vld [vmem:[#allocation13 + $0x210] sm:$0xff] }
 0x74d   :  { %v29044_v14 = vpack.c.bf16 %v22965_v45, %v7161_v11  ;;  %v4672_v45 = vld [vmem:[#allocation13 + $0x218] sm:$0xff]  ;;  %v4673_v11 = vld [vmem:[#allocation13 + $0x220] sm:$0xff] }
 0x74f   :  { %22570 = vmatmul.mubr.msk.f32.gmra.mrb[40].mxu0 %vm341_vm1, %v4050_v12  ;;  %v22968_v16 = vpop.f32.mrb[56].mxu1  ;;  %v4674_v12 = vld [vmem:[#allocation13 + $0x228] sm:$0xff] }
 0x750   :  { %v7171_v17 = vpop.f32.mrb[57].mxu1  ;;  %22572 = vmatprep.mubr.msk.f32.mxu0 %vm341_vm1, %v4051_v15  ;;  %v4675_v15 = vld [vmem:[#allocation13 + $0x230] sm:$0xff] }
 0x751   :  { %v29048_v20 = vpack.c.bf16 %v22968_v16, %v7171_v17  ;;  %v4677_v16 = vld [vmem:[#allocation13 + $0x240] sm:$0xff]  ;;  %v4678_v17 = vld [vmem:[#allocation13 + $0x248] sm:$0xff] }
 0x753   :  { %22573 = vmatmul.mubr.msk.f32.gmra.mrb[42].mxu0 %vm341_vm1, %v4052_v19  ;;  %v23007_v23 = vpop.f32.mrb[58].mxu1  ;;  %v4679_v19 = vld [vmem:[#allocation13 + $0x250] sm:$0xff] }
 0x754   :  { %v7475_v22 = vpop.f32.mrb[59].mxu1  ;;  %22575 = vmatprep.mubr.msk.f32.mxu0 %vm341_vm1, %v4053_v21  ;;  %v4681_v21 = vld [vmem:[#allocation13 + $0x260] sm:$0xff] }
 0x755   :  { %v29052_v29 = vpack.c.bf16 %v23007_v23, %v7475_v22  ;;  %v4682_v23 = vld [vmem:[#allocation13 + $0x268] sm:$0xff]  ;;  %v4683_v22 = vld [vmem:[#allocation13 + $0x270] sm:$0xff] }
 0x757   :  { %22576 = vmatmul.mubr.msk.f32.gmra.mrb[44].mxu0 %vm341_vm1, %v4054_v27  ;;  %v23010_v31 = vpop.f32.mrb[60].mxu1  ;;  %v4684_v27 = vld [vmem:[#allocation13 + $0x278] sm:$0xff] }
 0x758   :  { %v7485_v32 = vpop.f32.mrb[61].mxu1  ;;  %22578 = vmatprep.mubr.msk.f32.mxu0 %vm341_vm1, %v4055_v30  ;;  %v4983_v30 = vld [vmem:[#allocation13 + $0x280] sm:$0xff] }
 0x759   :  { %v29056_v26 = vpack.c.bf16 %v23010_v31, %v7485_v32  ;;  %v4984_v31 = vld [vmem:[#allocation13 + $0x288] sm:$0xff]  ;;  %v4985_v32 = vld [vmem:[#allocation13 + $0x290] sm:$0xff] }
 0x75b   :  { %22579 = vmatmul.mubr.msk.f32.gmra.mrb[46].mxu0 %vm341_vm1, %v4056_v33  ;;  %v23049_v36 = vpop.f32.mrb[62].mxu1  ;;  %v4986_v33 = vld [vmem:[#allocation13 + $0x298] sm:$0xff] }
 0x75c   :  { %v7789_v37 = vpop.f32.mrb[63].mxu1  ;;  %22599 = vmatprep.mubr.msk.f32.mxu0 %vm341_vm1, %v4355_v35  ;;  %v4987_v35 = vld [vmem:[#allocation13 + $0x2a0] sm:$0xff] }
 0x75d   :  { %v29060_v39 = vpack.c.bf16 %v23049_v36, %v7789_v37  ;;  %v4988_v36 = vld [vmem:[#allocation13 + $0x2a8] sm:$0xff]  ;;  %v4989_v37 = vld [vmem:[#allocation13 + $0x2b0] sm:$0xff] }
 0x75f   :  { %22600 = vmatmul.mubr.msk.f32.vlgmr.msra.gmra.mrb[32].mxu0 %vm341_vm1, %v4356_v38  ;;  %v23052_v41 = vpop.f32.mrb[64].mxu1  ;;  %v4991_v38 = vld [vmem:[#allocation13 + $0x2c0] sm:$0xff] }
 0x760   :  { %25766 = vmatpush3.bf16.msra.mxu0 %v28972_v55  ;;  %v7799_v42 = vpop.f32.mrb[65].mxu1  ;;  %22602 = vmatprep.mubr.msk.f32.mxu0 %vm341_vm1, %v4357_v40  ;;  %v4992_v40 = vld [vmem:[#allocation13 + $0x2c8] sm:$0xff] }
 0x761   :  { %25768 = vmatprep.subr.bf16.mxu0 %v28976_v60  ;;  %v29066_v47 = vpack.c.bf16 %v23052_v41, %v7799_v42  ;;  %v4993_v41 = vld [vmem:[#allocation13 + $0x2d0] sm:$0xff]  ;;  %v4995_v42 = vld [vmem:[#allocation13 + $0x2e0] sm:$0xff] }
 0x763   :  { %22603 = vmatmul.mubr.msk.f32.gmra.mrb[34].mxu0 %vm341_vm1, %v4358_v46  ;;  %v23091_v44 = vpop.f32.mrb[66].mxu1  ;;  %v4996_v46 = vld [vmem:[#allocation13 + $0x2e8] sm:$0xff] }
 0x764   :  { %25770 = vmatpush3.bf16.msra.mxu0 %v28976_v60  ;;  %v8103_v49 = vpop.f32.mrb[67].mxu1  ;;  %22605 = vmatprep.mubr.msk.f32.mxu0 %vm341_vm1, %v4359_v0  ;;  %v4364_v60 = vld [vmem:[#allocation13 + $0x1c8] sm:$0xff]  ;;  %v4997_v0 = vld [vmem:[#allocation13 + $0x2f0] sm:$0xff] }
 0x765   :  { %25776 = vmatprep.subr.bf16.mxu0 %v28980_v3  ;;  %v29072_v55 = vpack.c.bf16 %v23091_v44, %v8103_v49  ;;  %v4998_v44 = vld [vmem:[#allocation13 + $0x2f8] sm:$0xff]  ;;  %v5297_v49 = vld [vmem:[#allocation13 + $0x300] sm:$0xff] }
 0x767   :  { %22606 = vmatmul.mubr.msk.f32.gmra.mrb[36].mxu0 %vm341_vm1, %v4360_v50  ;;  %v23094_v52 = vpop.f32.mrb[68].mxu1  ;;  %v5298_v50 = vld [vmem:[#allocation13 + $0x308] sm:$0xff] }
 0x768   :  { %v8113_v54 = vpop.f32.mrb[69].mxu1  ;;  %22608 = vmatprep.mubr.msk.f32.mxu0 %vm341_vm1, %v4361_v51  ;;  %v5299_v51 = vld [vmem:[#allocation13 + $0x310] sm:$0xff] }
 0x769   :  { %v29076_v57 = vpack.c.bf16 %v23094_v52, %v8113_v54  ;;  %v5300_v52 = vld [vmem:[#allocation13 + $0x318] sm:$0xff]  ;;  %v5301_v54 = vld [vmem:[#allocation13 + $0x320] sm:$0xff] }
 0x76b   :  { %22609 = vmatmul.mubr.msk.f32.gmra.mrb[38].mxu0 %vm341_vm1, %v4362_v56  ;;  %v5302_v56 = vld [vmem:[#allocation13 + $0x328] sm:$0xff] }
 0x76c   :  { %22611 = vmatprep.mubr.msk.f32.mxu0 %vm341_vm1, %v4363_v58  ;;  %v5303_v58 = vld [vmem:[#allocation13 + $0x330] sm:$0xff] }
 0x76f   :  { %22612 = vmatmul.mubr.msk.f32.gmra.mrb[40].mxu0 %vm341_vm1, %v4364_v60  ;;  %v5305_v60 = vld [vmem:[#allocation13 + $0x340] sm:$0xff] }
 0x770   :  { %22614 = vmatprep.mubr.msk.f32.mxu0 %vm341_vm1, %v4365_v61  ;;  %v5306_v61 = vld [vmem:[#allocation13 + $0x348] sm:$0xff] }
 0x773   :  { %22615 = vmatmul.mubr.msk.f32.gmra.mrb[42].mxu0 %vm341_vm1, %v4366_v62  ;;  %v5307_v62 = vld [vmem:[#allocation13 + $0x350] sm:$0xff] }
 0x774   :  { %22617 = vmatprep.mubr.msk.f32.mxu0 %vm341_vm1, %v4367_v63  ;;  %v5309_v63 = vld [vmem:[#allocation13 + $0x360] sm:$0xff] }
 0x777   :  { %22618 = vmatmul.mubr.msk.f32.gmra.mrb[44].mxu0 %vm341_vm1, %v4368_v2  ;;  %v5310_v2 = vld [vmem:[#allocation13 + $0x368] sm:$0xff] }
 0x778   :  { %22620 = vmatprep.mubr.msk.f32.mxu0 %vm341_vm1, %v4369_v4  ;;  %v5311_v4 = vld [vmem:[#allocation13 + $0x370] sm:$0xff] }
 0x77b   :  { %22621 = vmatmul.mubr.msk.f32.gmra.mrb[46].mxu0 %vm341_vm1, %v4370_v5  ;;  %v5312_v5 = vld [vmem:[#allocation13 + $0x378] sm:$0xff] }
 0x77c   :  { %22641 = vmatprep.mubr.msk.f32.mxu0 %vm341_vm1, %v4669_v6  ;;  %v5611_v6 = vld [vmem:[#allocation13 + $0x380] sm:$0xff] }
 0x77f   :  { %22642 = vmatmul.mubr.msk.f32.vlgmr.msra.gmra.mrb[32].mxu0 %vm341_vm1, %v4670_v7  ;;  %v5612_v7 = vld [vmem:[#allocation13 + $0x388] sm:$0xff] }
 0x780   :  { %25778 = vmatpush3.bf16.msra.mxu0 %v28980_v3  ;;  %22644 = vmatprep.mubr.msk.f32.mxu0 %vm341_vm1, %v4671_v10  ;;  %v4676_v3 = vld [vmem:[#allocation13 + $0x238] sm:$0xff]  ;;  %v5613_v10 = vld [vmem:[#allocation13 + $0x390] sm:$0xff] }
 0x781   :  { %25780 = vmatprep.subr.bf16.mxu0 %v28984_v8 }
 0x783   :  { %22645 = vmatmul.mubr.msk.f32.gmra.mrb[34].mxu0 %vm341_vm1, %v4672_v45  ;;  %v5614_v45 = vld [vmem:[#allocation13 + $0x398] sm:$0xff] }
 0x784   :  { %25782 = vmatpush3.bf16.msra.mxu0 %v28984_v8  ;;  %22647 = vmatprep.mubr.msk.f32.mxu0 %vm341_vm1, %v4673_v11  ;;  %v4680_v8 = vld [vmem:[#allocation13 + $0x258] sm:$0xff]  ;;  %v5615_v11 = vld [vmem:[#allocation13 + $0x3a0] sm:$0xff] }
 0x785   :  { %25788 = vmatprep.subr.bf16.mxu0 %v28988_v13 }
 0x787   :  { %22648 = vmatmul.mubr.msk.f32.gmra.mrb[36].mxu0 %vm341_vm1, %v4674_v12  ;;  %v5616_v12 = vld [vmem:[#allocation13 + $0x3a8] sm:$0xff] }
 0x788   :  { %22650 = vmatprep.mubr.msk.f32.mxu0 %vm341_vm1, %v4675_v15  ;;  %v5617_v15 = vld [vmem:[#allocation13 + $0x3b0] sm:$0xff] }
 0x78b   :  { %22651 = vmatmul.mubr.msk.f32.gmra.mrb[38].mxu0 %vm341_vm1, %v4676_v3  ;;  %v5619_v3 = vld [vmem:[#allocation13 + $0x3c0] sm:$0xff] }
 0x78c   :  { %22653 = vmatprep.mubr.msk.f32.mxu0 %vm341_vm1, %v4677_v16  ;;  %v5620_v16 = vld [vmem:[#allocation13 + $0x3c8] sm:$0xff] }
 0x78f   :  { %22654 = vmatmul.mubr.msk.f32.gmra.mrb[40].mxu0 %vm341_vm1, %v4678_v17  ;;  %v5621_v17 = vld [vmem:[#allocation13 + $0x3d0] sm:$0xff] }
 0x790   :  { %22656 = vmatprep.mubr.msk.f32.mxu0 %vm341_vm1, %v4679_v19  ;;  %v5623_v19 = vld [vmem:[#allocation13 + $0x3e0] sm:$0xff] }
 0x793   :  { %22657 = vmatmul.mubr.msk.f32.gmra.mrb[42].mxu0 %vm341_vm1, %v4680_v8  ;;  %v5624_v8 = vld [vmem:[#allocation13 + $0x3e8] sm:$0xff] }
 0x794   :  { %22659 = vmatprep.mubr.msk.f32.mxu0 %vm341_vm1, %v4681_v21  ;;  %v5625_v21 = vld [vmem:[#allocation13 + $0x3f0] sm:$0xff] }
 0x797   :  { %22660 = vmatmul.mubr.msk.f32.gmra.mrb[44].mxu0 %vm341_vm1, %v4682_v23  ;;  %v5626_v23 = vld [vmem:[#allocation13 + $0x3f8] sm:$0xff] }
 0x798   :  { %22662 = vmatprep.mubr.msk.f32.mxu0 %vm341_vm1, %v4683_v22  ;;  %v5925_v22 = vld [vmem:[#allocation13 + $0x400] sm:$0xff] }
 0x79b   :  { %22663 = vmatmul.mubr.msk.f32.gmra.mrb[46].mxu0 %vm341_vm1, %v4684_v27  ;;  %v5926_v27 = vld [vmem:[#allocation13 + $0x408] sm:$0xff] }
 0x79c   :  { %22683 = vmatprep.mubr.msk.f32.mxu0 %vm341_vm1, %v4983_v30  ;;  %v5927_v30 = vld [vmem:[#allocation13 + $0x410] sm:$0xff] }
 0x79f   :  { %22684 = vmatmul.mubr.msk.f32.vlgmr.msra.gmra.mrb[32].mxu0 %vm341_vm1, %v4984_v31  ;;  %v5928_v31 = vld [vmem:[#allocation13 + $0x418] sm:$0xff] }
 0x7a0   :  { %25790 = vmatpush3.bf16.msra.mxu0 %v28988_v13  ;;  %22686 = vmatprep.mubr.msk.f32.mxu0 %vm341_vm1, %v4985_v32  ;;  %v4990_v13 = vld [vmem:[#allocation13 + $0x2b8] sm:$0xff]  ;;  %v5929_v32 = vld [vmem:[#allocation13 + $0x420] sm:$0xff] }
 0x7a1   :  { %25792 = vmatprep.subr.bf16.mxu0 %v28994_v18 }
 0x7a3   :  { %22687 = vmatmul.mubr.msk.f32.gmra.mrb[34].mxu0 %vm341_vm1, %v4986_v33  ;;  %v5930_v33 = vld [vmem:[#allocation13 + $0x428] sm:$0xff] }
 0x7a4   :  { %25794 = vmatpush3.bf16.msra.mxu0 %v28994_v18  ;;  %22689 = vmatprep.mubr.msk.f32.mxu0 %vm341_vm1, %v4987_v35  ;;  %v4994_v18 = vld [vmem:[#allocation13 + $0x2d8] sm:$0xff]  ;;  %v5931_v35 = vld [vmem:[#allocation13 + $0x430] sm:$0xff] }
 0x7a5   :  { %25800 = vmatprep.subr.bf16.mxu0 %v29000_v25 }
 0x7a7   :  { %22690 = vmatmul.mubr.msk.f32.gmra.mrb[36].mxu0 %vm341_vm1, %v4988_v36  ;;  %v5933_v36 = vld [vmem:[#allocation13 + $0x440] sm:$0xff] }
 0x7a8   :  { %22692 = vmatprep.mubr.msk.f32.mxu0 %vm341_vm1, %v4989_v37  ;;  %v5934_v37 = vld [vmem:[#allocation13 + $0x448] sm:$0xff] }
 0x7ab   :  { %22693 = vmatmul.mubr.msk.f32.gmra.mrb[38].mxu0 %vm341_vm1, %v4990_v13  ;;  %v5935_v13 = vld [vmem:[#allocation13 + $0x450] sm:$0xff] }
 0x7ac   :  { %22695 = vmatprep.mubr.msk.f32.mxu0 %vm341_vm1, %v4991_v38  ;;  %v5937_v38 = vld [vmem:[#allocation13 + $0x460] sm:$0xff] }
 0x7af   :  { %22696 = vmatmul.mubr.msk.f32.gmra.mrb[40].mxu0 %vm341_vm1, %v4992_v40  ;;  %v5938_v40 = vld [vmem:[#allocation13 + $0x468] sm:$0xff] }
 0x7b0   :  { %22698 = vmatprep.mubr.msk.f32.mxu0 %vm341_vm1, %v4993_v41  ;;  %v5939_v41 = vld [vmem:[#allocation13 + $0x470] sm:$0xff] }
 0x7b3   :  { %22699 = vmatmul.mubr.msk.f32.gmra.mrb[42].mxu0 %vm341_vm1, %v4994_v18  ;;  %v5940_v18 = vld [vmem:[#allocation13 + $0x478] sm:$0xff] }
 0x7b4   :  { %22701 = vmatprep.mubr.msk.f32.mxu0 %vm341_vm1, %v4995_v42  ;;  %v6239_v42 = vld [vmem:[#allocation13 + $0x480] sm:$0xff] }
 0x7b7   :  { %22702 = vmatmul.mubr.msk.f32.gmra.mrb[44].mxu0 %vm341_vm1, %v4996_v46  ;;  %v6240_v46 = vld [vmem:[#allocation13 + $0x488] sm:$0xff] }
 0x7b8   :  { %22704 = vmatprep.mubr.msk.f32.mxu0 %vm341_vm1, %v4997_v0  ;;  %v6241_v0 = vld [vmem:[#allocation13 + $0x490] sm:$0xff] }
 0x7bb   :  { %22705 = vmatmul.mubr.msk.f32.gmra.mrb[46].mxu0 %vm341_vm1, %v4998_v44  ;;  %v6242_v44 = vld [vmem:[#allocation13 + $0x498] sm:$0xff] }
 0x7bc   :  { %22725 = vmatprep.mubr.msk.f32.mxu0 %vm341_vm1, %v5297_v49  ;;  %v6243_v49 = vld [vmem:[#allocation13 + $0x4a0] sm:$0xff] }
 0x7bf   :  { %22726 = vmatmul.mubr.msk.f32.vlgmr.msra.gmra.mrb[32].mxu0 %vm341_vm1, %v5298_v50  ;;  %v6244_v50 = vld [vmem:[#allocation13 + $0x4a8] sm:$0xff] }
 0x7c0   :  { %25802 = vmatpush3.bf16.msra.mxu0 %v29000_v25  ;;  %22728 = vmatprep.mubr.msk.f32.mxu0 %vm341_vm1, %v5299_v51  ;;  %v5304_v25 = vld [vmem:[#allocation13 + $0x338] sm:$0xff]  ;;  %v6245_v51 = vld [vmem:[#allocation13 + $0x4b0] sm:$0xff] }
 0x7c1   :  { %25804 = vmatprep.subr.bf16.mxu0 %v29004_v24 }
 0x7c3   :  { %22729 = vmatmul.mubr.msk.f32.gmra.mrb[34].mxu0 %vm341_vm1, %v5300_v52  ;;  %v6247_v52 = vld [vmem:[#allocation13 + $0x4c0] sm:$0xff] }
 0x7c4   :  { %25806 = vmatpush3.bf16.msra.mxu0 %v29004_v24  ;;  %22731 = vmatprep.mubr.msk.f32.mxu0 %vm341_vm1, %v5301_v54  ;;  %v5308_v24 = vld [vmem:[#allocation13 + $0x358] sm:$0xff]  ;;  %v6248_v54 = vld [vmem:[#allocation13 + $0x4c8] sm:$0xff] }
 0x7c5   :  { %25812 = vmatprep.subr.bf16.mxu0 %v29008_v34 }
 0x7c7   :  { %22732 = vmatmul.mubr.msk.f32.gmra.mrb[36].mxu0 %vm341_vm1, %v5302_v56  ;;  %v6249_v56 = vld [vmem:[#allocation13 + $0x4d0] sm:$0xff] }
 0x7c8   :  { %22734 = vmatprep.mubr.msk.f32.mxu0 %vm341_vm1, %v5303_v58  ;;  %v6251_v58 = vld [vmem:[#allocation13 + $0x4e0] sm:$0xff] }
 0x7cb   :  { %22735 = vmatmul.mubr.msk.f32.gmra.mrb[38].mxu0 %vm341_vm1, %v5304_v25  ;;  %v6252_v25 = vld [vmem:[#allocation13 + $0x4e8] sm:$0xff] }
 0x7cc   :  { %22737 = vmatprep.mubr.msk.f32.mxu0 %vm341_vm1, %v5305_v60  ;;  %v6253_v60 = vld [vmem:[#allocation13 + $0x4f0] sm:$0xff] }
 0x7cf   :  { %22738 = vmatmul.mubr.msk.f32.gmra.mrb[40].mxu0 %vm341_vm1, %v5306_v61  ;;  %v6254_v61 = vld [vmem:[#allocation13 + $0x4f8] sm:$0xff] }
 0x7d0   :  { %22740 = vmatprep.mubr.msk.f32.mxu0 %vm341_vm1, %v5307_v62  ;;  %v6553_v62 = vld [vmem:[#allocation13 + $0x500] sm:$0xff] }
 0x7d3   :  { %22741 = vmatmul.mubr.msk.f32.gmra.mrb[42].mxu0 %vm341_vm1, %v5308_v24  ;;  %v6554_v24 = vld [vmem:[#allocation13 + $0x508] sm:$0xff] }
 0x7d4   :  { %22743 = vmatprep.mubr.msk.f32.mxu0 %vm341_vm1, %v5309_v63  ;;  %v6555_v63 = vld [vmem:[#allocation13 + $0x510] sm:$0xff] }
 0x7d7   :  { %22744 = vmatmul.mubr.msk.f32.gmra.mrb[44].mxu0 %vm341_vm1, %v5310_v2  ;;  %v6556_v2 = vld [vmem:[#allocation13 + $0x518] sm:$0xff] }
 0x7d8   :  { %22746 = vmatprep.mubr.msk.f32.mxu0 %vm341_vm1, %v5311_v4  ;;  %v6557_v4 = vld [vmem:[#allocation13 + $0x520] sm:$0xff] }
 0x7db   :  { %22747 = vmatmul.mubr.msk.f32.gmra.mrb[46].mxu0 %vm341_vm1, %v5312_v5  ;;  %v6558_v5 = vld [vmem:[#allocation13 + $0x528] sm:$0xff] }
 0x7dc   :  { %22767 = vmatprep.mubr.msk.f32.mxu0 %vm341_vm1, %v5611_v6  ;;  %v6559_v6 = vld [vmem:[#allocation13 + $0x530] sm:$0xff] }
 0x7df   :  { %22768 = vmatmul.mubr.msk.f32.vlgmr.msra.gmra.mrb[32].mxu0 %vm341_vm1, %v5612_v7  ;;  %v6561_v7 = vld [vmem:[#allocation13 + $0x540] sm:$0xff] }
 0x7e0   :  { %25814 = vmatpush3.bf16.msra.mxu0 %v29008_v34  ;;  %22770 = vmatprep.mubr.msk.f32.mxu0 %vm341_vm1, %v5613_v10  ;;  %v5618_v34 = vld [vmem:[#allocation13 + $0x3b8] sm:$0xff]  ;;  %v6562_v10 = vld [vmem:[#allocation13 + $0x548] sm:$0xff] }
 0x7e1   :  { %25816 = vmatprep.subr.bf16.mxu0 %v29012_v28 }
 0x7e3   :  { %22771 = vmatmul.mubr.msk.f32.gmra.mrb[34].mxu0 %vm341_vm1, %v5614_v45  ;;  %v6563_v45 = vld [vmem:[#allocation13 + $0x550] sm:$0xff] }
 0x7e4   :  { %25818 = vmatpush3.bf16.msra.mxu0 %v29012_v28  ;;  %22773 = vmatprep.mubr.msk.f32.mxu0 %vm341_vm1, %v5615_v11  ;;  %v5622_v28 = vld [vmem:[#allocation13 + $0x3d8] sm:$0xff]  ;;  %v6565_v11 = vld [vmem:[#allocation13 + $0x560] sm:$0xff] }
 0x7e5   :  { %25824 = vmatprep.subr.bf16.mxu0 %v29016_v43 }
 0x7e7   :  { %22774 = vmatmul.mubr.msk.f32.gmra.mrb[36].mxu0 %vm341_vm1, %v5616_v12  ;;  %v6566_v12 = vld [vmem:[#allocation13 + $0x568] sm:$0xff] }
 0x7e8   :  { %22776 = vmatprep.mubr.msk.f32.mxu0 %vm341_vm1, %v5617_v15  ;;  %v6567_v15 = vld [vmem:[#allocation13 + $0x570] sm:$0xff] }
 0x7eb   :  { %22777 = vmatmul.mubr.msk.f32.gmra.mrb[38].mxu0 %vm341_vm1, %v5618_v34  ;;  %v6568_v34 = vld [vmem:[#allocation13 + $0x578] sm:$0xff] }
 0x7ec   :  { %22779 = vmatprep.mubr.msk.f32.mxu0 %vm341_vm1, %v5619_v3  ;;  %v6867_v3 = vld [vmem:[#allocation13 + $0x580] sm:$0xff] }
 0x7ef   :  { %22780 = vmatmul.mubr.msk.f32.gmra.mrb[40].mxu0 %vm341_vm1, %v5620_v16  ;;  %v6868_v16 = vld [vmem:[#allocation13 + $0x588] sm:$0xff] }
 0x7f0   :  { %22782 = vmatprep.mubr.msk.f32.mxu0 %vm341_vm1, %v5621_v17  ;;  %v6869_v17 = vld [vmem:[#allocation13 + $0x590] sm:$0xff] }
 0x7f3   :  { %22783 = vmatmul.mubr.msk.f32.gmra.mrb[42].mxu0 %vm341_vm1, %v5622_v28  ;;  %v6870_v28 = vld [vmem:[#allocation13 + $0x598] sm:$0xff] }
 0x7f4   :  { %22785 = vmatprep.mubr.msk.f32.mxu0 %vm341_vm1, %v5623_v19  ;;  %v6871_v19 = vld [vmem:[#allocation13 + $0x5a0] sm:$0xff] }
 0x7f7   :  { %22786 = vmatmul.mubr.msk.f32.gmra.mrb[44].mxu0 %vm341_vm1, %v5624_v8  ;;  %v6872_v8 = vld [vmem:[#allocation13 + $0x5a8] sm:$0xff] }
 0x7f8   :  { %22788 = vmatprep.mubr.msk.f32.mxu0 %vm341_vm1, %v5625_v21  ;;  %v6873_v21 = vld [vmem:[#allocation13 + $0x5b0] sm:$0xff] }
 0x7fb   :  { %22789 = vmatmul.mubr.msk.f32.gmra.mrb[46].mxu0 %vm341_vm1, %v5626_v23  ;;  %v6875_v23 = vld [vmem:[#allocation13 + $0x5c0] sm:$0xff] }
 0x7fc   :  { %22809 = vmatprep.mubr.msk.f32.mxu0 %vm341_vm1, %v5925_v22  ;;  %v6876_v22 = vld [vmem:[#allocation13 + $0x5c8] sm:$0xff] }
 0x7ff   :  { %22810 = vmatmul.mubr.msk.f32.vlgmr.msra.gmra.mrb[32].mxu0 %vm341_vm1, %v5926_v27  ;;  %v6877_v27 = vld [vmem:[#allocation13 + $0x5d0] sm:$0xff] }
 0x800   :  { %25826 = vmatpush3.bf16.msra.mxu0 %v29016_v43  ;;  %22812 = vmatprep.mubr.msk.f32.mxu0 %vm341_vm1, %v5927_v30  ;;  %v5932_v43 = vld [vmem:[#allocation13 + $0x438] sm:$0xff]  ;;  %v6879_v30 = vld [vmem:[#allocation13 + $0x5e0] sm:$0xff] }
 0x801   :  { %25828 = vmatprep.subr.bf16.mxu0 %v29020_v48 }
 0x803   :  { %22813 = vmatmul.mubr.msk.f32.gmra.mrb[34].mxu0 %vm341_vm1, %v5928_v31  ;;  %v6880_v31 = vld [vmem:[#allocation13 + $0x5e8] sm:$0xff] }
 0x804   :  { %25830 = vmatpush3.bf16.msra.mxu0 %v29020_v48  ;;  %22815 = vmatprep.mubr.msk.f32.mxu0 %vm341_vm1, %v5929_v32  ;;  %v5936_v48 = vld [vmem:[#allocation13 + $0x458] sm:$0xff]  ;;  %v6881_v32 = vld [vmem:[#allocation13 + $0x5f0] sm:$0xff] }
 0x805   :  { %25836 = vmatprep.subr.bf16.mxu0 %v29024_v53 }
 0x807   :  { %22816 = vmatmul.mubr.msk.f32.gmra.mrb[36].mxu0 %vm341_vm1, %v5930_v33  ;;  %v6882_v33 = vld [vmem:[#allocation13 + $0x5f8] sm:$0xff] }
 0x808   :  { %22818 = vmatprep.mubr.msk.f32.mxu0 %vm341_vm1, %v5931_v35  ;;  %v7181_v35 = vld [vmem:[#allocation13 + $0x600] sm:$0xff] }
 0x80b   :  { %22819 = vmatmul.mubr.msk.f32.gmra.mrb[38].mxu0 %vm341_vm1, %v5932_v43  ;;  %v7182_v43 = vld [vmem:[#allocation13 + $0x608] sm:$0xff] }
 0x80c   :  { %22821 = vmatprep.mubr.msk.f32.mxu0 %vm341_vm1, %v5933_v36  ;;  %v7183_v36 = vld [vmem:[#allocation13 + $0x610] sm:$0xff] }
 0x80f   :  { %22822 = vmatmul.mubr.msk.f32.gmra.mrb[40].mxu0 %vm341_vm1, %v5934_v37  ;;  %v7184_v37 = vld [vmem:[#allocation13 + $0x618] sm:$0xff] }
 0x810   :  { %22824 = vmatprep.mubr.msk.f32.mxu0 %vm341_vm1, %v5935_v13  ;;  %v7185_v13 = vld [vmem:[#allocation13 + $0x620] sm:$0xff] }
 0x813   :  { %22825 = vmatmul.mubr.msk.f32.gmra.mrb[42].mxu0 %vm341_vm1, %v5936_v48  ;;  %v7186_v48 = vld [vmem:[#allocation13 + $0x628] sm:$0xff] }
 0x814   :  { %22827 = vmatprep.mubr.msk.f32.mxu0 %vm341_vm1, %v5937_v38  ;;  %v7187_v38 = vld [vmem:[#allocation13 + $0x630] sm:$0xff] }
 0x817   :  { %22828 = vmatmul.mubr.msk.f32.gmra.mrb[44].mxu0 %vm341_vm1, %v5938_v40  ;;  %v7189_v40 = vld [vmem:[#allocation13 + $0x640] sm:$0xff] }
 0x818   :  { %22830 = vmatprep.mubr.msk.f32.mxu0 %vm341_vm1, %v5939_v41  ;;  %v7190_v41 = vld [vmem:[#allocation13 + $0x648] sm:$0xff] }
 0x81b   :  { %22831 = vmatmul.mubr.msk.f32.gmra.mrb[46].mxu0 %vm341_vm1, %v5940_v18  ;;  %v7191_v18 = vld [vmem:[#allocation13 + $0x650] sm:$0xff] }
 0x81c   :  { %22851 = vmatprep.mubr.msk.f32.mxu0 %vm341_vm1, %v6239_v42  ;;  %v7193_v42 = vld [vmem:[#allocation13 + $0x660] sm:$0xff] }
 0x81f   :  { %22852 = vmatmul.mubr.msk.f32.vlgmr.msra.gmra.mrb[32].mxu0 %vm341_vm1, %v6240_v46  ;;  %v7194_v46 = vld [vmem:[#allocation13 + $0x668] sm:$0xff] }
 0x820   :  { %25838 = vmatpush3.bf16.msra.mxu0 %v29024_v53  ;;  %22854 = vmatprep.mubr.msk.f32.mxu0 %vm341_vm1, %v6241_v0  ;;  %v6246_v53 = vld [vmem:[#allocation13 + $0x4b8] sm:$0xff]  ;;  %v7195_v0 = vld [vmem:[#allocation13 + $0x670] sm:$0xff] }
 0x821   :  { %25840 = vmatprep.subr.bf16.mxu0 %v29030_v59 }
 0x823   :  { %22855 = vmatmul.mubr.msk.f32.gmra.mrb[34].mxu0 %vm341_vm1, %v6242_v44  ;;  %v7196_v44 = vld [vmem:[#allocation13 + $0x678] sm:$0xff] }
 0x824   :  { %25842 = vmatpush3.bf16.msra.mxu0 %v29030_v59  ;;  %22857 = vmatprep.mubr.msk.f32.mxu0 %vm341_vm1, %v6243_v49  ;;  %v6250_v59 = vld [vmem:[#allocation13 + $0x4d8] sm:$0xff]  ;;  %v7495_v49 = vld [vmem:[#allocation13 + $0x680] sm:$0xff] }
 0x825   :  { %25848 = vmatprep.subr.bf16.mxu0 %v29036_v1 }
 0x827   :  { %22858 = vmatmul.mubr.msk.f32.gmra.mrb[36].mxu0 %vm341_vm1, %v6244_v50  ;;  %v7496_v50 = vld [vmem:[#allocation13 + $0x688] sm:$0xff] }
 0x828   :  { %22860 = vmatprep.mubr.msk.f32.mxu0 %vm341_vm1, %v6245_v51  ;;  %v7497_v51 = vld [vmem:[#allocation13 + $0x690] sm:$0xff] }
 0x82b   :  { %22861 = vmatmul.mubr.msk.f32.gmra.mrb[38].mxu0 %vm341_vm1, %v6246_v53  ;;  %v7498_v53 = vld [vmem:[#allocation13 + $0x698] sm:$0xff] }
 0x82c   :  { %22863 = vmatprep.mubr.msk.f32.mxu0 %vm341_vm1, %v6247_v52  ;;  %v7499_v52 = vld [vmem:[#allocation13 + $0x6a0] sm:$0xff] }
 0x82f   :  { %22864 = vmatmul.mubr.msk.f32.gmra.mrb[40].mxu0 %vm341_vm1, %v6248_v54  ;;  %v7500_v54 = vld [vmem:[#allocation13 + $0x6a8] sm:$0xff] }
 0x830   :  { %22866 = vmatprep.mubr.msk.f32.mxu0 %vm341_vm1, %v6249_v56  ;;  %v7501_v56 = vld [vmem:[#allocation13 + $0x6b0] sm:$0xff] }
 0x833   :  { %22867 = vmatmul.mubr.msk.f32.gmra.mrb[42].mxu0 %vm341_vm1, %v6250_v59  ;;  %v7503_v59 = vld [vmem:[#allocation13 + $0x6c0] sm:$0xff] }
 0x834   :  { %22869 = vmatprep.mubr.msk.f32.mxu0 %vm341_vm1, %v6251_v58  ;;  %v7504_v58 = vld [vmem:[#allocation13 + $0x6c8] sm:$0xff] }
 0x837   :  { %22870 = vmatmul.mubr.msk.f32.gmra.mrb[44].mxu0 %vm341_vm1, %v6252_v25  ;;  %v7505_v25 = vld [vmem:[#allocation13 + $0x6d0] sm:$0xff] }
 0x838   :  { %22872 = vmatprep.mubr.msk.f32.mxu0 %vm341_vm1, %v6253_v60  ;;  %v7507_v60 = vld [vmem:[#allocation13 + $0x6e0] sm:$0xff] }
 0x83b   :  { %22873 = vmatmul.mubr.msk.f32.gmra.mrb[46].mxu0 %vm341_vm1, %v6254_v61  ;;  %v7508_v61 = vld [vmem:[#allocation13 + $0x6e8] sm:$0xff] }
 0x83c   :  { %22893 = vmatprep.mubr.msk.f32.mxu0 %vm341_vm1, %v6553_v62  ;;  %v7509_v62 = vld [vmem:[#allocation13 + $0x6f0] sm:$0xff] }
 0x83f   :  { %22894 = vmatmul.mubr.msk.f32.vlgmr.msra.gmra.mrb[32].mxu0 %vm341_vm1, %v6554_v24  ;;  %v7510_v24 = vld [vmem:[#allocation13 + $0x6f8] sm:$0xff] }
 0x840   :  { %25850 = vmatpush3.bf16.msra.mxu0 %v29036_v1  ;;  %22896 = vmatprep.mubr.msk.f32.mxu0 %vm341_vm1, %v6555_v63  ;;  %v6560_v1 = vld [vmem:[#allocation13 + $0x538] sm:$0xff]  ;;  %v7809_v63 = vld [vmem:[#allocation13 + $0x700] sm:$0xff] }
 0x841   :  { %25852 = vmatprep.subr.bf16.mxu0 %v29040_v9 }
 0x843   :  { %22897 = vmatmul.mubr.msk.f32.gmra.mrb[34].mxu0 %vm341_vm1, %v6556_v2  ;;  %v7810_v2 = vld [vmem:[#allocation13 + $0x708] sm:$0xff] }
 0x844   :  { %25854 = vmatpush3.bf16.msra.mxu0 %v29040_v9  ;;  %22899 = vmatprep.mubr.msk.f32.mxu0 %vm341_vm1, %v6557_v4  ;;  %v6564_v9 = vld [vmem:[#allocation13 + $0x558] sm:$0xff]  ;;  %v7811_v4 = vld [vmem:[#allocation13 + $0x710] sm:$0xff] }
 0x845   :  { %25860 = vmatprep.subr.bf16.mxu0 %v29044_v14 }
 0x847   :  { %22900 = vmatmul.mubr.msk.f32.gmra.mrb[36].mxu0 %vm341_vm1, %v6558_v5  ;;  %v7812_v5 = vld [vmem:[#allocation13 + $0x718] sm:$0xff] }
 0x848   :  { %22902 = vmatprep.mubr.msk.f32.mxu0 %vm341_vm1, %v6559_v6  ;;  %v7813_v6 = vld [vmem:[#allocation13 + $0x720] sm:$0xff] }
 0x84b   :  { %22903 = vmatmul.mubr.msk.f32.gmra.mrb[38].mxu0 %vm341_vm1, %v6560_v1  ;;  %v7814_v1 = vld [vmem:[#allocation13 + $0x728] sm:$0xff] }
 0x84c   :  { %22905 = vmatprep.mubr.msk.f32.mxu0 %vm341_vm1, %v6561_v7  ;;  %v7815_v7 = vld [vmem:[#allocation13 + $0x730] sm:$0xff] }
 0x84f   :  { %22906 = vmatmul.mubr.msk.f32.gmra.mrb[40].mxu0 %vm341_vm1, %v6562_v10  ;;  %v7816_v10 = vld [vmem:[#allocation13 + $0x738] sm:$0xff] }
 0x850   :  { %22908 = vmatprep.mubr.msk.f32.mxu0 %vm341_vm1, %v6563_v45  ;;  %v7818_v45 = vld [vmem:[#allocation13 + $0x748] sm:$0xff] }
 0x853   :  { %22909 = vmatmul.mubr.msk.f32.gmra.mrb[42].mxu0 %vm341_vm1, %v6564_v9  ;;  %v7819_v9 = vld [vmem:[#allocation13 + $0x750] sm:$0xff] }
 0x854   :  { %22911 = vmatprep.mubr.msk.f32.mxu0 %vm341_vm1, %v6565_v11  ;;  %v7821_v11 = vld [vmem:[#allocation13 + $0x760] sm:$0xff] }
 0x857   :  { %22912 = vmatmul.mubr.msk.f32.gmra.mrb[44].mxu0 %vm341_vm1, %v6566_v12  ;;  %v7822_v12 = vld [vmem:[#allocation13 + $0x768] sm:$0xff] }
 0x858   :  { %22914 = vmatprep.mubr.msk.f32.mxu0 %vm341_vm1, %v6567_v15  ;;  %v7823_v15 = vld [vmem:[#allocation13 + $0x770] sm:$0xff] }
 0x85b   :  { %22915 = vmatmul.mubr.msk.f32.gmra.mrb[46].mxu0 %vm341_vm1, %v6568_v34  ;;  %v7824_v34 = vld [vmem:[#allocation13 + $0x778] sm:$0xff] }
 0x85c   :  { %22935 = vmatprep.mubr.msk.f32.mxu0 %vm341_vm1, %v6867_v3  ;;  %v8123_v3 = vld [vmem:[#allocation13 + $0x780] sm:$0xff] }
 0x85f   :  { %22936 = vmatmul.mubr.msk.f32.vlgmr.msra.gmra.mrb[32].mxu0 %vm341_vm1, %v6868_v16  ;;  %v8124_v16 = vld [vmem:[#allocation13 + $0x788] sm:$0xff] }
 0x860   :  { %25862 = vmatpush3.bf16.msra.mxu0 %v29044_v14  ;;  %22938 = vmatprep.mubr.msk.f32.mxu0 %vm341_vm1, %v6869_v17  ;;  %v6874_v14 = vld [vmem:[#allocation13 + $0x5b8] sm:$0xff]  ;;  %v8125_v17 = vld [vmem:[#allocation13 + $0x790] sm:$0xff] }
 0x861   :  { %25864 = vmatprep.subr.bf16.mxu0 %v29048_v20 }
 0x863   :  { %22939 = vmatmul.mubr.msk.f32.gmra.mrb[34].mxu0 %vm341_vm1, %v6870_v28  ;;  %v8126_v28 = vld [vmem:[#allocation13 + $0x798] sm:$0xff] }
 0x864   :  { %25866 = vmatpush3.bf16.msra.mxu0 %v29048_v20  ;;  %22941 = vmatprep.mubr.msk.f32.mxu0 %vm341_vm1, %v6871_v19  ;;  %v6878_v20 = vld [vmem:[#allocation13 + $0x5d8] sm:$0xff]  ;;  %v8127_v19 = vld [vmem:[#allocation13 + $0x7a0] sm:$0xff] }
 0x865   :  { %25872 = vmatprep.subr.bf16.mxu0 %v29052_v29 }
 0x867   :  { %22942 = vmatmul.mubr.msk.f32.gmra.mrb[36].mxu0 %vm341_vm1, %v6872_v8  ;;  %v8128_v8 = vld [vmem:[#allocation13 + $0x7a8] sm:$0xff] }
 0x868   :  { %22944 = vmatprep.mubr.msk.f32.mxu0 %vm341_vm1, %v6873_v21  ;;  %v8129_v21 = vld [vmem:[#allocation13 + $0x7b0] sm:$0xff] }
 0x86b   :  { %22945 = vmatmul.mubr.msk.f32.gmra.mrb[38].mxu0 %vm341_vm1, %v6874_v14  ;;  %v8130_v14 = vld [vmem:[#allocation13 + $0x7b8] sm:$0xff] }
 0x86c   :  { %22947 = vmatprep.mubr.msk.f32.mxu0 %vm341_vm1, %v6875_v23  ;;  %v8131_v23 = vld [vmem:[#allocation13 + $0x7c0] sm:$0xff] }
 0x86f   :  { %22948 = vmatmul.mubr.msk.f32.gmra.mrb[40].mxu0 %vm341_vm1, %v6876_v22  ;;  %v8132_v22 = vld [vmem:[#allocation13 + $0x7c8] sm:$0xff] }
 0x870   :  { %22950 = vmatprep.mubr.msk.f32.mxu0 %vm341_vm1, %v6877_v27  ;;  %v8133_v27 = vld [vmem:[#allocation13 + $0x7d0] sm:$0xff] }
 0x873   :  { %22951 = vmatmul.mubr.msk.f32.gmra.mrb[42].mxu0 %vm341_vm1, %v6878_v20  ;;  %v8134_v20 = vld [vmem:[#allocation13 + $0x7d8] sm:$0xff] }
 0x874   :  { %22953 = vmatprep.mubr.msk.f32.mxu0 %vm341_vm1, %v6879_v30  ;;  %v8135_v30 = vld [vmem:[#allocation13 + $0x7e0] sm:$0xff] }
 0x877   :  { %22954 = vmatmul.mubr.msk.f32.gmra.mrb[44].mxu0 %vm341_vm1, %v6880_v31  ;;  %v8136_v31 = vld [vmem:[#allocation13 + $0x7e8] sm:$0xff] }
 0x878   :  { %22956 = vmatprep.mubr.msk.f32.mxu0 %vm341_vm1, %v6881_v32  ;;  %v8137_v32 = vld [vmem:[#allocation13 + $0x7f0] sm:$0xff] }
 0x87b   :  { %22957 = vmatmul.mubr.msk.f32.gmra.mrb[46].mxu0 %vm341_vm1, %v6882_v33  ;;  %v8138_v33 = vld [vmem:[#allocation13 + $0x7f8] sm:$0xff] }
 0x87c   :  { %22977 = vmatprep.mubr.msk.f32.mxu0 %vm341_vm1, %v7181_v35  ;;  %v19391_v35 = vld [vmem:[#allocation16] ss:$0 sm:$0xff] }
 0x87f   :  { %22978 = vmatmul.mubr.msk.f32.vlgmr.msra.gmra.mrb[32].mxu0 %vm341_vm1, %v7182_v43 }
 0x880   :  { %25874 = vmatpush3.bf16.msra.mxu0 %v29052_v29  ;;  %22980 = vmatprep.mubr.msk.f32.mxu0 %vm341_vm1, %v7183_v36  ;;  %v7188_v29 = vld [vmem:[#allocation13 + $0x638] sm:$0xff] }
 0x881   :  { %25876 = vmatprep.subr.bf16.mxu0 %v29056_v26 }
 0x883   :  { %22981 = vmatmul.mubr.msk.f32.gmra.mrb[34].mxu0 %vm341_vm1, %v7184_v37 }
 0x884   :  { %25878 = vmatpush3.bf16.msra.mxu0 %v29056_v26  ;;  %22983 = vmatprep.mubr.msk.f32.mxu0 %vm341_vm1, %v7185_v13  ;;  %v7192_v26 = vld [vmem:[#allocation13 + $0x658] sm:$0xff] }
 0x885   :  { %25884 = vmatprep.subr.bf16.mxu0 %v29060_v39 }
 0x887   :  { %22984 = vmatmul.mubr.msk.f32.gmra.mrb[36].mxu0 %vm341_vm1, %v7186_v48 }
 0x888   :  { %22986 = vmatprep.mubr.msk.f32.mxu0 %vm341_vm1, %v7187_v38 }
 0x88b   :  { %22987 = vmatmul.mubr.msk.f32.gmra.mrb[38].mxu0 %vm341_vm1, %v7188_v29 }
 0x88c   :  { %22989 = vmatprep.mubr.msk.f32.mxu0 %vm341_vm1, %v7189_v40  ;;  %v8545_v40 = vld [vmem:[#allocation22] sm:$0xff] }
 0x88d   :  { %23127 = vmatprep.subr.mxu1 %v8545_v40 }
 0x88e   :  { %23128 = vmatpush3.msra.mxu1 %v8545_v40 }
 0x88f   :  { %22990 = vmatmul.mubr.msk.f32.gmra.mrb[40].mxu0 %vm341_vm1, %v7190_v41 }
 0x890   :  { %22992 = vmatprep.mubr.msk.f32.mxu0 %vm341_vm1, %v7191_v18 }
 0x893   :  { %22993 = vmatmul.mubr.msk.f32.gmra.mrb[42].mxu0 %vm341_vm1, %v7192_v26 }
 0x894   :  { %22995 = vmatprep.mubr.msk.f32.mxu0 %vm341_vm1, %v7193_v42 }
 0x897   :  { %22996 = vmatmul.mubr.msk.f32.gmra.mrb[44].mxu0 %vm341_vm1, %v7194_v46 }
 0x898   :  { %22998 = vmatprep.mubr.msk.f32.mxu0 %vm341_vm1, %v7195_v0 }
 0x89b   :  { %22999 = vmatmul.mubr.msk.f32.gmra.mrb[46].mxu0 %vm341_vm1, %v7196_v44 }
 0x89c   :  { %23019 = vmatprep.mubr.msk.f32.mxu0 %vm341_vm1, %v7495_v49 }
 0x89f   :  { %23020 = vmatmul.mubr.msk.f32.vlgmr.msra.gmra.mrb[32].mxu0 %vm341_vm1, %v7496_v50 }
 0x8a0   :  { %25886 = vmatpush3.bf16.msra.mxu0 %v29060_v39  ;;  %23022 = vmatprep.mubr.msk.f32.mxu0 %vm341_vm1, %v7497_v51  ;;  %v7502_v39 = vld [vmem:[#allocation13 + $0x6b8] sm:$0xff] }
 0x8a1   :  { %25888 = vmatprep.subr.bf16.mxu0 %v29066_v47 }
 0x8a3   :  { %23023 = vmatmul.mubr.msk.f32.gmra.mrb[34].mxu0 %vm341_vm1, %v7498_v53 }
 0x8a4   :  { %25890 = vmatpush3.bf16.msra.mxu0 %v29066_v47  ;;  %23025 = vmatprep.mubr.msk.f32.mxu0 %vm341_vm1, %v7499_v52  ;;  %v7506_v47 = vld [vmem:[#allocation13 + $0x6d8] sm:$0xff] }
 0x8a5   :  { %25896 = vmatprep.subr.bf16.mxu0 %v29072_v55 }
 0x8a7   :  { %23026 = vmatmul.mubr.msk.f32.gmra.mrb[36].mxu0 %vm341_vm1, %v7500_v54 }
 0x8a8   :  { %23028 = vmatprep.mubr.msk.f32.mxu0 %vm341_vm1, %v7501_v56 }
 0x8ab   :  { %23029 = vmatmul.mubr.msk.f32.gmra.mrb[38].mxu0 %vm341_vm1, %v7502_v39 }
 0x8ac   :  { %23031 = vmatprep.mubr.msk.f32.mxu0 %vm341_vm1, %v7503_v59 }
 0x8af   :  { %23032 = vmatmul.mubr.msk.f32.gmra.mrb[40].mxu0 %vm341_vm1, %v7504_v58 }
 0x8b0   :  { %23034 = vmatprep.mubr.msk.f32.mxu0 %vm341_vm1, %v7505_v25 }
 0x8b3   :  { %23035 = vmatmul.mubr.msk.f32.gmra.mrb[42].mxu0 %vm341_vm1, %v7506_v47 }
 0x8b4   :  { %23037 = vmatprep.mubr.msk.f32.mxu0 %vm341_vm1, %v7507_v60 }
 0x8b7   :  { %23038 = vmatmul.mubr.msk.f32.gmra.mrb[44].mxu0 %vm341_vm1, %v7508_v61 }
 0x8b8   :  { %23040 = vmatprep.mubr.msk.f32.mxu0 %vm341_vm1, %v7509_v62 }
 0x8bb   :  { %23041 = vmatmul.mubr.msk.f32.gmra.mrb[46].mxu0 %vm341_vm1, %v7510_v24 }
 0x8bc   :  { %23061 = vmatprep.mubr.msk.f32.mxu0 %vm341_vm1, %v7809_v63 }
 0x8bf   :  { %23062 = vmatmul.mubr.msk.f32.vlgmr.msra.gmra.mrb[32].mxu0 %vm341_vm1, %v7810_v2 }
 0x8c0   :  { %25898 = vmatpush3.bf16.msra.mxu0 %v29072_v55  ;;  %23064 = vmatprep.mubr.msk.f32.mxu0 %vm341_vm1, %v7811_v4  ;;  %v7817_v55 = vld [vmem:[#allocation13 + $0x740] sm:$0xff] }
 0x8c1   :  { %25900 = vmatprep.subr.bf16.mxu0 %v29076_v57 }
 0x8c3   :  { %23065 = vmatmul.mubr.msk.f32.gmra.mrb[34].mxu0 %vm341_vm1, %v7812_v5 }
 0x8c4   :  { %25902 = vmatpush3.bf16.msra.mxu0 %v29076_v57  ;;  %23067 = vmatprep.mubr.msk.f32.mxu0 %vm341_vm1, %v7813_v6  ;;  %v7820_v57 = vld [vmem:[#allocation13 + $0x758] sm:$0xff] }
 0x8c7   :  { %23068 = vmatmul.mubr.msk.f32.gmra.mrb[36].mxu0 %vm341_vm1, %v7814_v1 }
 0x8c8   :  { %23070 = vmatprep.mubr.msk.f32.mxu0 %vm341_vm1, %v7815_v7 }
 0x8cb   :  { %23071 = vmatmul.mubr.msk.f32.gmra.mrb[38].mxu0 %vm341_vm1, %v7816_v10 }
 0x8cc   :  { %23073 = vmatprep.mubr.msk.f32.mxu0 %vm341_vm1, %v7817_v55 }
 0x8cf   :  { %23074 = vmatmul.mubr.msk.f32.gmra.mrb[40].mxu0 %vm341_vm1, %v7818_v45 }
 0x8d0   :  { %23076 = vmatprep.mubr.msk.f32.mxu0 %vm341_vm1, %v7819_v9 }
 0x8d3   :  { %23077 = vmatmul.mubr.msk.f32.gmra.mrb[42].mxu0 %vm341_vm1, %v7820_v57 }
 0x8d4   :  { %23079 = vmatprep.mubr.msk.f32.mxu0 %vm341_vm1, %v7821_v11 }
 0x8d7   :  { %23080 = vmatmul.mubr.msk.f32.gmra.mrb[44].mxu0 %vm341_vm1, %v7822_v12 }
 0x8d8   :  { %23082 = vmatprep.mubr.msk.f32.mxu0 %vm341_vm1, %v7823_v15 }
 0x8db   :  { %23083 = vmatmul.mubr.msk.f32.gmra.mrb[46].mxu0 %vm341_vm1, %v7824_v34 }
 0x8dc   :  { %23103 = vmatprep.mubr.msk.f32.mxu0 %vm341_vm1, %v8123_v3 }
 0x8df   :  { %23104 = vmatmul.mubr.msk.f32.vlgmr.msra.gmra.mrb[32].mxu0 %vm341_vm1, %v8124_v16 }
 0x8e0   :  { %23106 = vmatprep.mubr.msk.f32.mxu0 %vm341_vm1, %v8125_v17 }
 0x8e3   :  { %23107 = vmatmul.mubr.msk.f32.gmra.mrb[34].mxu0 %vm341_vm1, %v8126_v28 }
 0x8e4   :  { %23109 = vmatprep.mubr.msk.f32.mxu0 %vm341_vm1, %v8127_v19 }
 0x8e7   :  { %23110 = vmatmul.mubr.msk.f32.gmra.mrb[36].mxu0 %vm341_vm1, %v8128_v8 }
 0x8e8   :  { %23112 = vmatprep.mubr.msk.f32.mxu0 %vm341_vm1, %v8129_v21 }
 0x8eb   :  { %23113 = vmatmul.mubr.msk.f32.gmra.mrb[38].mxu0 %vm341_vm1, %v8130_v14 }
 0x8ec   :  { %23115 = vmatprep.mubr.msk.f32.mxu0 %vm341_vm1, %v8131_v23 }
 0x8ef   :  { %23116 = vmatmul.mubr.msk.f32.gmra.mrb[40].mxu0 %vm341_vm1, %v8132_v22 }
 0x8f0   :  { %23118 = vmatprep.mubr.msk.f32.mxu0 %vm341_vm1, %v8133_v27 }
 0x8f3   :  { %23119 = vmatmul.mubr.msk.f32.gmra.mrb[42].mxu0 %vm341_vm1, %v8134_v20 }
 0x8f4   :  { %23121 = vmatprep.mubr.msk.f32.mxu0 %vm341_vm1, %v8135_v30 }
 0x8f7   :  { %23122 = vmatmul.mubr.msk.f32.gmra.mrb[44].mxu0 %vm341_vm1, %v8136_v31 }
 0x8f8   :  { %23124 = vmatprep.mubr.msk.f32.mxu0 %vm341_vm1, %v8137_v32 }
 0x8fb   :  { %23125 = vmatmul.mubr.msk.f32.gmra.mrb[46].mxu0 %vm341_vm1, %v8138_v33  ;;  %v29349_v33 = vld [vmem:[#allocation22 + $0x8] sm:$0xff] }
 0x8fc   :  { %23281 = vmatprep.subr.mxu1 %v29349_v33 }
 0x9b2   :  { %v23105_v43 = vpop.f32.mrb[32].mxu0 }
 0x9b3   :  { %v29322_v36 = vadd.f32 %v23105_v43, %v19391_v35  ;;  %v8253_v37 = vpop.f32.mrb[33].mxu0 }
 0x9b4   :  { %v29324_v13 = vadd.f32 %v19391_v35, %v8253_v37 }
 0x9b5   :  { %v8349_v48 = vsel %vm419_vm2, %v29322_v36, 0.0 }
 0x9b6   :  { %v8348_v38 = vsel %vm419_vm2, %v29324_v13, 0.0  ;;  %v23108_v29 = vpop.f32.mrb[34].mxu0 }
 0x9b7   :  { %v8350_v41 = vadd.f32 %v8349_v48, %v8348_v38  ;;  %v8263_v18 = vpop.f32.mrb[35].mxu0  ;;  %v29330_v26 = vadd.f32 %v23108_v29, %v19391_v35 }
 0x9b8   :  { %v29332_v42 = vadd.f32 %v19391_v35, %v8263_v18 }
 0x9b9   :  { %v8353_v50 = vsel %vm419_vm2, %v29330_v26, 0.0 }
 0x9ba   :  { %v8351_v46 = vsel %vm419_vm2, %v29332_v42, 0.0  ;;  %v23111_v0 = vpop.f32.mrb[36].mxu0 }
 0x9bb   :  { %v8352_v44 = vadd.f32 %v8351_v46, %v8350_v41  ;;  %v8273_v49 = vpop.f32.mrb[37].mxu0  ;;  %v26439_v51 = vadd.f32 %v23111_v0, %v19391_v35 }
 0x9bc   :  { %v26440_v53 = vadd.f32 %v19391_v35, %v8273_v49 }
 0x9bd   :  { %v8354_v52 = vadd.f32 %v8353_v50, %v8352_v44  ;;  %v8357_v58 = vsel %vm419_vm2, %v26439_v51, 0.0 }
 0x9be   :  { %v8355_v54 = vsel %vm419_vm2, %v26440_v53, 0.0  ;;  %v23114_v56 = vpop.f32.mrb[38].mxu0 }
 0x9bf   :  { %v8356_v39 = vadd.f32 %v8355_v54, %v8354_v52  ;;  %v8283_v59 = vpop.f32.mrb[39].mxu0  ;;  %v26441_v25 = vadd.f32 %v23114_v56, %v19391_v35 }
 0x9c0   :  { %v26442_v47 = vadd.f32 %v19391_v35, %v8283_v59 }
 0x9c1   :  { %v8358_v60 = vadd.f32 %v8357_v58, %v8356_v39  ;;  %v8361_v2 = vsel %vm419_vm2, %v26441_v25, 0.0 }
 0x9c2   :  { %v8359_v61 = vsel %vm419_vm2, %v26442_v47, 0.0  ;;  %v23117_v62 = vpop.f32.mrb[40].mxu0 }
 0x9c3   :  { %v8360_v24 = vadd.f32 %v8359_v61, %v8358_v60  ;;  %v8293_v63 = vpop.f32.mrb[41].mxu0  ;;  %v26443_v4 = vadd.f32 %v23117_v62, %v19391_v35 }
 0x9c4   :  { %v26444_v5 = vadd.f32 %v19391_v35, %v8293_v63 }
 0x9c5   :  { %v8362_v6 = vadd.f32 %v8361_v2, %v8360_v24  ;;  %v8365_v45 = vsel %vm419_vm2, %v26443_v4, 0.0 }
 0x9c6   :  { %v8363_v1 = vsel %vm419_vm2, %v26444_v5, 0.0  ;;  %v23120_v7 = vpop.f32.mrb[42].mxu0 }
 0x9c7   :  { %v8364_v10 = vadd.f32 %v8363_v1, %v8362_v6  ;;  %v8303_v55 = vpop.f32.mrb[43].mxu0  ;;  %v26445_v9 = vadd.f32 %v23120_v7, %v19391_v35 }
 0x9c8   :  { %v26446_v57 = vadd.f32 %v19391_v35, %v8303_v55 }
 0x9c9   :  { %v8366_v11 = vadd.f32 %v8365_v45, %v8364_v10  ;;  %v8369_v16 = vsel %vm419_vm2, %v26445_v9, 0.0 }
 0x9ca   :  { %v8367_v12 = vsel %vm419_vm2, %v26446_v57, 0.0  ;;  %v23123_v15 = vpop.f32.mrb[44].mxu0 }
 0x9cb   :  { %v8368_v34 = vadd.f32 %v8367_v12, %v8366_v11  ;;  %v8313_v3 = vpop.f32.mrb[45].mxu0  ;;  %v26447_v17 = vadd.f32 %v23123_v15, %v19391_v35 }
 0x9cc   :  { %v26448_v28 = vadd.f32 %v19391_v35, %v8313_v3 }
 0x9cd   :  { %v8370_v19 = vadd.f32 %v8369_v16, %v8368_v34  ;;  %v8373_v22 = vsel %vm419_vm2, %v26447_v17, 0.0 }
 0x9ce   :  { %v8371_v8 = vsel %vm419_vm2, %v26448_v28, 0.0  ;;  %v23126_v21 = vpop.f32.mrb[46].mxu0 }
 0x9cf   :  { %v8372_v14 = vadd.f32 %v8371_v8, %v8370_v19  ;;  %v8323_v23 = vpop.f32.mrb[47].mxu0  ;;  %v26449_v27 = vadd.f32 %v23126_v21, %v19391_v35 }
 0x9d0   :  { %v26450_v20 = vadd.f32 %v19391_v35, %v8323_v23 }
 0x9d1   :  { %v8374_v30 = vadd.f32 %v8373_v22, %v8372_v14  ;;  %v8377_v43 = vsel %vm419_vm2, %v26449_v27, 0.0 }
 0x9d2   :  { %v8375_v31 = vsel %vm419_vm2, %v26450_v20, 0.0 }
 0x9d3   :  { %v8376_v32 = vadd.f32 %v8375_v31, %v8374_v30 }
 0x9d5   :  { %v8378_v37 = vadd.f32 %v8377_v43, %v8376_v32 }
 0x9d7   :  { %v8379_v48 = vrot.slane %v8378_v37, 4 }
 0x9d9   :  { %v8380_v38 = vadd.f32 %v8379_v48, %v8378_v37 }
 0x9db   :  { %v8381_v29 = vrot.slane %v8380_v38, 2 }
 0x9dd   :  { %v8382_v40 = vadd.f32 %v8381_v29, %v8380_v38 }
 0x9df   :  { %v8383_v41 = vrot.slane %v8382_v40, 1 }
 0x9e1   :  { %v8384_v18 = vadd.f32 %v8383_v41, %v8382_v40 }
 0x9e3   :  { %v8386_v46 = vmul.f32 0.0078125, %v8384_v18 }
 0x9e5   :  { %v29354_v35 = vsub.f32 %v29324_v13, %v8386_v46  ;;  %v29357_v0 = vsub.f32 %v29322_v36, %v8386_v46  ;;  %v29360_v44 = vsub.f32 %v29332_v42, %v8386_v46  ;;  %v29363_v49 = vsub.f32 %v29330_v26, %v8386_v46 }
 0x9e6   :  { %v29365_v50 = vsub.f32 %v26440_v53, %v8386_v46  ;;  %v29367_v52 = vsub.f32 %v26439_v51, %v8386_v46  ;;  %v29369_v54 = vsub.f32 %v26442_v47, %v8386_v46  ;;  %v29371_v56 = vsub.f32 %v26441_v25, %v8386_v46 }
 0x9e7   :  { %v29373_v39 = vsub.f32 %v26444_v5, %v8386_v46  ;;  %v29375_v13 = vsub.f32 %v26443_v4, %v8386_v46  ;;  %v29377_v36 = vsub.f32 %v26446_v57, %v8386_v46  ;;  %v29379_v59 = vsub.f32 %v26445_v9, %v8386_v46 }
 0x9e8   :  { %v29381_v42 = vsub.f32 %v26448_v28, %v8386_v46  ;;  %v29383_v26 = vsub.f32 %v26447_v17, %v8386_v46  ;;  %v29385_v53 = vsub.f32 %v26450_v20, %v8386_v46  ;;  %v29387_v51 = vsub.f32 %v26449_v27, %v8386_v46 }
 0x9e9   :  { %v8403_v58 = vmul.f32 %v29354_v35, %v29354_v35  ;;  %v8404_v25 = vmul.f32 %v29357_v0, %v29357_v0  ;;  %v8405_v47 = vmul.f32 %v29360_v44, %v29360_v44  ;;  %v8406_v60 = vmul.f32 %v29363_v49, %v29363_v49 }
 0x9ea   :  { %v8407_v63 = vmul.f32 %v29365_v50, %v29365_v50  ;;  %v8408_v5 = vmul.f32 %v29367_v52, %v29367_v52  ;;  %v8409_v7 = vmul.f32 %v29369_v54, %v29369_v54  ;;  %v8410_v45 = vmul.f32 %v29371_v56, %v29371_v56 }
 0x9eb   :  { %v8419_v61 = vsel %vm419_vm2, %v8403_v58, 0.0  ;;  %v8420_v62 = vsel %vm419_vm2, %v8404_v25, 0.0  ;;  %v8422_v2 = vsel %vm419_vm2, %v8405_v47, 0.0  ;;  %v8424_v6 = vsel %vm419_vm2, %v8406_v60, 0.0 }
 0x9ec   :  { %v8421_v24 = vadd.f32 %v8420_v62, %v8419_v61  ;;  %v8426_v10 = vsel %vm419_vm2, %v8407_v63, 0.0  ;;  %v8428_v9 = vsel %vm419_vm2, %v8408_v5, 0.0  ;;  %v8411_v11 = vmul.f32 %v29373_v39, %v29373_v39 }
 0x9ed   :  { %v8430_v12 = vsel %vm419_vm2, %v8409_v7, 0.0  ;;  %v8412_v34 = vmul.f32 %v29375_v13, %v29375_v13  ;;  %v8432_v3 = vsel %vm419_vm2, %v8410_v45, 0.0  ;;  %v8413_v17 = vmul.f32 %v29377_v36, %v29377_v36  ;;  %v29441_v7 = vld [vmem:[#allocation18] ss:$0 sm:$0xff] }
 0x9ee   :  { %v8423_v4 = vadd.f32 %v8422_v2, %v8421_v24  ;;  %v8434_v28 = vsel %vm419_vm2, %v8411_v11, 0.0  ;;  %v8414_v8 = vmul.f32 %v29379_v59, %v29379_v59  ;;  %v8415_v23 = vmul.f32 %v29381_v42, %v29381_v42 }
 0x9ef   :  { %v8436_v21 = vsel %vm419_vm2, %v8412_v34, 0.0  ;;  %v8438_v22 = vsel %vm419_vm2, %v8413_v17, 0.0  ;;  %v8416_v20 = vmul.f32 %v29383_v26, %v29383_v26  ;;  %v8417_v32 = vmul.f32 %v29385_v53, %v29385_v53 }
 0x9f0   :  { %v8425_v1 = vadd.f32 %v8424_v6, %v8423_v4  ;;  %v8440_v30 = vsel %vm419_vm2, %v8414_v8, 0.0  ;;  %v8442_v43 = vsel %vm419_vm2, %v8415_v23, 0.0  ;;  %v8418_v48 = vmul.f32 %v29387_v51, %v29387_v51 }
 0x9f1   :  { %v8444_v38 = vsel %vm419_vm2, %v8416_v20, 0.0  ;;  %v8446_v40 = vsel %vm419_vm2, %v8417_v32, 0.0 }
 0x9f2   :  { %v8427_v55 = vadd.f32 %v8426_v10, %v8425_v1  ;;  %v8448_v18 = vsel %vm419_vm2, %v8418_v48, 0.0 }
 0x9f4   :  { %v8429_v57 = vadd.f32 %v8428_v9, %v8427_v55 }
 0x9f6   :  { %v8431_v15 = vadd.f32 %v8430_v12, %v8429_v57  ;;  %v19713_v12 = vld [vmem:[#allocation19] ss:$0 sm:$0xff] }
 0x9f8   :  { %v8433_v16 = vadd.f32 %v8432_v3, %v8431_v15 }
 0x9fa   :  { %v8435_v19 = vadd.f32 %v8434_v28, %v8433_v16  ;;  %v9914_v28 = vld [vmem:[#allocation22 + $0x10] sm:$0xff] }
 0x9fc   :  { %v8437_v14 = vadd.f32 %v8436_v21, %v8435_v19 }
 0x9fe   :  { %v8439_v27 = vadd.f32 %v8438_v22, %v8437_v14 }
 0xa00   :  { %v8441_v31 = vadd.f32 %v8440_v30, %v8439_v27 }
 0xa02   :  { %v8443_v37 = vadd.f32 %v8442_v43, %v8441_v31 }
 0xa04   :  { %v8445_v29 = vadd.f32 %v8444_v38, %v8443_v37 }
 0xa06   :  { %v8447_v41 = vadd.f32 %v8446_v40, %v8445_v29 }
 0xa08   :  { %v8449_v46 = vadd.f32 %v8448_v18, %v8447_v41 }
 0xa0a   :  { %v8450_v58 = vrot.slane %v8449_v46, 4 }
 0xa0c   :  { %v8451_v25 = vadd.f32 %v8450_v58, %v8449_v46 }
 0xa0e   :  { %v8452_v47 = vrot.slane %v8451_v25, 2 }
 0xa10   :  { %v8453_v60 = vadd.f32 %v8452_v47, %v8451_v25 }
 0xa12   :  { %v8454_v61 = vrot.slane %v8453_v60, 1 }
 0xa14   :  { %v8455_v62 = vadd.f32 %v8454_v61, %v8453_v60 }
 0xa16   :  { %v8456_v24 = vmul.f32 0.0078125, %v8455_v62 }
 0xa18   :  { %v8458_v63 = vadd.f32 1e-05, %v8456_v24 }
 0xa1a   :  { %27797 = vrsqrt.f32 %v8458_v63 }
 0xa24   :  { %v27798_v2 = vpop.eup %27797 }
 0xa25   :  { %v8460_v4 = vmul.f32 %v27798_v2, %v29354_v35  ;;  %v8461_v5 = vmul.f32 %v27798_v2, %v29357_v0  ;;  %v8462_v6 = vmul.f32 %v27798_v2, %v29360_v44  ;;  %v8463_v1 = vmul.f32 %v27798_v2, %v29363_v49 }
 0xa26   :  { %v8464_v10 = vmul.f32 %v27798_v2, %v29365_v50  ;;  %v8465_v55 = vmul.f32 %v27798_v2, %v29367_v52  ;;  %v8466_v45 = vmul.f32 %v27798_v2, %v29369_v54  ;;  %v8467_v9 = vmul.f32 %v27798_v2, %v29371_v56 }
 0xa27   :  { %v8468_v57 = vmul.f32 %v27798_v2, %v29373_v39  ;;  %v8469_v35 = vmul.f32 %v27798_v2, %v29375_v13  ;;  %v8470_v0 = vmul.f32 %v27798_v2, %v29377_v36  ;;  %v8471_v44 = vmul.f32 %v27798_v2, %v29379_v59 }
 0xa28   :  { %v8472_v49 = vmul.f32 %v27798_v2, %v29381_v42  ;;  %v8473_v11 = vmul.f32 %v27798_v2, %v29383_v26  ;;  %v8474_v50 = vmul.f32 %v27798_v2, %v29385_v53  ;;  %v8475_v52 = vmul.f32 %v27798_v2, %v29387_v51 }
 0xa29   :  { %v8482_v54 = vmul.f32 %v29441_v7, %v8460_v4  ;;  %v8483_v56 = vmul.f32 %v29441_v7, %v8461_v5  ;;  %v8484_v39 = vmul.f32 %v29441_v7, %v8462_v6  ;;  %v8485_v36 = vmul.f32 %v29441_v7, %v8463_v1  ;;  %v8739_v1 = vld [vmem:[#allocation21] sm:$0xff] }
 0xa2a   :  { %v8486_v59 = vmul.f32 %v29441_v7, %v8464_v10  ;;  %v8487_v53 = vmul.f32 %v29441_v7, %v8465_v55  ;;  %v8488_v3 = vmul.f32 %v29441_v7, %v8466_v45  ;;  %v8489_v19 = vmul.f32 %v29441_v7, %v8467_v9  ;;  %23185 = vmatprep.mubr.f32.mxu0 %v8739_v1 }
 0xa2b   :  { %v8505_v13 = vadd.f32 %v19713_v12, %v8482_v54  ;;  %v8506_v15 = vadd.f32 %v19713_v12, %v8483_v56  ;;  %v8507_v42 = vadd.f32 %v19713_v12, %v8484_v39  ;;  %v8508_v51 = vadd.f32 %v19713_v12, %v8485_v36 }
 0xa2c   :  { %v8509_v16 = vadd.f32 %v19713_v12, %v8486_v59  ;;  %v8510_v8 = vadd.f32 %v19713_v12, %v8487_v53  ;;  %v8490_v14 = vmul.f32 %v29441_v7, %v8468_v57  ;;  %v8511_v23 = vadd.f32 %v19713_v12, %v8488_v3 }
 0xa2d   :  { %v29460_v34 = vmax.f32 %v8505_v13, 0.0  ;;  %v29462_v26 = vmax.f32 %v8506_v15, 0.0  ;;  %v29466_v17 = vmax.f32 %v8507_v42, 0.0  ;;  %v29476_v21 = vmax.f32 %v8508_v51, 0.0 }
 0xa2e   :  { %v29479_v22 = vmax.f32 %v8509_v16, 0.0  ;;  %v8491_v27 = vmul.f32 %v29441_v7, %v8469_v35  ;;  %v29486_v20 = vmax.f32 %v8510_v8, 0.0  ;;  %v8492_v30 = vmul.f32 %v29441_v7, %v8470_v0  ;;  %v8741_v8 = vld [vmem:[#allocation21 + $0x10] sm:$0xff] }
 0xa2f   :  { %23129 = vmatprep.mubr.msk.f32.mxu1 %vm419_vm2, %v29460_v34  ;;  %v8513_v31 = vadd.f32 %v19713_v12, %v8490_v14  ;;  %v29489_v32 = vmax.f32 %v8511_v23, 0.0  ;;  %v8493_v43 = vmul.f32 %v29441_v7, %v8471_v44  ;;  %v8494_v38 = vmul.f32 %v29441_v7, %v8472_v49 }
 0xa30   :  { %23130 = vmatmul.mubr.msk.f32.vlgmr.msra.gmra.mrb[70].mxu1 %vm419_vm2, %v29462_v26  ;;  %v8514_v37 = vadd.f32 %v19713_v12, %v8491_v27  ;;  %v8515_v29 = vadd.f32 %v19713_v12, %v8492_v30  ;;  %v8495_v41 = vmul.f32 %v29441_v7, %v8473_v11  ;;  %v8496_v58 = vmul.f32 %v29441_v7, %v8474_v50  ;;  %v8742_v27 = vld [vmem:[#allocation21 + $0x18] sm:$0xff]  ;;  %v8743_v30 = vld [vmem:[#allocation21 + $0x20] sm:$0xff] }
 0xa31   :  { %23132 = vmatprep.mubr.msk.f32.mxu1 %vm419_vm2, %v29466_v17  ;;  %23282 = vmatpush3.msra.mxu1 %v29349_v33  ;;  %v8512_v33 = vadd.f32 %v19713_v12, %v8489_v19  ;;  %v29499_v40 = vmax.f32 %v8513_v31, 0.0  ;;  %v8516_v18 = vadd.f32 %v19713_v12, %v8493_v43  ;;  %v8517_v25 = vadd.f32 %v19713_v12, %v8494_v38 }
 0xa32   :  { %23435 = vmatprep.subr.mxu1 %v9914_v28  ;;  %v29506_v46 = vmax.f32 %v8514_v37, 0.0  ;;  %v29509_v47 = vmax.f32 %v8515_v29, 0.0  ;;  %v8497_v60 = vmul.f32 %v29441_v7, %v8475_v52  ;;  %v8518_v61 = vadd.f32 %v19713_v12, %v8495_v41  ;;  %v8744_v37 = vld [vmem:[#allocation21 + $0x28] sm:$0xff]  ;;  %v8745_v29 = vld [vmem:[#allocation21 + $0x30] sm:$0xff] }
 0xa33   :  { %v29496_v48 = vmax.f32 %v8512_v33, 0.0  ;;  %v29516_v62 = vmax.f32 %v8516_v18, 0.0  ;;  %v8519_v24 = vadd.f32 %v19713_v12, %v8496_v58  ;;  %v29518_v63 = vmax.f32 %v8517_v25, 0.0  ;;  %v8746_v58 = vld [vmem:[#allocation21 + $0x38] sm:$0xff] }
 0xa34   :  { %23133 = vmatmul.mubr.msk.f32.gmra.mrb[72].mxu1 %vm419_vm2, %v29476_v21  ;;  %v8520_v2 = vadd.f32 %v19713_v12, %v8497_v60  ;;  %v29524_v4 = vmax.f32 %v8518_v61, 0.0  ;;  %v8747_v60 = vld [vmem:[#allocation21 + $0x40] sm:$0xff] }
 0xa35   :  { %23135 = vmatprep.mubr.msk.f32.mxu1 %vm419_vm2, %v29479_v22  ;;  %v29526_v5 = vmax.f32 %v8519_v24, 0.0 }
 0xa36   :  { %v29532_v6 = vmax.f32 %v8520_v2, 0.0  ;;  %v8748_v2 = vld [vmem:[#allocation21 + $0x48] sm:$0xff] }
 0xa38   :  { %23136 = vmatmul.mubr.msk.f32.gmra.mrb[74].mxu1 %vm419_vm2, %v29486_v20 }
 0xa39   :  { %23138 = vmatprep.mubr.msk.f32.mxu1 %vm419_vm2, %v29489_v32 }
 0xa3c   :  { %23139 = vmatmul.mubr.msk.f32.gmra.mrb[76].mxu1 %vm419_vm2, %v29496_v48 }
 0xa3d   :  { %23141 = vmatprep.mubr.msk.f32.mxu1 %vm419_vm2, %v29499_v40 }
 0xa40   :  { %23142 = vmatmul.mubr.msk.f32.gmra.mrb[78].mxu1 %vm419_vm2, %v29506_v46 }
 0xa41   :  { %23144 = vmatprep.mubr.msk.f32.mxu1 %vm419_vm2, %v29509_v47 }
 0xa44   :  { %23145 = vmatmul.mubr.msk.f32.gmra.mrb[80].mxu1 %vm419_vm2, %v29516_v62 }
 0xa45   :  { %23147 = vmatprep.mubr.msk.f32.mxu1 %vm419_vm2, %v29518_v63 }
 0xa48   :  { %23148 = vmatmul.mubr.msk.f32.gmra.mrb[82].mxu1 %vm419_vm2, %v29524_v4 }
 0xa49   :  { %23150 = vmatprep.mubr.msk.f32.mxu1 %vm419_vm2, %v29526_v5 }
 0xa4c   :  { %23151 = vmatmul.mubr.msk.f32.gmra.mrb[84].mxu1 %vm419_vm2, %v29532_v6 }
 0xa4d   :  { %23283 = vmatprep.mubr.msk.f32.mxu1 %vm419_vm2, %v29460_v34 }
 0xa50   :  { %23284 = vmatmul.mubr.msk.f32.vlgmr.msra.gmra.mrb[86].mxu1 %vm419_vm2, %v29462_v26 }
 0xa51   :  { %23286 = vmatprep.mubr.msk.f32.mxu1 %vm419_vm2, %v29466_v17  ;;  %23436 = vmatpush3.msra.mxu1 %v9914_v28  ;;  %v8740_v28 = vld [vmem:[#allocation21 + $0x8] sm:$0xff] }
 0xa54   :  { %23287 = vmatmul.mubr.msk.f32.gmra.mrb[88].mxu1 %vm419_vm2, %v29476_v21 }
 0xa55   :  { %23289 = vmatprep.mubr.msk.f32.mxu1 %vm419_vm2, %v29479_v22 }
 0xa58   :  { %23290 = vmatmul.mubr.msk.f32.gmra.mrb[90].mxu1 %vm419_vm2, %v29486_v20 }
 0xa59   :  { %23292 = vmatprep.mubr.msk.f32.mxu1 %vm419_vm2, %v29489_v32 }
 0xa5c   :  { %23293 = vmatmul.mubr.msk.f32.gmra.mrb[92].mxu1 %vm419_vm2, %v29496_v48 }
 0xa5d   :  { %23295 = vmatprep.mubr.msk.f32.mxu1 %vm419_vm2, %v29499_v40 }
 0xa60   :  { %23296 = vmatmul.mubr.msk.f32.gmra.mrb[94].mxu1 %vm419_vm2, %v29506_v46 }
 0xa61   :  { %23298 = vmatprep.mubr.msk.f32.mxu1 %vm419_vm2, %v29509_v47 }
 0xa64   :  { %23299 = vmatmul.mubr.msk.f32.gmra.mrb[96].mxu1 %vm419_vm2, %v29516_v62 }
 0xa65   :  { %23301 = vmatprep.mubr.msk.f32.mxu1 %vm419_vm2, %v29518_v63 }
 0xa68   :  { %23302 = vmatmul.mubr.msk.f32.gmra.mrb[98].mxu1 %vm419_vm2, %v29524_v4 }
 0xa69   :  { %23304 = vmatprep.mubr.msk.f32.mxu1 %vm419_vm2, %v29526_v5 }
 0xa6c   :  { %23305 = vmatmul.mubr.msk.f32.gmra.mrb[100].mxu1 %vm419_vm2, %v29532_v6 }
 0xa6d   :  { %23437 = vmatprep.mubr.msk.f32.mxu1 %vm419_vm2, %v29460_v34 }
 0xa70   :  { %23438 = vmatmul.mubr.msk.f32.vlgmr.msra.gmra.mrb[102].mxu1 %vm419_vm2, %v29462_v26 }
 0xa71   :  { %23440 = vmatprep.mubr.msk.f32.mxu1 %vm419_vm2, %v29466_v17 }
 0xa74   :  { %23441 = vmatmul.mubr.msk.f32.gmra.mrb[104].mxu1 %vm419_vm2, %v29476_v21 }
 0xa75   :  { %23443 = vmatprep.mubr.msk.f32.mxu1 %vm419_vm2, %v29479_v22 }
 0xa78   :  { %23444 = vmatmul.mubr.msk.f32.gmra.mrb[106].mxu1 %vm419_vm2, %v29486_v20 }
 0xa79   :  { %23446 = vmatprep.mubr.msk.f32.mxu1 %vm419_vm2, %v29489_v32 }
 0xa7c   :  { %23447 = vmatmul.mubr.msk.f32.gmra.mrb[108].mxu1 %vm419_vm2, %v29496_v48 }
 0xa7d   :  { %23449 = vmatprep.mubr.msk.f32.mxu1 %vm419_vm2, %v29499_v40 }
 0xa80   :  { %23450 = vmatmul.mubr.msk.f32.gmra.mrb[110].mxu1 %vm419_vm2, %v29506_v46 }
 0xa81   :  { %23452 = vmatprep.mubr.msk.f32.mxu1 %vm419_vm2, %v29509_v47 }
 0xa84   :  { %23453 = vmatmul.mubr.msk.f32.gmra.mrb[112].mxu1 %vm419_vm2, %v29516_v62 }
 0xa85   :  { %23455 = vmatprep.mubr.msk.f32.mxu1 %vm419_vm2, %v29518_v63 }
 0xa88   :  { %23456 = vmatmul.mubr.msk.f32.gmra.mrb[114].mxu1 %vm419_vm2, %v29524_v4 }
 0xa89   :  { %23458 = vmatprep.mubr.msk.f32.mxu1 %vm419_vm2, %v29526_v5 }
 0xa8c   :  { %23459 = vmatmul.mubr.msk.f32.gmra.mrb[116].mxu1 %vm419_vm2, %v29532_v6 }
 0xb03   :  { %v23131_v7 = vpop.f32.mrb[70].mxu1 }
 0xb04   :  { %v8660_v10 = vpop.f32.mrb[71].mxu1 }
 0xb05   :  { %v25903_v55 = vpack.c.bf16 %v23131_v7, %v8660_v10  ;;  %v8749_v7 = vld [vmem:[#allocation21 + $0x50] sm:$0xff] }
 0xb07   :  { %v23134_v45 = vpop.f32.mrb[72].mxu1  ;;  %25904 = vmatprep.subr.bf16.mxu0 %v25903_v55 }
 0xb08   :  { %v8670_v9 = vpop.f32.mrb[73].mxu1  ;;  %25906 = vmatpush3.bf16.msra.mxu0 %v25903_v55 }
 0xb09   :  { %v25907_v57 = vpack.c.bf16 %v23134_v45, %v8670_v9  ;;  %v8750_v45 = vld [vmem:[#allocation21 + $0x58] sm:$0xff] }
 0xb0b   :  { %v23137_v35 = vpop.f32.mrb[74].mxu1  ;;  %25908 = vmatprep.subr.bf16.mxu0 %v25907_v57 }
 0xb0c   :  { %v8680_v0 = vpop.f32.mrb[75].mxu1  ;;  %25910 = vmatpush3.bf16.msra.mxu0 %v25907_v57  ;;  %v8751_v57 = vld [vmem:[#allocation21 + $0x60] sm:$0xff] }
 0xb0d   :  { %v25911_v44 = vpack.c.bf16 %v23137_v35, %v8680_v0 }
 0xb0f   :  { %v23140_v49 = vpop.f32.mrb[76].mxu1  ;;  %25912 = vmatprep.subr.bf16.mxu0 %v25911_v44 }
 0xb10   :  { %v8690_v11 = vpop.f32.mrb[77].mxu1  ;;  %25914 = vmatpush3.bf16.msra.mxu0 %v25911_v44  ;;  %v8752_v44 = vld [vmem:[#allocation21 + $0x68] sm:$0xff] }
 0xb11   :  { %v25915_v50 = vpack.c.bf16 %v23140_v49, %v8690_v11  ;;  %v8753_v11 = vld [vmem:[#allocation21 + $0x70] sm:$0xff] }
 0xb13   :  { %v23143_v52 = vpop.f32.mrb[78].mxu1  ;;  %25916 = vmatprep.subr.bf16.mxu0 %v25915_v50 }
 0xb14   :  { %v8700_v54 = vpop.f32.mrb[79].mxu1  ;;  %25918 = vmatpush3.bf16.msra.mxu0 %v25915_v50 }
 0xb15   :  { %v25919_v56 = vpack.c.bf16 %v23143_v52, %v8700_v54  ;;  %v8754_v54 = vld [vmem:[#allocation21 + $0x78] sm:$0xff] }
 0xb17   :  { %v23146_v12 = vpop.f32.mrb[80].mxu1  ;;  %25920 = vmatprep.subr.bf16.mxu0 %v25919_v56 }
 0xb18   :  { %v8710_v39 = vpop.f32.mrb[81].mxu1  ;;  %25922 = vmatpush3.bf16.msra.mxu0 %v25919_v56 }
 0xb19   :  { %v25923_v13 = vpack.c.bf16 %v23146_v12, %v8710_v39  ;;  %v8755_v12 = vld [vmem:[#allocation21 + $0x80] sm:$0xff] }
 0xb1b   :  { %v23149_v15 = vpop.f32.mrb[82].mxu1  ;;  %25924 = vmatprep.subr.bf16.mxu0 %v25923_v13 }
 0xb1c   :  { %v8720_v36 = vpop.f32.mrb[83].mxu1  ;;  %25926 = vmatpush3.bf16.msra.mxu0 %v25923_v13 }
 0xb1d   :  { %v25927_v59 = vpack.c.bf16 %v23149_v15, %v8720_v36  ;;  %v8756_v15 = vld [vmem:[#allocation21 + $0x88] sm:$0xff] }
 0xb1f   :  { %v23152_v42 = vpop.f32.mrb[84].mxu1  ;;  %25928 = vmatprep.subr.bf16.mxu0 %v25927_v59 }
 0xb20   :  { %v8730_v53 = vpop.f32.mrb[85].mxu1  ;;  %25930 = vmatpush3.bf16.msra.mxu0 %v25927_v59  ;;  %v8757_v59 = vld [vmem:[#allocation21 + $0x90] sm:$0xff] }
 0xb21   :  { %v25931_v51 = vpack.c.bf16 %v23152_v42, %v8730_v53 }
 0xb23   :  { %25932 = vmatprep.subr.bf16.mxu0 %v25931_v51  ;;  %v23285_v3 = vpop.f32.mrb[86].mxu1 }
 0xb24   :  { %25934 = vmatpush3.bf16.msra.mxu0 %v25931_v51  ;;  %v9320_v16 = vpop.f32.mrb[87].mxu1  ;;  %v8758_v51 = vld [vmem:[#allocation21 + $0x98] sm:$0xff] }
 0xb25   :  { %v25935_v19 = vpack.c.bf16 %v23285_v3, %v9320_v16  ;;  %v8759_v16 = vld [vmem:[#allocation21 + $0xa0] sm:$0xff] }
 0xb27   :  { %23186 = vmatmul.mubr.f32.vlgmr.msra.gmra.mrb[48].mxu0 %v8740_v28  ;;  %v23288_v14 = vpop.f32.mrb[88].mxu1  ;;  %25936 = vmatprep.subr.bf16.mxu0 %v25935_v19 }
 0xb28   :  { %v9330_v23 = vpop.f32.mrb[89].mxu1  ;;  %25938 = vmatpush3.bf16.msra.mxu0 %v25935_v19  ;;  %23188 = vmatprep.mubr.f32.mxu0 %v8741_v8  ;;  %v8760_v8 = vld [vmem:[#allocation21 + $0xa8] sm:$0xff] }
 0xb29   :  { %v25939_v33 = vpack.c.bf16 %v23288_v14, %v9330_v23  ;;  %v8761_v23 = vld [vmem:[#allocation21 + $0xb0] sm:$0xff] }
 0xb2b   :  { %23189 = vmatmul.mubr.f32.gmra.mrb[50].mxu0 %v8742_v27  ;;  %v23291_v31 = vpop.f32.mrb[90].mxu1  ;;  %25940 = vmatprep.subr.bf16.mxu0 %v25939_v33 }
 0xb2c   :  { %v9340_v43 = vpop.f32.mrb[91].mxu1  ;;  %25942 = vmatpush3.bf16.msra.mxu0 %v25939_v33  ;;  %23191 = vmatprep.mubr.f32.mxu0 %v8743_v30  ;;  %v8762_v30 = vld [vmem:[#allocation21 + $0xb8] sm:$0xff] }
 0xb2d   :  { %v25943_v38 = vpack.c.bf16 %v23291_v31, %v9340_v43  ;;  %v8763_v43 = vld [vmem:[#allocation21 + $0xc0] sm:$0xff] }
 0xb2f   :  { %23192 = vmatmul.mubr.f32.gmra.mrb[52].mxu0 %v8744_v37  ;;  %v23294_v41 = vpop.f32.mrb[92].mxu1  ;;  %25944 = vmatprep.subr.bf16.mxu0 %v25943_v38 }
 0xb30   :  { %v9350_v18 = vpop.f32.mrb[93].mxu1  ;;  %25946 = vmatpush3.bf16.msra.mxu0 %v25943_v38  ;;  %23194 = vmatprep.mubr.f32.mxu0 %v8745_v29  ;;  %v8764_v29 = vld [vmem:[#allocation21 + $0xc8] sm:$0xff] }
 0xb31   :  { %v25947_v25 = vpack.c.bf16 %v23294_v41, %v9350_v18  ;;  %v8765_v18 = vld [vmem:[#allocation21 + $0xd0] sm:$0xff] }
 0xb33   :  { %23195 = vmatmul.mubr.f32.gmra.mrb[54].mxu0 %v8746_v58  ;;  %v23297_v61 = vpop.f32.mrb[94].mxu1  ;;  %25948 = vmatprep.subr.bf16.mxu0 %v25947_v25 }
 0xb34   :  { %v9360_v24 = vpop.f32.mrb[95].mxu1  ;;  %25950 = vmatpush3.bf16.msra.mxu0 %v25947_v25  ;;  %23197 = vmatprep.mubr.f32.mxu0 %v8747_v60  ;;  %v8766_v60 = vld [vmem:[#allocation21 + $0xd8] sm:$0xff] }
 0xb35   :  { %v25951_v1 = vpack.c.bf16 %v23297_v61, %v9360_v24  ;;  %v8767_v24 = vld [vmem:[#allocation21 + $0xe0] sm:$0xff] }
 0xb37   :  { %23198 = vmatmul.mubr.f32.gmra.mrb[56].mxu0 %v8748_v2  ;;  %v23300_v10 = vpop.f32.mrb[96].mxu1  ;;  %25952 = vmatprep.subr.bf16.mxu0 %v25951_v1 }
 0xb38   :  { %v9370_v55 = vpop.f32.mrb[97].mxu1  ;;  %25954 = vmatpush3.bf16.msra.mxu0 %v25951_v1  ;;  %23200 = vmatprep.mubr.f32.mxu0 %v8749_v7  ;;  %v8768_v7 = vld [vmem:[#allocation21 + $0xe8] sm:$0xff] }
 0xb39   :  { %v25955_v9 = vpack.c.bf16 %v23300_v10, %v9370_v55  ;;  %v8769_v55 = vld [vmem:[#allocation21 + $0xf0] sm:$0xff] }
 0xb3b   :  { %23201 = vmatmul.mubr.f32.gmra.mrb[58].mxu0 %v8750_v45  ;;  %v23303_v35 = vpop.f32.mrb[98].mxu1  ;;  %25956 = vmatprep.subr.bf16.mxu0 %v25955_v9 }
 0xb3c   :  { %v9380_v0 = vpop.f32.mrb[99].mxu1  ;;  %25958 = vmatpush3.bf16.msra.mxu0 %v25955_v9  ;;  %23203 = vmatprep.mubr.f32.mxu0 %v8751_v57  ;;  %v8770_v57 = vld [vmem:[#allocation21 + $0xf8] sm:$0xff] }
 0xb3d   :  { %v25959_v49 = vpack.c.bf16 %v23303_v35, %v9380_v0  ;;  %v8771_v0 = vld [vmem:[#allocation21 + $0x100] sm:$0xff] }
 0xb3f   :  { %23204 = vmatmul.mubr.f32.gmra.mrb[60].mxu0 %v8752_v44  ;;  %v23306_v50 = vpop.f32.mrb[100].mxu1  ;;  %25960 = vmatprep.subr.bf16.mxu0 %v25959_v49  ;;  %v8772_v44 = vld [vmem:[#allocation21 + $0x108] sm:$0xff] }
 0xb40   :  { %v9390_v52 = vpop.f32.mrb[101].mxu1  ;;  %25962 = vmatpush3.bf16.msra.mxu0 %v25959_v49  ;;  %23206 = vmatprep.mubr.f32.mxu0 %v8753_v11  ;;  %v8773_v49 = vld [vmem:[#allocation21 + $0x110] sm:$0xff]  ;;  %v8774_v11 = vld [vmem:[#allocation21 + $0x118] sm:$0xff] }
 0xb41   :  { %v25963_v56 = vpack.c.bf16 %v23306_v50, %v9390_v52  ;;  %v8775_v50 = vld [vmem:[#allocation21 + $0x120] sm:$0xff]  ;;  %v8776_v52 = vld [vmem:[#allocation21 + $0x128] sm:$0xff] }
 0xb43   :  { %23207 = vmatmul.mubr.f32.gmra.mrb[62].mxu0 %v8754_v54  ;;  %25964 = vmatprep.subr.bf16.mxu0 %v25963_v56  ;;  %v23439_v39 = vpop.f32.mrb[102].mxu1  ;;  %v8777_v54 = vld [vmem:[#allocation21 + $0x130] sm:$0xff] }
 0xb44   :  { %25966 = vmatpush3.bf16.msra.mxu0 %v25963_v56  ;;  %v9981_v13 = vpop.f32.mrb[103].mxu1  ;;  %23209 = vmatprep.mubr.f32.mxu0 %v8755_v12  ;;  %v8778_v56 = vld [vmem:[#allocation21 + $0x138] sm:$0xff]  ;;  %v8779_v12 = vld [vmem:[#allocation21 + $0x140] sm:$0xff] }
 0xb45   :  { %v29600_v36 = vpack.c.bf16 %v23439_v39, %v9981_v13  ;;  %v8780_v39 = vld [vmem:[#allocation21 + $0x148] sm:$0xff]  ;;  %v8781_v13 = vld [vmem:[#allocation21 + $0x150] sm:$0xff] }
 0xb47   :  { %23210 = vmatmul.mubr.f32.gmra.mrb[64].mxu0 %v8756_v15  ;;  %v23442_v42 = vpop.f32.mrb[104].mxu1  ;;  %25968 = vmatprep.subr.bf16.mxu0 %v29600_v36  ;;  %v8782_v15 = vld [vmem:[#allocation21 + $0x158] sm:$0xff] }
 0xb48   :  { %v9991_v53 = vpop.f32.mrb[105].mxu1  ;;  %23212 = vmatprep.mubr.f32.mxu0 %v8757_v59  ;;  %v8783_v59 = vld [vmem:[#allocation21 + $0x160] sm:$0xff] }
 0xb49   :  { %v29603_v3 = vpack.c.bf16 %v23442_v42, %v9991_v53  ;;  %v8784_v42 = vld [vmem:[#allocation21 + $0x168] sm:$0xff]  ;;  %v8785_v53 = vld [vmem:[#allocation21 + $0x170] sm:$0xff] }
 0xb4b   :  { %23213 = vmatmul.mubr.f32.gmra.mrb[66].mxu0 %v8758_v51  ;;  %v23445_v28 = vpop.f32.mrb[106].mxu1  ;;  %v8786_v51 = vld [vmem:[#allocation21 + $0x178] sm:$0xff] }
 0xb4c   :  { %v10001_v19 = vpop.f32.mrb[107].mxu1  ;;  %23215 = vmatprep.mubr.f32.mxu0 %v8759_v16  ;;  %v8787_v16 = vld [vmem:[#allocation21 + $0x180] sm:$0xff] }
 0xb4d   :  { %v29605_v14 = vpack.c.bf16 %v23445_v28, %v10001_v19  ;;  %v8788_v28 = vld [vmem:[#allocation21 + $0x188] sm:$0xff]  ;;  %v8789_v19 = vld [vmem:[#allocation21 + $0x190] sm:$0xff] }
 0xb4f   :  { %23216 = vmatmul.mubr.f32.gmra.mrb[68].mxu0 %v8760_v8  ;;  %v23448_v27 = vpop.f32.mrb[108].mxu1  ;;  %v8790_v8 = vld [vmem:[#allocation21 + $0x198] sm:$0xff] }
 0xb50   :  { %v10011_v33 = vpop.f32.mrb[109].mxu1  ;;  %23218 = vmatprep.mubr.f32.mxu0 %v8761_v23  ;;  %v8791_v23 = vld [vmem:[#allocation21 + $0x1a0] sm:$0xff] }
 0xb51   :  { %v29607_v31 = vpack.c.bf16 %v23448_v27, %v10011_v33  ;;  %v8792_v27 = vld [vmem:[#allocation21 + $0x1a8] sm:$0xff]  ;;  %v8793_v33 = vld [vmem:[#allocation21 + $0x1b0] sm:$0xff] }
 0xb53   :  { %23219 = vmatmul.mubr.f32.gmra.mrb[70].mxu0 %v8762_v30  ;;  %v23451_v37 = vpop.f32.mrb[110].mxu1  ;;  %v8794_v30 = vld [vmem:[#allocation21 + $0x1b8] sm:$0xff] }
 0xb54   :  { %v10021_v38 = vpop.f32.mrb[111].mxu1  ;;  %23221 = vmatprep.mubr.f32.mxu0 %v8763_v43  ;;  %v8795_v43 = vld [vmem:[#allocation21 + $0x1c0] sm:$0xff] }
 0xb55   :  { %v29609_v41 = vpack.c.bf16 %v23451_v37, %v10021_v38  ;;  %v8796_v37 = vld [vmem:[#allocation21 + $0x1c8] sm:$0xff]  ;;  %v8797_v38 = vld [vmem:[#allocation21 + $0x1d0] sm:$0xff] }
 0xb57   :  { %23222 = vmatmul.mubr.f32.gmra.mrb[72].mxu0 %v8764_v29  ;;  %v23454_v58 = vpop.f32.mrb[112].mxu1  ;;  %v8798_v29 = vld [vmem:[#allocation21 + $0x1d8] sm:$0xff] }
 0xb58   :  { %v10031_v25 = vpop.f32.mrb[113].mxu1  ;;  %23224 = vmatprep.mubr.f32.mxu0 %v8765_v18  ;;  %v8799_v18 = vld [vmem:[#allocation21 + $0x1e0] sm:$0xff] }
 0xb59   :  { %v29611_v61 = vpack.c.bf16 %v23454_v58, %v10031_v25  ;;  %v8800_v58 = vld [vmem:[#allocation21 + $0x1e8] sm:$0xff]  ;;  %v8801_v25 = vld [vmem:[#allocation21 + $0x1f0] sm:$0xff] }
 0xb5b   :  { %23225 = vmatmul.mubr.f32.gmra.mrb[74].mxu0 %v8766_v60  ;;  %v23457_v2 = vpop.f32.mrb[114].mxu1  ;;  %v8802_v60 = vld [vmem:[#allocation21 + $0x1f8] sm:$0xff] }
 0xb5c   :  { %v10041_v1 = vpop.f32.mrb[115].mxu1  ;;  %23227 = vmatprep.mubr.f32.mxu0 %v8767_v24  ;;  %v9400_v24 = vld [vmem:[#allocation21 + $0x200] sm:$0xff] }
 0xb5d   :  { %v29613_v10 = vpack.c.bf16 %v23457_v2, %v10041_v1  ;;  %v9401_v2 = vld [vmem:[#allocation21 + $0x208] sm:$0xff]  ;;  %v9402_v1 = vld [vmem:[#allocation21 + $0x210] sm:$0xff] }
 0xb5f   :  { %23228 = vmatmul.mubr.f32.gmra.mrb[76].mxu0 %v8768_v7  ;;  %v23460_v45 = vpop.f32.mrb[116].mxu1  ;;  %v9403_v7 = vld [vmem:[#allocation21 + $0x218] sm:$0xff] }
 0xb60   :  { %v10051_v9 = vpop.f32.mrb[117].mxu1  ;;  %23230 = vmatprep.mubr.f32.mxu0 %v8769_v55  ;;  %v9404_v55 = vld [vmem:[#allocation21 + $0x220] sm:$0xff] }
 0xb61   :  { %v29615_v35 = vpack.c.bf16 %v23460_v45, %v10051_v9  ;;  %v9405_v45 = vld [vmem:[#allocation21 + $0x228] sm:$0xff]  ;;  %v9406_v9 = vld [vmem:[#allocation21 + $0x230] sm:$0xff] }
 0xb63   :  { %23231 = vmatmul.mubr.f32.gmra.mrb[78].mxu0 %v8770_v57  ;;  %v9407_v57 = vld [vmem:[#allocation21 + $0x238] sm:$0xff] }
 0xb64   :  { %23233 = vmatprep.mubr.f32.mxu0 %v8771_v0  ;;  %v9409_v0 = vld [vmem:[#allocation21 + $0x248] sm:$0xff] }
 0xb67   :  { %23234 = vmatmul.mubr.f32.gmra.mrb[80].mxu0 %v8772_v44  ;;  %v9411_v44 = vld [vmem:[#allocation21 + $0x258] sm:$0xff] }
 0xb68   :  { %23236 = vmatprep.mubr.f32.mxu0 %v8773_v49  ;;  %v9413_v49 = vld [vmem:[#allocation21 + $0x268] sm:$0xff] }
 0xb6b   :  { %23237 = vmatmul.mubr.f32.gmra.mrb[82].mxu0 %v8774_v11  ;;  %v9415_v11 = vld [vmem:[#allocation21 + $0x278] sm:$0xff] }
 0xb6c   :  { %23239 = vmatprep.mubr.f32.mxu0 %v8775_v50  ;;  %v9417_v50 = vld [vmem:[#allocation21 + $0x288] sm:$0xff] }
 0xb6f   :  { %23240 = vmatmul.mubr.f32.gmra.mrb[84].mxu0 %v8776_v52  ;;  %v9418_v52 = vld [vmem:[#allocation21 + $0x290] sm:$0xff] }
 0xb70   :  { %23242 = vmatprep.mubr.f32.mxu0 %v8777_v54  ;;  %v9420_v54 = vld [vmem:[#allocation21 + $0x2a0] sm:$0xff] }
 0xb73   :  { %23243 = vmatmul.mubr.f32.gmra.mrb[86].mxu0 %v8778_v56  ;;  %v9421_v56 = vld [vmem:[#allocation21 + $0x2a8] sm:$0xff] }
 0xb74   :  { %23245 = vmatprep.mubr.f32.mxu0 %v8779_v12  ;;  %v9422_v12 = vld [vmem:[#allocation21 + $0x2b0] sm:$0xff] }
 0xb77   :  { %23246 = vmatmul.mubr.f32.gmra.mrb[88].mxu0 %v8780_v39  ;;  %v9424_v39 = vld [vmem:[#allocation21 + $0x2c0] sm:$0xff] }
 0xb78   :  { %23248 = vmatprep.mubr.f32.mxu0 %v8781_v13  ;;  %v9425_v13 = vld [vmem:[#allocation21 + $0x2c8] sm:$0xff] }
 0xb7b   :  { %23249 = vmatmul.mubr.f32.gmra.mrb[90].mxu0 %v8782_v15  ;;  %v9426_v15 = vld [vmem:[#allocation21 + $0x2d0] sm:$0xff] }
 0xb7c   :  { %23251 = vmatprep.mubr.f32.mxu0 %v8783_v59  ;;  %v9428_v59 = vld [vmem:[#allocation21 + $0x2e0] sm:$0xff] }
 0xb7f   :  { %23252 = vmatmul.mubr.f32.gmra.mrb[92].mxu0 %v8784_v42  ;;  %v9429_v42 = vld [vmem:[#allocation21 + $0x2e8] sm:$0xff] }
 0xb80   :  { %23254 = vmatprep.mubr.f32.mxu0 %v8785_v53  ;;  %v9430_v53 = vld [vmem:[#allocation21 + $0x2f0] sm:$0xff] }
 0xb83   :  { %23255 = vmatmul.mubr.f32.gmra.mrb[94].mxu0 %v8786_v51  ;;  %v9431_v51 = vld [vmem:[#allocation21 + $0x2f8] sm:$0xff] }
 0xb84   :  { %23257 = vmatprep.mubr.f32.mxu0 %v8787_v16  ;;  %v9432_v16 = vld [vmem:[#allocation21 + $0x300] sm:$0xff] }
 0xb87   :  { %23258 = vmatmul.mubr.f32.gmra.mrb[96].mxu0 %v8788_v28  ;;  %v9433_v28 = vld [vmem:[#allocation21 + $0x308] sm:$0xff] }
 0xb88   :  { %23260 = vmatprep.mubr.f32.mxu0 %v8789_v19  ;;  %v9434_v19 = vld [vmem:[#allocation21 + $0x310] sm:$0xff] }
 0xb8b   :  { %23261 = vmatmul.mubr.f32.gmra.mrb[98].mxu0 %v8790_v8  ;;  %v9435_v8 = vld [vmem:[#allocation21 + $0x318] sm:$0xff] }
 0xb8c   :  { %23263 = vmatprep.mubr.f32.mxu0 %v8791_v23  ;;  %v9436_v23 = vld [vmem:[#allocation21 + $0x320] sm:$0xff] }
 0xb8f   :  { %23264 = vmatmul.mubr.f32.gmra.mrb[100].mxu0 %v8792_v27  ;;  %v29632_v27 = vld [vmem:[#allocation22 + $0x18] sm:$0xff] }
 0xb90   :  { %23266 = vmatprep.mubr.f32.mxu0 %v8793_v33  ;;  %v9437_v33 = vld [vmem:[#allocation21 + $0x328] sm:$0xff] }
 0xb93   :  { %23267 = vmatmul.mubr.f32.gmra.mrb[102].mxu0 %v8794_v30  ;;  %v9438_v30 = vld [vmem:[#allocation21 + $0x330] sm:$0xff] }
 0xb94   :  { %23269 = vmatprep.mubr.f32.mxu0 %v8795_v43  ;;  %v9439_v43 = vld [vmem:[#allocation21 + $0x338] sm:$0xff] }
 0xb97   :  { %23270 = vmatmul.mubr.f32.gmra.mrb[104].mxu0 %v8796_v37  ;;  %v9440_v37 = vld [vmem:[#allocation21 + $0x340] sm:$0xff] }
 0xb98   :  { %23272 = vmatprep.mubr.f32.mxu0 %v8797_v38  ;;  %v9441_v38 = vld [vmem:[#allocation21 + $0x348] sm:$0xff] }
 0xb9b   :  { %23273 = vmatmul.mubr.f32.gmra.mrb[106].mxu0 %v8798_v29  ;;  %v9442_v29 = vld [vmem:[#allocation21 + $0x350] sm:$0xff] }
 0xb9c   :  { %23275 = vmatprep.mubr.f32.mxu0 %v8799_v18  ;;  %v9443_v18 = vld [vmem:[#allocation21 + $0x358] sm:$0xff] }
 0xb9f   :  { %23276 = vmatmul.mubr.f32.gmra.mrb[108].mxu0 %v8800_v58  ;;  %v9444_v58 = vld [vmem:[#allocation21 + $0x360] sm:$0xff] }
 0xba0   :  { %23278 = vmatprep.mubr.f32.mxu0 %v8801_v25  ;;  %v9445_v25 = vld [vmem:[#allocation21 + $0x368] sm:$0xff] }
 0xba3   :  { %23279 = vmatmul.mubr.f32.gmra.mrb[110].mxu0 %v8802_v60  ;;  %v9446_v60 = vld [vmem:[#allocation21 + $0x370] sm:$0xff] }
 0xba4   :  { %23339 = vmatprep.mubr.f32.mxu0 %v9400_v24  ;;  %v9447_v24 = vld [vmem:[#allocation21 + $0x378] sm:$0xff] }
 0xba7   :  { %23340 = vmatmul.mubr.f32.vlgmr.msra.gmra.mrb[48].mxu0 %v9401_v2  ;;  %v9448_v2 = vld [vmem:[#allocation21 + $0x380] sm:$0xff] }
 0xba8   :  { %25970 = vmatpush3.bf16.msra.mxu0 %v29600_v36  ;;  %23342 = vmatprep.mubr.f32.mxu0 %v9402_v1  ;;  %v9408_v36 = vld [vmem:[#allocation21 + $0x240] sm:$0xff]  ;;  %v9449_v1 = vld [vmem:[#allocation21 + $0x388] sm:$0xff] }
 0xba9   :  { %25972 = vmatprep.subr.bf16.mxu0 %v29603_v3 }
 0xbab   :  { %23343 = vmatmul.mubr.f32.gmra.mrb[50].mxu0 %v9403_v7  ;;  %v9450_v7 = vld [vmem:[#allocation21 + $0x390] sm:$0xff] }
 0xbac   :  { %25974 = vmatpush3.bf16.msra.mxu0 %v29603_v3  ;;  %23345 = vmatprep.mubr.f32.mxu0 %v9404_v55  ;;  %v9410_v3 = vld [vmem:[#allocation21 + $0x250] sm:$0xff]  ;;  %v9451_v55 = vld [vmem:[#allocation21 + $0x398] sm:$0xff] }
 0xbad   :  { %25976 = vmatprep.subr.bf16.mxu0 %v29605_v14 }
 0xbaf   :  { %23346 = vmatmul.mubr.f32.gmra.mrb[52].mxu0 %v9405_v45  ;;  %v9452_v45 = vld [vmem:[#allocation21 + $0x3a0] sm:$0xff] }
 0xbb0   :  { %25978 = vmatpush3.bf16.msra.mxu0 %v29605_v14  ;;  %23348 = vmatprep.mubr.f32.mxu0 %v9406_v9  ;;  %v9412_v14 = vld [vmem:[#allocation21 + $0x260] sm:$0xff]  ;;  %v9453_v9 = vld [vmem:[#allocation21 + $0x3a8] sm:$0xff] }
 0xbb1   :  { %25980 = vmatprep.subr.bf16.mxu0 %v29607_v31 }
 0xbb3   :  { %23349 = vmatmul.mubr.f32.gmra.mrb[54].mxu0 %v9407_v57  ;;  %v9454_v57 = vld [vmem:[#allocation21 + $0x3b0] sm:$0xff] }
 0xbb4   :  { %25982 = vmatpush3.bf16.msra.mxu0 %v29607_v31  ;;  %23351 = vmatprep.mubr.f32.mxu0 %v9408_v36  ;;  %v9414_v31 = vld [vmem:[#allocation21 + $0x270] sm:$0xff]  ;;  %v9455_v36 = vld [vmem:[#allocation21 + $0x3b8] sm:$0xff] }
 0xbb5   :  { %25984 = vmatprep.subr.bf16.mxu0 %v29609_v41 }
 0xbb7   :  { %23352 = vmatmul.mubr.f32.gmra.mrb[56].mxu0 %v9409_v0  ;;  %v9456_v0 = vld [vmem:[#allocation21 + $0x3c0] sm:$0xff] }
 0xbb8   :  { %25986 = vmatpush3.bf16.msra.mxu0 %v29609_v41  ;;  %23354 = vmatprep.mubr.f32.mxu0 %v9410_v3  ;;  %v9416_v41 = vld [vmem:[#allocation21 + $0x280] sm:$0xff]  ;;  %v9457_v3 = vld [vmem:[#allocation21 + $0x3c8] sm:$0xff] }
 0xbb9   :  { %25988 = vmatprep.subr.bf16.mxu0 %v29611_v61 }
 0xbbb   :  { %23355 = vmatmul.mubr.f32.gmra.mrb[58].mxu0 %v9411_v44  ;;  %v9458_v44 = vld [vmem:[#allocation21 + $0x3d0] sm:$0xff] }
 0xbbc   :  { %25990 = vmatpush3.bf16.msra.mxu0 %v29611_v61  ;;  %23357 = vmatprep.mubr.f32.mxu0 %v9412_v14  ;;  %v9419_v61 = vld [vmem:[#allocation21 + $0x298] sm:$0xff] }
 0xbbd   :  { %25992 = vmatprep.subr.bf16.mxu0 %v29613_v10  ;;  %v9459_v14 = vld [vmem:[#allocation21 + $0x3d8] sm:$0xff] }
 0xbbf   :  { %23358 = vmatmul.mubr.f32.gmra.mrb[60].mxu0 %v9413_v49  ;;  %v9460_v49 = vld [vmem:[#allocation21 + $0x3e0] sm:$0xff] }
 0xbc0   :  { %25994 = vmatpush3.bf16.msra.mxu0 %v29613_v10  ;;  %23360 = vmatprep.mubr.f32.mxu0 %v9414_v31  ;;  %v9423_v10 = vld [vmem:[#allocation21 + $0x2b8] sm:$0xff]  ;;  %v9461_v31 = vld [vmem:[#allocation21 + $0x3e8] sm:$0xff] }
 0xbc1   :  { %25996 = vmatprep.subr.bf16.mxu0 %v29615_v35 }
 0xbc3   :  { %23361 = vmatmul.mubr.f32.gmra.mrb[62].mxu0 %v9415_v11  ;;  %v9462_v11 = vld [vmem:[#allocation21 + $0x3f0] sm:$0xff] }
 0xbc4   :  { %25998 = vmatpush3.bf16.msra.mxu0 %v29615_v35  ;;  %23363 = vmatprep.mubr.f32.mxu0 %v9416_v41  ;;  %v9427_v35 = vld [vmem:[#allocation21 + $0x2d8] sm:$0xff] }
 0xbc5   :  { %23589 = vmatprep.subr.mxu0 %v29632_v27  ;;  %v9463_v41 = vld [vmem:[#allocation21 + $0x3f8] sm:$0xff] }
 0xbc7   :  { %23364 = vmatmul.mubr.f32.gmra.mrb[64].mxu0 %v9417_v50  ;;  %v10061_v50 = vld [vmem:[#allocation21 + $0x400] sm:$0xff] }
 0xbc8   :  { %23366 = vmatprep.mubr.f32.mxu0 %v9418_v52  ;;  %v10062_v52 = vld [vmem:[#allocation21 + $0x408] sm:$0xff] }
 0xbcb   :  { %23367 = vmatmul.mubr.f32.gmra.mrb[66].mxu0 %v9419_v61  ;;  %v10063_v61 = vld [vmem:[#allocation21 + $0x410] sm:$0xff] }
 0xbcc   :  { %23369 = vmatprep.mubr.f32.mxu0 %v9420_v54  ;;  %v10064_v54 = vld [vmem:[#allocation21 + $0x418] sm:$0xff] }
 0xbcf   :  { %23370 = vmatmul.mubr.f32.gmra.mrb[68].mxu0 %v9421_v56  ;;  %v10065_v56 = vld [vmem:[#allocation21 + $0x420] sm:$0xff] }
 0xbd0   :  { %23372 = vmatprep.mubr.f32.mxu0 %v9422_v12  ;;  %v10066_v12 = vld [vmem:[#allocation21 + $0x428] sm:$0xff] }
 0xbd3   :  { %23373 = vmatmul.mubr.f32.gmra.mrb[70].mxu0 %v9423_v10  ;;  %v10067_v10 = vld [vmem:[#allocation21 + $0x430] sm:$0xff] }
 0xbd4   :  { %23375 = vmatprep.mubr.f32.mxu0 %v9424_v39  ;;  %v10068_v39 = vld [vmem:[#allocation21 + $0x438] sm:$0xff] }
 0xbd7   :  { %23376 = vmatmul.mubr.f32.gmra.mrb[72].mxu0 %v9425_v13  ;;  %v10069_v13 = vld [vmem:[#allocation21 + $0x440] sm:$0xff] }
 0xbd8   :  { %23378 = vmatprep.mubr.f32.mxu0 %v9426_v15  ;;  %v10070_v15 = vld [vmem:[#allocation21 + $0x448] sm:$0xff] }
 0xbdb   :  { %23379 = vmatmul.mubr.f32.gmra.mrb[74].mxu0 %v9427_v35  ;;  %v10071_v35 = vld [vmem:[#allocation21 + $0x450] sm:$0xff] }
 0xbdc   :  { %23381 = vmatprep.mubr.f32.mxu0 %v9428_v59  ;;  %v10072_v59 = vld [vmem:[#allocation21 + $0x458] sm:$0xff] }
 0xbdf   :  { %23382 = vmatmul.mubr.f32.gmra.mrb[76].mxu0 %v9429_v42  ;;  %v10073_v42 = vld [vmem:[#allocation21 + $0x460] sm:$0xff] }
 0xbe0   :  { %23384 = vmatprep.mubr.f32.mxu0 %v9430_v53  ;;  %v10074_v53 = vld [vmem:[#allocation21 + $0x468] sm:$0xff] }
 0xbe3   :  { %23385 = vmatmul.mubr.f32.gmra.mrb[78].mxu0 %v9431_v51  ;;  %v10075_v51 = vld [vmem:[#allocation21 + $0x470] sm:$0xff] }
 0xbe4   :  { %23387 = vmatprep.mubr.f32.mxu0 %v9432_v16  ;;  %v10076_v16 = vld [vmem:[#allocation21 + $0x478] sm:$0xff] }
 0xbe7   :  { %23388 = vmatmul.mubr.f32.gmra.mrb[80].mxu0 %v9433_v28  ;;  %v10077_v28 = vld [vmem:[#allocation21 + $0x480] sm:$0xff] }
 0xbe8   :  { %23390 = vmatprep.mubr.f32.mxu0 %v9434_v19  ;;  %v10078_v19 = vld [vmem:[#allocation21 + $0x488] sm:$0xff] }
 0xbeb   :  { %23391 = vmatmul.mubr.f32.gmra.mrb[82].mxu0 %v9435_v8  ;;  %v10079_v8 = vld [vmem:[#allocation21 + $0x490] sm:$0xff] }
 0xbec   :  { %23393 = vmatprep.mubr.f32.mxu0 %v9436_v23  ;;  %v10080_v23 = vld [vmem:[#allocation21 + $0x498] sm:$0xff] }
 0xbef   :  { %23394 = vmatmul.mubr.f32.gmra.mrb[84].mxu0 %v9437_v33  ;;  %v10082_v33 = vld [vmem:[#allocation21 + $0x4a8] sm:$0xff] }
 0xbf0   :  { %23396 = vmatprep.mubr.f32.mxu0 %v9438_v30  ;;  %v10083_v30 = vld [vmem:[#allocation21 + $0x4b0] sm:$0xff] }
 0xbf3   :  { %23397 = vmatmul.mubr.f32.gmra.mrb[86].mxu0 %v9439_v43  ;;  %v10084_v43 = vld [vmem:[#allocation21 + $0x4b8] sm:$0xff] }
 0xbf4   :  { %23399 = vmatprep.mubr.f32.mxu0 %v9440_v37  ;;  %v10085_v37 = vld [vmem:[#allocation21 + $0x4c0] sm:$0xff] }
 0xbf7   :  { %23400 = vmatmul.mubr.f32.gmra.mrb[88].mxu0 %v9441_v38  ;;  %v10086_v38 = vld [vmem:[#allocation21 + $0x4c8] sm:$0xff] }
 0xbf8   :  { %23402 = vmatprep.mubr.f32.mxu0 %v9442_v29  ;;  %v10087_v29 = vld [vmem:[#allocation21 + $0x4d0] sm:$0xff] }
 0xbfb   :  { %23403 = vmatmul.mubr.f32.gmra.mrb[90].mxu0 %v9443_v18  ;;  %v10088_v18 = vld [vmem:[#allocation21 + $0x4d8] sm:$0xff] }
 0xbfc   :  { %23405 = vmatprep.mubr.f32.mxu0 %v9444_v58  ;;  %v10089_v58 = vld [vmem:[#allocation21 + $0x4e0] sm:$0xff] }
 0xbff   :  { %23406 = vmatmul.mubr.f32.gmra.mrb[92].mxu0 %v9445_v25  ;;  %v10090_v25 = vld [vmem:[#allocation21 + $0x4e8] sm:$0xff] }
 0xc00   :  { %23408 = vmatprep.mubr.f32.mxu0 %v9446_v60  ;;  %v10091_v60 = vld [vmem:[#allocation21 + $0x4f0] sm:$0xff] }
 0xc03   :  { %23409 = vmatmul.mubr.f32.gmra.mrb[94].mxu0 %v9447_v24  ;;  %v10092_v24 = vld [vmem:[#allocation21 + $0x4f8] sm:$0xff] }
 0xc04   :  { %23411 = vmatprep.mubr.f32.mxu0 %v9448_v2  ;;  %v10093_v2 = vld [vmem:[#allocation21 + $0x500] sm:$0xff] }
 0xc07   :  { %23412 = vmatmul.mubr.f32.gmra.mrb[96].mxu0 %v9449_v1  ;;  %v10094_v1 = vld [vmem:[#allocation21 + $0x508] sm:$0xff] }
 0xc08   :  { %23414 = vmatprep.mubr.f32.mxu0 %v9450_v7  ;;  %v10095_v7 = vld [vmem:[#allocation21 + $0x510] sm:$0xff] }
 0xc0b   :  { %23415 = vmatmul.mubr.f32.gmra.mrb[98].mxu0 %v9451_v55  ;;  %v10096_v55 = vld [vmem:[#allocation21 + $0x518] sm:$0xff] }
 0xc0c   :  { %23417 = vmatprep.mubr.f32.mxu0 %v9452_v45  ;;  %v10097_v45 = vld [vmem:[#allocation21 + $0x520] sm:$0xff] }
 0xc0f   :  { %23418 = vmatmul.mubr.f32.gmra.mrb[100].mxu0 %v9453_v9  ;;  %v10098_v9 = vld [vmem:[#allocation21 + $0x528] sm:$0xff] }
 0xc10   :  { %23420 = vmatprep.mubr.f32.mxu0 %v9454_v57  ;;  %v10099_v57 = vld [vmem:[#allocation21 + $0x530] sm:$0xff] }
 0xc13   :  { %23421 = vmatmul.mubr.f32.gmra.mrb[102].mxu0 %v9455_v36  ;;  %v10100_v36 = vld [vmem:[#allocation21 + $0x538] sm:$0xff] }
 0xc14   :  { %23423 = vmatprep.mubr.f32.mxu0 %v9456_v0  ;;  %v10101_v0 = vld [vmem:[#allocation21 + $0x540] sm:$0xff] }
 0xc17   :  { %23424 = vmatmul.mubr.f32.gmra.mrb[104].mxu0 %v9457_v3  ;;  %v10102_v3 = vld [vmem:[#allocation21 + $0x548] sm:$0xff] }
 0xc18   :  { %23426 = vmatprep.mubr.f32.mxu0 %v9458_v44  ;;  %v10103_v44 = vld [vmem:[#allocation21 + $0x550] sm:$0xff] }
 0xc1b   :  { %23427 = vmatmul.mubr.f32.gmra.mrb[106].mxu0 %v9459_v14  ;;  %v10104_v14 = vld [vmem:[#allocation21 + $0x558] sm:$0xff] }
 0xc1c   :  { %23429 = vmatprep.mubr.f32.mxu0 %v9460_v49  ;;  %v10105_v49 = vld [vmem:[#allocation21 + $0x560] sm:$0xff] }
 0xc1f   :  { %23430 = vmatmul.mubr.f32.gmra.mrb[108].mxu0 %v9461_v31  ;;  %v10106_v31 = vld [vmem:[#allocation21 + $0x568] sm:$0xff] }
 0xc20   :  { %23432 = vmatprep.mubr.f32.mxu0 %v9462_v11  ;;  %v10107_v11 = vld [vmem:[#allocation21 + $0x570] sm:$0xff] }
 0xc23   :  { %23433 = vmatmul.mubr.f32.gmra.mrb[110].mxu0 %v9463_v41  ;;  %v10108_v41 = vld [vmem:[#allocation21 + $0x578] sm:$0xff] }
 0xc24   :  { %23493 = vmatprep.mubr.f32.mxu0 %v10061_v50  ;;  %v10109_v50 = vld [vmem:[#allocation21 + $0x580] sm:$0xff] }
 0xc27   :  { %23494 = vmatmul.mubr.f32.vlgmr.msra.gmra.mrb[48].mxu0 %v10062_v52  ;;  %v10110_v52 = vld [vmem:[#allocation21 + $0x588] sm:$0xff] }
 0xc28   :  { %23496 = vmatprep.mubr.f32.mxu0 %v10063_v61  ;;  %23590 = vmatpush3.msra.mxu0 %v29632_v27  ;;  %v10081_v27 = vld [vmem:[#allocation21 + $0x4a0] sm:$0xff]  ;;  %v10111_v61 = vld [vmem:[#allocation21 + $0x590] sm:$0xff] }
 0xc2b   :  { %23497 = vmatmul.mubr.f32.gmra.mrb[50].mxu0 %v10064_v54  ;;  %v10112_v54 = vld [vmem:[#allocation21 + $0x598] sm:$0xff] }
 0xc2c   :  { %23499 = vmatprep.mubr.f32.mxu0 %v10065_v56  ;;  %v10113_v56 = vld [vmem:[#allocation21 + $0x5a0] sm:$0xff] }
 0xc2f   :  { %23500 = vmatmul.mubr.f32.gmra.mrb[52].mxu0 %v10066_v12  ;;  %v10114_v12 = vld [vmem:[#allocation21 + $0x5a8] sm:$0xff] }
 0xc30   :  { %23502 = vmatprep.mubr.f32.mxu0 %v10067_v10  ;;  %v10115_v10 = vld [vmem:[#allocation21 + $0x5b0] sm:$0xff] }
 0xc33   :  { %23503 = vmatmul.mubr.f32.gmra.mrb[54].mxu0 %v10068_v39  ;;  %v10116_v39 = vld [vmem:[#allocation21 + $0x5b8] sm:$0xff] }
 0xc34   :  { %23505 = vmatprep.mubr.f32.mxu0 %v10069_v13  ;;  %v10117_v13 = vld [vmem:[#allocation21 + $0x5c0] sm:$0xff] }
 0xc37   :  { %23506 = vmatmul.mubr.f32.gmra.mrb[56].mxu0 %v10070_v15  ;;  %v10118_v15 = vld [vmem:[#allocation21 + $0x5c8] sm:$0xff] }
 0xc38   :  { %23508 = vmatprep.mubr.f32.mxu0 %v10071_v35  ;;  %v10119_v35 = vld [vmem:[#allocation21 + $0x5d0] sm:$0xff] }
 0xc3b   :  { %23509 = vmatmul.mubr.f32.gmra.mrb[58].mxu0 %v10072_v59  ;;  %v10120_v59 = vld [vmem:[#allocation21 + $0x5d8] sm:$0xff] }
 0xc3c   :  { %23511 = vmatprep.mubr.f32.mxu0 %v10073_v42  ;;  %v10121_v42 = vld [vmem:[#allocation21 + $0x5e0] sm:$0xff] }
 0xc3f   :  { %23512 = vmatmul.mubr.f32.gmra.mrb[60].mxu0 %v10074_v53  ;;  %v10122_v53 = vld [vmem:[#allocation21 + $0x5e8] sm:$0xff] }
 0xc40   :  { %23514 = vmatprep.mubr.f32.mxu0 %v10075_v51  ;;  %v10123_v51 = vld [vmem:[#allocation21 + $0x5f0] sm:$0xff] }
 0xc43   :  { %23515 = vmatmul.mubr.f32.gmra.mrb[62].mxu0 %v10076_v16  ;;  %v10124_v16 = vld [vmem:[#allocation21 + $0x5f8] sm:$0xff] }
 0xc44   :  { %23517 = vmatprep.mubr.f32.mxu0 %v10077_v28  ;;  %v10722_v28 = vld [vmem:[#allocation21 + $0x600] sm:$0xff] }
 0xc47   :  { %23518 = vmatmul.mubr.f32.gmra.mrb[64].mxu0 %v10078_v19 }
 0xc48   :  { %23520 = vmatprep.mubr.f32.mxu0 %v10079_v8 }
 0xc4b   :  { %23521 = vmatmul.mubr.f32.gmra.mrb[66].mxu0 %v10080_v23 }
 0xc4c   :  { %23523 = vmatprep.mubr.f32.mxu0 %v10081_v27 }
 0xc4f   :  { %23524 = vmatmul.mubr.f32.gmra.mrb[68].mxu0 %v10082_v33 }
 0xc50   :  { %23526 = vmatprep.mubr.f32.mxu0 %v10083_v30 }
 0xc53   :  { %23527 = vmatmul.mubr.f32.gmra.mrb[70].mxu0 %v10084_v43 }
 0xc54   :  { %23529 = vmatprep.mubr.f32.mxu0 %v10085_v37 }
 0xc57   :  { %23530 = vmatmul.mubr.f32.gmra.mrb[72].mxu0 %v10086_v38 }
 0xc58   :  { %23532 = vmatprep.mubr.f32.mxu0 %v10087_v29 }
 0xc5b   :  { %23533 = vmatmul.mubr.f32.gmra.mrb[74].mxu0 %v10088_v18 }
 0xc5c   :  { %23535 = vmatprep.mubr.f32.mxu0 %v10089_v58 }
 0xc5f   :  { %23536 = vmatmul.mubr.f32.gmra.mrb[76].mxu0 %v10090_v25 }
 0xc60   :  { %23538 = vmatprep.mubr.f32.mxu0 %v10091_v60 }
 0xc63   :  { %23539 = vmatmul.mubr.f32.gmra.mrb[78].mxu0 %v10092_v24 }
 0xc64   :  { %23541 = vmatprep.mubr.f32.mxu0 %v10093_v2 }
 0xc67   :  { %23542 = vmatmul.mubr.f32.gmra.mrb[80].mxu0 %v10094_v1 }
 0xc68   :  { %23544 = vmatprep.mubr.f32.mxu0 %v10095_v7 }
 0xc6b   :  { %23545 = vmatmul.mubr.f32.gmra.mrb[82].mxu0 %v10096_v55 }
 0xc6c   :  { %23547 = vmatprep.mubr.f32.mxu0 %v10097_v45 }
 0xc6f   :  { %23548 = vmatmul.mubr.f32.gmra.mrb[84].mxu0 %v10098_v9 }
 0xc70   :  { %23550 = vmatprep.mubr.f32.mxu0 %v10099_v57 }
 0xc73   :  { %23551 = vmatmul.mubr.f32.gmra.mrb[86].mxu0 %v10100_v36 }
 0xc74   :  { %23553 = vmatprep.mubr.f32.mxu0 %v10101_v0 }
 0xc77   :  { %23554 = vmatmul.mubr.f32.gmra.mrb[88].mxu0 %v10102_v3  ;;  %v11236_v3 = vld [vmem:[#allocation22 + $0x20] sm:$0xff] }
 0xc78   :  { %23556 = vmatprep.mubr.f32.mxu0 %v10103_v44  ;;  %v10723_v44 = vld [vmem:[#allocation21 + $0x608] sm:$0xff] }
 0xc7b   :  { %23557 = vmatmul.mubr.f32.gmra.mrb[90].mxu0 %v10104_v14  ;;  %v10724_v14 = vld [vmem:[#allocation21 + $0x610] sm:$0xff] }
 0xc7c   :  { %23559 = vmatprep.mubr.f32.mxu0 %v10105_v49  ;;  %v10725_v49 = vld [vmem:[#allocation21 + $0x618] sm:$0xff] }
 0xc7f   :  { %23560 = vmatmul.mubr.f32.gmra.mrb[92].mxu0 %v10106_v31  ;;  %v10726_v31 = vld [vmem:[#allocation21 + $0x620] sm:$0xff] }
 0xc80   :  { %23562 = vmatprep.mubr.f32.mxu0 %v10107_v11  ;;  %v10727_v11 = vld [vmem:[#allocation21 + $0x628] sm:$0xff] }
 0xc83   :  { %23563 = vmatmul.mubr.f32.gmra.mrb[94].mxu0 %v10108_v41  ;;  %v10728_v41 = vld [vmem:[#allocation21 + $0x630] sm:$0xff] }
 0xc84   :  { %23565 = vmatprep.mubr.f32.mxu0 %v10109_v50  ;;  %v10729_v50 = vld [vmem:[#allocation21 + $0x638] sm:$0xff] }
 0xc87   :  { %23566 = vmatmul.mubr.f32.gmra.mrb[96].mxu0 %v10110_v52  ;;  %v10730_v52 = vld [vmem:[#allocation21 + $0x640] sm:$0xff] }
 0xc88   :  { %23568 = vmatprep.mubr.f32.mxu0 %v10111_v61  ;;  %v10731_v61 = vld [vmem:[#allocation21 + $0x648] sm:$0xff] }
 0xc8b   :  { %23569 = vmatmul.mubr.f32.gmra.mrb[98].mxu0 %v10112_v54  ;;  %v10732_v54 = vld [vmem:[#allocation21 + $0x650] sm:$0xff] }
 0xc8c   :  { %23571 = vmatprep.mubr.f32.mxu0 %v10113_v56  ;;  %v10733_v56 = vld [vmem:[#allocation21 + $0x658] sm:$0xff] }
 0xc8f   :  { %23572 = vmatmul.mubr.f32.gmra.mrb[100].mxu0 %v10114_v12  ;;  %v10734_v12 = vld [vmem:[#allocation21 + $0x660] sm:$0xff] }
 0xc90   :  { %23574 = vmatprep.mubr.f32.mxu0 %v10115_v10  ;;  %v10735_v10 = vld [vmem:[#allocation21 + $0x668] sm:$0xff] }
 0xc93   :  { %23575 = vmatmul.mubr.f32.gmra.mrb[102].mxu0 %v10116_v39  ;;  %v10736_v39 = vld [vmem:[#allocation21 + $0x670] sm:$0xff] }
 0xc94   :  { %23577 = vmatprep.mubr.f32.mxu0 %v10117_v13  ;;  %v10737_v13 = vld [vmem:[#allocation21 + $0x678] sm:$0xff] }
 0xc97   :  { %23578 = vmatmul.mubr.f32.gmra.mrb[104].mxu0 %v10118_v15  ;;  %v10738_v15 = vld [vmem:[#allocation21 + $0x680] sm:$0xff] }
 0xc98   :  { %23580 = vmatprep.mubr.f32.mxu0 %v10119_v35  ;;  %v10739_v35 = vld [vmem:[#allocation21 + $0x688] sm:$0xff] }
 0xc9b   :  { %23581 = vmatmul.mubr.f32.gmra.mrb[106].mxu0 %v10120_v59  ;;  %v10740_v59 = vld [vmem:[#allocation21 + $0x690] sm:$0xff] }
 0xc9c   :  { %23583 = vmatprep.mubr.f32.mxu0 %v10121_v42  ;;  %v10741_v42 = vld [vmem:[#allocation21 + $0x698] sm:$0xff] }
 0xc9f   :  { %23584 = vmatmul.mubr.f32.gmra.mrb[108].mxu0 %v10122_v53  ;;  %v10742_v53 = vld [vmem:[#allocation21 + $0x6a0] sm:$0xff] }
 0xca0   :  { %23586 = vmatprep.mubr.f32.mxu0 %v10123_v51  ;;  %v10743_v51 = vld [vmem:[#allocation21 + $0x6a8] sm:$0xff] }
 0xca3   :  { %23587 = vmatmul.mubr.f32.gmra.mrb[110].mxu0 %v10124_v16  ;;  %v10744_v16 = vld [vmem:[#allocation21 + $0x6b0] sm:$0xff] }
 0xca4   :  { %23591 = vmatprep.mubr.msk.f32.mxu0 %vm419_vm2, %v29460_v34 }
 0xca7   :  { %23592 = vmatmul.mubr.msk.f32.vlgmr.msra.gmra.mrb[112].mxu0 %vm419_vm2, %v29462_v26 }
 0xca8   :  { %23594 = vmatprep.mubr.msk.f32.mxu0 %vm419_vm2, %v29466_v17 }
 0xcab   :  { %23595 = vmatmul.mubr.msk.f32.gmra.mrb[114].mxu0 %vm419_vm2, %v29476_v21 }
 0xcac   :  { %23597 = vmatprep.mubr.msk.f32.mxu0 %vm419_vm2, %v29479_v22 }
 0xcaf   :  { %23598 = vmatmul.mubr.msk.f32.gmra.mrb[116].mxu0 %vm419_vm2, %v29486_v20 }
 0xcb0   :  { %23600 = vmatprep.mubr.msk.f32.mxu0 %vm419_vm2, %v29489_v32 }
 0xcb3   :  { %23601 = vmatmul.mubr.msk.f32.gmra.mrb[118].mxu0 %vm419_vm2, %v29496_v48 }
 0xcb4   :  { %23603 = vmatprep.mubr.msk.f32.mxu0 %vm419_vm2, %v29499_v40 }
 0xcb7   :  { %23604 = vmatmul.mubr.msk.f32.gmra.mrb[120].mxu0 %vm419_vm2, %v29506_v46 }
 0xcb8   :  { %23606 = vmatprep.mubr.msk.f32.mxu0 %vm419_vm2, %v29509_v47 }
 0xcbb   :  { %23607 = vmatmul.mubr.msk.f32.gmra.mrb[122].mxu0 %vm419_vm2, %v29516_v62 }
 0xcbc   :  { %23609 = vmatprep.mubr.msk.f32.mxu0 %vm419_vm2, %v29518_v63 }
 0xcbf   :  { %23610 = vmatmul.mubr.msk.f32.gmra.mrb[124].mxu0 %vm419_vm2, %v29524_v4 }
 0xcc0   :  { %23612 = vmatprep.mubr.msk.f32.mxu0 %vm419_vm2, %v29526_v5 }
 0xcc3   :  { %23613 = vmatmul.mubr.msk.f32.gmra.mrb[126].mxu0 %vm419_vm2, %v29532_v6 }
 0xcc4   :  { %23647 = vmatprep.mubr.f32.mxu0 %v10722_v28  ;;  %v10745_v28 = vld [vmem:[#allocation21 + $0x6b8] sm:$0xff] }
 0xd7a   :  { %v23593_v19 = vpop.f32.mrb[112].mxu0 }
 0xd7b   :  { %v10642_v8 = vpop.f32.mrb[113].mxu0 }
 0xd7c   :  { %v25999_v23 = vpack.c.bf16 %v23593_v19, %v10642_v8  ;;  %v10746_v19 = vld [vmem:[#allocation21 + $0x6c0] sm:$0xff]  ;;  %v10747_v8 = vld [vmem:[#allocation21 + $0x6c8] sm:$0xff] }
 0xd7e   :  { %v23596_v27 = vpop.f32.mrb[114].mxu0  ;;  %26000 = vmatprep.subr.bf16.mxu0 %v25999_v23 }
 0xd7f   :  { %v10652_v33 = vpop.f32.mrb[115].mxu0  ;;  %26002 = vmatpush3.bf16.msra.mxu0 %v25999_v23  ;;  %v10748_v23 = vld [vmem:[#allocation21 + $0x6d0] sm:$0xff] }
 0xd80   :  { %v26003_v30 = vpack.c.bf16 %v23596_v27, %v10652_v33  ;;  %v10749_v27 = vld [vmem:[#allocation21 + $0x6d8] sm:$0xff]  ;;  %v10750_v33 = vld [vmem:[#allocation21 + $0x6e0] sm:$0xff] }
 0xd82   :  { %v23599_v43 = vpop.f32.mrb[116].mxu0  ;;  %26004 = vmatprep.subr.bf16.mxu0 %v26003_v30 }
 0xd83   :  { %v10662_v37 = vpop.f32.mrb[117].mxu0  ;;  %26006 = vmatpush3.bf16.msra.mxu0 %v26003_v30  ;;  %v10751_v30 = vld [vmem:[#allocation21 + $0x6e8] sm:$0xff] }
 0xd84   :  { %v26007_v38 = vpack.c.bf16 %v23599_v43, %v10662_v37  ;;  %v10752_v43 = vld [vmem:[#allocation21 + $0x6f0] sm:$0xff]  ;;  %v10753_v37 = vld [vmem:[#allocation21 + $0x6f8] sm:$0xff] }
 0xd86   :  { %v23602_v29 = vpop.f32.mrb[118].mxu0  ;;  %26008 = vmatprep.subr.bf16.mxu0 %v26007_v38 }
 0xd87   :  { %v10672_v18 = vpop.f32.mrb[119].mxu0  ;;  %26010 = vmatpush3.bf16.msra.mxu0 %v26007_v38  ;;  %v10754_v38 = vld [vmem:[#allocation21 + $0x700] sm:$0xff] }
 0xd88   :  { %v26011_v58 = vpack.c.bf16 %v23602_v29, %v10672_v18  ;;  %v10755_v29 = vld [vmem:[#allocation21 + $0x708] sm:$0xff]  ;;  %v10756_v18 = vld [vmem:[#allocation21 + $0x710] sm:$0xff] }
 0xd8a   :  { %v23605_v25 = vpop.f32.mrb[120].mxu0  ;;  %26012 = vmatprep.subr.bf16.mxu0 %v26011_v58 }
 0xd8b   :  { %v10682_v60 = vpop.f32.mrb[121].mxu0  ;;  %26014 = vmatpush3.bf16.msra.mxu0 %v26011_v58  ;;  %v10757_v58 = vld [vmem:[#allocation21 + $0x718] sm:$0xff] }
 0xd8c   :  { %v26015_v24 = vpack.c.bf16 %v23605_v25, %v10682_v60  ;;  %v10758_v25 = vld [vmem:[#allocation21 + $0x720] sm:$0xff]  ;;  %v10759_v60 = vld [vmem:[#allocation21 + $0x728] sm:$0xff] }
 0xd8e   :  { %v23608_v2 = vpop.f32.mrb[122].mxu0  ;;  %26016 = vmatprep.subr.bf16.mxu0 %v26015_v24 }
 0xd8f   :  { %v10692_v1 = vpop.f32.mrb[123].mxu0  ;;  %26018 = vmatpush3.bf16.msra.mxu0 %v26015_v24  ;;  %v10760_v24 = vld [vmem:[#allocation21 + $0x730] sm:$0xff] }
 0xd90   :  { %v26019_v7 = vpack.c.bf16 %v23608_v2, %v10692_v1  ;;  %v10761_v2 = vld [vmem:[#allocation21 + $0x738] sm:$0xff]  ;;  %v10762_v1 = vld [vmem:[#allocation21 + $0x740] sm:$0xff] }
 0xd92   :  { %v23611_v55 = vpop.f32.mrb[124].mxu0  ;;  %26020 = vmatprep.subr.bf16.mxu0 %v26019_v7 }
 0xd93   :  { %v10702_v45 = vpop.f32.mrb[125].mxu0  ;;  %26022 = vmatpush3.bf16.msra.mxu0 %v26019_v7  ;;  %v10763_v7 = vld [vmem:[#allocation21 + $0x748] sm:$0xff] }
 0xd94   :  { %v26023_v9 = vpack.c.bf16 %v23611_v55, %v10702_v45  ;;  %v10764_v55 = vld [vmem:[#allocation21 + $0x750] sm:$0xff]  ;;  %v10765_v45 = vld [vmem:[#allocation21 + $0x758] sm:$0xff] }
 0xd96   :  { %v23614_v57 = vpop.f32.mrb[126].mxu0  ;;  %26024 = vmatprep.subr.bf16.mxu0 %v26023_v9 }
 0xd97   :  { %v10712_v36 = vpop.f32.mrb[127].mxu0  ;;  %26026 = vmatpush3.bf16.msra.mxu0 %v26023_v9  ;;  %v10766_v9 = vld [vmem:[#allocation21 + $0x760] sm:$0xff] }
 0xd98   :  { %v26027_v0 = vpack.c.bf16 %v23614_v57, %v10712_v36  ;;  %v10767_v57 = vld [vmem:[#allocation21 + $0x768] sm:$0xff]  ;;  %v10768_v36 = vld [vmem:[#allocation21 + $0x770] sm:$0xff] }
 0xd9a   :  { %26028 = vmatprep.subr.bf16.mxu0 %v26027_v0 }
 0xd9b   :  { %26030 = vmatpush3.bf16.msra.mxu0 %v26027_v0  ;;  %v10769_v0 = vld [vmem:[#allocation21 + $0x778] sm:$0xff] }
 0xd9c   :  { %23743 = vmatprep.subr.mxu0 %v11236_v3 }
 0xd9e   :  { %23648 = vmatmul.mubr.f32.vlgmr.msra.gmra.mrb[48].mxu0 %v10723_v44  ;;  %v10771_v44 = vld [vmem:[#allocation21 + $0x788] sm:$0xff] }
 0xd9f   :  { %23650 = vmatprep.mubr.f32.mxu0 %v10724_v14  ;;  %23744 = vmatpush3.msra.mxu0 %v11236_v3  ;;  %v10770_v3 = vld [vmem:[#allocation21 + $0x780] sm:$0xff]  ;;  %v10772_v14 = vld [vmem:[#allocation21 + $0x790] sm:$0xff] }
 0xda2   :  { %23651 = vmatmul.mubr.f32.gmra.mrb[50].mxu0 %v10725_v49  ;;  %v10773_v49 = vld [vmem:[#allocation21 + $0x798] sm:$0xff] }
 0xda3   :  { %23653 = vmatprep.mubr.f32.mxu0 %v10726_v31  ;;  %v10774_v31 = vld [vmem:[#allocation21 + $0x7a0] sm:$0xff] }
 0xda6   :  { %23654 = vmatmul.mubr.f32.gmra.mrb[52].mxu0 %v10727_v11  ;;  %v10775_v11 = vld [vmem:[#allocation21 + $0x7a8] sm:$0xff] }
 0xda7   :  { %23656 = vmatprep.mubr.f32.mxu0 %v10728_v41  ;;  %v10776_v41 = vld [vmem:[#allocation21 + $0x7b0] sm:$0xff] }
 0xdaa   :  { %23657 = vmatmul.mubr.f32.gmra.mrb[54].mxu0 %v10729_v50  ;;  %v10777_v50 = vld [vmem:[#allocation21 + $0x7b8] sm:$0xff] }
 0xdab   :  { %23659 = vmatprep.mubr.f32.mxu0 %v10730_v52  ;;  %v10778_v52 = vld [vmem:[#allocation21 + $0x7c0] sm:$0xff] }
 0xdae   :  { %23660 = vmatmul.mubr.f32.gmra.mrb[56].mxu0 %v10731_v61  ;;  %v10779_v61 = vld [vmem:[#allocation21 + $0x7c8] sm:$0xff] }
 0xdaf   :  { %23662 = vmatprep.mubr.f32.mxu0 %v10732_v54  ;;  %v10780_v54 = vld [vmem:[#allocation21 + $0x7d0] sm:$0xff] }
 0xdb2   :  { %23663 = vmatmul.mubr.f32.gmra.mrb[58].mxu0 %v10733_v56  ;;  %v10781_v56 = vld [vmem:[#allocation21 + $0x7d8] sm:$0xff] }
 0xdb3   :  { %23665 = vmatprep.mubr.f32.mxu0 %v10734_v12  ;;  %v10782_v12 = vld [vmem:[#allocation21 + $0x7e0] sm:$0xff] }
 0xdb6   :  { %23666 = vmatmul.mubr.f32.gmra.mrb[60].mxu0 %v10735_v10  ;;  %v10783_v10 = vld [vmem:[#allocation21 + $0x7e8] sm:$0xff] }
 0xdb7   :  { %23668 = vmatprep.mubr.f32.mxu0 %v10736_v39  ;;  %v10784_v39 = vld [vmem:[#allocation21 + $0x7f0] sm:$0xff] }
 0xdba   :  { %23669 = vmatmul.mubr.f32.gmra.mrb[62].mxu0 %v10737_v13  ;;  %v10785_v13 = vld [vmem:[#allocation21 + $0x7f8] sm:$0xff] }
 0xdbb   :  { %23671 = vmatprep.mubr.f32.mxu0 %v10738_v15  ;;  %v11383_v15 = vld [vmem:[#allocation21 + $0x800] sm:$0xff] }
 0xdbe   :  { %23672 = vmatmul.mubr.f32.gmra.mrb[64].mxu0 %v10739_v35 }
 0xdbf   :  { %23674 = vmatprep.mubr.f32.mxu0 %v10740_v59 }
 0xdc2   :  { %23675 = vmatmul.mubr.f32.gmra.mrb[66].mxu0 %v10741_v42 }
 0xdc3   :  { %23677 = vmatprep.mubr.f32.mxu0 %v10742_v53 }
 0xdc6   :  { %23678 = vmatmul.mubr.f32.gmra.mrb[68].mxu0 %v10743_v51 }
 0xdc7   :  { %23680 = vmatprep.mubr.f32.mxu0 %v10744_v16 }
 0xdca   :  { %23681 = vmatmul.mubr.f32.gmra.mrb[70].mxu0 %v10745_v28 }
 0xdcb   :  { %23683 = vmatprep.mubr.f32.mxu0 %v10746_v19 }
 0xdce   :  { %23684 = vmatmul.mubr.f32.gmra.mrb[72].mxu0 %v10747_v8 }
 0xdcf   :  { %23686 = vmatprep.mubr.f32.mxu0 %v10748_v23 }
 0xdd2   :  { %23687 = vmatmul.mubr.f32.gmra.mrb[74].mxu0 %v10749_v27 }
 0xdd3   :  { %23689 = vmatprep.mubr.f32.mxu0 %v10750_v33 }
 0xdd6   :  { %23690 = vmatmul.mubr.f32.gmra.mrb[76].mxu0 %v10751_v30 }
 0xdd7   :  { %23692 = vmatprep.mubr.f32.mxu0 %v10752_v43 }
 0xdda   :  { %23693 = vmatmul.mubr.f32.gmra.mrb[78].mxu0 %v10753_v37 }
 0xddb   :  { %23695 = vmatprep.mubr.f32.mxu0 %v10754_v38 }
 0xdde   :  { %23696 = vmatmul.mubr.f32.gmra.mrb[80].mxu0 %v10755_v29 }
 0xddf   :  { %23698 = vmatprep.mubr.f32.mxu0 %v10756_v18 }
 0xde2   :  { %23699 = vmatmul.mubr.f32.gmra.mrb[82].mxu0 %v10757_v58 }
 0xde3   :  { %23701 = vmatprep.mubr.f32.mxu0 %v10758_v25 }
 0xde6   :  { %23702 = vmatmul.mubr.f32.gmra.mrb[84].mxu0 %v10759_v60 }
 0xde7   :  { %23704 = vmatprep.mubr.f32.mxu0 %v10760_v24 }
 0xdea   :  { %23705 = vmatmul.mubr.f32.gmra.mrb[86].mxu0 %v10761_v2 }
 0xdeb   :  { %23707 = vmatprep.mubr.f32.mxu0 %v10762_v1 }
 0xdee   :  { %23708 = vmatmul.mubr.f32.gmra.mrb[88].mxu0 %v10763_v7  ;;  %v11897_v7 = vld [vmem:[#allocation22 + $0x28] sm:$0xff] }
 0xdef   :  { %23710 = vmatprep.mubr.f32.mxu0 %v10764_v55  ;;  %v11384_v55 = vld [vmem:[#allocation21 + $0x808] sm:$0xff] }
 0xdf2   :  { %23711 = vmatmul.mubr.f32.gmra.mrb[90].mxu0 %v10765_v45  ;;  %v11385_v45 = vld [vmem:[#allocation21 + $0x810] sm:$0xff] }
 0xdf3   :  { %23713 = vmatprep.mubr.f32.mxu0 %v10766_v9  ;;  %v11386_v9 = vld [vmem:[#allocation21 + $0x818] sm:$0xff] }
 0xdf6   :  { %23714 = vmatmul.mubr.f32.gmra.mrb[92].mxu0 %v10767_v57  ;;  %v11387_v57 = vld [vmem:[#allocation21 + $0x820] sm:$0xff] }
 0xdf7   :  { %23716 = vmatprep.mubr.f32.mxu0 %v10768_v36  ;;  %v11388_v36 = vld [vmem:[#allocation21 + $0x828] sm:$0xff] }
 0xdfa   :  { %23717 = vmatmul.mubr.f32.gmra.mrb[94].mxu0 %v10769_v0  ;;  %v11389_v0 = vld [vmem:[#allocation21 + $0x830] sm:$0xff] }
 0xdfb   :  { %23719 = vmatprep.mubr.f32.mxu0 %v10770_v3  ;;  %v11390_v3 = vld [vmem:[#allocation21 + $0x838] sm:$0xff] }
 0xdfe   :  { %23720 = vmatmul.mubr.f32.gmra.mrb[96].mxu0 %v10771_v44  ;;  %v11391_v44 = vld [vmem:[#allocation21 + $0x840] sm:$0xff] }
 0xdff   :  { %23722 = vmatprep.mubr.f32.mxu0 %v10772_v14  ;;  %v11392_v14 = vld [vmem:[#allocation21 + $0x848] sm:$0xff] }
 0xe02   :  { %23723 = vmatmul.mubr.f32.gmra.mrb[98].mxu0 %v10773_v49  ;;  %v11393_v49 = vld [vmem:[#allocation21 + $0x850] sm:$0xff] }
 0xe03   :  { %23725 = vmatprep.mubr.f32.mxu0 %v10774_v31  ;;  %v11394_v31 = vld [vmem:[#allocation21 + $0x858] sm:$0xff] }
 0xe06   :  { %23726 = vmatmul.mubr.f32.gmra.mrb[100].mxu0 %v10775_v11  ;;  %v11395_v11 = vld [vmem:[#allocation21 + $0x860] sm:$0xff] }
 0xe07   :  { %23728 = vmatprep.mubr.f32.mxu0 %v10776_v41  ;;  %v11396_v41 = vld [vmem:[#allocation21 + $0x868] sm:$0xff] }
 0xe0a   :  { %23729 = vmatmul.mubr.f32.gmra.mrb[102].mxu0 %v10777_v50  ;;  %v11397_v50 = vld [vmem:[#allocation21 + $0x870] sm:$0xff] }
 0xe0b   :  { %23731 = vmatprep.mubr.f32.mxu0 %v10778_v52  ;;  %v11398_v52 = vld [vmem:[#allocation21 + $0x878] sm:$0xff] }
 0xe0e   :  { %23732 = vmatmul.mubr.f32.gmra.mrb[104].mxu0 %v10779_v61  ;;  %v11399_v61 = vld [vmem:[#allocation21 + $0x880] sm:$0xff] }
 0xe0f   :  { %23734 = vmatprep.mubr.f32.mxu0 %v10780_v54  ;;  %v11400_v54 = vld [vmem:[#allocation21 + $0x888] sm:$0xff] }
 0xe12   :  { %23735 = vmatmul.mubr.f32.gmra.mrb[106].mxu0 %v10781_v56  ;;  %v11401_v56 = vld [vmem:[#allocation21 + $0x890] sm:$0xff] }
 0xe13   :  { %23737 = vmatprep.mubr.f32.mxu0 %v10782_v12  ;;  %v11402_v12 = vld [vmem:[#allocation21 + $0x898] sm:$0xff] }
 0xe16   :  { %23738 = vmatmul.mubr.f32.gmra.mrb[108].mxu0 %v10783_v10  ;;  %v11403_v10 = vld [vmem:[#allocation21 + $0x8a0] sm:$0xff] }
 0xe17   :  { %23740 = vmatprep.mubr.f32.mxu0 %v10784_v39  ;;  %v11404_v39 = vld [vmem:[#allocation21 + $0x8a8] sm:$0xff] }
 0xe1a   :  { %23741 = vmatmul.mubr.f32.gmra.mrb[110].mxu0 %v10785_v13  ;;  %v11405_v13 = vld [vmem:[#allocation21 + $0x8b0] sm:$0xff] }
 0xe1b   :  { %23745 = vmatprep.mubr.msk.f32.mxu0 %vm419_vm2, %v29460_v34 }
 0xe1e   :  { %23746 = vmatmul.mubr.msk.f32.vlgmr.msra.gmra.mrb[128].mxu0 %vm419_vm2, %v29462_v26 }
 0xe1f   :  { %23748 = vmatprep.mubr.msk.f32.mxu0 %vm419_vm2, %v29466_v17 }
 0xe22   :  { %23749 = vmatmul.mubr.msk.f32.gmra.mrb[130].mxu0 %vm419_vm2, %v29476_v21 }
 0xe23   :  { %23751 = vmatprep.mubr.msk.f32.mxu0 %vm419_vm2, %v29479_v22 }
 0xe26   :  { %23752 = vmatmul.mubr.msk.f32.gmra.mrb[132].mxu0 %vm419_vm2, %v29486_v20 }
 0xe27   :  { %23754 = vmatprep.mubr.msk.f32.mxu0 %vm419_vm2, %v29489_v32 }
 0xe2a   :  { %23755 = vmatmul.mubr.msk.f32.gmra.mrb[134].mxu0 %vm419_vm2, %v29496_v48 }
 0xe2b   :  { %23757 = vmatprep.mubr.msk.f32.mxu0 %vm419_vm2, %v29499_v40 }
 0xe2e   :  { %23758 = vmatmul.mubr.msk.f32.gmra.mrb[136].mxu0 %vm419_vm2, %v29506_v46 }
 0xe2f   :  { %23760 = vmatprep.mubr.msk.f32.mxu0 %vm419_vm2, %v29509_v47 }
 0xe32   :  { %23761 = vmatmul.mubr.msk.f32.gmra.mrb[138].mxu0 %vm419_vm2, %v29516_v62 }
 0xe33   :  { %23763 = vmatprep.mubr.msk.f32.mxu0 %vm419_vm2, %v29518_v63 }
 0xe36   :  { %23764 = vmatmul.mubr.msk.f32.gmra.mrb[140].mxu0 %vm419_vm2, %v29524_v4 }
 0xe37   :  { %23766 = vmatprep.mubr.msk.f32.mxu0 %vm419_vm2, %v29526_v5 }
 0xe3a   :  { %23767 = vmatmul.mubr.msk.f32.gmra.mrb[142].mxu0 %vm419_vm2, %v29532_v6 }
 0xe3b   :  { %23801 = vmatprep.mubr.f32.mxu0 %v11383_v15  ;;  %v11406_v15 = vld [vmem:[#allocation21 + $0x8b8] sm:$0xff] }
 0xef1   :  { %v23747_v35 = vpop.f32.mrb[128].mxu0 }
 0xef2   :  { %v11303_v59 = vpop.f32.mrb[129].mxu0 }
 0xef3   :  { %v26031_v42 = vpack.c.bf16 %v23747_v35, %v11303_v59  ;;  %v11407_v35 = vld [vmem:[#allocation21 + $0x8c0] sm:$0xff]  ;;  %v11408_v59 = vld [vmem:[#allocation21 + $0x8c8] sm:$0xff] }
 0xef5   :  { %v23750_v53 = vpop.f32.mrb[130].mxu0  ;;  %26032 = vmatprep.subr.bf16.mxu0 %v26031_v42 }
 0xef6   :  { %v11313_v51 = vpop.f32.mrb[131].mxu0  ;;  %26034 = vmatpush3.bf16.msra.mxu0 %v26031_v42  ;;  %v11409_v42 = vld [vmem:[#allocation21 + $0x8d0] sm:$0xff] }
 0xef7   :  { %v26035_v16 = vpack.c.bf16 %v23750_v53, %v11313_v51  ;;  %v11410_v53 = vld [vmem:[#allocation21 + $0x8d8] sm:$0xff]  ;;  %v11411_v51 = vld [vmem:[#allocation21 + $0x8e0] sm:$0xff] }
 0xef9   :  { %v23753_v28 = vpop.f32.mrb[132].mxu0  ;;  %26036 = vmatprep.subr.bf16.mxu0 %v26035_v16 }
 0xefa   :  { %v11323_v19 = vpop.f32.mrb[133].mxu0  ;;  %26038 = vmatpush3.bf16.msra.mxu0 %v26035_v16  ;;  %v11412_v16 = vld [vmem:[#allocation21 + $0x8e8] sm:$0xff] }
 0xefb   :  { %v26039_v8 = vpack.c.bf16 %v23753_v28, %v11323_v19  ;;  %v11413_v28 = vld [vmem:[#allocation21 + $0x8f0] sm:$0xff]  ;;  %v11414_v19 = vld [vmem:[#allocation21 + $0x8f8] sm:$0xff] }
 0xefd   :  { %v23756_v23 = vpop.f32.mrb[134].mxu0  ;;  %26040 = vmatprep.subr.bf16.mxu0 %v26039_v8 }
 0xefe   :  { %v11333_v27 = vpop.f32.mrb[135].mxu0  ;;  %26042 = vmatpush3.bf16.msra.mxu0 %v26039_v8  ;;  %v11415_v8 = vld [vmem:[#allocation21 + $0x900] sm:$0xff] }
 0xeff   :  { %v26043_v33 = vpack.c.bf16 %v23756_v23, %v11333_v27  ;;  %v11416_v23 = vld [vmem:[#allocation21 + $0x908] sm:$0xff]  ;;  %v11417_v27 = vld [vmem:[#allocation21 + $0x910] sm:$0xff] }
 0xf01   :  { %v23759_v30 = vpop.f32.mrb[136].mxu0  ;;  %26044 = vmatprep.subr.bf16.mxu0 %v26043_v33 }
 0xf02   :  { %v11343_v43 = vpop.f32.mrb[137].mxu0  ;;  %26046 = vmatpush3.bf16.msra.mxu0 %v26043_v33  ;;  %v11418_v33 = vld [vmem:[#allocation21 + $0x918] sm:$0xff] }
 0xf03   :  { %v26047_v37 = vpack.c.bf16 %v23759_v30, %v11343_v43  ;;  %v11419_v30 = vld [vmem:[#allocation21 + $0x920] sm:$0xff]  ;;  %v11420_v43 = vld [vmem:[#allocation21 + $0x928] sm:$0xff] }
 0xf05   :  { %v23762_v38 = vpop.f32.mrb[138].mxu0  ;;  %26048 = vmatprep.subr.bf16.mxu0 %v26047_v37 }
 0xf06   :  { %v11353_v29 = vpop.f32.mrb[139].mxu0  ;;  %26050 = vmatpush3.bf16.msra.mxu0 %v26047_v37  ;;  %v11421_v37 = vld [vmem:[#allocation21 + $0x930] sm:$0xff] }
 0xf07   :  { %v26051_v18 = vpack.c.bf16 %v23762_v38, %v11353_v29  ;;  %v11422_v38 = vld [vmem:[#allocation21 + $0x938] sm:$0xff]  ;;  %v11423_v29 = vld [vmem:[#allocation21 + $0x940] sm:$0xff] }
 0xf09   :  { %v23765_v58 = vpop.f32.mrb[140].mxu0  ;;  %26052 = vmatprep.subr.bf16.mxu0 %v26051_v18 }
 0xf0a   :  { %v11363_v25 = vpop.f32.mrb[141].mxu0  ;;  %26054 = vmatpush3.bf16.msra.mxu0 %v26051_v18  ;;  %v11424_v18 = vld [vmem:[#allocation21 + $0x948] sm:$0xff] }
 0xf0b   :  { %v26055_v60 = vpack.c.bf16 %v23765_v58, %v11363_v25  ;;  %v11425_v58 = vld [vmem:[#allocation21 + $0x950] sm:$0xff]  ;;  %v11426_v25 = vld [vmem:[#allocation21 + $0x958] sm:$0xff] }
 0xf0d   :  { %v23768_v24 = vpop.f32.mrb[142].mxu0  ;;  %26056 = vmatprep.subr.bf16.mxu0 %v26055_v60 }
 0xf0e   :  { %v11373_v2 = vpop.f32.mrb[143].mxu0  ;;  %26058 = vmatpush3.bf16.msra.mxu0 %v26055_v60  ;;  %v11427_v60 = vld [vmem:[#allocation21 + $0x960] sm:$0xff] }
 0xf0f   :  { %v26059_v1 = vpack.c.bf16 %v23768_v24, %v11373_v2  ;;  %v11428_v24 = vld [vmem:[#allocation21 + $0x968] sm:$0xff]  ;;  %v11429_v2 = vld [vmem:[#allocation21 + $0x970] sm:$0xff] }
 0xf11   :  { %26060 = vmatprep.subr.bf16.mxu0 %v26059_v1 }
 0xf12   :  { %26062 = vmatpush3.bf16.msra.mxu0 %v26059_v1  ;;  %v11430_v1 = vld [vmem:[#allocation21 + $0x978] sm:$0xff] }
 0xf13   :  { %23897 = vmatprep.subr.mxu0 %v11897_v7 }
 0xf15   :  { %23802 = vmatmul.mubr.f32.vlgmr.msra.gmra.mrb[48].mxu0 %v11384_v55  ;;  %v11432_v55 = vld [vmem:[#allocation21 + $0x988] sm:$0xff] }
 0xf16   :  { %23804 = vmatprep.mubr.f32.mxu0 %v11385_v45  ;;  %23898 = vmatpush3.msra.mxu0 %v11897_v7  ;;  %v11431_v7 = vld [vmem:[#allocation21 + $0x980] sm:$0xff]  ;;  %v11433_v45 = vld [vmem:[#allocation21 + $0x990] sm:$0xff] }
 0xf19   :  { %23805 = vmatmul.mubr.f32.gmra.mrb[50].mxu0 %v11386_v9  ;;  %v11434_v9 = vld [vmem:[#allocation21 + $0x998] sm:$0xff] }
 0xf1a   :  { %23807 = vmatprep.mubr.f32.mxu0 %v11387_v57  ;;  %v11435_v57 = vld [vmem:[#allocation21 + $0x9a0] sm:$0xff] }
 0xf1d   :  { %23808 = vmatmul.mubr.f32.gmra.mrb[52].mxu0 %v11388_v36  ;;  %v11436_v36 = vld [vmem:[#allocation21 + $0x9a8] sm:$0xff] }
 0xf1e   :  { %23810 = vmatprep.mubr.f32.mxu0 %v11389_v0  ;;  %v11437_v0 = vld [vmem:[#allocation21 + $0x9b0] sm:$0xff] }
 0xf21   :  { %23811 = vmatmul.mubr.f32.gmra.mrb[54].mxu0 %v11390_v3  ;;  %v11438_v3 = vld [vmem:[#allocation21 + $0x9b8] sm:$0xff] }
 0xf22   :  { %23813 = vmatprep.mubr.f32.mxu0 %v11391_v44  ;;  %v11439_v44 = vld [vmem:[#allocation21 + $0x9c0] sm:$0xff] }
 0xf25   :  { %23814 = vmatmul.mubr.f32.gmra.mrb[56].mxu0 %v11392_v14  ;;  %v11440_v14 = vld [vmem:[#allocation21 + $0x9c8] sm:$0xff] }
 0xf26   :  { %23816 = vmatprep.mubr.f32.mxu0 %v11393_v49  ;;  %v11441_v49 = vld [vmem:[#allocation21 + $0x9d0] sm:$0xff] }
 0xf29   :  { %23817 = vmatmul.mubr.f32.gmra.mrb[58].mxu0 %v11394_v31  ;;  %v11442_v31 = vld [vmem:[#allocation21 + $0x9d8] sm:$0xff] }
 0xf2a   :  { %23819 = vmatprep.mubr.f32.mxu0 %v11395_v11  ;;  %v11443_v11 = vld [vmem:[#allocation21 + $0x9e0] sm:$0xff] }
 0xf2d   :  { %23820 = vmatmul.mubr.f32.gmra.mrb[60].mxu0 %v11396_v41  ;;  %v11444_v41 = vld [vmem:[#allocation21 + $0x9e8] sm:$0xff] }
 0xf2e   :  { %23822 = vmatprep.mubr.f32.mxu0 %v11397_v50  ;;  %v11445_v50 = vld [vmem:[#allocation21 + $0x9f0] sm:$0xff] }
 0xf31   :  { %23823 = vmatmul.mubr.f32.gmra.mrb[62].mxu0 %v11398_v52  ;;  %v11446_v52 = vld [vmem:[#allocation21 + $0x9f8] sm:$0xff] }
 0xf32   :  { %23825 = vmatprep.mubr.f32.mxu0 %v11399_v61 }
 0xf35   :  { %23826 = vmatmul.mubr.f32.gmra.mrb[64].mxu0 %v11400_v54 }
 0xf36   :  { %23828 = vmatprep.mubr.f32.mxu0 %v11401_v56 }
 0xf39   :  { %23829 = vmatmul.mubr.f32.gmra.mrb[66].mxu0 %v11402_v12 }
 0xf3a   :  { %23831 = vmatprep.mubr.f32.mxu0 %v11403_v10  ;;  %v12044_v10 = vld [vmem:[#allocation21 + $0xa00] sm:$0xff] }
 0xf3d   :  { %23832 = vmatmul.mubr.f32.gmra.mrb[68].mxu0 %v11404_v39 }
 0xf3e   :  { %23834 = vmatprep.mubr.f32.mxu0 %v11405_v13 }
 0xf41   :  { %23835 = vmatmul.mubr.f32.gmra.mrb[70].mxu0 %v11406_v15 }
 0xf42   :  { %23837 = vmatprep.mubr.f32.mxu0 %v11407_v35 }
 0xf45   :  { %23838 = vmatmul.mubr.f32.gmra.mrb[72].mxu0 %v11408_v59 }
 0xf46   :  { %23840 = vmatprep.mubr.f32.mxu0 %v11409_v42 }
 0xf49   :  { %23841 = vmatmul.mubr.f32.gmra.mrb[74].mxu0 %v11410_v53 }
 0xf4a   :  { %23843 = vmatprep.mubr.f32.mxu0 %v11411_v51 }
 0xf4d   :  { %23844 = vmatmul.mubr.f32.gmra.mrb[76].mxu0 %v11412_v16 }
 0xf4e   :  { %23846 = vmatprep.mubr.f32.mxu0 %v11413_v28 }
 0xf51   :  { %23847 = vmatmul.mubr.f32.gmra.mrb[78].mxu0 %v11414_v19 }
 0xf52   :  { %23849 = vmatprep.mubr.f32.mxu0 %v11415_v8 }
 0xf55   :  { %23850 = vmatmul.mubr.f32.gmra.mrb[80].mxu0 %v11416_v23 }
 0xf56   :  { %23852 = vmatprep.mubr.f32.mxu0 %v11417_v27 }
 0xf59   :  { %23853 = vmatmul.mubr.f32.gmra.mrb[82].mxu0 %v11418_v33 }
 0xf5a   :  { %23855 = vmatprep.mubr.f32.mxu0 %v11419_v30 }
 0xf5d   :  { %23856 = vmatmul.mubr.f32.gmra.mrb[84].mxu0 %v11420_v43 }
 0xf5e   :  { %23858 = vmatprep.mubr.f32.mxu0 %v11421_v37 }
 0xf61   :  { %23859 = vmatmul.mubr.f32.gmra.mrb[86].mxu0 %v11422_v38 }
 0xf62   :  { %23861 = vmatprep.mubr.f32.mxu0 %v11423_v29 }
 0xf65   :  { %23862 = vmatmul.mubr.f32.gmra.mrb[88].mxu0 %v11424_v18 }
 0xf66   :  { %23864 = vmatprep.mubr.f32.mxu0 %v11425_v58 }
 0xf69   :  { %23865 = vmatmul.mubr.f32.gmra.mrb[90].mxu0 %v11426_v25 }
 0xf6a   :  { %23867 = vmatprep.mubr.f32.mxu0 %v11427_v60 }
 0xf6d   :  { %23868 = vmatmul.mubr.f32.gmra.mrb[92].mxu0 %v11428_v24 }
 0xf6e   :  { %23870 = vmatprep.mubr.f32.mxu0 %v11429_v2 }
 0xf71   :  { %23871 = vmatmul.mubr.f32.gmra.mrb[94].mxu0 %v11430_v1 }
 0xf72   :  { %23873 = vmatprep.mubr.f32.mxu0 %v11431_v7 }
 0xf75   :  { %23874 = vmatmul.mubr.f32.gmra.mrb[96].mxu0 %v11432_v55 }
 0xf76   :  { %23876 = vmatprep.mubr.f32.mxu0 %v11433_v45 }
 0xf79   :  { %23877 = vmatmul.mubr.f32.gmra.mrb[98].mxu0 %v11434_v9 }
 0xf7a   :  { %23879 = vmatprep.mubr.f32.mxu0 %v11435_v57 }
 0xf7d   :  { %23880 = vmatmul.mubr.f32.gmra.mrb[100].mxu0 %v11436_v36 }
 0xf7e   :  { %23882 = vmatprep.mubr.f32.mxu0 %v11437_v0 }
 0xf81   :  { %23883 = vmatmul.mubr.f32.gmra.mrb[102].mxu0 %v11438_v3 }
 0xf82   :  { %23885 = vmatprep.mubr.f32.mxu0 %v11439_v44 }
 0xf85   :  { %23886 = vmatmul.mubr.f32.gmra.mrb[104].mxu0 %v11440_v14 }
 0xf86   :  { %23888 = vmatprep.mubr.f32.mxu0 %v11441_v49 }
 0xf89   :  { %23889 = vmatmul.mubr.f32.gmra.mrb[106].mxu0 %v11442_v31 }
 0xf8a   :  { %23891 = vmatprep.mubr.f32.mxu0 %v11443_v11 }
 0xf8d   :  { %23892 = vmatmul.mubr.f32.gmra.mrb[108].mxu0 %v11444_v41 }
 0xf8e   :  { %23894 = vmatprep.mubr.f32.mxu0 %v11445_v50 }
 0xf91   :  { %23895 = vmatmul.mubr.f32.gmra.mrb[110].mxu0 %v11446_v52 }
 0xf92   :  { %23899 = vmatprep.mubr.msk.f32.mxu0 %vm419_vm2, %v29460_v34 }
 0xf95   :  { %23900 = vmatmul.mubr.msk.f32.vlgmr.msra.gmra.mrb[144].mxu0 %vm419_vm2, %v29462_v26 }
 0xf96   :  { %23902 = vmatprep.mubr.msk.f32.mxu0 %vm419_vm2, %v29466_v17 }
 0xf99   :  { %23903 = vmatmul.mubr.msk.f32.gmra.mrb[146].mxu0 %vm419_vm2, %v29476_v21 }
 0xf9a   :  { %23905 = vmatprep.mubr.msk.f32.mxu0 %vm419_vm2, %v29479_v22 }
 0xf9d   :  { %23906 = vmatmul.mubr.msk.f32.gmra.mrb[148].mxu0 %vm419_vm2, %v29486_v20 }
 0xf9e   :  { %23908 = vmatprep.mubr.msk.f32.mxu0 %vm419_vm2, %v29489_v32 }
 0xfa1   :  { %23909 = vmatmul.mubr.msk.f32.gmra.mrb[150].mxu0 %vm419_vm2, %v29496_v48 }
 0xfa2   :  { %23911 = vmatprep.mubr.msk.f32.mxu0 %vm419_vm2, %v29499_v40 }
 0xfa5   :  { %23912 = vmatmul.mubr.msk.f32.gmra.mrb[152].mxu0 %vm419_vm2, %v29506_v46 }
 0xfa6   :  { %23914 = vmatprep.mubr.msk.f32.mxu0 %vm419_vm2, %v29509_v47 }
 0xfa9   :  { %23915 = vmatmul.mubr.msk.f32.gmra.mrb[154].mxu0 %vm419_vm2, %v29516_v62 }
 0xfaa   :  { %23917 = vmatprep.mubr.msk.f32.mxu0 %vm419_vm2, %v29518_v63 }
 0xfad   :  { %23918 = vmatmul.mubr.msk.f32.gmra.mrb[156].mxu0 %vm419_vm2, %v29524_v4 }
 0xfae   :  { %23920 = vmatprep.mubr.msk.f32.mxu0 %vm419_vm2, %v29526_v5 }
 0xfb1   :  { %23921 = vmatmul.mubr.msk.f32.gmra.mrb[158].mxu0 %vm419_vm2, %v29532_v6 }
 0xfb2   :  { %23955 = vmatprep.mubr.f32.mxu0 %v12044_v10 }
0x1004   :  { %v29732_v61 = vpop.f32.mrb[62].mxu0 }
0x1005   :  { %30845 = vst [vmem:[#allocation33_spill] sm:$0xff] %v29732_v61  ;;  %v29734_v54 = vpop.f32.mrb[63].mxu0 }
0x1006   :  { %30846 = vst [vmem:[#allocation34_spill] sm:$0xff] %v29734_v54 }
0x1008   :  { %v29736_v56 = vpop.f32.mrb[64].mxu0 }
0x1009   :  { %30847 = vst [vmem:[#allocation35_spill] sm:$0xff] %v29736_v56  ;;  %v29738_v12 = vpop.f32.mrb[65].mxu0 }
0x100a   :  { %30848 = vst [vmem:[#allocation36_spill] sm:$0xff] %v29738_v12 }
0x100c   :  { %v29740_v39 = vpop.f32.mrb[66].mxu0 }
0x100d   :  { %30849 = vst [vmem:[#allocation37_spill] sm:$0xff] %v29740_v39  ;;  %v29742_v13 = vpop.f32.mrb[67].mxu0 }
0x100e   :  { %30850 = vst [vmem:[#allocation38_spill] sm:$0xff] %v29742_v13 }
0x1010   :  { %v29744_v15 = vpop.f32.mrb[68].mxu0 }
0x1011   :  { %30851 = vst [vmem:[#allocation39_spill] sm:$0xff] %v29744_v15  ;;  %v29746_v35 = vpop.f32.mrb[69].mxu0 }
0x1012   :  { %30852 = vst [vmem:[#allocation40_spill] sm:$0xff] %v29746_v35 }
0x1014   :  { %v29748_v59 = vpop.f32.mrb[70].mxu0 }
0x1015   :  { %30853 = vst [vmem:[#allocation41_spill] sm:$0xff] %v29748_v59  ;;  %v29750_v42 = vpop.f32.mrb[71].mxu0 }
0x1016   :  { %30854 = vst [vmem:[#allocation42_spill] sm:$0xff] %v29750_v42 }
0x1018   :  { %v29752_v53 = vpop.f32.mrb[72].mxu0 }
0x1019   :  { %30855 = vst [vmem:[#allocation43_spill] sm:$0xff] %v29752_v53  ;;  %v29754_v51 = vpop.f32.mrb[73].mxu0 }
0x101a   :  { %30856 = vst [vmem:[#allocation44_spill] sm:$0xff] %v29754_v51  ;;  %v13388_v51 = vld [vmem:[#allocation21 + $0xeb0] sm:$0xff] }
0x101c   :  { %v29756_v16 = vpop.f32.mrb[74].mxu0 }
0x101d   :  { %30857 = vst [vmem:[#allocation45_spill] sm:$0xff] %v29756_v16  ;;  %v29758_v28 = vpop.f32.mrb[75].mxu0 }
0x101e   :  { %30858 = vst [vmem:[#allocation46_spill] sm:$0xff] %v29758_v28 }
0x1020   :  { %v29760_v19 = vpop.f32.mrb[76].mxu0 }
0x1021   :  { %30859 = vst [vmem:[#allocation47_spill] sm:$0xff] %v29760_v19  ;;  %v29762_v8 = vpop.f32.mrb[77].mxu0 }
0x1022   :  { %30860 = vst [vmem:[#allocation48_spill] sm:$0xff] %v29762_v8 }
0x1024   :  { %v29764_v23 = vpop.f32.mrb[78].mxu0 }
0x1025   :  { %30861 = vst [vmem:[#allocation49_spill] sm:$0xff] %v29764_v23  ;;  %v29766_v27 = vpop.f32.mrb[79].mxu0 }
0x1026   :  { %30862 = vst [vmem:[#allocation50_spill] sm:$0xff] %v29766_v27 }
0x1028   :  { %v29768_v33 = vpop.f32.mrb[80].mxu0 }
0x1029   :  { %30863 = vst [vmem:[#allocation51_spill] sm:$0xff] %v29768_v33  ;;  %v29770_v30 = vpop.f32.mrb[81].mxu0 }
0x102a   :  { %30864 = vst [vmem:[#allocation52_spill] sm:$0xff] %v29770_v30 }
0x102c   :  { %v29772_v43 = vpop.f32.mrb[82].mxu0 }
0x102d   :  { %30865 = vst [vmem:[#allocation53_spill] sm:$0xff] %v29772_v43  ;;  %v29774_v37 = vpop.f32.mrb[83].mxu0 }
0x102e   :  { %30866 = vst [vmem:[#allocation54_spill] sm:$0xff] %v29774_v37 }
0x1030   :  { %v29776_v38 = vpop.f32.mrb[84].mxu0 }
0x1031   :  { %30867 = vst [vmem:[#allocation55_spill] sm:$0xff] %v29776_v38  ;;  %v29778_v29 = vpop.f32.mrb[85].mxu0 }
0x1032   :  { %30868 = vst [vmem:[#allocation56_spill] sm:$0xff] %v29778_v29  ;;  %v12709_v29 = vld [vmem:[#allocation21 + $0xc20] sm:$0xff] }
0x1034   :  { %v29780_v18 = vpop.f32.mrb[86].mxu0 }
0x1035   :  { %30869 = vst [vmem:[#allocation57_spill] sm:$0xff] %v29780_v18  ;;  %v29782_v58 = vpop.f32.mrb[87].mxu0 }
0x1036   :  { %30870 = vst [vmem:[#allocation58_spill] sm:$0xff] %v29782_v58 }
0x1038   :  { %v29784_v25 = vpop.f32.mrb[88].mxu0 }
0x1039   :  { %30871 = vst [vmem:[#allocation59_spill] sm:$0xff] %v29784_v25  ;;  %v29786_v60 = vpop.f32.mrb[89].mxu0 }
0x103a   :  { %30872 = vst [vmem:[#allocation60_spill] sm:$0xff] %v29786_v60 }
0x103c   :  { %v29788_v24 = vpop.f32.mrb[90].mxu0 }
0x103d   :  { %30873 = vst [vmem:[#allocation61_spill] sm:$0xff] %v29788_v24  ;;  %v29790_v2 = vpop.f32.mrb[91].mxu0 }
0x103e   :  { %30874 = vst [vmem:[#allocation62_spill] sm:$0xff] %v29790_v2 }
0x1040   :  { %v29792_v1 = vpop.f32.mrb[92].mxu0 }
0x1041   :  { %30875 = vst [vmem:[#allocation63_spill] sm:$0xff] %v29792_v1  ;;  %v29794_v7 = vpop.f32.mrb[93].mxu0 }
0x1042   :  { %30876 = vst [vmem:[#allocation64_spill] sm:$0xff] %v29794_v7 }
0x1044   :  { %v29796_v55 = vpop.f32.mrb[94].mxu0 }
0x1045   :  { %30877 = vst [vmem:[#allocation65_spill] sm:$0xff] %v29796_v55  ;;  %v29798_v45 = vpop.f32.mrb[95].mxu0 }
0x1046   :  { %30878 = vst [vmem:[#allocation66_spill] sm:$0xff] %v29798_v45 }
0x1048   :  { %v29800_v9 = vpop.f32.mrb[96].mxu0 }
0x1049   :  { %30879 = vst [vmem:[#allocation67_spill] sm:$0xff] %v29800_v9  ;;  %v29802_v57 = vpop.f32.mrb[97].mxu0 }
0x104a   :  { %30880 = vst [vmem:[#allocation68_spill] sm:$0xff] %v29802_v57 }
0x104c   :  { %v29804_v36 = vpop.f32.mrb[98].mxu0 }
0x104d   :  { %30881 = vst [vmem:[#allocation69_spill] sm:$0xff] %v29804_v36  ;;  %v29806_v0 = vpop.f32.mrb[99].mxu0 }
0x104e   :  { %30882 = vst [vmem:[#allocation70_spill] sm:$0xff] %v29806_v0 }
0x1050   :  { %v29808_v3 = vpop.f32.mrb[100].mxu0 }
0x1051   :  { %30883 = vst [vmem:[#allocation71_spill] sm:$0xff] %v29808_v3  ;;  %v29810_v44 = vpop.f32.mrb[101].mxu0 }
0x1052   :  { %30884 = vst [vmem:[#allocation72_spill] sm:$0xff] %v29810_v44 }
0x1054   :  { %v29812_v14 = vpop.f32.mrb[102].mxu0 }
0x1055   :  { %30885 = vst [vmem:[#allocation73_spill] sm:$0xff] %v29812_v14  ;;  %v29814_v49 = vpop.f32.mrb[103].mxu0 }
0x1056   :  { %30886 = vst [vmem:[#allocation74_spill] sm:$0xff] %v29814_v49 }
0x1058   :  { %v29816_v31 = vpop.f32.mrb[104].mxu0 }
0x1059   :  { %30887 = vst [vmem:[#allocation75_spill] sm:$0xff] %v29816_v31  ;;  %v29818_v11 = vpop.f32.mrb[105].mxu0 }
0x105a   :  { %30888 = vst [vmem:[#allocation76_spill] sm:$0xff] %v29818_v11 }
0x105c   :  { %v29820_v41 = vpop.f32.mrb[106].mxu0 }
0x105d   :  { %30889 = vst [vmem:[#allocation77_spill] sm:$0xff] %v29820_v41  ;;  %v29822_v50 = vpop.f32.mrb[107].mxu0 }
0x105e   :  { %30890 = vst [vmem:[#allocation78_spill] sm:$0xff] %v29822_v50 }
0x1060   :  { %v29824_v52 = vpop.f32.mrb[108].mxu0 }
0x1061   :  { %30891 = vst [vmem:[#allocation79_spill] sm:$0xff] %v29824_v52  ;;  %v29826_v10 = vpop.f32.mrb[109].mxu0 }
0x1062   :  { %30892 = vst [vmem:[#allocation80_spill] sm:$0xff] %v29826_v10 }
0x1064   :  { %v29828_v0 = vpop.f32.mrb[110].mxu0 }
0x1065   :  { %30893 = vst [vmem:[#allocation81_spill] sm:$0xff] %v29828_v0  ;;  %v29830_v3 = vpop.f32.mrb[111].mxu0 }
0x1066   :  { %30894 = vst [vmem:[#allocation82_spill] sm:$0xff] %v29830_v3 }
0x1068   :  { %v23901_v44 = vpop.f32.mrb[144].mxu0 }
0x1069   :  { %v11964_v14 = vpop.f32.mrb[145].mxu0 }
0x106a   :  { %v26063_v36 = vpack.c.bf16 %v23901_v44, %v11964_v14 }
0x106c   :  { %v23904_v49 = vpop.f32.mrb[146].mxu0  ;;  %26064 = vmatprep.subr.bf16.mxu0 %v26063_v36  ;;  %26415 = vmatprep.subr.bf16.mxu1 %v26063_v36 }
0x106d   :  { %v11974_v31 = vpop.f32.mrb[147].mxu0  ;;  %26066 = vmatpush3.bf16.msra.mxu0 %v26063_v36  ;;  %26423 = vmatpush3.bf16.msra.mxu1 %v26063_v36 }
0x106e   :  { %v26067_v41 = vpack.c.bf16 %v23904_v49, %v11974_v31 }
0x1070   :  { %v23907_v11 = vpop.f32.mrb[148].mxu0  ;;  %26068 = vmatprep.subr.bf16.mxu0 %v26067_v41  ;;  %26416 = vmatprep.subr.bf16.mxu1 %v26067_v41 }
0x1071   :  { %v11984_v52 = vpop.f32.mrb[149].mxu0  ;;  %26070 = vmatpush3.bf16.msra.mxu0 %v26067_v41  ;;  %26424 = vmatpush3.bf16.msra.mxu1 %v26067_v41 }
0x1072   :  { %v26071_v10 = vpack.c.bf16 %v23907_v11, %v11984_v52 }
0x1074   :  { %v23910_v0 = vpop.f32.mrb[150].mxu0  ;;  %26072 = vmatprep.subr.bf16.mxu0 %v26071_v10  ;;  %26417 = vmatprep.subr.bf16.mxu1 %v26071_v10 }
0x1075   :  { %v11994_v3 = vpop.f32.mrb[151].mxu0  ;;  %26074 = vmatpush3.bf16.msra.mxu0 %v26071_v10  ;;  %26425 = vmatpush3.bf16.msra.mxu1 %v26071_v10 }
0x1076   :  { %v26075_v44 = vpack.c.bf16 %v23910_v0, %v11994_v3 }
0x1078   :  { %v23913_v14 = vpop.f32.mrb[152].mxu0  ;;  %26076 = vmatprep.subr.bf16.mxu0 %v26075_v44  ;;  %26418 = vmatprep.subr.bf16.mxu1 %v26075_v44 }
0x1079   :  { %v12004_v50 = vpop.f32.mrb[153].mxu0  ;;  %26078 = vmatpush3.bf16.msra.mxu0 %v26075_v44  ;;  %26426 = vmatpush3.bf16.msra.mxu1 %v26075_v44  ;;  %v12558_v44 = vld [vmem:[#allocation22 + $0x30] sm:$0xff] }
0x107a   :  { %v26079_v36 = vpack.c.bf16 %v23913_v14, %v12004_v50  ;;  %v12045_v14 = vld [vmem:[#allocation21 + $0xa08] sm:$0xff] }
0x107c   :  { %v23916_v49 = vpop.f32.mrb[154].mxu0  ;;  %26080 = vmatprep.subr.bf16.mxu0 %v26079_v36  ;;  %26419 = vmatprep.subr.bf16.mxu1 %v26079_v36 }
0x107d   :  { %v12014_v31 = vpop.f32.mrb[155].mxu0  ;;  %26082 = vmatpush3.bf16.msra.mxu0 %v26079_v36  ;;  %26427 = vmatpush3.bf16.msra.mxu1 %v26079_v36  ;;  %v12046_v36 = vld [vmem:[#allocation21 + $0xa10] sm:$0xff] }
0x107e   :  { %v26083_v11 = vpack.c.bf16 %v23916_v49, %v12014_v31  ;;  %v13219_v49 = vld [vmem:[#allocation22 + $0x38] sm:$0xff] }
0x107f   :  { %v12047_v31 = vld [vmem:[#allocation21 + $0xa18] sm:$0xff] }
0x1080   :  { %v23919_v41 = vpop.f32.mrb[156].mxu0  ;;  %26084 = vmatprep.subr.bf16.mxu0 %v26083_v11  ;;  %26420 = vmatprep.subr.bf16.mxu1 %v26083_v11 }
0x1081   :  { %v12024_v52 = vpop.f32.mrb[157].mxu0  ;;  %26086 = vmatpush3.bf16.msra.mxu0 %v26083_v11  ;;  %26428 = vmatpush3.bf16.msra.mxu1 %v26083_v11  ;;  %v12048_v11 = vld [vmem:[#allocation21 + $0xa20] sm:$0xff] }
0x1082   :  { %v26087_v0 = vpack.c.bf16 %v23919_v41, %v12024_v52  ;;  %v12049_v41 = vld [vmem:[#allocation21 + $0xa28] sm:$0xff]  ;;  %v12050_v52 = vld [vmem:[#allocation21 + $0xa30] sm:$0xff] }
0x1084   :  { %v23922_v3 = vpop.f32.mrb[158].mxu0  ;;  %26088 = vmatprep.subr.bf16.mxu0 %v26087_v0  ;;  %26421 = vmatprep.subr.bf16.mxu1 %v26087_v0 }
0x1085   :  { %v12034_v10 = vpop.f32.mrb[159].mxu0  ;;  %26090 = vmatpush3.bf16.msra.mxu0 %v26087_v0  ;;  %26429 = vmatpush3.bf16.msra.mxu1 %v26087_v0  ;;  %v12051_v0 = vld [vmem:[#allocation21 + $0xa38] sm:$0xff] }
0x1086   :  { %v26091_v50 = vpack.c.bf16 %v23922_v3, %v12034_v10  ;;  %v12052_v3 = vld [vmem:[#allocation21 + $0xa40] sm:$0xff]  ;;  %v12053_v10 = vld [vmem:[#allocation21 + $0xa48] sm:$0xff] }
0x1088   :  { %26092 = vmatprep.subr.bf16.mxu0 %v26091_v50  ;;  %26422 = vmatprep.subr.bf16.mxu1 %v26091_v50 }
0x1089   :  { %26094 = vmatpush3.bf16.msra.mxu0 %v26091_v50  ;;  %26430 = vmatpush3.bf16.msra.mxu1 %v26091_v50  ;;  %v12054_v50 = vld [vmem:[#allocation21 + $0xa50] sm:$0xff] }
0x108a   :  { %24051 = vmatprep.subr.mxu0 %v12558_v44 }
0x108c   :  { %23956 = vmatmul.mubr.f32.vlgmr.msra.gmra.mrb[48].mxu0 %v12045_v14  ;;  %v12055_v14 = vld [vmem:[#allocation21 + $0xa58] sm:$0xff] }
0x108d   :  { %23958 = vmatprep.mubr.f32.mxu0 %v12046_v36  ;;  %24052 = vmatpush3.msra.mxu0 %v12558_v44  ;;  %v12056_v36 = vld [vmem:[#allocation21 + $0xa60] sm:$0xff]  ;;  %v12057_v44 = vld [vmem:[#allocation21 + $0xa68] sm:$0xff] }
0x108e   :  { %24205 = vmatprep.subr.mxu0 %v13219_v49 }
0x1090   :  { %23959 = vmatmul.mubr.f32.gmra.mrb[50].mxu0 %v12047_v31  ;;  %v13880_v31 = vld [vmem:[#allocation22 + $0x40] sm:$0xff] }
0x1091   :  { %23961 = vmatprep.mubr.f32.mxu0 %v12048_v11  ;;  %v12059_v11 = vld [vmem:[#allocation21 + $0xa78] sm:$0xff] }
0x1094   :  { %23962 = vmatmul.mubr.f32.gmra.mrb[52].mxu0 %v12049_v41  ;;  %v12060_v41 = vld [vmem:[#allocation21 + $0xa80] sm:$0xff] }
0x1095   :  { %23964 = vmatprep.mubr.f32.mxu0 %v12050_v52  ;;  %v12061_v52 = vld [vmem:[#allocation21 + $0xa88] sm:$0xff] }
0x1098   :  { %23965 = vmatmul.mubr.f32.gmra.mrb[54].mxu0 %v12051_v0  ;;  %v12062_v0 = vld [vmem:[#allocation21 + $0xa90] sm:$0xff] }
0x1099   :  { %23967 = vmatprep.mubr.f32.mxu0 %v12052_v3  ;;  %v12063_v3 = vld [vmem:[#allocation21 + $0xa98] sm:$0xff] }
0x109c   :  { %23968 = vmatmul.mubr.f32.gmra.mrb[56].mxu0 %v12053_v10  ;;  %v12064_v10 = vld [vmem:[#allocation21 + $0xaa0] sm:$0xff] }
0x109d   :  { %23970 = vmatprep.mubr.f32.mxu0 %v12054_v50  ;;  %v12065_v50 = vld [vmem:[#allocation21 + $0xaa8] sm:$0xff] }
0x10a0   :  { %23971 = vmatmul.mubr.f32.gmra.mrb[58].mxu0 %v12055_v14  ;;  %v14541_v14 = vld [vmem:[#allocation22 + $0x48] sm:$0xff] }
0x10a1   :  { %23973 = vmatprep.mubr.f32.mxu0 %v12056_v36  ;;  %v12066_v36 = vld [vmem:[#allocation21 + $0xab0] sm:$0xff] }
0x10a4   :  { %23974 = vmatmul.mubr.f32.gmra.mrb[60].mxu0 %v12057_v44  ;;  %v12067_v44 = vld [vmem:[#allocation21 + $0xab8] sm:$0xff] }
0x10a5   :  { %24053 = vmatprep.mubr.msk.f32.mxu0 %vm419_vm2, %v29460_v34 }
0x10a8   :  { %24054 = vmatmul.mubr.msk.f32.vlgmr.msra.gmra.mrb[160].mxu0 %vm419_vm2, %v29462_v26 }
0x10a9   :  { %24056 = vmatprep.mubr.msk.f32.mxu0 %vm419_vm2, %v29466_v17  ;;  %24206 = vmatpush3.msra.mxu0 %v13219_v49  ;;  %v12058_v49 = vld [vmem:[#allocation21 + $0xa70] sm:$0xff] }
0x10aa   :  { %24359 = vmatprep.subr.mxu0 %v13880_v31  ;;  %23976 = vmatprep.mubr.f32.mxu1 %v12058_v49  ;;  %v12068_v49 = vld [vmem:[#allocation21 + $0xac0] sm:$0xff] }
0x10ab   :  { %23977 = vmatmul.mubr.f32.vlgmr.msra.gmra.mrb[118].mxu1 %v12059_v11  ;;  %v12069_v11 = vld [vmem:[#allocation21 + $0xac8] sm:$0xff] }
0x10ac   :  { %24057 = vmatmul.mubr.msk.f32.gmra.mrb[162].mxu0 %vm419_vm2, %v29476_v21  ;;  %23979 = vmatprep.mubr.f32.mxu1 %v12060_v41  ;;  %v12071_v41 = vld [vmem:[#allocation21 + $0xad8] sm:$0xff] }
0x10ad   :  { %24059 = vmatprep.mubr.msk.f32.mxu0 %vm419_vm2, %v29479_v22 }
0x10af   :  { %23980 = vmatmul.mubr.f32.gmra.mrb[120].mxu1 %v12061_v52  ;;  %v12072_v52 = vld [vmem:[#allocation21 + $0xae0] sm:$0xff] }
0x10b0   :  { %24060 = vmatmul.mubr.msk.f32.gmra.mrb[164].mxu0 %vm419_vm2, %v29486_v20  ;;  %23982 = vmatprep.mubr.f32.mxu1 %v12062_v0  ;;  %v12073_v0 = vld [vmem:[#allocation21 + $0xae8] sm:$0xff] }
0x10b1   :  { %24062 = vmatprep.mubr.msk.f32.mxu0 %vm419_vm2, %v29489_v32 }
0x10b3   :  { %23983 = vmatmul.mubr.f32.gmra.mrb[122].mxu1 %v12063_v3  ;;  %v12074_v3 = vld [vmem:[#allocation21 + $0xaf0] sm:$0xff] }
0x10b4   :  { %24063 = vmatmul.mubr.msk.f32.gmra.mrb[166].mxu0 %vm419_vm2, %v29496_v48  ;;  %23985 = vmatprep.mubr.f32.mxu1 %v12064_v10  ;;  %v12075_v10 = vld [vmem:[#allocation21 + $0xaf8] sm:$0xff] }
0x10b5   :  { %24065 = vmatprep.mubr.msk.f32.mxu0 %vm419_vm2, %v29499_v40 }
0x10b7   :  { %23986 = vmatmul.mubr.f32.gmra.mrb[124].mxu1 %v12065_v50  ;;  %v12076_v50 = vld [vmem:[#allocation21 + $0xb00] sm:$0xff] }
0x10b8   :  { %24066 = vmatmul.mubr.msk.f32.gmra.mrb[168].mxu0 %vm419_vm2, %v29506_v46  ;;  %23988 = vmatprep.mubr.f32.mxu1 %v12066_v36  ;;  %v12077_v36 = vld [vmem:[#allocation21 + $0xb08] sm:$0xff] }
0x10b9   :  { %24068 = vmatprep.mubr.msk.f32.mxu0 %vm419_vm2, %v29509_v47 }
0x10bb   :  { %23989 = vmatmul.mubr.f32.gmra.mrb[126].mxu1 %v12067_v44  ;;  %v12078_v44 = vld [vmem:[#allocation21 + $0xb10] sm:$0xff] }
0x10bc   :  { %24069 = vmatmul.mubr.msk.f32.gmra.mrb[170].mxu0 %vm419_vm2, %v29516_v62  ;;  %23991 = vmatprep.mubr.f32.mxu1 %v12068_v49  ;;  %v12079_v49 = vld [vmem:[#allocation21 + $0xb18] sm:$0xff] }
0x10bd   :  { %24071 = vmatprep.mubr.msk.f32.mxu0 %vm419_vm2, %v29518_v63 }
0x10bf   :  { %23992 = vmatmul.mubr.f32.gmra.mrb[128].mxu1 %v12069_v11  ;;  %v12080_v11 = vld [vmem:[#allocation21 + $0xb20] sm:$0xff] }
0x10c0   :  { %24072 = vmatmul.mubr.msk.f32.gmra.mrb[172].mxu0 %vm419_vm2, %v29524_v4 }
0x10c1   :  { %24074 = vmatprep.mubr.msk.f32.mxu0 %vm419_vm2, %v29526_v5 }
0x10c4   :  { %24075 = vmatmul.mubr.msk.f32.gmra.mrb[174].mxu0 %vm419_vm2, %v29532_v6 }
0x10c5   :  { %24207 = vmatprep.mubr.msk.f32.mxu0 %vm419_vm2, %v29460_v34 }
0x10c8   :  { %24208 = vmatmul.mubr.msk.f32.vlgmr.msra.gmra.mrb[176].mxu0 %vm419_vm2, %v29462_v26 }
0x10c9   :  { %24210 = vmatprep.mubr.msk.f32.mxu0 %vm419_vm2, %v29466_v17  ;;  %24360 = vmatpush3.msra.mxu0 %v13880_v31  ;;  %v12070_v31 = vld [vmem:[#allocation21 + $0xad0] sm:$0xff] }
0x10ca   :  { %24513 = vmatprep.subr.mxu0 %v14541_v14  ;;  %23994 = vmatprep.mubr.f32.mxu1 %v12070_v31  ;;  %v15202_v31 = vld [vmem:[#allocation22 + $0x50] sm:$0xff] }
0x10cb   :  { %23995 = vmatmul.mubr.f32.gmra.mrb[130].mxu1 %v12071_v41  ;;  %v12081_v41 = vld [vmem:[#allocation21 + $0xb28] sm:$0xff] }
0x10cc   :  { %24211 = vmatmul.mubr.msk.f32.gmra.mrb[178].mxu0 %vm419_vm2, %v29476_v21  ;;  %23997 = vmatprep.mubr.f32.mxu1 %v12072_v52  ;;  %v12082_v52 = vld [vmem:[#allocation21 + $0xb30] sm:$0xff] }
0x10cd   :  { %24213 = vmatprep.mubr.msk.f32.mxu0 %vm419_vm2, %v29479_v22 }
0x10cf   :  { %23998 = vmatmul.mubr.f32.gmra.mrb[132].mxu1 %v12073_v0  ;;  %v12083_v0 = vld [vmem:[#allocation21 + $0xb38] sm:$0xff] }
0x10d0   :  { %24214 = vmatmul.mubr.msk.f32.gmra.mrb[180].mxu0 %vm419_vm2, %v29486_v20  ;;  %24000 = vmatprep.mubr.f32.mxu1 %v12074_v3  ;;  %v12084_v3 = vld [vmem:[#allocation21 + $0xb40] sm:$0xff] }
0x10d1   :  { %24216 = vmatprep.mubr.msk.f32.mxu0 %vm419_vm2, %v29489_v32 }
0x10d3   :  { %24001 = vmatmul.mubr.f32.gmra.mrb[134].mxu1 %v12075_v10  ;;  %v12085_v10 = vld [vmem:[#allocation21 + $0xb48] sm:$0xff] }
0x10d4   :  { %24217 = vmatmul.mubr.msk.f32.gmra.mrb[182].mxu0 %vm419_vm2, %v29496_v48  ;;  %24003 = vmatprep.mubr.f32.mxu1 %v12076_v50  ;;  %v12087_v50 = vld [vmem:[#allocation21 + $0xb58] sm:$0xff] }
0x10d5   :  { %24219 = vmatprep.mubr.msk.f32.mxu0 %vm419_vm2, %v29499_v40 }
0x10d7   :  { %24004 = vmatmul.mubr.f32.gmra.mrb[136].mxu1 %v12077_v36  ;;  %v12088_v36 = vld [vmem:[#allocation21 + $0xb60] sm:$0xff] }
0x10d8   :  { %24220 = vmatmul.mubr.msk.f32.gmra.mrb[184].mxu0 %vm419_vm2, %v29506_v46  ;;  %24006 = vmatprep.mubr.f32.mxu1 %v12078_v44  ;;  %v12089_v44 = vld [vmem:[#allocation21 + $0xb68] sm:$0xff] }
0x10d9   :  { %24222 = vmatprep.mubr.msk.f32.mxu0 %vm419_vm2, %v29509_v47 }
0x10db   :  { %24007 = vmatmul.mubr.f32.gmra.mrb[138].mxu1 %v12079_v49  ;;  %v12090_v49 = vld [vmem:[#allocation21 + $0xb70] sm:$0xff] }
0x10dc   :  { %24223 = vmatmul.mubr.msk.f32.gmra.mrb[186].mxu0 %vm419_vm2, %v29516_v62  ;;  %24009 = vmatprep.mubr.f32.mxu1 %v12080_v11  ;;  %v12091_v11 = vld [vmem:[#allocation21 + $0xb78] sm:$0xff] }
0x10dd   :  { %24225 = vmatprep.mubr.msk.f32.mxu0 %vm419_vm2, %v29518_v63 }
0x10df   :  { %24010 = vmatmul.mubr.f32.gmra.mrb[140].mxu1 %v12081_v41  ;;  %v12092_v41 = vld [vmem:[#allocation21 + $0xb80] sm:$0xff] }
0x10e0   :  { %24226 = vmatmul.mubr.msk.f32.gmra.mrb[188].mxu0 %vm419_vm2, %v29524_v4  ;;  %24012 = vmatprep.mubr.f32.mxu1 %v12082_v52  ;;  %v12093_v52 = vld [vmem:[#allocation21 + $0xb88] sm:$0xff] }
0x10e1   :  { %24228 = vmatprep.mubr.msk.f32.mxu0 %vm419_vm2, %v29526_v5 }
0x10e3   :  { %24013 = vmatmul.mubr.f32.gmra.mrb[142].mxu1 %v12083_v0  ;;  %v12094_v0 = vld [vmem:[#allocation21 + $0xb90] sm:$0xff] }
0x10e4   :  { %24229 = vmatmul.mubr.msk.f32.gmra.mrb[190].mxu0 %vm419_vm2, %v29532_v6  ;;  %24015 = vmatprep.mubr.f32.mxu1 %v12084_v3  ;;  %v12095_v3 = vld [vmem:[#allocation21 + $0xb98] sm:$0xff] }
0x10e5   :  { %24361 = vmatprep.mubr.msk.f32.mxu0 %vm419_vm2, %v29460_v34 }
0x10e7   :  { %24016 = vmatmul.mubr.f32.gmra.mrb[144].mxu1 %v12085_v10  ;;  %v12096_v10 = vld [vmem:[#allocation21 + $0xba0] sm:$0xff] }
0x10e8   :  { %24362 = vmatmul.mubr.msk.f32.vlgmr.msra.gmra.mrb[192].mxu0 %vm419_vm2, %v29462_v26 }
0x10e9   :  { %24364 = vmatprep.mubr.msk.f32.mxu0 %vm419_vm2, %v29466_v17  ;;  %24514 = vmatpush3.msra.mxu0 %v14541_v14  ;;  %v12086_v14 = vld [vmem:[#allocation21 + $0xb50] sm:$0xff] }
0x10ea   :  { %24667 = vmatprep.subr.mxu0 %v15202_v31  ;;  %24018 = vmatprep.mubr.f32.mxu1 %v12086_v14  ;;  %v15863_v14 = vld [vmem:[#allocation22 + $0x58] sm:$0xff] }
0x10eb   :  { %24019 = vmatmul.mubr.f32.gmra.mrb[146].mxu1 %v12087_v50  ;;  %v12097_v50 = vld [vmem:[#allocation21 + $0xba8] sm:$0xff] }
0x10ec   :  { %24365 = vmatmul.mubr.msk.f32.gmra.mrb[194].mxu0 %vm419_vm2, %v29476_v21  ;;  %24021 = vmatprep.mubr.f32.mxu1 %v12088_v36  ;;  %v12098_v36 = vld [vmem:[#allocation21 + $0xbb0] sm:$0xff] }
0x10ed   :  { %24367 = vmatprep.mubr.msk.f32.mxu0 %vm419_vm2, %v29479_v22 }
0x10ef   :  { %24022 = vmatmul.mubr.f32.gmra.mrb[148].mxu1 %v12089_v44  ;;  %v12099_v44 = vld [vmem:[#allocation21 + $0xbb8] sm:$0xff] }
0x10f0   :  { %24368 = vmatmul.mubr.msk.f32.gmra.mrb[196].mxu0 %vm419_vm2, %v29486_v20  ;;  %24024 = vmatprep.mubr.f32.mxu1 %v12090_v49  ;;  %v12100_v49 = vld [vmem:[#allocation21 + $0xbc0] sm:$0xff] }
0x10f1   :  { %24370 = vmatprep.mubr.msk.f32.mxu0 %vm419_vm2, %v29489_v32 }
0x10f3   :  { %24025 = vmatmul.mubr.f32.gmra.mrb[150].mxu1 %v12091_v11  ;;  %v12101_v11 = vld [vmem:[#allocation21 + $0xbc8] sm:$0xff] }
0x10f4   :  { %24371 = vmatmul.mubr.msk.f32.gmra.mrb[198].mxu0 %vm419_vm2, %v29496_v48  ;;  %24027 = vmatprep.mubr.f32.mxu1 %v12092_v41  ;;  %v12103_v41 = vld [vmem:[#allocation21 + $0xbd8] sm:$0xff] }
0x10f5   :  { %24373 = vmatprep.mubr.msk.f32.mxu0 %vm419_vm2, %v29499_v40 }
0x10f7   :  { %24028 = vmatmul.mubr.f32.gmra.mrb[152].mxu1 %v12093_v52  ;;  %v12104_v52 = vld [vmem:[#allocation21 + $0xbe0] sm:$0xff] }
0x10f8   :  { %24374 = vmatmul.mubr.msk.f32.gmra.mrb[200].mxu0 %vm419_vm2, %v29506_v46  ;;  %24030 = vmatprep.mubr.f32.mxu1 %v12094_v0  ;;  %v12105_v0 = vld [vmem:[#allocation21 + $0xbe8] sm:$0xff] }
0x10f9   :  { %24376 = vmatprep.mubr.msk.f32.mxu0 %vm419_vm2, %v29509_v47 }
0x10fb   :  { %24031 = vmatmul.mubr.f32.gmra.mrb[154].mxu1 %v12095_v3  ;;  %v12106_v3 = vld [vmem:[#allocation21 + $0xbf0] sm:$0xff] }
0x10fc   :  { %24377 = vmatmul.mubr.msk.f32.gmra.mrb[202].mxu0 %vm419_vm2, %v29516_v62  ;;  %24033 = vmatprep.mubr.f32.mxu1 %v12096_v10  ;;  %v12107_v10 = vld [vmem:[#allocation21 + $0xbf8] sm:$0xff] }
0x10fd   :  { %24379 = vmatprep.mubr.msk.f32.mxu0 %vm419_vm2, %v29518_v63 }
0x10ff   :  { %24034 = vmatmul.mubr.f32.gmra.mrb[156].mxu1 %v12097_v50  ;;  %v12705_v50 = vld [vmem:[#allocation21 + $0xc00] sm:$0xff] }
0x1100   :  { %24380 = vmatmul.mubr.msk.f32.gmra.mrb[204].mxu0 %vm419_vm2, %v29524_v4  ;;  %24036 = vmatprep.mubr.f32.mxu1 %v12098_v36  ;;  %v16524_v36 = vld [vmem:[#allocation22 + $0x60] sm:$0xff] }
0x1101   :  { %24382 = vmatprep.mubr.msk.f32.mxu0 %vm419_vm2, %v29526_v5 }
0x1103   :  { %24037 = vmatmul.mubr.f32.gmra.mrb[158].mxu1 %v12099_v44 }
0x1104   :  { %24383 = vmatmul.mubr.msk.f32.gmra.mrb[206].mxu0 %vm419_vm2, %v29532_v6  ;;  %24039 = vmatprep.mubr.f32.mxu1 %v12100_v49 }
0x1105   :  { %24515 = vmatprep.mubr.msk.f32.mxu0 %vm419_vm2, %v29460_v34 }
0x1107   :  { %24040 = vmatmul.mubr.f32.gmra.mrb[160].mxu1 %v12101_v11 }
0x1108   :  { %24516 = vmatmul.mubr.msk.f32.vlgmr.msra.gmra.mrb[208].mxu0 %vm419_vm2, %v29462_v26 }
0x1109   :  { %24518 = vmatprep.mubr.msk.f32.mxu0 %vm419_vm2, %v29466_v17  ;;  %24668 = vmatpush3.msra.mxu0 %v15202_v31  ;;  %v12102_v31 = vld [vmem:[#allocation21 + $0xbd0] sm:$0xff] }
0x110a   :  { %24821 = vmatprep.subr.mxu0 %v15863_v14  ;;  %24042 = vmatprep.mubr.f32.mxu1 %v12102_v31 }
0x110b   :  { %24043 = vmatmul.mubr.f32.gmra.mrb[162].mxu1 %v12103_v41 }
0x110c   :  { %24519 = vmatmul.mubr.msk.f32.gmra.mrb[210].mxu0 %vm419_vm2, %v29476_v21  ;;  %24045 = vmatprep.mubr.f32.mxu1 %v12104_v52  ;;  %v17846_v52 = vld [vmem:[#allocation22 + $0x70] sm:$0xff] }
0x110d   :  { %24521 = vmatprep.mubr.msk.f32.mxu0 %vm419_vm2, %v29479_v22 }
0x110f   :  { %24046 = vmatmul.mubr.f32.gmra.mrb[164].mxu1 %v12105_v0 }
0x1110   :  { %24522 = vmatmul.mubr.msk.f32.gmra.mrb[212].mxu0 %vm419_vm2, %v29486_v20  ;;  %24048 = vmatprep.mubr.f32.mxu1 %v12106_v3 }
0x1111   :  { %24524 = vmatprep.mubr.msk.f32.mxu0 %vm419_vm2, %v29489_v32 }
0x1113   :  { %24049 = vmatmul.mubr.f32.gmra.mrb[166].mxu1 %v12107_v10 }
0x1114   :  { %24525 = vmatmul.mubr.msk.f32.gmra.mrb[214].mxu0 %vm419_vm2, %v29496_v48  ;;  %24109 = vmatprep.mubr.f32.mxu1 %v12705_v50 }
0x1115   :  { %24527 = vmatprep.mubr.msk.f32.mxu0 %vm419_vm2, %v29499_v40 }
0x1118   :  { %24528 = vmatmul.mubr.msk.f32.gmra.mrb[216].mxu0 %vm419_vm2, %v29506_v46 }
0x1119   :  { %24530 = vmatprep.mubr.msk.f32.mxu0 %vm419_vm2, %v29509_v47 }
0x111c   :  { %24531 = vmatmul.mubr.msk.f32.gmra.mrb[218].mxu0 %vm419_vm2, %v29516_v62 }
0x111d   :  { %24533 = vmatprep.mubr.msk.f32.mxu0 %vm419_vm2, %v29518_v63 }
0x1120   :  { %24534 = vmatmul.mubr.msk.f32.gmra.mrb[220].mxu0 %vm419_vm2, %v29524_v4 }
0x1121   :  { %24536 = vmatprep.mubr.msk.f32.mxu0 %vm419_vm2, %v29526_v5 }
0x1124   :  { %24537 = vmatmul.mubr.msk.f32.gmra.mrb[222].mxu0 %vm419_vm2, %v29532_v6 }
0x1125   :  { %24669 = vmatprep.mubr.msk.f32.mxu0 %vm419_vm2, %v29460_v34 }
0x1128   :  { %24670 = vmatmul.mubr.msk.f32.vlgmr.msra.gmra.mrb[224].mxu0 %vm419_vm2, %v29462_v26 }
0x1129   :  { %24672 = vmatprep.mubr.msk.f32.mxu0 %vm419_vm2, %v29466_v17  ;;  %24822 = vmatpush3.msra.mxu0 %v15863_v14  ;;  %v17185_v14 = vld [vmem:[#allocation22 + $0x68] sm:$0xff] }
0x112a   :  { %24975 = vmatprep.subr.mxu0 %v16524_v36 }
0x112c   :  { %24673 = vmatmul.mubr.msk.f32.gmra.mrb[226].mxu0 %vm419_vm2, %v29476_v21 }
0x112d   :  { %24675 = vmatprep.mubr.msk.f32.mxu0 %vm419_vm2, %v29479_v22 }
0x1130   :  { %24676 = vmatmul.mubr.msk.f32.gmra.mrb[228].mxu0 %vm419_vm2, %v29486_v20 }
0x1131   :  { %24678 = vmatprep.mubr.msk.f32.mxu0 %vm419_vm2, %v29489_v32 }
0x1134   :  { %24679 = vmatmul.mubr.msk.f32.gmra.mrb[230].mxu0 %vm419_vm2, %v29496_v48 }
0x1135   :  { %24681 = vmatprep.mubr.msk.f32.mxu0 %vm419_vm2, %v29499_v40 }
0x1138   :  { %24682 = vmatmul.mubr.msk.f32.gmra.mrb[232].mxu0 %vm419_vm2, %v29506_v46 }
0x1139   :  { %24684 = vmatprep.mubr.msk.f32.mxu0 %vm419_vm2, %v29509_v47 }
0x113c   :  { %24685 = vmatmul.mubr.msk.f32.gmra.mrb[234].mxu0 %vm419_vm2, %v29516_v62 }
0x113d   :  { %24687 = vmatprep.mubr.msk.f32.mxu0 %vm419_vm2, %v29518_v63 }
0x1140   :  { %24688 = vmatmul.mubr.msk.f32.gmra.mrb[236].mxu0 %vm419_vm2, %v29524_v4 }
0x1141   :  { %24690 = vmatprep.mubr.msk.f32.mxu0 %vm419_vm2, %v29526_v5 }
0x1144   :  { %24691 = vmatmul.mubr.msk.f32.gmra.mrb[238].mxu0 %vm419_vm2, %v29532_v6 }
0x1145   :  { %24823 = vmatprep.mubr.msk.f32.mxu0 %vm419_vm2, %v29460_v34 }
0x1148   :  { %24824 = vmatmul.mubr.msk.f32.vlgmr.msra.gmra.mrb[240].mxu0 %vm419_vm2, %v29462_v26 }
0x1149   :  { %24826 = vmatprep.mubr.msk.f32.mxu0 %vm419_vm2, %v29466_v17  ;;  %24976 = vmatpush3.msra.mxu0 %v16524_v36 }
0x114a   :  { %25129 = vmatprep.subr.mxu0 %v17185_v14 }
0x114c   :  { %24827 = vmatmul.mubr.msk.f32.gmra.mrb[242].mxu0 %vm419_vm2, %v29476_v21 }
0x114d   :  { %24829 = vmatprep.mubr.msk.f32.mxu0 %vm419_vm2, %v29479_v22 }
0x1150   :  { %24830 = vmatmul.mubr.msk.f32.gmra.mrb[244].mxu0 %vm419_vm2, %v29486_v20 }
0x1151   :  { %24832 = vmatprep.mubr.msk.f32.mxu0 %vm419_vm2, %v29489_v32 }
0x1154   :  { %24833 = vmatmul.mubr.msk.f32.gmra.mrb[246].mxu0 %vm419_vm2, %v29496_v48 }
0x1155   :  { %24835 = vmatprep.mubr.msk.f32.mxu0 %vm419_vm2, %v29499_v40 }
0x1158   :  { %24836 = vmatmul.mubr.msk.f32.gmra.mrb[248].mxu0 %vm419_vm2, %v29506_v46 }
0x1159   :  { %24838 = vmatprep.mubr.msk.f32.mxu0 %vm419_vm2, %v29509_v47 }
0x115c   :  { %24839 = vmatmul.mubr.msk.f32.gmra.mrb[250].mxu0 %vm419_vm2, %v29516_v62 }
0x115d   :  { %24841 = vmatprep.mubr.msk.f32.mxu0 %vm419_vm2, %v29518_v63 }
0x115f   :  { %v30018_v44 = vpop.f32.mrb[48].mxu0 }
0x1160   :  { %v30020_v49 = vpop.f32.mrb[49].mxu0  ;;  %24842 = vmatmul.mubr.msk.f32.gmra.mrb[252].mxu0 %vm419_vm2, %v29524_v4 }
0x1161   :  { %24844 = vmatprep.mubr.msk.f32.mxu0 %vm419_vm2, %v29526_v5 }
0x1163   :  { %v30026_v11 = vpop.f32.mrb[50].mxu0 }
0x1164   :  { %v30028_v31 = vpop.f32.mrb[51].mxu0  ;;  %24845 = vmatmul.mubr.msk.f32.gmra.mrb[254].mxu0 %vm419_vm2, %v29532_v6 }
0x1165   :  { %30895 = vst [vmem:[#allocation83_spill] sm:$0xff] %v30028_v31  ;;  %24977 = vmatprep.mubr.msk.f32.mxu0 %vm419_vm2, %v29460_v34 }
0x1167   :  { %v30034_v41 = vpop.f32.mrb[52].mxu0 }
0x1168   :  { %30896 = vst [vmem:[#allocation84_spill] sm:$0xff] %v30034_v41  ;;  %v30036_v0 = vpop.f32.mrb[53].mxu0  ;;  %24978 = vmatmul.mubr.msk.f32.vlgmr.msra.gmra.mrb[0].mxu0 %vm419_vm2, %v29462_v26 }
0x1169   :  { %30897 = vst [vmem:[#allocation85_spill] sm:$0xff] %v30036_v0  ;;  %24980 = vmatprep.mubr.msk.f32.mxu0 %vm419_vm2, %v29466_v17  ;;  %25130 = vmatpush3.msra.mxu0 %v17185_v14 }
0x116a   :  { %25283 = vmatprep.subr.mxu0 %v17846_v52 }
0x116b   :  { %v30042_v3 = vpop.f32.mrb[54].mxu0 }
0x116c   :  { %30898 = vst [vmem:[#allocation86_spill] sm:$0xff] %v30042_v3  ;;  %v30044_v10 = vpop.f32.mrb[55].mxu0  ;;  %24981 = vmatmul.mubr.msk.f32.gmra.mrb[2].mxu0 %vm419_vm2, %v29476_v21 }
0x116d   :  { %30899 = vst [vmem:[#allocation87_spill] sm:$0xff] %v30044_v10  ;;  %24983 = vmatprep.mubr.msk.f32.mxu0 %vm419_vm2, %v29479_v22 }
0x116f   :  { %v30050_v50 = vpop.f32.mrb[56].mxu0 }
0x1170   :  { %30900 = vst [vmem:[#allocation88_spill] sm:$0xff] %v30050_v50  ;;  %v30052_v36 = vpop.f32.mrb[57].mxu0  ;;  %24984 = vmatmul.mubr.msk.f32.gmra.mrb[4].mxu0 %vm419_vm2, %v29486_v20 }
0x1171   :  { %30901 = vst [vmem:[#allocation89_spill] sm:$0xff] %v30052_v36  ;;  %24986 = vmatprep.mubr.msk.f32.mxu0 %vm419_vm2, %v29489_v32 }
0x1173   :  { %v30058_v14 = vpop.f32.mrb[58].mxu0 }
0x1174   :  { %30902 = vst [vmem:[#allocation90_spill] sm:$0xff] %v30058_v14  ;;  %v30060_v57 = vpop.f32.mrb[59].mxu0  ;;  %24987 = vmatmul.mubr.msk.f32.gmra.mrb[6].mxu0 %vm419_vm2, %v29496_v48 }
0x1175   :  { %30903 = vst [vmem:[#allocation91_spill] sm:$0xff] %v30060_v57  ;;  %24989 = vmatprep.mubr.msk.f32.mxu0 %vm419_vm2, %v29499_v40 }
0x1177   :  { %v30066_v9 = vpop.f32.mrb[60].mxu0 }
0x1178   :  { %30904 = vst [vmem:[#allocation92_spill] sm:$0xff] %v30066_v9  ;;  %v30068_v45 = vpop.f32.mrb[61].mxu0  ;;  %24990 = vmatmul.mubr.msk.f32.gmra.mrb[8].mxu0 %vm419_vm2, %v29506_v46 }
0x1179   :  { %30905 = vst [vmem:[#allocation93_spill] sm:$0xff] %v30068_v45  ;;  %24992 = vmatprep.mubr.msk.f32.mxu0 %vm419_vm2, %v29509_v47 }
0x117b   :  { %v24055_v55 = vpop.f32.mrb[160].mxu0 }
0x117c   :  { %v12625_v7 = vpop.f32.mrb[161].mxu0  ;;  %24993 = vmatmul.mubr.msk.f32.gmra.mrb[10].mxu0 %vm419_vm2, %v29516_v62 }
0x117d   :  { %v26095_v1 = vpack.c.bf16 %v24055_v55, %v12625_v7  ;;  %24995 = vmatprep.mubr.msk.f32.mxu0 %vm419_vm2, %v29518_v63 }
0x117f   :  { %v24058_v2 = vpop.f32.mrb[162].mxu0  ;;  %26096 = vmatprep.subr.bf16.mxu1 %v26095_v1 }
0x1180   :  { %v12635_v24 = vpop.f32.mrb[163].mxu0  ;;  %26098 = vmatpush3.bf16.msra.mxu1 %v26095_v1  ;;  %24996 = vmatmul.mubr.msk.f32.gmra.mrb[12].mxu0 %vm419_vm2, %v29524_v4  ;;  %v30086_v1 = vld [vmem:[#allocation22 + $0x78] sm:$0xff] }
0x1181   :  { %v26099_v60 = vpack.c.bf16 %v24058_v2, %v12635_v24  ;;  %24998 = vmatprep.mubr.msk.f32.mxu0 %vm419_vm2, %v29526_v5 }
0x1183   :  { %v24061_v25 = vpop.f32.mrb[164].mxu0  ;;  %26100 = vmatprep.subr.bf16.mxu1 %v26099_v60 }
0x1184   :  { %v12645_v58 = vpop.f32.mrb[165].mxu0  ;;  %26102 = vmatpush3.bf16.msra.mxu1 %v26099_v60  ;;  %24999 = vmatmul.mubr.msk.f32.gmra.mrb[14].mxu0 %vm419_vm2, %v29532_v6 }
0x1185   :  { %v26103_v7 = vpack.c.bf16 %v24061_v25, %v12645_v58  ;;  %25131 = vmatprep.mubr.msk.f32.mxu0 %vm419_vm2, %v29460_v34 }
0x1187   :  { %v24064_v55 = vpop.f32.mrb[166].mxu0  ;;  %26104 = vmatprep.subr.bf16.mxu1 %v26103_v7 }
0x1188   :  { %v12655_v18 = vpop.f32.mrb[167].mxu0  ;;  %26106 = vmatpush3.bf16.msra.mxu1 %v26103_v7  ;;  %25132 = vmatmul.mubr.msk.f32.vlgmr.msra.gmra.mrb[16].mxu0 %vm419_vm2, %v29462_v26 }
0x1189   :  { %v26107_v24 = vpack.c.bf16 %v24064_v55, %v12655_v18  ;;  %25134 = vmatprep.mubr.msk.f32.mxu0 %vm419_vm2, %v29466_v17  ;;  %25284 = vmatpush3.msra.mxu0 %v17846_v52 }
0x118a   :  { %25437 = vmatprep.subr.mxu0 %v30086_v1 }
0x118b   :  { %v24067_v58 = vpop.f32.mrb[168].mxu0  ;;  %26108 = vmatprep.subr.bf16.mxu1 %v26107_v24 }
0x118c   :  { %v12665_v25 = vpop.f32.mrb[169].mxu0  ;;  %26110 = vmatpush3.bf16.msra.mxu1 %v26107_v24  ;;  %25135 = vmatmul.mubr.msk.f32.gmra.mrb[18].mxu0 %vm419_vm2, %v29476_v21 }
0x118d   :  { %v26111_v60 = vpack.c.bf16 %v24067_v58, %v12665_v25  ;;  %25137 = vmatprep.mubr.msk.f32.mxu0 %vm419_vm2, %v29479_v22 }
0x118f   :  { %v24070_v2 = vpop.f32.mrb[170].mxu0  ;;  %26112 = vmatprep.subr.bf16.mxu1 %v26111_v60 }
0x1190   :  { %v12675_v18 = vpop.f32.mrb[171].mxu0  ;;  %26114 = vmatpush3.bf16.msra.mxu1 %v26111_v60  ;;  %25138 = vmatmul.mubr.msk.f32.gmra.mrb[20].mxu0 %vm419_vm2, %v29486_v20 }
0x1191   :  { %v26115_v52 = vpack.c.bf16 %v24070_v2, %v12675_v18  ;;  %25140 = vmatprep.mubr.msk.f32.mxu0 %vm419_vm2, %v29489_v32 }
0x1193   :  { %v24073_v7 = vpop.f32.mrb[172].mxu0  ;;  %26116 = vmatprep.subr.bf16.mxu1 %v26115_v52 }
0x1194   :  { %v12685_v55 = vpop.f32.mrb[173].mxu0  ;;  %26118 = vmatpush3.bf16.msra.mxu1 %v26115_v52  ;;  %25141 = vmatmul.mubr.msk.f32.gmra.mrb[22].mxu0 %vm419_vm2, %v29496_v48  ;;  %v12706_v52 = vld [vmem:[#allocation21 + $0xc08] sm:$0xff] }
0x1195   :  { %v26119_v24 = vpack.c.bf16 %v24073_v7, %v12685_v55  ;;  %25143 = vmatprep.mubr.msk.f32.mxu0 %vm419_vm2, %v29499_v40  ;;  %v12707_v55 = vld [vmem:[#allocation21 + $0xc10] sm:$0xff] }
0x1197   :  { %v24076_v58 = vpop.f32.mrb[174].mxu0  ;;  %26120 = vmatprep.subr.bf16.mxu1 %v26119_v24 }
0x1198   :  { %v12695_v25 = vpop.f32.mrb[175].mxu0  ;;  %26122 = vmatpush3.bf16.msra.mxu1 %v26119_v24  ;;  %25144 = vmatmul.mubr.msk.f32.gmra.mrb[24].mxu0 %vm419_vm2, %v29506_v46 }
0x1199   :  { %v26123_v60 = vpack.c.bf16 %v24076_v58, %v12695_v25  ;;  %25146 = vmatprep.mubr.msk.f32.mxu0 %vm419_vm2, %v29509_v47  ;;  %v12708_v25 = vld [vmem:[#allocation21 + $0xc18] sm:$0xff] }
0x119b   :  { %26124 = vmatprep.subr.bf16.mxu1 %v26123_v60  ;;  %v24209_v2 = vpop.f32.mrb[176].mxu0 }
0x119c   :  { %26126 = vmatpush3.bf16.msra.mxu1 %v26123_v60  ;;  %v13286_v18 = vpop.f32.mrb[177].mxu0  ;;  %25147 = vmatmul.mubr.msk.f32.gmra.mrb[26].mxu0 %vm419_vm2, %v29516_v62 }
0x119d   :  { %v26127_v7 = vpack.c.bf16 %v24209_v2, %v13286_v18  ;;  %25149 = vmatprep.mubr.msk.f32.mxu0 %vm419_vm2, %v29518_v63 }
0x119f   :  { %24110 = vmatmul.mubr.f32.vlgmr.msra.gmra.mrb[168].mxu1 %v12706_v52  ;;  %v24212_v24 = vpop.f32.mrb[178].mxu0  ;;  %26128 = vmatprep.subr.bf16.mxu1 %v26127_v7  ;;  %v12710_v52 = vld [vmem:[#allocation21 + $0xc28] sm:$0xff] }
0x11a0   :  { %v13296_v58 = vpop.f32.mrb[179].mxu0  ;;  %26130 = vmatpush3.bf16.msra.mxu1 %v26127_v7  ;;  %25150 = vmatmul.mubr.msk.f32.gmra.mrb[28].mxu0 %vm419_vm2, %v29524_v4 }
0x11a1   :  { %v26131_v60 = vpack.c.bf16 %v24212_v24, %v13296_v58  ;;  %25152 = vmatprep.mubr.msk.f32.mxu0 %vm419_vm2, %v29526_v5  ;;  %24112 = vmatprep.mubr.f32.mxu1 %v12707_v55  ;;  %v12711_v24 = vld [vmem:[#allocation21 + $0xc30] sm:$0xff] }
0x11a3   :  { %24113 = vmatmul.mubr.f32.gmra.mrb[170].mxu1 %v12708_v25  ;;  %v24215_v2 = vpop.f32.mrb[180].mxu0  ;;  %26132 = vmatprep.subr.bf16.mxu1 %v26131_v60  ;;  %v12712_v25 = vld [vmem:[#allocation21 + $0xc38] sm:$0xff] }
0x11a4   :  { %v13306_v18 = vpop.f32.mrb[181].mxu0  ;;  %26134 = vmatpush3.bf16.msra.mxu1 %v26131_v60  ;;  %25153 = vmatmul.mubr.msk.f32.gmra.mrb[30].mxu0 %vm419_vm2, %v29532_v6 }
0x11a5   :  { %v26135_v7 = vpack.c.bf16 %v24215_v2, %v13306_v18  ;;  %25285 = vmatprep.mubr.msk.f32.mxu0 %vm419_vm2, %v29460_v34  ;;  %24115 = vmatprep.mubr.f32.mxu1 %v12709_v29  ;;  %v12713_v2 = vld [vmem:[#allocation21 + $0xc40] sm:$0xff] }
0x11a7   :  { %24116 = vmatmul.mubr.f32.gmra.mrb[172].mxu1 %v12710_v52  ;;  %v24218_v58 = vpop.f32.mrb[182].mxu0  ;;  %26136 = vmatprep.subr.bf16.mxu1 %v26135_v7  ;;  %v12714_v52 = vld [vmem:[#allocation21 + $0xc48] sm:$0xff] }
0x11a8   :  { %v13316_v55 = vpop.f32.mrb[183].mxu0  ;;  %26138 = vmatpush3.bf16.msra.mxu1 %v26135_v7  ;;  %25286 = vmatmul.mubr.msk.f32.vlgmr.msra.gmra.mrb[32].mxu0 %vm419_vm2, %v29462_v26 }
0x11a9   :  { %v26139_v60 = vpack.c.bf16 %v24218_v58, %v13316_v55  ;;  %25288 = vmatprep.mubr.msk.f32.mxu0 %vm419_vm2, %v29466_v17  ;;  %24118 = vmatprep.mubr.f32.mxu1 %v12711_v24  ;;  %v12715_v58 = vld [vmem:[#allocation21 + $0xc50] sm:$0xff] }
0x11aa   :  { %25438 = vmatpush3.msra.mxu0 %v30086_v1  ;;  %v12716_v1 = vld [vmem:[#allocation21 + $0xc58] sm:$0xff] }
0x11ab   :  { %24119 = vmatmul.mubr.f32.gmra.mrb[174].mxu1 %v12712_v25  ;;  %v24221_v29 = vpop.f32.mrb[184].mxu0  ;;  %26140 = vmatprep.subr.bf16.mxu1 %v26139_v60 }
0x11ac   :  { %v13326_v18 = vpop.f32.mrb[185].mxu0  ;;  %26142 = vmatpush3.bf16.msra.mxu1 %v26139_v60  ;;  %25289 = vmatmul.mubr.msk.f32.gmra.mrb[34].mxu0 %vm419_vm2, %v29476_v21  ;;  %v12717_v60 = vld [vmem:[#allocation21 + $0xc60] sm:$0xff] }
0x11ad   :  { %v26143_v7 = vpack.c.bf16 %v24221_v29, %v13326_v18  ;;  %25291 = vmatprep.mubr.msk.f32.mxu0 %vm419_vm2, %v29479_v22  ;;  %24121 = vmatprep.mubr.f32.mxu1 %v12713_v2  ;;  %v12718_v18 = vld [vmem:[#allocation21 + $0xc68] sm:$0xff] }
0x11af   :  { %24122 = vmatmul.mubr.f32.gmra.mrb[176].mxu1 %v12714_v52  ;;  %v24224_v24 = vpop.f32.mrb[186].mxu0  ;;  %26144 = vmatprep.subr.bf16.mxu1 %v26143_v7 }
0x11b0   :  { %v13336_v55 = vpop.f32.mrb[187].mxu0  ;;  %26146 = vmatpush3.bf16.msra.mxu1 %v26143_v7  ;;  %25292 = vmatmul.mubr.msk.f32.gmra.mrb[36].mxu0 %vm419_vm2, %v29486_v20  ;;  %v12719_v7 = vld [vmem:[#allocation21 + $0xc70] sm:$0xff] }
0x11b1   :  { %v26147_v25 = vpack.c.bf16 %v24224_v24, %v13336_v55  ;;  %25294 = vmatprep.mubr.msk.f32.mxu0 %vm419_vm2, %v29489_v32  ;;  %24124 = vmatprep.mubr.f32.mxu1 %v12715_v58  ;;  %v12720_v55 = vld [vmem:[#allocation21 + $0xc78] sm:$0xff] }
0x11b3   :  { %24125 = vmatmul.mubr.f32.gmra.mrb[178].mxu1 %v12716_v1  ;;  %v24227_v29 = vpop.f32.mrb[188].mxu0  ;;  %26148 = vmatprep.subr.bf16.mxu1 %v26147_v25 }
0x11b4   :  { %v13346_v2 = vpop.f32.mrb[189].mxu0  ;;  %26150 = vmatpush3.bf16.msra.mxu1 %v26147_v25  ;;  %25295 = vmatmul.mubr.msk.f32.gmra.mrb[38].mxu0 %vm419_vm2, %v29496_v48  ;;  %v12721_v25 = vld [vmem:[#allocation21 + $0xc80] sm:$0xff] }
0x11b5   :  { %v26151_v52 = vpack.c.bf16 %v24227_v29, %v13346_v2  ;;  %25297 = vmatprep.mubr.msk.f32.mxu0 %vm419_vm2, %v29499_v40  ;;  %24127 = vmatprep.mubr.f32.mxu1 %v12717_v60  ;;  %v12722_v2 = vld [vmem:[#allocation21 + $0xc88] sm:$0xff] }
0x11b7   :  { %24128 = vmatmul.mubr.f32.gmra.mrb[180].mxu1 %v12718_v18  ;;  %v24230_v24 = vpop.f32.mrb[190].mxu0  ;;  %26152 = vmatprep.subr.bf16.mxu1 %v26151_v52 }
0x11b8   :  { %v13356_v58 = vpop.f32.mrb[191].mxu0  ;;  %26154 = vmatpush3.bf16.msra.mxu1 %v26151_v52  ;;  %25298 = vmatmul.mubr.msk.f32.gmra.mrb[40].mxu0 %vm419_vm2, %v29506_v46  ;;  %v12723_v52 = vld [vmem:[#allocation21 + $0xc90] sm:$0xff] }
0x11b9   :  { %v26155_v1 = vpack.c.bf16 %v24230_v24, %v13356_v58  ;;  %25300 = vmatprep.mubr.msk.f32.mxu0 %vm419_vm2, %v29509_v47  ;;  %24130 = vmatprep.mubr.f32.mxu1 %v12719_v7  ;;  %v12724_v58 = vld [vmem:[#allocation21 + $0xc98] sm:$0xff] }
0x11bb   :  { %24131 = vmatmul.mubr.f32.gmra.mrb[118].mxu1 %v12720_v55  ;;  %26156 = vmatprep.subr.bf16.mxu1 %v26155_v1  ;;  %v24363_v29 = vpop.f32.mrb[192].mxu0 }
0x11bc   :  { %26158 = vmatpush3.bf16.msra.mxu1 %v26155_v1  ;;  %v13947_v60 = vpop.f32.mrb[193].mxu0  ;;  %25301 = vmatmul.mubr.msk.f32.gmra.mrb[42].mxu0 %vm419_vm2, %v29516_v62  ;;  %v12725_v1 = vld [vmem:[#allocation21 + $0xca0] sm:$0xff] }
0x11bd   :  { %v30144_v18 = vpack.c.bf16 %v24363_v29, %v13947_v60  ;;  %25303 = vmatprep.mubr.msk.f32.mxu0 %vm419_vm2, %v29518_v63  ;;  %24133 = vmatprep.mubr.f32.mxu1 %v12721_v25  ;;  %v12726_v60 = vld [vmem:[#allocation21 + $0xca8] sm:$0xff] }
0x11bf   :  { %24134 = vmatmul.mubr.f32.gmra.mrb[120].mxu1 %v12722_v2  ;;  %v24366_v24 = vpop.f32.mrb[194].mxu0  ;;  %26160 = vmatprep.subr.bf16.mxu1 %v30144_v18 }
0x11c0   :  { %v13957_v7 = vpop.f32.mrb[195].mxu0  ;;  %25304 = vmatmul.mubr.msk.f32.gmra.mrb[44].mxu0 %vm419_vm2, %v29524_v4  ;;  %24136 = vmatprep.mubr.f32.mxu1 %v12723_v52  ;;  %v12727_v52 = vld [vmem:[#allocation21 + $0xcb0] sm:$0xff] }
0x11c1   :  { %v30151_v55 = vpack.c.bf16 %v24366_v24, %v13957_v7  ;;  %25306 = vmatprep.mubr.msk.f32.mxu0 %vm419_vm2, %v29526_v5 }
0x11c3   :  { %24137 = vmatmul.mubr.f32.gmra.mrb[122].mxu1 %v12724_v58  ;;  %v24369_v29 = vpop.f32.mrb[196].mxu0  ;;  %v12728_v58 = vld [vmem:[#allocation21 + $0xcb8] sm:$0xff] }
0x11c4   :  { %v13967_v25 = vpop.f32.mrb[197].mxu0  ;;  %25307 = vmatmul.mubr.msk.f32.gmra.mrb[46].mxu0 %vm419_vm2, %v29532_v6  ;;  %24139 = vmatprep.mubr.f32.mxu1 %v12725_v1  ;;  %v12729_v1 = vld [vmem:[#allocation21 + $0xcc0] sm:$0xff] }
0x11c5   :  { %v30157_v2 = vpack.c.bf16 %v24369_v29, %v13967_v25  ;;  %25439 = vmatprep.mubr.msk.f32.mxu0 %vm419_vm2, %v29460_v34  ;;  %v12730_v34 = vld [vmem:[#allocation21 + $0xcc8] sm:$0xff] }
0x11c7   :  { %24140 = vmatmul.mubr.f32.gmra.mrb[124].mxu1 %v12726_v60  ;;  %v24372_v24 = vpop.f32.mrb[198].mxu0 }
0x11c8   :  { %v13977_v7 = vpop.f32.mrb[199].mxu0  ;;  %25440 = vmatmul.mubr.msk.f32.vlgmr.msra.gmra.mrb[112].mxu0 %vm419_vm2, %v29462_v26  ;;  %24142 = vmatprep.mubr.f32.mxu1 %v12727_v52  ;;  %v12731_v26 = vld [vmem:[#allocation21 + $0xcd0] sm:$0xff] }
0x11c9   :  { %v30163_v38 = vpack.c.bf16 %v24372_v24, %v13977_v7  ;;  %25442 = vmatprep.mubr.msk.f32.mxu0 %vm419_vm2, %v29466_v17  ;;  %v12732_v17 = vld [vmem:[#allocation21 + $0xcd8] sm:$0xff] }
0x11cb   :  { %24143 = vmatmul.mubr.f32.gmra.mrb[126].mxu1 %v12728_v58  ;;  %v24375_v29 = vpop.f32.mrb[200].mxu0 }
0x11cc   :  { %v13987_v25 = vpop.f32.mrb[201].mxu0  ;;  %25443 = vmatmul.mubr.msk.f32.gmra.mrb[114].mxu0 %vm419_vm2, %v29476_v21  ;;  %24145 = vmatprep.mubr.f32.mxu1 %v12729_v1  ;;  %v12733_v21 = vld [vmem:[#allocation21 + $0xce0] sm:$0xff] }
0x11cd   :  { %v30169_v60 = vpack.c.bf16 %v24375_v29, %v13987_v25  ;;  %25445 = vmatprep.mubr.msk.f32.mxu0 %vm419_vm2, %v29479_v22  ;;  %v12734_v22 = vld [vmem:[#allocation21 + $0xce8] sm:$0xff] }
0x11cf   :  { %24146 = vmatmul.mubr.f32.gmra.mrb[128].mxu1 %v12730_v34  ;;  %v24378_v52 = vpop.f32.mrb[202].mxu0 }
0x11d0   :  { %v13997_v24 = vpop.f32.mrb[203].mxu0  ;;  %25446 = vmatmul.mubr.msk.f32.gmra.mrb[116].mxu0 %vm419_vm2, %v29486_v20  ;;  %24148 = vmatprep.mubr.f32.mxu1 %v12731_v26  ;;  %v12735_v20 = vld [vmem:[#allocation21 + $0xcf0] sm:$0xff] }
0x11d1   :  { %v30175_v7 = vpack.c.bf16 %v24378_v52, %v13997_v24  ;;  %25448 = vmatprep.mubr.msk.f32.mxu0 %vm419_vm2, %v29489_v32  ;;  %v12736_v32 = vld [vmem:[#allocation21 + $0xcf8] sm:$0xff] }
0x11d3   :  { %24149 = vmatmul.mubr.f32.gmra.mrb[130].mxu1 %v12732_v17  ;;  %v24381_v58 = vpop.f32.mrb[204].mxu0 }
0x11d4   :  { %v14007_v1 = vpop.f32.mrb[205].mxu0  ;;  %25449 = vmatmul.mubr.msk.f32.gmra.mrb[118].mxu0 %vm419_vm2, %v29496_v48  ;;  %24151 = vmatprep.mubr.f32.mxu1 %v12733_v21  ;;  %v12737_v48 = vld [vmem:[#allocation21 + $0xd00] sm:$0xff] }
0x11d5   :  { %v30181_v29 = vpack.c.bf16 %v24381_v58, %v14007_v1  ;;  %25451 = vmatprep.mubr.msk.f32.mxu0 %vm419_vm2, %v29499_v40  ;;  %v12738_v40 = vld [vmem:[#allocation21 + $0xd08] sm:$0xff] }
0x11d7   :  { %24152 = vmatmul.mubr.f32.gmra.mrb[132].mxu1 %v12734_v22  ;;  %v24384_v25 = vpop.f32.mrb[206].mxu0 }
0x11d8   :  { %v14017_v34 = vpop.f32.mrb[207].mxu0  ;;  %25452 = vmatmul.mubr.msk.f32.gmra.mrb[120].mxu0 %vm419_vm2, %v29506_v46  ;;  %24154 = vmatprep.mubr.f32.mxu1 %v12735_v20  ;;  %v12739_v46 = vld [vmem:[#allocation21 + $0xd10] sm:$0xff] }
0x11d9   :  { %v30187_v26 = vpack.c.bf16 %v24384_v25, %v14017_v34  ;;  %25454 = vmatprep.mubr.msk.f32.mxu0 %vm419_vm2, %v29509_v47  ;;  %v12740_v47 = vld [vmem:[#allocation21 + $0xd18] sm:$0xff]  ;;  %v12743_v34 = vld [vmem:[#allocation21 + $0xd30] sm:$0xff] }
0x11db   :  { %24155 = vmatmul.mubr.f32.gmra.mrb[134].mxu1 %v12736_v32  ;;  %v24517_v52 = vpop.f32.mrb[208].mxu0 }
0x11dc   :  { %v14608_v24 = vpop.f32.mrb[209].mxu0  ;;  %25455 = vmatmul.mubr.msk.f32.gmra.mrb[122].mxu0 %vm419_vm2, %v29516_v62  ;;  %24157 = vmatprep.mubr.f32.mxu1 %v12737_v48  ;;  %v12741_v62 = vld [vmem:[#allocation21 + $0xd20] sm:$0xff]  ;;  %v12744_v48 = vld [vmem:[#allocation21 + $0xd38] sm:$0xff] }
0x11dd   :  { %v30193_v17 = vpack.c.bf16 %v24517_v52, %v14608_v24  ;;  %25457 = vmatprep.mubr.msk.f32.mxu0 %vm419_vm2, %v29518_v63  ;;  %v12742_v63 = vld [vmem:[#allocation21 + $0xd28] sm:$0xff] }
0x11df   :  { %24158 = vmatmul.mubr.f32.gmra.mrb[136].mxu1 %v12738_v40  ;;  %v24520_v21 = vpop.f32.mrb[210].mxu0 }
0x11e0   :  { %v14618_v58 = vpop.f32.mrb[211].mxu0  ;;  %25458 = vmatmul.mubr.msk.f32.gmra.mrb[124].mxu0 %vm419_vm2, %v29524_v4  ;;  %24160 = vmatprep.mubr.f32.mxu1 %v12739_v46  ;;  %v12746_v46 = vld [vmem:[#allocation21 + $0xd48] sm:$0xff] }
0x11e1   :  { %v30199_v1 = vpack.c.bf16 %v24520_v21, %v14618_v58  ;;  %25460 = vmatprep.mubr.msk.f32.mxu0 %vm419_vm2, %v29526_v5  ;;  %v12745_v5 = vld [vmem:[#allocation21 + $0xd40] sm:$0xff] }
0x11e3   :  { %24161 = vmatmul.mubr.f32.gmra.mrb[138].mxu1 %v12740_v47  ;;  %v24523_v22 = vpop.f32.mrb[212].mxu0 }
0x11e4   :  { %v14628_v20 = vpop.f32.mrb[213].mxu0  ;;  %25461 = vmatmul.mubr.msk.f32.gmra.mrb[126].mxu0 %vm419_vm2, %v29532_v6  ;;  %24163 = vmatprep.mubr.f32.mxu1 %v12741_v62  ;;  %v12747_v6 = vld [vmem:[#allocation21 + $0xd50] sm:$0xff]  ;;  %v12748_v62 = vld [vmem:[#allocation21 + $0xd58] sm:$0xff] }
0x11e5   :  { %v30205_v25 = vpack.c.bf16 %v24523_v22, %v14628_v20  ;;  %v12749_v20 = vld [vmem:[#allocation21 + $0xd60] sm:$0xff] }
0x11e7   :  { %24164 = vmatmul.mubr.f32.gmra.mrb[140].mxu1 %v12742_v63  ;;  %v24526_v4 = vpop.f32.mrb[214].mxu0 }
0x11e8   :  { %v14638_v32 = vpop.f32.mrb[215].mxu0  ;;  %24166 = vmatprep.mubr.f32.mxu1 %v12743_v34 }
0x11e9   :  { %v30207_v52 = vpack.c.bf16 %v24526_v4, %v14638_v32  ;;  %v12750_v4 = vld [vmem:[#allocation21 + $0xd68] sm:$0xff] }
0x11eb   :  { %24167 = vmatmul.mubr.f32.gmra.mrb[142].mxu1 %v12744_v48  ;;  %v24529_v24 = vpop.f32.mrb[216].mxu0  ;;  %v12751_v48 = vld [vmem:[#allocation21 + $0xd70] sm:$0xff] }
0x11ec   :  { %v14648_v40 = vpop.f32.mrb[217].mxu0  ;;  %24169 = vmatprep.mubr.f32.mxu1 %v12745_v5 }
0x11ed   :  { %v30209_v21 = vpack.c.bf16 %v24529_v24, %v14648_v40  ;;  %v12752_v40 = vld [vmem:[#allocation21 + $0xd78] sm:$0xff] }
0x11ef   :  { %24170 = vmatmul.mubr.f32.gmra.mrb[144].mxu1 %v12746_v46  ;;  %v24532_v58 = vpop.f32.mrb[218].mxu0 }
0x11f0   :  { %v14658_v47 = vpop.f32.mrb[219].mxu0  ;;  %24172 = vmatprep.mubr.f32.mxu1 %v12747_v6  ;;  %v12753_v6 = vld [vmem:[#allocation21 + $0xd80] sm:$0xff] }
0x11f1   :  { %v30211_v22 = vpack.c.bf16 %v24532_v58, %v14658_v47 }
0x11f3   :  { %24173 = vmatmul.mubr.f32.gmra.mrb[146].mxu1 %v12748_v62  ;;  %v24535_v63 = vpop.f32.mrb[220].mxu0  ;;  %v12754_v62 = vld [vmem:[#allocation21 + $0xd88] sm:$0xff] }
0x11f4   :  { %v14668_v34 = vpop.f32.mrb[221].mxu0  ;;  %24175 = vmatprep.mubr.f32.mxu1 %v12749_v20  ;;  %v12755_v20 = vld [vmem:[#allocation21 + $0xd90] sm:$0xff] }
0x11f5   :  { %v30213_v32 = vpack.c.bf16 %v24535_v63, %v14668_v34 }
0x11f7   :  { %24176 = vmatmul.mubr.f32.gmra.mrb[148].mxu1 %v12750_v4  ;;  %v24538_v5 = vpop.f32.mrb[222].mxu0  ;;  %v12756_v4 = vld [vmem:[#allocation21 + $0xd98] sm:$0xff] }
0x11f8   :  { %v14678_v24 = vpop.f32.mrb[223].mxu0  ;;  %24178 = vmatprep.mubr.f32.mxu1 %v12751_v48  ;;  %v12757_v48 = vld [vmem:[#allocation21 + $0xda0] sm:$0xff] }
0x11f9   :  { %v30215_v46 = vpack.c.bf16 %v24538_v5, %v14678_v24 }
0x11fb   :  { %24179 = vmatmul.mubr.f32.gmra.mrb[150].mxu1 %v12752_v40  ;;  %v24671_v58 = vpop.f32.mrb[224].mxu0  ;;  %v12758_v40 = vld [vmem:[#allocation21 + $0xda8] sm:$0xff] }
0x11fc   :  { %v15269_v47 = vpop.f32.mrb[225].mxu0  ;;  %24181 = vmatprep.mubr.f32.mxu1 %v12753_v6  ;;  %v12759_v6 = vld [vmem:[#allocation21 + $0xdb0] sm:$0xff] }
0x11fd   :  { %v30217_v37 = vpack.c.bf16 %v24671_v58, %v15269_v47 }
0x11ff   :  { %24182 = vmatmul.mubr.f32.gmra.mrb[152].mxu1 %v12754_v62  ;;  %v24674_v63 = vpop.f32.mrb[226].mxu0  ;;  %v12760_v62 = vld [vmem:[#allocation21 + $0xdb8] sm:$0xff] }
0x1200   :  { %v15279_v34 = vpop.f32.mrb[227].mxu0  ;;  %24184 = vmatprep.mubr.f32.mxu1 %v12755_v20  ;;  %v12761_v20 = vld [vmem:[#allocation21 + $0xdc0] sm:$0xff] }
0x1201   :  { %v30219_v43 = vpack.c.bf16 %v24674_v63, %v15279_v34 }
0x1203   :  { %24185 = vmatmul.mubr.f32.gmra.mrb[154].mxu1 %v12756_v4  ;;  %v24677_v5 = vpop.f32.mrb[228].mxu0  ;;  %v12762_v4 = vld [vmem:[#allocation21 + $0xdc8] sm:$0xff] }
0x1204   :  { %v15289_v24 = vpop.f32.mrb[229].mxu0  ;;  %24187 = vmatprep.mubr.f32.mxu1 %v12757_v48  ;;  %v12763_v48 = vld [vmem:[#allocation21 + $0xdd0] sm:$0xff] }
0x1205   :  { %v30221_v30 = vpack.c.bf16 %v24677_v5, %v15289_v24 }
0x1207   :  { %24188 = vmatmul.mubr.f32.gmra.mrb[156].mxu1 %v12758_v40  ;;  %v24680_v58 = vpop.f32.mrb[230].mxu0  ;;  %v12764_v40 = vld [vmem:[#allocation21 + $0xdd8] sm:$0xff] }
0x1208   :  { %v15299_v47 = vpop.f32.mrb[231].mxu0  ;;  %24190 = vmatprep.mubr.f32.mxu1 %v12759_v6  ;;  %v12765_v6 = vld [vmem:[#allocation21 + $0xde0] sm:$0xff] }
0x1209   :  { %v30223_v33 = vpack.c.bf16 %v24680_v58, %v15299_v47 }
0x120b   :  { %24191 = vmatmul.mubr.f32.gmra.mrb[158].mxu1 %v12760_v62  ;;  %v24683_v63 = vpop.f32.mrb[232].mxu0  ;;  %v12766_v62 = vld [vmem:[#allocation21 + $0xde8] sm:$0xff] }
0x120c   :  { %v15309_v34 = vpop.f32.mrb[233].mxu0  ;;  %24193 = vmatprep.mubr.f32.mxu1 %v12761_v20  ;;  %v12767_v20 = vld [vmem:[#allocation21 + $0xdf0] sm:$0xff] }
0x120d   :  { %v30225_v27 = vpack.c.bf16 %v24683_v63, %v15309_v34 }
0x120f   :  { %24194 = vmatmul.mubr.f32.gmra.mrb[160].mxu1 %v12762_v4  ;;  %v24686_v5 = vpop.f32.mrb[234].mxu0  ;;  %v12768_v4 = vld [vmem:[#allocation21 + $0xdf8] sm:$0xff] }
0x1210   :  { %v15319_v24 = vpop.f32.mrb[235].mxu0  ;;  %24196 = vmatprep.mubr.f32.mxu1 %v12763_v48  ;;  %v13366_v48 = vld [vmem:[#allocation21 + $0xe00] sm:$0xff] }
0x1211   :  { %v30227_v23 = vpack.c.bf16 %v24686_v5, %v15319_v24 }
0x1213   :  { %24197 = vmatmul.mubr.f32.gmra.mrb[162].mxu1 %v12764_v40  ;;  %v24689_v58 = vpop.f32.mrb[236].mxu0  ;;  %v13367_v40 = vld [vmem:[#allocation21 + $0xe08] sm:$0xff] }
0x1214   :  { %v15329_v47 = vpop.f32.mrb[237].mxu0  ;;  %24199 = vmatprep.mubr.f32.mxu1 %v12765_v6  ;;  %v13368_v6 = vld [vmem:[#allocation21 + $0xe10] sm:$0xff] }
0x1215   :  { %v30229_v8 = vpack.c.bf16 %v24689_v58, %v15329_v47 }
0x1217   :  { %24200 = vmatmul.mubr.f32.gmra.mrb[164].mxu1 %v12766_v62  ;;  %v24692_v63 = vpop.f32.mrb[238].mxu0  ;;  %v13369_v62 = vld [vmem:[#allocation21 + $0xe18] sm:$0xff] }
0x1218   :  { %v15339_v34 = vpop.f32.mrb[239].mxu0  ;;  %24202 = vmatprep.mubr.f32.mxu1 %v12767_v20 }
0x1219   :  { %v30231_v19 = vpack.c.bf16 %v24692_v63, %v15339_v34  ;;  %v13370_v63 = vld [vmem:[#allocation21 + $0xe20] sm:$0xff] }
0x121b   :  { %24203 = vmatmul.mubr.f32.gmra.mrb[166].mxu1 %v12768_v4  ;;  %v24825_v5 = vpop.f32.mrb[240].mxu0 }
0x121c   :  { %v15930_v24 = vpop.f32.mrb[241].mxu0  ;;  %24263 = vmatprep.mubr.f32.mxu1 %v13366_v48  ;;  %v13371_v48 = vld [vmem:[#allocation21 + $0xe28] sm:$0xff] }
0x121d   :  { %v30233_v28 = vpack.c.bf16 %v24825_v5, %v15930_v24 }
0x121f   :  { %24264 = vmatmul.mubr.f32.vlgmr.msra.gmra.mrb[168].mxu1 %v13367_v40  ;;  %v24828_v58 = vpop.f32.mrb[242].mxu0 }
0x1220   :  { %26162 = vmatpush3.bf16.msra.mxu1 %v30144_v18  ;;  %v15940_v47 = vpop.f32.mrb[243].mxu0  ;;  %24266 = vmatprep.mubr.f32.mxu1 %v13368_v6  ;;  %v13372_v18 = vld [vmem:[#allocation21 + $0xe30] sm:$0xff]  ;;  %v13373_v6 = vld [vmem:[#allocation21 + $0xe38] sm:$0xff] }
0x1221   :  { %26164 = vmatprep.subr.bf16.mxu1 %v30151_v55  ;;  %v30237_v20 = vpack.c.bf16 %v24828_v58, %v15940_v47 }
0x1223   :  { %24267 = vmatmul.mubr.f32.gmra.mrb[170].mxu1 %v13369_v62  ;;  %v24831_v34 = vpop.f32.mrb[244].mxu0 }
0x1224   :  { %26166 = vmatpush3.bf16.msra.mxu1 %v30151_v55  ;;  %v15950_v4 = vpop.f32.mrb[245].mxu0  ;;  %24269 = vmatprep.mubr.f32.mxu1 %v13370_v63  ;;  %v13374_v55 = vld [vmem:[#allocation21 + $0xe40] sm:$0xff]  ;;  %v13375_v63 = vld [vmem:[#allocation21 + $0xe48] sm:$0xff] }
0x1225   :  { %26168 = vmatprep.subr.bf16.mxu1 %v30157_v2  ;;  %v30241_v5 = vpack.c.bf16 %v24831_v34, %v15950_v4 }
0x1227   :  { %24270 = vmatmul.mubr.f32.gmra.mrb[172].mxu1 %v13371_v48  ;;  %v24834_v24 = vpop.f32.mrb[246].mxu0 }
0x1228   :  { %26170 = vmatpush3.bf16.msra.mxu1 %v30157_v2  ;;  %v15960_v40 = vpop.f32.mrb[247].mxu0  ;;  %24272 = vmatprep.mubr.f32.mxu1 %v13372_v18  ;;  %v13376_v2 = vld [vmem:[#allocation21 + $0xe50] sm:$0xff]  ;;  %v13377_v18 = vld [vmem:[#allocation21 + $0xe58] sm:$0xff] }
0x1229   :  { %26172 = vmatprep.subr.bf16.mxu1 %v30163_v38  ;;  %v30245_v58 = vpack.c.bf16 %v24834_v24, %v15960_v40 }
0x122b   :  { %24273 = vmatmul.mubr.f32.gmra.mrb[174].mxu1 %v13373_v6  ;;  %v24837_v47 = vpop.f32.mrb[248].mxu0 }
0x122c   :  { %26174 = vmatpush3.bf16.msra.mxu1 %v30163_v38  ;;  %v15970_v62 = vpop.f32.mrb[249].mxu0  ;;  %24275 = vmatprep.mubr.f32.mxu1 %v13374_v55  ;;  %v13378_v38 = vld [vmem:[#allocation21 + $0xe60] sm:$0xff]  ;;  %v13379_v55 = vld [vmem:[#allocation21 + $0xe68] sm:$0xff] }
0x122d   :  { %26176 = vmatprep.subr.bf16.mxu1 %v30169_v60  ;;  %v30249_v34 = vpack.c.bf16 %v24837_v47, %v15970_v62 }
0x122f   :  { %24276 = vmatmul.mubr.f32.gmra.mrb[176].mxu1 %v13375_v63  ;;  %v24840_v4 = vpop.f32.mrb[250].mxu0 }
0x1230   :  { %26178 = vmatpush3.bf16.msra.mxu1 %v30169_v60  ;;  %v15980_v48 = vpop.f32.mrb[251].mxu0  ;;  %24278 = vmatprep.mubr.f32.mxu1 %v13376_v2  ;;  %v13380_v60 = vld [vmem:[#allocation21 + $0xe70] sm:$0xff]  ;;  %v13381_v2 = vld [vmem:[#allocation21 + $0xe78] sm:$0xff] }
0x1231   :  { %26180 = vmatprep.subr.bf16.mxu1 %v30175_v7  ;;  %v30253_v24 = vpack.c.bf16 %v24840_v4, %v15980_v48 }
0x1233   :  { %24279 = vmatmul.mubr.f32.gmra.mrb[178].mxu1 %v13377_v18  ;;  %v24843_v40 = vpop.f32.mrb[252].mxu0 }
0x1234   :  { %26182 = vmatpush3.bf16.msra.mxu1 %v30175_v7  ;;  %v15990_v6 = vpop.f32.mrb[253].mxu0  ;;  %24281 = vmatprep.mubr.f32.mxu1 %v13378_v38  ;;  %v13382_v7 = vld [vmem:[#allocation21 + $0xe80] sm:$0xff]  ;;  %v13383_v38 = vld [vmem:[#allocation21 + $0xe88] sm:$0xff] }
0x1235   :  { %26184 = vmatprep.subr.bf16.mxu1 %v30181_v29  ;;  %v30257_v47 = vpack.c.bf16 %v24843_v40, %v15990_v6 }
0x1237   :  { %24282 = vmatmul.mubr.f32.gmra.mrb[180].mxu1 %v13379_v55  ;;  %v24846_v62 = vpop.f32.mrb[254].mxu0 }
0x1238   :  { %26186 = vmatpush3.bf16.msra.mxu1 %v30181_v29  ;;  %v16000_v63 = vpop.f32.mrb[255].mxu0  ;;  %24284 = vmatprep.mubr.f32.mxu1 %v13380_v60  ;;  %v13384_v29 = vld [vmem:[#allocation21 + $0xe90] sm:$0xff]  ;;  %v13385_v60 = vld [vmem:[#allocation21 + $0xe98] sm:$0xff] }
0x1239   :  { %26188 = vmatprep.subr.bf16.mxu1 %v30187_v26  ;;  %v30261_v4 = vpack.c.bf16 %v24846_v62, %v16000_v63  ;;  %v13386_v63 = vld [vmem:[#allocation21 + $0xea0] sm:$0xff] }
0x123b   :  { %24285 = vmatmul.mubr.f32.gmra.mrb[118].mxu1 %v13381_v2  ;;  %v24979_v48 = vpop.f32.mrb[0].mxu0 }
0x123c   :  { %26190 = vmatpush3.bf16.msra.mxu1 %v30187_v26  ;;  %v16591_v18 = vpop.f32.mrb[1].mxu0  ;;  %24287 = vmatprep.mubr.f32.mxu1 %v13382_v7  ;;  %v13387_v26 = vld [vmem:[#allocation21 + $0xea8] sm:$0xff] }
0x123d   :  { %26192 = vmatprep.subr.bf16.mxu1 %v30193_v17  ;;  %v30265_v40 = vpack.c.bf16 %v24979_v48, %v16591_v18 }
0x123f   :  { %24288 = vmatmul.mubr.f32.gmra.mrb[120].mxu1 %v13383_v38  ;;  %v24982_v6 = vpop.f32.mrb[2].mxu0  ;;  %v13389_v38 = vld [vmem:[#allocation21 + $0xeb8] sm:$0xff] }
0x1240   :  { %v16601_v55 = vpop.f32.mrb[3].mxu0  ;;  %24290 = vmatprep.mubr.f32.mxu1 %v13384_v29  ;;  %v13390_v29 = vld [vmem:[#allocation21 + $0xec0] sm:$0xff] }
0x1241   :  { %v30267_v62 = vpack.c.bf16 %v24982_v6, %v16601_v55 }
0x1243   :  { %24291 = vmatmul.mubr.f32.gmra.mrb[122].mxu1 %v13385_v60  ;;  %v24985_v2 = vpop.f32.mrb[4].mxu0  ;;  %v13391_v60 = vld [vmem:[#allocation21 + $0xec8] sm:$0xff] }
0x1244   :  { %v16611_v16 = vpop.f32.mrb[5].mxu0  ;;  %24293 = vmatprep.mubr.f32.mxu1 %v13386_v63  ;;  %v13392_v63 = vld [vmem:[#allocation21 + $0xed0] sm:$0xff] }
0x1245   :  { %v30269_v7 = vpack.c.bf16 %v24985_v2, %v16611_v16 }
0x1247   :  { %24294 = vmatmul.mubr.f32.gmra.mrb[124].mxu1 %v13387_v26  ;;  %v24988_v48 = vpop.f32.mrb[6].mxu0  ;;  %v13393_v26 = vld [vmem:[#allocation21 + $0xed8] sm:$0xff] }
0x1248   :  { %v16621_v18 = vpop.f32.mrb[7].mxu0  ;;  %24296 = vmatprep.mubr.f32.mxu1 %v13388_v51  ;;  %v13394_v51 = vld [vmem:[#allocation21 + $0xee0] sm:$0xff] }
0x1249   :  { %v30271_v53 = vpack.c.bf16 %v24988_v48, %v16621_v18 }
0x124b   :  { %24297 = vmatmul.mubr.f32.gmra.mrb[126].mxu1 %v13389_v38  ;;  %v24991_v6 = vpop.f32.mrb[8].mxu0  ;;  %v13395_v38 = vld [vmem:[#allocation21 + $0xee8] sm:$0xff] }
0x124c   :  { %v16631_v55 = vpop.f32.mrb[9].mxu0  ;;  %24299 = vmatprep.mubr.f32.mxu1 %v13390_v29  ;;  %v13396_v29 = vld [vmem:[#allocation21 + $0xef0] sm:$0xff] }
0x124d   :  { %v30273_v42 = vpack.c.bf16 %v24991_v6, %v16631_v55 }
0x124f   :  { %24300 = vmatmul.mubr.f32.gmra.mrb[128].mxu1 %v13391_v60  ;;  %v24994_v16 = vpop.f32.mrb[10].mxu0  ;;  %v13397_v60 = vld [vmem:[#allocation21 + $0xef8] sm:$0xff] }
0x1250   :  { %v16641_v2 = vpop.f32.mrb[11].mxu0  ;;  %24302 = vmatprep.mubr.f32.mxu1 %v13392_v63  ;;  %v13398_v63 = vld [vmem:[#allocation21 + $0xf00] sm:$0xff] }
0x1251   :  { %v30275_v59 = vpack.c.bf16 %v24994_v16, %v16641_v2 }
0x1253   :  { %24303 = vmatmul.mubr.f32.gmra.mrb[130].mxu1 %v13393_v26  ;;  %v24997_v48 = vpop.f32.mrb[12].mxu0  ;;  %v13399_v26 = vld [vmem:[#allocation21 + $0xf08] sm:$0xff] }
0x1254   :  { %v16651_v18 = vpop.f32.mrb[13].mxu0  ;;  %24305 = vmatprep.mubr.f32.mxu1 %v13394_v51  ;;  %v13400_v51 = vld [vmem:[#allocation21 + $0xf10] sm:$0xff] }
0x1255   :  { %v30277_v35 = vpack.c.bf16 %v24997_v48, %v16651_v18 }
0x1257   :  { %24306 = vmatmul.mubr.f32.gmra.mrb[132].mxu1 %v13395_v38  ;;  %v25000_v6 = vpop.f32.mrb[14].mxu0  ;;  %v13401_v38 = vld [vmem:[#allocation21 + $0xf18] sm:$0xff] }
0x1258   :  { %v16661_v55 = vpop.f32.mrb[15].mxu0  ;;  %24308 = vmatprep.mubr.f32.mxu1 %v13396_v29  ;;  %v13402_v29 = vld [vmem:[#allocation21 + $0xf20] sm:$0xff] }
0x1259   :  { %v30279_v15 = vpack.c.bf16 %v25000_v6, %v16661_v55 }
0x125b   :  { %24309 = vmatmul.mubr.f32.gmra.mrb[134].mxu1 %v13397_v60  ;;  %v25133_v16 = vpop.f32.mrb[16].mxu0  ;;  %v13403_v60 = vld [vmem:[#allocation21 + $0xf28] sm:$0xff] }
0x125c   :  { %v17252_v2 = vpop.f32.mrb[17].mxu0  ;;  %24311 = vmatprep.mubr.f32.mxu1 %v13398_v63  ;;  %v13404_v63 = vld [vmem:[#allocation21 + $0xf30] sm:$0xff] }
0x125d   :  { %v30281_v13 = vpack.c.bf16 %v25133_v16, %v17252_v2 }
0x125f   :  { %24312 = vmatmul.mubr.f32.gmra.mrb[136].mxu1 %v13399_v26  ;;  %v25136_v48 = vpop.f32.mrb[18].mxu0  ;;  %v13405_v26 = vld [vmem:[#allocation21 + $0xf38] sm:$0xff] }
0x1260   :  { %v17262_v18 = vpop.f32.mrb[19].mxu0  ;;  %24314 = vmatprep.mubr.f32.mxu1 %v13400_v51  ;;  %v13406_v51 = vld [vmem:[#allocation21 + $0xf40] sm:$0xff] }
0x1261   :  { %v30283_v39 = vpack.c.bf16 %v25136_v48, %v17262_v18 }
0x1263   :  { %24315 = vmatmul.mubr.f32.gmra.mrb[138].mxu1 %v13401_v38  ;;  %v25139_v6 = vpop.f32.mrb[20].mxu0  ;;  %v13407_v38 = vld [vmem:[#allocation21 + $0xf48] sm:$0xff] }
0x1264   :  { %v17272_v55 = vpop.f32.mrb[21].mxu0  ;;  %24317 = vmatprep.mubr.f32.mxu1 %v13402_v29  ;;  %v13408_v29 = vld [vmem:[#allocation21 + $0xf50] sm:$0xff] }
0x1265   :  { %v30285_v12 = vpack.c.bf16 %v25139_v6, %v17272_v55 }
0x1267   :  { %24318 = vmatmul.mubr.f32.gmra.mrb[140].mxu1 %v13403_v60  ;;  %v25142_v16 = vpop.f32.mrb[22].mxu0  ;;  %v13409_v60 = vld [vmem:[#allocation21 + $0xf58] sm:$0xff] }
0x1268   :  { %v17282_v2 = vpop.f32.mrb[23].mxu0  ;;  %24320 = vmatprep.mubr.f32.mxu1 %v13404_v63  ;;  %v13410_v63 = vld [vmem:[#allocation21 + $0xf60] sm:$0xff] }
0x1269   :  { %v30287_v56 = vpack.c.bf16 %v25142_v16, %v17282_v2 }
0x126b   :  { %24321 = vmatmul.mubr.f32.gmra.mrb[142].mxu1 %v13405_v26  ;;  %v25145_v48 = vpop.f32.mrb[24].mxu0  ;;  %v13411_v26 = vld [vmem:[#allocation21 + $0xf68] sm:$0xff] }
0x126c   :  { %v17292_v18 = vpop.f32.mrb[25].mxu0  ;;  %24323 = vmatprep.mubr.f32.mxu1 %v13406_v51  ;;  %v13412_v51 = vld [vmem:[#allocation21 + $0xf70] sm:$0xff] }
0x126d   :  { %v30289_v54 = vpack.c.bf16 %v25145_v48, %v17292_v18 }
0x126f   :  { %24324 = vmatmul.mubr.f32.gmra.mrb[144].mxu1 %v13407_v38  ;;  %v25148_v6 = vpop.f32.mrb[26].mxu0  ;;  %v13413_v38 = vld [vmem:[#allocation21 + $0xf78] sm:$0xff] }
0x1270   :  { %v17302_v55 = vpop.f32.mrb[27].mxu0  ;;  %24326 = vmatprep.mubr.f32.mxu1 %v13408_v29  ;;  %v13414_v29 = vld [vmem:[#allocation21 + $0xf80] sm:$0xff] }
0x1271   :  { %v30291_v61 = vpack.c.bf16 %v25148_v6, %v17302_v55 }
0x1273   :  { %24327 = vmatmul.mubr.f32.gmra.mrb[146].mxu1 %v13409_v60  ;;  %v25151_v16 = vpop.f32.mrb[28].mxu0  ;;  %v13415_v60 = vld [vmem:[#allocation21 + $0xf88] sm:$0xff] }
0x1274   :  { %v17312_v2 = vpop.f32.mrb[29].mxu0  ;;  %24329 = vmatprep.mubr.f32.mxu1 %v13410_v63  ;;  %v13416_v63 = vld [vmem:[#allocation21 + $0xf90] sm:$0xff] }
0x1275   :  { %v30293_v45 = vpack.c.bf16 %v25151_v16, %v17312_v2 }
0x1277   :  { %24330 = vmatmul.mubr.f32.gmra.mrb[148].mxu1 %v13411_v26  ;;  %v25154_v48 = vpop.f32.mrb[30].mxu0  ;;  %v13417_v26 = vld [vmem:[#allocation21 + $0xf98] sm:$0xff] }
0x1278   :  { %v17322_v18 = vpop.f32.mrb[31].mxu0  ;;  %24332 = vmatprep.mubr.f32.mxu1 %v13412_v51  ;;  %v13418_v51 = vld [vmem:[#allocation21 + $0xfa0] sm:$0xff] }
0x1279   :  { %v30295_v9 = vpack.c.bf16 %v25154_v48, %v17322_v18 }
0x127b   :  { %24333 = vmatmul.mubr.f32.gmra.mrb[150].mxu1 %v13413_v38  ;;  %v25287_v6 = vpop.f32.mrb[32].mxu0  ;;  %v13419_v38 = vld [vmem:[#allocation21 + $0xfa8] sm:$0xff] }
0x127c   :  { %v17913_v55 = vpop.f32.mrb[33].mxu0  ;;  %24335 = vmatprep.mubr.f32.mxu1 %v13414_v29  ;;  %v13420_v29 = vld [vmem:[#allocation21 + $0xfb0] sm:$0xff] }
0x127d   :  { %v30297_v57 = vpack.c.bf16 %v25287_v6, %v17913_v55 }
0x127f   :  { %24336 = vmatmul.mubr.f32.gmra.mrb[152].mxu1 %v13415_v60  ;;  %v25290_v16 = vpop.f32.mrb[34].mxu0  ;;  %v13421_v60 = vld [vmem:[#allocation21 + $0xfb8] sm:$0xff] }
0x1280   :  { %v17923_v2 = vpop.f32.mrb[35].mxu0  ;;  %24338 = vmatprep.mubr.f32.mxu1 %v13416_v63  ;;  %v13422_v63 = vld [vmem:[#allocation21 + $0xfc0] sm:$0xff] }
0x1281   :  { %v30299_v14 = vpack.c.bf16 %v25290_v16, %v17923_v2 }
0x1283   :  { %24339 = vmatmul.mubr.f32.gmra.mrb[154].mxu1 %v13417_v26  ;;  %v25293_v48 = vpop.f32.mrb[36].mxu0  ;;  %v13423_v26 = vld [vmem:[#allocation21 + $0xfc8] sm:$0xff] }
0x1284   :  { %v17933_v18 = vpop.f32.mrb[37].mxu0  ;;  %24341 = vmatprep.mubr.f32.mxu1 %v13418_v51  ;;  %v13424_v51 = vld [vmem:[#allocation21 + $0xfd0] sm:$0xff] }
0x1285   :  { %v30301_v36 = vpack.c.bf16 %v25293_v48, %v17933_v18 }
0x1287   :  { %24342 = vmatmul.mubr.f32.gmra.mrb[156].mxu1 %v13419_v38  ;;  %v25296_v6 = vpop.f32.mrb[38].mxu0  ;;  %v13425_v38 = vld [vmem:[#allocation21 + $0xfd8] sm:$0xff] }
0x1288   :  { %v17943_v55 = vpop.f32.mrb[39].mxu0  ;;  %24344 = vmatprep.mubr.f32.mxu1 %v13420_v29  ;;  %v13426_v29 = vld [vmem:[#allocation21 + $0xfe0] sm:$0xff] }
0x1289   :  { %v30303_v50 = vpack.c.bf16 %v25296_v6, %v17943_v55 }
0x128b   :  { %24345 = vmatmul.mubr.f32.gmra.mrb[158].mxu1 %v13421_v60  ;;  %v25299_v16 = vpop.f32.mrb[40].mxu0  ;;  %v13427_v60 = vld [vmem:[#allocation21 + $0xfe8] sm:$0xff] }
0x128c   :  { %v17953_v2 = vpop.f32.mrb[41].mxu0  ;;  %24347 = vmatprep.mubr.f32.mxu1 %v13422_v63  ;;  %v13428_v63 = vld [vmem:[#allocation21 + $0xff0] sm:$0xff] }
0x128d   :  { %v30305_v10 = vpack.c.bf16 %v25299_v16, %v17953_v2 }
0x128f   :  { %24348 = vmatmul.mubr.f32.gmra.mrb[160].mxu1 %v13423_v26  ;;  %v25302_v48 = vpop.f32.mrb[42].mxu0  ;;  %v13429_v26 = vld [vmem:[#allocation21 + $0xff8] sm:$0xff] }
0x1290   :  { %v17963_v18 = vpop.f32.mrb[43].mxu0  ;;  %24350 = vmatprep.mubr.f32.mxu1 %v13424_v51  ;;  %v14027_v51 = vld [vmem:[#allocation21 + $0x1000] sm:$0xff] }
0x1291   :  { %v30307_v3 = vpack.c.bf16 %v25302_v48, %v17963_v18 }
0x1293   :  { %24351 = vmatmul.mubr.f32.gmra.mrb[162].mxu1 %v13425_v38  ;;  %v25305_v6 = vpop.f32.mrb[44].mxu0  ;;  %v14028_v38 = vld [vmem:[#allocation21 + $0x1008] sm:$0xff] }
0x1294   :  { %v17973_v55 = vpop.f32.mrb[45].mxu0  ;;  %24353 = vmatprep.mubr.f32.mxu1 %v13426_v29  ;;  %v14029_v29 = vld [vmem:[#allocation21 + $0x1010] sm:$0xff] }
0x1295   :  { %v30309_v0 = vpack.c.bf16 %v25305_v6, %v17973_v55 }
0x1297   :  { %24354 = vmatmul.mubr.f32.gmra.mrb[164].mxu1 %v13427_v60  ;;  %v25308_v16 = vpop.f32.mrb[46].mxu0  ;;  %v14030_v60 = vld [vmem:[#allocation21 + $0x1018] sm:$0xff] }
0x1298   :  { %v17983_v2 = vpop.f32.mrb[47].mxu0  ;;  %24356 = vmatprep.mubr.f32.mxu1 %v13428_v63 }
0x1299   :  { %v30311_v41 = vpack.c.bf16 %v25308_v16, %v17983_v2  ;;  %v14031_v16 = vld [vmem:[#allocation21 + $0x1020] sm:$0xff] }
0x129b   :  { %24357 = vmatmul.mubr.f32.gmra.mrb[166].mxu1 %v13429_v26  ;;  %v25441_v48 = vpop.f32.mrb[112].mxu0 }
0x129c   :  { %v18574_v18 = vpop.f32.mrb[113].mxu0  ;;  %24417 = vmatprep.mubr.f32.mxu1 %v14027_v51  ;;  %v14032_v51 = vld [vmem:[#allocation21 + $0x1028] sm:$0xff] }
0x129d   :  { %v30313_v31 = vpack.c.bf16 %v25441_v48, %v18574_v18 }
0x129f   :  { %24418 = vmatmul.mubr.f32.vlgmr.msra.gmra.mrb[168].mxu1 %v14028_v38  ;;  %v25444_v6 = vpop.f32.mrb[114].mxu0 }
0x12a0   :  { %26194 = vmatpush3.bf16.msra.mxu1 %v30193_v17  ;;  %v18584_v55 = vpop.f32.mrb[115].mxu0  ;;  %24420 = vmatprep.mubr.f32.mxu1 %v14029_v29  ;;  %v14033_v17 = vld [vmem:[#allocation21 + $0x1030] sm:$0xff]  ;;  %v14034_v29 = vld [vmem:[#allocation21 + $0x1038] sm:$0xff] }
0x12a1   :  { %26196 = vmatprep.subr.bf16.mxu1 %v30199_v1  ;;  %v30317_v63 = vpack.c.bf16 %v25444_v6, %v18584_v55 }
0x12a3   :  { %24421 = vmatmul.mubr.f32.gmra.mrb[170].mxu1 %v14030_v60  ;;  %v25447_v2 = vpop.f32.mrb[116].mxu0 }
0x12a4   :  { %26198 = vmatpush3.bf16.msra.mxu1 %v30199_v1  ;;  %v18594_v26 = vpop.f32.mrb[117].mxu0  ;;  %24423 = vmatprep.mubr.f32.mxu1 %v14031_v16  ;;  %v14035_v1 = vld [vmem:[#allocation21 + $0x1040] sm:$0xff]  ;;  %v14036_v16 = vld [vmem:[#allocation21 + $0x1048] sm:$0xff] }
0x12a5   :  { %26200 = vmatprep.subr.bf16.mxu1 %v30205_v25  ;;  %v30321_v48 = vpack.c.bf16 %v25447_v2, %v18594_v26 }
0x12a7   :  { %24424 = vmatmul.mubr.f32.gmra.mrb[172].mxu1 %v14032_v51  ;;  %v25450_v18 = vpop.f32.mrb[118].mxu0 }
0x12a8   :  { %26202 = vmatpush3.bf16.msra.mxu1 %v30205_v25  ;;  %v18604_v38 = vpop.f32.mrb[119].mxu0  ;;  %24426 = vmatprep.mubr.f32.mxu1 %v14033_v17  ;;  %v14037_v25 = vld [vmem:[#allocation21 + $0x1050] sm:$0xff]  ;;  %v14038_v17 = vld [vmem:[#allocation21 + $0x1058] sm:$0xff] }
0x12a9   :  { %26204 = vmatprep.subr.bf16.mxu1 %v30207_v52  ;;  %v30325_v6 = vpack.c.bf16 %v25450_v18, %v18604_v38 }
0x12ab   :  { %24427 = vmatmul.mubr.f32.gmra.mrb[174].mxu1 %v14034_v29  ;;  %v25453_v55 = vpop.f32.mrb[120].mxu0 }
0x12ac   :  { %26206 = vmatpush3.bf16.msra.mxu1 %v30207_v52  ;;  %v18614_v60 = vpop.f32.mrb[121].mxu0  ;;  %24429 = vmatprep.mubr.f32.mxu1 %v14035_v1  ;;  %v14039_v52 = vld [vmem:[#allocation21 + $0x1060] sm:$0xff]  ;;  %v14040_v1 = vld [vmem:[#allocation21 + $0x1068] sm:$0xff] }
0x12ad   :  { %26208 = vmatprep.subr.bf16.mxu1 %v30209_v21  ;;  %v30329_v2 = vpack.c.bf16 %v25453_v55, %v18614_v60 }
0x12af   :  { %24430 = vmatmul.mubr.f32.gmra.mrb[176].mxu1 %v14036_v16  ;;  %v25456_v26 = vpop.f32.mrb[122].mxu0 }
0x12b0   :  { %26210 = vmatpush3.bf16.msra.mxu1 %v30209_v21  ;;  %v18624_v51 = vpop.f32.mrb[123].mxu0  ;;  %24432 = vmatprep.mubr.f32.mxu1 %v14037_v25  ;;  %v14041_v21 = vld [vmem:[#allocation21 + $0x1070] sm:$0xff]  ;;  %v14042_v25 = vld [vmem:[#allocation21 + $0x1078] sm:$0xff] }
0x12b1   :  { %26212 = vmatprep.subr.bf16.mxu1 %v30211_v22  ;;  %v30333_v18 = vpack.c.bf16 %v25456_v26, %v18624_v51  ;;  %v14044_v51 = vld [vmem:[#allocation21 + $0x1088] sm:$0xff] }
0x12b3   :  { %24433 = vmatmul.mubr.f32.gmra.mrb[178].mxu1 %v14038_v17  ;;  %v25459_v38 = vpop.f32.mrb[124].mxu0  ;;  %v14045_v17 = vld [vmem:[#allocation21 + $0x1090] sm:$0xff] }
0x12b4   :  { %26214 = vmatpush3.bf16.msra.mxu1 %v30211_v22  ;;  %v18634_v29 = vpop.f32.mrb[125].mxu0  ;;  %24435 = vmatprep.mubr.f32.mxu1 %v14039_v52  ;;  %v14043_v22 = vld [vmem:[#allocation21 + $0x1080] sm:$0xff]  ;;  %v14046_v52 = vld [vmem:[#allocation21 + $0x1098] sm:$0xff] }
0x12b5   :  { %26216 = vmatprep.subr.bf16.mxu1 %v30213_v32  ;;  %v30337_v55 = vpack.c.bf16 %v25459_v38, %v18634_v29  ;;  %v14048_v38 = vld [vmem:[#allocation21 + $0x10a8] sm:$0xff]  ;;  %v14049_v29 = vld [vmem:[#allocation21 + $0x10b0] sm:$0xff] }
0x12b7   :  { %24436 = vmatmul.mubr.f32.gmra.mrb[180].mxu1 %v14040_v1  ;;  %v25462_v60 = vpop.f32.mrb[126].mxu0  ;;  %v14050_v1 = vld [vmem:[#allocation21 + $0x10b8] sm:$0xff] }
0x12b8   :  { %26218 = vmatpush3.bf16.msra.mxu1 %v30213_v32  ;;  %v18644_v16 = vpop.f32.mrb[127].mxu0  ;;  %24438 = vmatprep.mubr.f32.mxu1 %v14041_v21  ;;  %v14047_v32 = vld [vmem:[#allocation21 + $0x10a0] sm:$0xff] }
0x12b9   :  { %26220 = vmatprep.subr.bf16.mxu1 %v30215_v46  ;;  %v30341_v26 = vpack.c.bf16 %v25462_v60, %v18644_v16  ;;  %v14051_v21 = vld [vmem:[#allocation21 + $0x10c0] sm:$0xff]  ;;  %v14053_v60 = vld [vmem:[#allocation21 + $0x10d0] sm:$0xff]  ;;  %v14054_v16 = vld [vmem:[#allocation21 + $0x10d8] sm:$0xff] }
0x12bb   :  { %24439 = vmatmul.mubr.f32.gmra.mrb[118].mxu1 %v14042_v25  ;;  %v14055_v25 = vld [vmem:[#allocation21 + $0x10e0] sm:$0xff] }
0x12bc   :  { %26222 = vmatpush3.bf16.msra.mxu1 %v30215_v46  ;;  %24441 = vmatprep.mubr.f32.mxu1 %v14043_v22  ;;  %v14052_v46 = vld [vmem:[#allocation21 + $0x10c8] sm:$0xff] }
0x12bd   :  { %26224 = vmatprep.subr.bf16.mxu1 %v30217_v37  ;;  %v14056_v22 = vld [vmem:[#allocation21 + $0x10e8] sm:$0xff] }
0x12bf   :  { %24442 = vmatmul.mubr.f32.gmra.mrb[120].mxu1 %v14044_v51  ;;  %v14057_v51 = vld [vmem:[#allocation21 + $0x10f0] sm:$0xff] }
0x12c0   :  { %24444 = vmatprep.mubr.f32.mxu1 %v14045_v17  ;;  %v14058_v17 = vld [vmem:[#allocation21 + $0x10f8] sm:$0xff] }
0x12c3   :  { %24445 = vmatmul.mubr.f32.gmra.mrb[122].mxu1 %v14046_v52  ;;  %v14059_v52 = vld [vmem:[#allocation21 + $0x1100] sm:$0xff] }
0x12c4   :  { %24447 = vmatprep.mubr.f32.mxu1 %v14047_v32  ;;  %v14060_v32 = vld [vmem:[#allocation21 + $0x1108] sm:$0xff] }
0x12c7   :  { %24448 = vmatmul.mubr.f32.gmra.mrb[124].mxu1 %v14048_v38  ;;  %v14061_v38 = vld [vmem:[#allocation21 + $0x1110] sm:$0xff] }
0x12c8   :  { %24450 = vmatprep.mubr.f32.mxu1 %v14049_v29  ;;  %v14062_v29 = vld [vmem:[#allocation21 + $0x1118] sm:$0xff] }
0x12cb   :  { %24451 = vmatmul.mubr.f32.gmra.mrb[126].mxu1 %v14050_v1  ;;  %v14063_v1 = vld [vmem:[#allocation21 + $0x1120] sm:$0xff] }
0x12cc   :  { %24453 = vmatprep.mubr.f32.mxu1 %v14051_v21  ;;  %v14064_v21 = vld [vmem:[#allocation21 + $0x1128] sm:$0xff] }
0x12cf   :  { %24454 = vmatmul.mubr.f32.gmra.mrb[128].mxu1 %v14052_v46  ;;  %v14065_v46 = vld [vmem:[#allocation21 + $0x1130] sm:$0xff] }
0x12d0   :  { %24456 = vmatprep.mubr.f32.mxu1 %v14053_v60  ;;  %v14066_v60 = vld [vmem:[#allocation21 + $0x1138] sm:$0xff] }
0x12d3   :  { %24457 = vmatmul.mubr.f32.gmra.mrb[130].mxu1 %v14054_v16  ;;  %v14067_v16 = vld [vmem:[#allocation21 + $0x1140] sm:$0xff] }
0x12d4   :  { %24459 = vmatprep.mubr.f32.mxu1 %v14055_v25  ;;  %v14068_v25 = vld [vmem:[#allocation21 + $0x1148] sm:$0xff] }
0x12d7   :  { %24460 = vmatmul.mubr.f32.gmra.mrb[132].mxu1 %v14056_v22  ;;  %v14069_v22 = vld [vmem:[#allocation21 + $0x1150] sm:$0xff] }
0x12d8   :  { %24462 = vmatprep.mubr.f32.mxu1 %v14057_v51  ;;  %v14070_v51 = vld [vmem:[#allocation21 + $0x1158] sm:$0xff] }
0x12db   :  { %24463 = vmatmul.mubr.f32.gmra.mrb[134].mxu1 %v14058_v17  ;;  %v14071_v17 = vld [vmem:[#allocation21 + $0x1160] sm:$0xff] }
0x12dc   :  { %24465 = vmatprep.mubr.f32.mxu1 %v14059_v52  ;;  %v14072_v52 = vld [vmem:[#allocation21 + $0x1168] sm:$0xff] }
0x12df   :  { %24466 = vmatmul.mubr.f32.gmra.mrb[136].mxu1 %v14060_v32  ;;  %v14073_v32 = vld [vmem:[#allocation21 + $0x1170] sm:$0xff] }
0x12e0   :  { %24468 = vmatprep.mubr.f32.mxu1 %v14061_v38  ;;  %v14074_v38 = vld [vmem:[#allocation21 + $0x1178] sm:$0xff] }
0x12e3   :  { %24469 = vmatmul.mubr.f32.gmra.mrb[138].mxu1 %v14062_v29  ;;  %v14075_v29 = vld [vmem:[#allocation21 + $0x1180] sm:$0xff] }
0x12e4   :  { %24471 = vmatprep.mubr.f32.mxu1 %v14063_v1  ;;  %v14076_v1 = vld [vmem:[#allocation21 + $0x1188] sm:$0xff] }
0x12e7   :  { %24472 = vmatmul.mubr.f32.gmra.mrb[140].mxu1 %v14064_v21  ;;  %v14077_v21 = vld [vmem:[#allocation21 + $0x1190] sm:$0xff] }
0x12e8   :  { %24474 = vmatprep.mubr.f32.mxu1 %v14065_v46  ;;  %v14078_v46 = vld [vmem:[#allocation21 + $0x1198] sm:$0xff] }
0x12eb   :  { %24475 = vmatmul.mubr.f32.gmra.mrb[142].mxu1 %v14066_v60  ;;  %v14079_v60 = vld [vmem:[#allocation21 + $0x11a0] sm:$0xff] }
0x12ec   :  { %24477 = vmatprep.mubr.f32.mxu1 %v14067_v16  ;;  %v14080_v16 = vld [vmem:[#allocation21 + $0x11a8] sm:$0xff] }
0x12ef   :  { %24478 = vmatmul.mubr.f32.gmra.mrb[144].mxu1 %v14068_v25  ;;  %v14081_v25 = vld [vmem:[#allocation21 + $0x11b0] sm:$0xff] }
0x12f0   :  { %24480 = vmatprep.mubr.f32.mxu1 %v14069_v22  ;;  %v14082_v22 = vld [vmem:[#allocation21 + $0x11b8] sm:$0xff] }
0x12f3   :  { %24481 = vmatmul.mubr.f32.gmra.mrb[146].mxu1 %v14070_v51  ;;  %v14083_v51 = vld [vmem:[#allocation21 + $0x11c0] sm:$0xff] }
0x12f4   :  { %24483 = vmatprep.mubr.f32.mxu1 %v14071_v17  ;;  %v14084_v17 = vld [vmem:[#allocation21 + $0x11c8] sm:$0xff] }
0x12f7   :  { %24484 = vmatmul.mubr.f32.gmra.mrb[148].mxu1 %v14072_v52  ;;  %v14085_v52 = vld [vmem:[#allocation21 + $0x11d0] sm:$0xff] }
0x12f8   :  { %24486 = vmatprep.mubr.f32.mxu1 %v14073_v32  ;;  %v14086_v32 = vld [vmem:[#allocation21 + $0x11d8] sm:$0xff] }
0x12fb   :  { %24487 = vmatmul.mubr.f32.gmra.mrb[150].mxu1 %v14074_v38  ;;  %v14087_v38 = vld [vmem:[#allocation21 + $0x11e0] sm:$0xff] }
0x12fc   :  { %24489 = vmatprep.mubr.f32.mxu1 %v14075_v29  ;;  %v14088_v29 = vld [vmem:[#allocation21 + $0x11e8] sm:$0xff] }
0x12ff   :  { %24490 = vmatmul.mubr.f32.gmra.mrb[152].mxu1 %v14076_v1  ;;  %v14089_v1 = vld [vmem:[#allocation21 + $0x11f0] sm:$0xff] }
0x1300   :  { %24492 = vmatprep.mubr.f32.mxu1 %v14077_v21  ;;  %v14090_v21 = vld [vmem:[#allocation21 + $0x11f8] sm:$0xff] }
0x1303   :  { %24493 = vmatmul.mubr.f32.gmra.mrb[154].mxu1 %v14078_v46  ;;  %v14688_v46 = vld [vmem:[#allocation21 + $0x1200] sm:$0xff] }
0x1304   :  { %24495 = vmatprep.mubr.f32.mxu1 %v14079_v60  ;;  %v14689_v60 = vld [vmem:[#allocation21 + $0x1208] sm:$0xff] }
0x1307   :  { %24496 = vmatmul.mubr.f32.gmra.mrb[156].mxu1 %v14080_v16  ;;  %v14690_v16 = vld [vmem:[#allocation21 + $0x1210] sm:$0xff] }
0x1308   :  { %24498 = vmatprep.mubr.f32.mxu1 %v14081_v25  ;;  %v14691_v25 = vld [vmem:[#allocation21 + $0x1218] sm:$0xff] }
0x130b   :  { %24499 = vmatmul.mubr.f32.gmra.mrb[158].mxu1 %v14082_v22  ;;  %v14692_v22 = vld [vmem:[#allocation21 + $0x1220] sm:$0xff] }
0x130c   :  { %24501 = vmatprep.mubr.f32.mxu1 %v14083_v51  ;;  %v14693_v51 = vld [vmem:[#allocation21 + $0x1228] sm:$0xff] }
0x130f   :  { %24502 = vmatmul.mubr.f32.gmra.mrb[160].mxu1 %v14084_v17  ;;  %v14694_v17 = vld [vmem:[#allocation21 + $0x1230] sm:$0xff] }
0x1310   :  { %24504 = vmatprep.mubr.f32.mxu1 %v14085_v52  ;;  %v14695_v52 = vld [vmem:[#allocation21 + $0x1238] sm:$0xff] }
0x1313   :  { %24505 = vmatmul.mubr.f32.gmra.mrb[162].mxu1 %v14086_v32  ;;  %v14697_v32 = vld [vmem:[#allocation21 + $0x1248] sm:$0xff] }
0x1314   :  { %24507 = vmatprep.mubr.f32.mxu1 %v14087_v38  ;;  %v14699_v38 = vld [vmem:[#allocation21 + $0x1258] sm:$0xff] }
0x1317   :  { %24508 = vmatmul.mubr.f32.gmra.mrb[164].mxu1 %v14088_v29  ;;  %v14701_v29 = vld [vmem:[#allocation21 + $0x1268] sm:$0xff] }
0x1318   :  { %24510 = vmatprep.mubr.f32.mxu1 %v14089_v1  ;;  %v14703_v1 = vld [vmem:[#allocation21 + $0x1278] sm:$0xff] }
0x131b   :  { %24511 = vmatmul.mubr.f32.gmra.mrb[166].mxu1 %v14090_v21  ;;  %v14705_v21 = vld [vmem:[#allocation21 + $0x1288] sm:$0xff] }
0x131c   :  { %24571 = vmatprep.mubr.f32.mxu1 %v14688_v46  ;;  %v14707_v46 = vld [vmem:[#allocation21 + $0x1298] sm:$0xff] }
0x131f   :  { %24572 = vmatmul.mubr.f32.vlgmr.msra.gmra.mrb[168].mxu1 %v14689_v60  ;;  %v14708_v60 = vld [vmem:[#allocation21 + $0x12a0] sm:$0xff] }
0x1320   :  { %26226 = vmatpush3.bf16.msra.mxu1 %v30217_v37  ;;  %24574 = vmatprep.mubr.f32.mxu1 %v14690_v16  ;;  %v14696_v37 = vld [vmem:[#allocation21 + $0x1240] sm:$0xff]  ;;  %v14710_v16 = vld [vmem:[#allocation21 + $0x12b0] sm:$0xff] }
0x1321   :  { %26228 = vmatprep.subr.bf16.mxu1 %v30219_v43 }
0x1323   :  { %24575 = vmatmul.mubr.f32.gmra.mrb[170].mxu1 %v14691_v25  ;;  %v14711_v25 = vld [vmem:[#allocation21 + $0x12b8] sm:$0xff] }
0x1324   :  { %26230 = vmatpush3.bf16.msra.mxu1 %v30219_v43  ;;  %24577 = vmatprep.mubr.f32.mxu1 %v14692_v22  ;;  %v14698_v43 = vld [vmem:[#allocation21 + $0x1250] sm:$0xff]  ;;  %v14712_v22 = vld [vmem:[#allocation21 + $0x12c0] sm:$0xff] }
0x1325   :  { %26232 = vmatprep.subr.bf16.mxu1 %v30221_v30 }
0x1327   :  { %24578 = vmatmul.mubr.f32.gmra.mrb[172].mxu1 %v14693_v51  ;;  %v14714_v51 = vld [vmem:[#allocation21 + $0x12d0] sm:$0xff] }
0x1328   :  { %26234 = vmatpush3.bf16.msra.mxu1 %v30221_v30  ;;  %24580 = vmatprep.mubr.f32.mxu1 %v14694_v17  ;;  %v14700_v30 = vld [vmem:[#allocation21 + $0x1260] sm:$0xff]  ;;  %v14715_v17 = vld [vmem:[#allocation21 + $0x12d8] sm:$0xff] }
0x1329   :  { %26236 = vmatprep.subr.bf16.mxu1 %v30223_v33 }
0x132b   :  { %24581 = vmatmul.mubr.f32.gmra.mrb[174].mxu1 %v14695_v52  ;;  %v14716_v52 = vld [vmem:[#allocation21 + $0x12e0] sm:$0xff] }
0x132c   :  { %26238 = vmatpush3.bf16.msra.mxu1 %v30223_v33  ;;  %24583 = vmatprep.mubr.f32.mxu1 %v14696_v37  ;;  %v14702_v33 = vld [vmem:[#allocation21 + $0x1270] sm:$0xff]  ;;  %v14717_v37 = vld [vmem:[#allocation21 + $0x12e8] sm:$0xff] }
0x132d   :  { %26240 = vmatprep.subr.bf16.mxu1 %v30225_v27 }
0x132f   :  { %24584 = vmatmul.mubr.f32.gmra.mrb[176].mxu1 %v14697_v32  ;;  %v14718_v32 = vld [vmem:[#allocation21 + $0x12f0] sm:$0xff] }
0x1330   :  { %26242 = vmatpush3.bf16.msra.mxu1 %v30225_v27  ;;  %24586 = vmatprep.mubr.f32.mxu1 %v14698_v43  ;;  %v14704_v27 = vld [vmem:[#allocation21 + $0x1280] sm:$0xff]  ;;  %v14719_v43 = vld [vmem:[#allocation21 + $0x12f8] sm:$0xff] }
0x1331   :  { %26244 = vmatprep.subr.bf16.mxu1 %v30227_v23 }
0x1333   :  { %24587 = vmatmul.mubr.f32.gmra.mrb[178].mxu1 %v14699_v38  ;;  %v14720_v38 = vld [vmem:[#allocation21 + $0x1300] sm:$0xff] }
0x1334   :  { %26246 = vmatpush3.bf16.msra.mxu1 %v30227_v23  ;;  %24589 = vmatprep.mubr.f32.mxu1 %v14700_v30  ;;  %v14706_v23 = vld [vmem:[#allocation21 + $0x1290] sm:$0xff]  ;;  %v14721_v30 = vld [vmem:[#allocation21 + $0x1308] sm:$0xff] }
0x1335   :  { %26248 = vmatprep.subr.bf16.mxu1 %v30229_v8 }
0x1337   :  { %24590 = vmatmul.mubr.f32.gmra.mrb[180].mxu1 %v14701_v29  ;;  %v14722_v29 = vld [vmem:[#allocation21 + $0x1310] sm:$0xff] }
0x1338   :  { %26250 = vmatpush3.bf16.msra.mxu1 %v30229_v8  ;;  %24592 = vmatprep.mubr.f32.mxu1 %v14702_v33  ;;  %v14709_v8 = vld [vmem:[#allocation21 + $0x12a8] sm:$0xff]  ;;  %v14723_v33 = vld [vmem:[#allocation21 + $0x1318] sm:$0xff] }
0x1339   :  { %26252 = vmatprep.subr.bf16.mxu1 %v30231_v19 }
0x133b   :  { %24593 = vmatmul.mubr.f32.gmra.mrb[118].mxu1 %v14703_v1  ;;  %v14724_v1 = vld [vmem:[#allocation21 + $0x1320] sm:$0xff] }
0x133c   :  { %26254 = vmatpush3.bf16.msra.mxu1 %v30231_v19  ;;  %24595 = vmatprep.mubr.f32.mxu1 %v14704_v27  ;;  %v14713_v19 = vld [vmem:[#allocation21 + $0x12c8] sm:$0xff] }
0x133d   :  { %26256 = vmatprep.subr.bf16.mxu1 %v30233_v28  ;;  %v14725_v27 = vld [vmem:[#allocation21 + $0x1328] sm:$0xff] }
0x133f   :  { %24596 = vmatmul.mubr.f32.gmra.mrb[120].mxu1 %v14705_v21  ;;  %v14726_v21 = vld [vmem:[#allocation21 + $0x1330] sm:$0xff] }
0x1340   :  { %24598 = vmatprep.mubr.f32.mxu1 %v14706_v23  ;;  %v14727_v23 = vld [vmem:[#allocation21 + $0x1338] sm:$0xff] }
0x1343   :  { %24599 = vmatmul.mubr.f32.gmra.mrb[122].mxu1 %v14707_v46  ;;  %v14728_v46 = vld [vmem:[#allocation21 + $0x1340] sm:$0xff] }
0x1344   :  { %24601 = vmatprep.mubr.f32.mxu1 %v14708_v60  ;;  %v14729_v60 = vld [vmem:[#allocation21 + $0x1348] sm:$0xff] }
0x1347   :  { %24602 = vmatmul.mubr.f32.gmra.mrb[124].mxu1 %v14709_v8  ;;  %v14730_v8 = vld [vmem:[#allocation21 + $0x1350] sm:$0xff] }
0x1348   :  { %24604 = vmatprep.mubr.f32.mxu1 %v14710_v16  ;;  %v14731_v16 = vld [vmem:[#allocation21 + $0x1358] sm:$0xff] }
0x134b   :  { %24605 = vmatmul.mubr.f32.gmra.mrb[126].mxu1 %v14711_v25  ;;  %v14732_v25 = vld [vmem:[#allocation21 + $0x1360] sm:$0xff] }
0x134c   :  { %24607 = vmatprep.mubr.f32.mxu1 %v14712_v22  ;;  %v14733_v22 = vld [vmem:[#allocation21 + $0x1368] sm:$0xff] }
0x134f   :  { %24608 = vmatmul.mubr.f32.gmra.mrb[128].mxu1 %v14713_v19  ;;  %v14734_v19 = vld [vmem:[#allocation21 + $0x1370] sm:$0xff] }
0x1350   :  { %24610 = vmatprep.mubr.f32.mxu1 %v14714_v51  ;;  %v14735_v51 = vld [vmem:[#allocation21 + $0x1378] sm:$0xff] }
0x1353   :  { %24611 = vmatmul.mubr.f32.gmra.mrb[130].mxu1 %v14715_v17  ;;  %v14736_v17 = vld [vmem:[#allocation21 + $0x1380] sm:$0xff] }
0x1354   :  { %24613 = vmatprep.mubr.f32.mxu1 %v14716_v52  ;;  %v14737_v52 = vld [vmem:[#allocation21 + $0x1388] sm:$0xff] }
0x1357   :  { %24614 = vmatmul.mubr.f32.gmra.mrb[132].mxu1 %v14717_v37  ;;  %v14738_v37 = vld [vmem:[#allocation21 + $0x1390] sm:$0xff] }
0x1358   :  { %24616 = vmatprep.mubr.f32.mxu1 %v14718_v32  ;;  %v14739_v32 = vld [vmem:[#allocation21 + $0x1398] sm:$0xff] }
0x135b   :  { %24617 = vmatmul.mubr.f32.gmra.mrb[134].mxu1 %v14719_v43  ;;  %v14740_v43 = vld [vmem:[#allocation21 + $0x13a0] sm:$0xff] }
0x135c   :  { %24619 = vmatprep.mubr.f32.mxu1 %v14720_v38  ;;  %v14741_v38 = vld [vmem:[#allocation21 + $0x13a8] sm:$0xff] }
0x135f   :  { %24620 = vmatmul.mubr.f32.gmra.mrb[136].mxu1 %v14721_v30  ;;  %v14742_v30 = vld [vmem:[#allocation21 + $0x13b0] sm:$0xff] }
0x1360   :  { %24622 = vmatprep.mubr.f32.mxu1 %v14722_v29  ;;  %v14743_v29 = vld [vmem:[#allocation21 + $0x13b8] sm:$0xff] }
0x1363   :  { %24623 = vmatmul.mubr.f32.gmra.mrb[138].mxu1 %v14723_v33  ;;  %v14744_v33 = vld [vmem:[#allocation21 + $0x13c0] sm:$0xff] }
0x1364   :  { %24625 = vmatprep.mubr.f32.mxu1 %v14724_v1  ;;  %v14745_v1 = vld [vmem:[#allocation21 + $0x13c8] sm:$0xff] }
0x1367   :  { %24626 = vmatmul.mubr.f32.gmra.mrb[140].mxu1 %v14725_v27  ;;  %v14746_v27 = vld [vmem:[#allocation21 + $0x13d0] sm:$0xff] }
0x1368   :  { %24628 = vmatprep.mubr.f32.mxu1 %v14726_v21  ;;  %v14747_v21 = vld [vmem:[#allocation21 + $0x13d8] sm:$0xff] }
0x136b   :  { %24629 = vmatmul.mubr.f32.gmra.mrb[142].mxu1 %v14727_v23  ;;  %v14748_v23 = vld [vmem:[#allocation21 + $0x13e0] sm:$0xff] }
0x136c   :  { %24631 = vmatprep.mubr.f32.mxu1 %v14728_v46  ;;  %v14749_v46 = vld [vmem:[#allocation21 + $0x13e8] sm:$0xff] }
0x136f   :  { %24632 = vmatmul.mubr.f32.gmra.mrb[144].mxu1 %v14729_v60  ;;  %v14750_v60 = vld [vmem:[#allocation21 + $0x13f0] sm:$0xff] }
0x1370   :  { %24634 = vmatprep.mubr.f32.mxu1 %v14730_v8  ;;  %v14751_v8 = vld [vmem:[#allocation21 + $0x13f8] sm:$0xff] }
0x1373   :  { %24635 = vmatmul.mubr.f32.gmra.mrb[146].mxu1 %v14731_v16  ;;  %v15349_v16 = vld [vmem:[#allocation21 + $0x1400] sm:$0xff] }
0x1374   :  { %24637 = vmatprep.mubr.f32.mxu1 %v14732_v25  ;;  %v15350_v25 = vld [vmem:[#allocation21 + $0x1408] sm:$0xff] }
0x1377   :  { %24638 = vmatmul.mubr.f32.gmra.mrb[148].mxu1 %v14733_v22  ;;  %v15351_v22 = vld [vmem:[#allocation21 + $0x1410] sm:$0xff] }
0x1378   :  { %24640 = vmatprep.mubr.f32.mxu1 %v14734_v19  ;;  %v15352_v19 = vld [vmem:[#allocation21 + $0x1418] sm:$0xff] }
0x137b   :  { %24641 = vmatmul.mubr.f32.gmra.mrb[150].mxu1 %v14735_v51  ;;  %v15353_v51 = vld [vmem:[#allocation21 + $0x1420] sm:$0xff] }
0x137c   :  { %24643 = vmatprep.mubr.f32.mxu1 %v14736_v17  ;;  %v15354_v17 = vld [vmem:[#allocation21 + $0x1428] sm:$0xff] }
0x137f   :  { %24644 = vmatmul.mubr.f32.gmra.mrb[152].mxu1 %v14737_v52  ;;  %v15355_v52 = vld [vmem:[#allocation21 + $0x1430] sm:$0xff] }
0x1380   :  { %24646 = vmatprep.mubr.f32.mxu1 %v14738_v37  ;;  %v15356_v37 = vld [vmem:[#allocation21 + $0x1438] sm:$0xff] }
0x1383   :  { %24647 = vmatmul.mubr.f32.gmra.mrb[154].mxu1 %v14739_v32  ;;  %v15358_v32 = vld [vmem:[#allocation21 + $0x1448] sm:$0xff] }
0x1384   :  { %24649 = vmatprep.mubr.f32.mxu1 %v14740_v43  ;;  %v15360_v43 = vld [vmem:[#allocation21 + $0x1458] sm:$0xff] }
0x1387   :  { %24650 = vmatmul.mubr.f32.gmra.mrb[156].mxu1 %v14741_v38  ;;  %v15362_v38 = vld [vmem:[#allocation21 + $0x1468] sm:$0xff] }
0x1388   :  { %24652 = vmatprep.mubr.f32.mxu1 %v14742_v30  ;;  %v15364_v30 = vld [vmem:[#allocation21 + $0x1478] sm:$0xff] }
0x138b   :  { %24653 = vmatmul.mubr.f32.gmra.mrb[158].mxu1 %v14743_v29  ;;  %v15366_v29 = vld [vmem:[#allocation21 + $0x1488] sm:$0xff] }
0x138c   :  { %24655 = vmatprep.mubr.f32.mxu1 %v14744_v33  ;;  %v15368_v33 = vld [vmem:[#allocation21 + $0x1498] sm:$0xff] }
0x138f   :  { %24656 = vmatmul.mubr.f32.gmra.mrb[160].mxu1 %v14745_v1  ;;  %v15369_v1 = vld [vmem:[#allocation21 + $0x14a0] sm:$0xff] }
0x1390   :  { %24658 = vmatprep.mubr.f32.mxu1 %v14746_v27  ;;  %v15371_v27 = vld [vmem:[#allocation21 + $0x14b0] sm:$0xff] }
0x1393   :  { %24659 = vmatmul.mubr.f32.gmra.mrb[162].mxu1 %v14747_v21  ;;  %v15372_v21 = vld [vmem:[#allocation21 + $0x14b8] sm:$0xff] }
0x1394   :  { %24661 = vmatprep.mubr.f32.mxu1 %v14748_v23  ;;  %v15373_v23 = vld [vmem:[#allocation21 + $0x14c0] sm:$0xff] }
0x1397   :  { %24662 = vmatmul.mubr.f32.gmra.mrb[164].mxu1 %v14749_v46  ;;  %v15375_v46 = vld [vmem:[#allocation21 + $0x14d0] sm:$0xff] }
0x1398   :  { %24664 = vmatprep.mubr.f32.mxu1 %v14750_v60  ;;  %v15376_v60 = vld [vmem:[#allocation21 + $0x14d8] sm:$0xff] }
0x139b   :  { %24665 = vmatmul.mubr.f32.gmra.mrb[166].mxu1 %v14751_v8  ;;  %v15377_v8 = vld [vmem:[#allocation21 + $0x14e0] sm:$0xff] }
0x139c   :  { %24725 = vmatprep.mubr.f32.mxu1 %v15349_v16  ;;  %v15378_v16 = vld [vmem:[#allocation21 + $0x14e8] sm:$0xff] }
0x139f   :  { %24726 = vmatmul.mubr.f32.vlgmr.msra.gmra.mrb[168].mxu1 %v15350_v25  ;;  %v15379_v25 = vld [vmem:[#allocation21 + $0x14f0] sm:$0xff] }
0x13a0   :  { %26258 = vmatpush3.bf16.msra.mxu1 %v30233_v28  ;;  %24728 = vmatprep.mubr.f32.mxu1 %v15351_v22  ;;  %v15357_v28 = vld [vmem:[#allocation21 + $0x1440] sm:$0xff]  ;;  %v15380_v22 = vld [vmem:[#allocation21 + $0x14f8] sm:$0xff] }
0x13a1   :  { %26260 = vmatprep.subr.bf16.mxu1 %v30237_v20 }
0x13a3   :  { %24729 = vmatmul.mubr.f32.gmra.mrb[170].mxu1 %v15352_v19  ;;  %v15381_v19 = vld [vmem:[#allocation21 + $0x1500] sm:$0xff] }
0x13a4   :  { %26262 = vmatpush3.bf16.msra.mxu1 %v30237_v20  ;;  %24731 = vmatprep.mubr.f32.mxu1 %v15353_v51  ;;  %v15359_v20 = vld [vmem:[#allocation21 + $0x1450] sm:$0xff]  ;;  %v15382_v51 = vld [vmem:[#allocation21 + $0x1508] sm:$0xff] }
0x13a5   :  { %26264 = vmatprep.subr.bf16.mxu1 %v30241_v5 }
0x13a7   :  { %24732 = vmatmul.mubr.f32.gmra.mrb[172].mxu1 %v15354_v17  ;;  %v15383_v17 = vld [vmem:[#allocation21 + $0x1510] sm:$0xff] }
0x13a8   :  { %26266 = vmatpush3.bf16.msra.mxu1 %v30241_v5  ;;  %24734 = vmatprep.mubr.f32.mxu1 %v15355_v52  ;;  %v15361_v5 = vld [vmem:[#allocation21 + $0x1460] sm:$0xff]  ;;  %v15384_v52 = vld [vmem:[#allocation21 + $0x1518] sm:$0xff] }
0x13a9   :  { %26268 = vmatprep.subr.bf16.mxu1 %v30245_v58 }
0x13ab   :  { %24735 = vmatmul.mubr.f32.gmra.mrb[174].mxu1 %v15356_v37  ;;  %v15385_v37 = vld [vmem:[#allocation21 + $0x1520] sm:$0xff] }
0x13ac   :  { %26270 = vmatpush3.bf16.msra.mxu1 %v30245_v58  ;;  %24737 = vmatprep.mubr.f32.mxu1 %v15357_v28  ;;  %v15363_v58 = vld [vmem:[#allocation21 + $0x1470] sm:$0xff]  ;;  %v15386_v28 = vld [vmem:[#allocation21 + $0x1528] sm:$0xff] }
0x13ad   :  { %26272 = vmatprep.subr.bf16.mxu1 %v30249_v34 }
0x13af   :  { %24738 = vmatmul.mubr.f32.gmra.mrb[176].mxu1 %v15358_v32  ;;  %v15387_v32 = vld [vmem:[#allocation21 + $0x1530] sm:$0xff] }
0x13b0   :  { %26274 = vmatpush3.bf16.msra.mxu1 %v30249_v34  ;;  %24740 = vmatprep.mubr.f32.mxu1 %v15359_v20  ;;  %v15365_v34 = vld [vmem:[#allocation21 + $0x1480] sm:$0xff]  ;;  %v15388_v20 = vld [vmem:[#allocation21 + $0x1538] sm:$0xff] }
0x13b1   :  { %26276 = vmatprep.subr.bf16.mxu1 %v30253_v24 }
0x13b3   :  { %24741 = vmatmul.mubr.f32.gmra.mrb[178].mxu1 %v15360_v43  ;;  %v15389_v43 = vld [vmem:[#allocation21 + $0x1540] sm:$0xff] }
0x13b4   :  { %26278 = vmatpush3.bf16.msra.mxu1 %v30253_v24  ;;  %24743 = vmatprep.mubr.f32.mxu1 %v15361_v5  ;;  %v15367_v24 = vld [vmem:[#allocation21 + $0x1490] sm:$0xff]  ;;  %v15390_v5 = vld [vmem:[#allocation21 + $0x1548] sm:$0xff] }
0x13b5   :  { %26280 = vmatprep.subr.bf16.mxu1 %v30257_v47 }
0x13b7   :  { %24744 = vmatmul.mubr.f32.gmra.mrb[180].mxu1 %v15362_v38  ;;  %v15391_v38 = vld [vmem:[#allocation21 + $0x1550] sm:$0xff] }
0x13b8   :  { %26282 = vmatpush3.bf16.msra.mxu1 %v30257_v47  ;;  %24746 = vmatprep.mubr.f32.mxu1 %v15363_v58  ;;  %v15370_v47 = vld [vmem:[#allocation21 + $0x14a8] sm:$0xff]  ;;  %v15392_v58 = vld [vmem:[#allocation21 + $0x1558] sm:$0xff] }
0x13b9   :  { %26284 = vmatprep.subr.bf16.mxu1 %v30261_v4 }
0x13bb   :  { %24747 = vmatmul.mubr.f32.gmra.mrb[118].mxu1 %v15364_v30  ;;  %v15393_v30 = vld [vmem:[#allocation21 + $0x1560] sm:$0xff] }
0x13bc   :  { %26286 = vmatpush3.bf16.msra.mxu1 %v30261_v4  ;;  %24749 = vmatprep.mubr.f32.mxu1 %v15365_v34  ;;  %v15374_v4 = vld [vmem:[#allocation21 + $0x14c8] sm:$0xff] }
0x13bd   :  { %26288 = vmatprep.subr.bf16.mxu1 %v30265_v40  ;;  %v15394_v34 = vld [vmem:[#allocation21 + $0x1568] sm:$0xff] }
0x13bf   :  { %24750 = vmatmul.mubr.f32.gmra.mrb[120].mxu1 %v15366_v29  ;;  %v15395_v29 = vld [vmem:[#allocation21 + $0x1570] sm:$0xff] }
0x13c0   :  { %24752 = vmatprep.mubr.f32.mxu1 %v15367_v24  ;;  %v15396_v24 = vld [vmem:[#allocation21 + $0x1578] sm:$0xff] }
0x13c3   :  { %24753 = vmatmul.mubr.f32.gmra.mrb[122].mxu1 %v15368_v33  ;;  %v15397_v33 = vld [vmem:[#allocation21 + $0x1580] sm:$0xff] }
0x13c4   :  { %24755 = vmatprep.mubr.f32.mxu1 %v15369_v1  ;;  %v15398_v1 = vld [vmem:[#allocation21 + $0x1588] sm:$0xff] }
0x13c7   :  { %24756 = vmatmul.mubr.f32.gmra.mrb[124].mxu1 %v15370_v47  ;;  %v15399_v47 = vld [vmem:[#allocation21 + $0x1590] sm:$0xff] }
0x13c8   :  { %24758 = vmatprep.mubr.f32.mxu1 %v15371_v27  ;;  %v15400_v27 = vld [vmem:[#allocation21 + $0x1598] sm:$0xff] }
0x13cb   :  { %24759 = vmatmul.mubr.f32.gmra.mrb[126].mxu1 %v15372_v21  ;;  %v15401_v21 = vld [vmem:[#allocation21 + $0x15a0] sm:$0xff] }
0x13cc   :  { %24761 = vmatprep.mubr.f32.mxu1 %v15373_v23  ;;  %v15402_v23 = vld [vmem:[#allocation21 + $0x15a8] sm:$0xff] }
0x13cf   :  { %24762 = vmatmul.mubr.f32.gmra.mrb[128].mxu1 %v15374_v4  ;;  %v15403_v4 = vld [vmem:[#allocation21 + $0x15b0] sm:$0xff] }
0x13d0   :  { %24764 = vmatprep.mubr.f32.mxu1 %v15375_v46  ;;  %v15404_v46 = vld [vmem:[#allocation21 + $0x15b8] sm:$0xff] }
0x13d3   :  { %24765 = vmatmul.mubr.f32.gmra.mrb[130].mxu1 %v15376_v60  ;;  %v15405_v60 = vld [vmem:[#allocation21 + $0x15c0] sm:$0xff] }
0x13d4   :  { %24767 = vmatprep.mubr.f32.mxu1 %v15377_v8  ;;  %v15406_v8 = vld [vmem:[#allocation21 + $0x15c8] sm:$0xff] }
0x13d7   :  { %24768 = vmatmul.mubr.f32.gmra.mrb[132].mxu1 %v15378_v16  ;;  %v15407_v16 = vld [vmem:[#allocation21 + $0x15d0] sm:$0xff] }
0x13d8   :  { %24770 = vmatprep.mubr.f32.mxu1 %v15379_v25  ;;  %v15408_v25 = vld [vmem:[#allocation21 + $0x15d8] sm:$0xff] }
0x13db   :  { %24771 = vmatmul.mubr.f32.gmra.mrb[134].mxu1 %v15380_v22  ;;  %v15409_v22 = vld [vmem:[#allocation21 + $0x15e0] sm:$0xff] }
0x13dc   :  { %24773 = vmatprep.mubr.f32.mxu1 %v15381_v19  ;;  %v15410_v19 = vld [vmem:[#allocation21 + $0x15e8] sm:$0xff] }
0x13df   :  { %24774 = vmatmul.mubr.f32.gmra.mrb[136].mxu1 %v15382_v51  ;;  %v15411_v51 = vld [vmem:[#allocation21 + $0x15f0] sm:$0xff] }
0x13e0   :  { %24776 = vmatprep.mubr.f32.mxu1 %v15383_v17  ;;  %v15412_v17 = vld [vmem:[#allocation21 + $0x15f8] sm:$0xff] }
0x13e3   :  { %24777 = vmatmul.mubr.f32.gmra.mrb[138].mxu1 %v15384_v52  ;;  %v16010_v52 = vld [vmem:[#allocation21 + $0x1600] sm:$0xff] }
0x13e4   :  { %24779 = vmatprep.mubr.f32.mxu1 %v15385_v37  ;;  %v16011_v37 = vld [vmem:[#allocation21 + $0x1608] sm:$0xff] }
0x13e7   :  { %24780 = vmatmul.mubr.f32.gmra.mrb[140].mxu1 %v15386_v28  ;;  %v16012_v28 = vld [vmem:[#allocation21 + $0x1610] sm:$0xff] }
0x13e8   :  { %24782 = vmatprep.mubr.f32.mxu1 %v15387_v32  ;;  %v16013_v32 = vld [vmem:[#allocation21 + $0x1618] sm:$0xff] }
0x13eb   :  { %24783 = vmatmul.mubr.f32.gmra.mrb[142].mxu1 %v15388_v20  ;;  %v16014_v20 = vld [vmem:[#allocation21 + $0x1620] sm:$0xff] }
0x13ec   :  { %24785 = vmatprep.mubr.f32.mxu1 %v15389_v43  ;;  %v16015_v43 = vld [vmem:[#allocation21 + $0x1628] sm:$0xff] }
0x13ef   :  { %24786 = vmatmul.mubr.f32.gmra.mrb[144].mxu1 %v15390_v5  ;;  %v16016_v5 = vld [vmem:[#allocation21 + $0x1630] sm:$0xff] }
0x13f0   :  { %24788 = vmatprep.mubr.f32.mxu1 %v15391_v38  ;;  %v16017_v38 = vld [vmem:[#allocation21 + $0x1638] sm:$0xff] }
0x13f3   :  { %24789 = vmatmul.mubr.f32.gmra.mrb[146].mxu1 %v15392_v58  ;;  %v16019_v58 = vld [vmem:[#allocation21 + $0x1648] sm:$0xff] }
0x13f4   :  { %24791 = vmatprep.mubr.f32.mxu1 %v15393_v30  ;;  %v16021_v30 = vld [vmem:[#allocation21 + $0x1658] sm:$0xff] }
0x13f7   :  { %24792 = vmatmul.mubr.f32.gmra.mrb[148].mxu1 %v15394_v34  ;;  %v16023_v34 = vld [vmem:[#allocation21 + $0x1668] sm:$0xff] }
0x13f8   :  { %24794 = vmatprep.mubr.f32.mxu1 %v15395_v29  ;;  %v16025_v29 = vld [vmem:[#allocation21 + $0x1678] sm:$0xff] }
0x13fb   :  { %24795 = vmatmul.mubr.f32.gmra.mrb[150].mxu1 %v15396_v24  ;;  %v16027_v24 = vld [vmem:[#allocation21 + $0x1688] sm:$0xff] }
0x13fc   :  { %24797 = vmatprep.mubr.f32.mxu1 %v15397_v33  ;;  %v16029_v33 = vld [vmem:[#allocation21 + $0x1698] sm:$0xff] }
0x13ff   :  { %24798 = vmatmul.mubr.f32.gmra.mrb[152].mxu1 %v15398_v1  ;;  %v16030_v1 = vld [vmem:[#allocation21 + $0x16a0] sm:$0xff] }
0x1400   :  { %24800 = vmatprep.mubr.f32.mxu1 %v15399_v47  ;;  %v16032_v47 = vld [vmem:[#allocation21 + $0x16b0] sm:$0xff] }
0x1403   :  { %24801 = vmatmul.mubr.f32.gmra.mrb[154].mxu1 %v15400_v27  ;;  %v16033_v27 = vld [vmem:[#allocation21 + $0x16b8] sm:$0xff] }
0x1404   :  { %24803 = vmatprep.mubr.f32.mxu1 %v15401_v21  ;;  %v16034_v21 = vld [vmem:[#allocation21 + $0x16c0] sm:$0xff] }
0x1407   :  { %24804 = vmatmul.mubr.f32.gmra.mrb[156].mxu1 %v15402_v23  ;;  %v16036_v23 = vld [vmem:[#allocation21 + $0x16d0] sm:$0xff] }
0x1408   :  { %24806 = vmatprep.mubr.f32.mxu1 %v15403_v4  ;;  %v16037_v4 = vld [vmem:[#allocation21 + $0x16d8] sm:$0xff] }
0x140b   :  { %24807 = vmatmul.mubr.f32.gmra.mrb[158].mxu1 %v15404_v46  ;;  %v16038_v46 = vld [vmem:[#allocation21 + $0x16e0] sm:$0xff] }
0x140c   :  { %24809 = vmatprep.mubr.f32.mxu1 %v15405_v60  ;;  %v16039_v60 = vld [vmem:[#allocation21 + $0x16e8] sm:$0xff] }
0x140f   :  { %24810 = vmatmul.mubr.f32.gmra.mrb[160].mxu1 %v15406_v8  ;;  %v16040_v8 = vld [vmem:[#allocation21 + $0x16f0] sm:$0xff] }
0x1410   :  { %24812 = vmatprep.mubr.f32.mxu1 %v15407_v16  ;;  %v16041_v16 = vld [vmem:[#allocation21 + $0x16f8] sm:$0xff] }
0x1413   :  { %24813 = vmatmul.mubr.f32.gmra.mrb[162].mxu1 %v15408_v25  ;;  %v16042_v25 = vld [vmem:[#allocation21 + $0x1700] sm:$0xff] }
0x1414   :  { %24815 = vmatprep.mubr.f32.mxu1 %v15409_v22  ;;  %v16043_v22 = vld [vmem:[#allocation21 + $0x1708] sm:$0xff] }
0x1417   :  { %24816 = vmatmul.mubr.f32.gmra.mrb[164].mxu1 %v15410_v19  ;;  %v16044_v19 = vld [vmem:[#allocation21 + $0x1710] sm:$0xff] }
0x1418   :  { %24818 = vmatprep.mubr.f32.mxu1 %v15411_v51  ;;  %v16045_v51 = vld [vmem:[#allocation21 + $0x1718] sm:$0xff] }
0x141b   :  { %24819 = vmatmul.mubr.f32.gmra.mrb[166].mxu1 %v15412_v17  ;;  %v16046_v17 = vld [vmem:[#allocation21 + $0x1720] sm:$0xff] }
0x141c   :  { %24879 = vmatprep.mubr.f32.mxu1 %v16010_v52  ;;  %v16047_v52 = vld [vmem:[#allocation21 + $0x1728] sm:$0xff] }
0x141f   :  { %24880 = vmatmul.mubr.f32.vlgmr.msra.gmra.mrb[168].mxu1 %v16011_v37  ;;  %v16048_v37 = vld [vmem:[#allocation21 + $0x1730] sm:$0xff] }
0x1420   :  { %26290 = vmatpush3.bf16.msra.mxu1 %v30265_v40  ;;  %24882 = vmatprep.mubr.f32.mxu1 %v16012_v28  ;;  %v16018_v40 = vld [vmem:[#allocation21 + $0x1640] sm:$0xff]  ;;  %v16049_v28 = vld [vmem:[#allocation21 + $0x1738] sm:$0xff] }
0x1421   :  { %26292 = vmatprep.subr.bf16.mxu1 %v30267_v62 }
0x1423   :  { %24883 = vmatmul.mubr.f32.gmra.mrb[170].mxu1 %v16013_v32  ;;  %v16050_v32 = vld [vmem:[#allocation21 + $0x1740] sm:$0xff] }
0x1424   :  { %26294 = vmatpush3.bf16.msra.mxu1 %v30267_v62  ;;  %24885 = vmatprep.mubr.f32.mxu1 %v16014_v20  ;;  %v16020_v62 = vld [vmem:[#allocation21 + $0x1650] sm:$0xff]  ;;  %v16051_v20 = vld [vmem:[#allocation21 + $0x1748] sm:$0xff] }
0x1425   :  { %26296 = vmatprep.subr.bf16.mxu1 %v30269_v7 }
0x1427   :  { %24886 = vmatmul.mubr.f32.gmra.mrb[172].mxu1 %v16015_v43  ;;  %v16052_v43 = vld [vmem:[#allocation21 + $0x1750] sm:$0xff] }
0x1428   :  { %26298 = vmatpush3.bf16.msra.mxu1 %v30269_v7  ;;  %24888 = vmatprep.mubr.f32.mxu1 %v16016_v5  ;;  %v16022_v7 = vld [vmem:[#allocation21 + $0x1660] sm:$0xff]  ;;  %v16053_v5 = vld [vmem:[#allocation21 + $0x1758] sm:$0xff] }
0x1429   :  { %26300 = vmatprep.subr.bf16.mxu1 %v30271_v53 }
0x142b   :  { %24889 = vmatmul.mubr.f32.gmra.mrb[174].mxu1 %v16017_v38  ;;  %v16054_v38 = vld [vmem:[#allocation21 + $0x1760] sm:$0xff] }
0x142c   :  { %26302 = vmatpush3.bf16.msra.mxu1 %v30271_v53  ;;  %24891 = vmatprep.mubr.f32.mxu1 %v16018_v40  ;;  %v16024_v53 = vld [vmem:[#allocation21 + $0x1670] sm:$0xff]  ;;  %v16055_v40 = vld [vmem:[#allocation21 + $0x1768] sm:$0xff] }
0x142d   :  { %26304 = vmatprep.subr.bf16.mxu1 %v30273_v42 }
0x142f   :  { %24892 = vmatmul.mubr.f32.gmra.mrb[176].mxu1 %v16019_v58  ;;  %v16056_v58 = vld [vmem:[#allocation21 + $0x1770] sm:$0xff] }
0x1430   :  { %26306 = vmatpush3.bf16.msra.mxu1 %v30273_v42  ;;  %24894 = vmatprep.mubr.f32.mxu1 %v16020_v62  ;;  %v16026_v42 = vld [vmem:[#allocation21 + $0x1680] sm:$0xff]  ;;  %v16057_v62 = vld [vmem:[#allocation21 + $0x1778] sm:$0xff] }
0x1431   :  { %26308 = vmatprep.subr.bf16.mxu1 %v30275_v59 }
0x1433   :  { %24895 = vmatmul.mubr.f32.gmra.mrb[178].mxu1 %v16021_v30  ;;  %v16058_v30 = vld [vmem:[#allocation21 + $0x1780] sm:$0xff] }
0x1434   :  { %26310 = vmatpush3.bf16.msra.mxu1 %v30275_v59  ;;  %24897 = vmatprep.mubr.f32.mxu1 %v16022_v7  ;;  %v16028_v59 = vld [vmem:[#allocation21 + $0x1690] sm:$0xff]  ;;  %v16059_v7 = vld [vmem:[#allocation21 + $0x1788] sm:$0xff] }
0x1435   :  { %26312 = vmatprep.subr.bf16.mxu1 %v30277_v35 }
0x1437   :  { %24898 = vmatmul.mubr.f32.gmra.mrb[180].mxu1 %v16023_v34  ;;  %v16060_v34 = vld [vmem:[#allocation21 + $0x1790] sm:$0xff] }
0x1438   :  { %26314 = vmatpush3.bf16.msra.mxu1 %v30277_v35  ;;  %24900 = vmatprep.mubr.f32.mxu1 %v16024_v53  ;;  %v16031_v35 = vld [vmem:[#allocation21 + $0x16a8] sm:$0xff]  ;;  %v16061_v53 = vld [vmem:[#allocation21 + $0x1798] sm:$0xff] }
0x1439   :  { %26316 = vmatprep.subr.bf16.mxu1 %v30279_v15 }
0x143b   :  { %24901 = vmatmul.mubr.f32.gmra.mrb[118].mxu1 %v16025_v29  ;;  %v16062_v29 = vld [vmem:[#allocation21 + $0x17a0] sm:$0xff] }
0x143c   :  { %26318 = vmatpush3.bf16.msra.mxu1 %v30279_v15  ;;  %24903 = vmatprep.mubr.f32.mxu1 %v16026_v42  ;;  %v16035_v15 = vld [vmem:[#allocation21 + $0x16c8] sm:$0xff] }
0x143d   :  { %26320 = vmatprep.subr.bf16.mxu1 %v30281_v13  ;;  %v16063_v42 = vld [vmem:[#allocation21 + $0x17a8] sm:$0xff] }
0x143f   :  { %24904 = vmatmul.mubr.f32.gmra.mrb[120].mxu1 %v16027_v24  ;;  %v16064_v24 = vld [vmem:[#allocation21 + $0x17b0] sm:$0xff] }
0x1440   :  { %24906 = vmatprep.mubr.f32.mxu1 %v16028_v59  ;;  %v16065_v59 = vld [vmem:[#allocation21 + $0x17b8] sm:$0xff] }
0x1443   :  { %24907 = vmatmul.mubr.f32.gmra.mrb[122].mxu1 %v16029_v33  ;;  %v16066_v33 = vld [vmem:[#allocation21 + $0x17c0] sm:$0xff] }
0x1444   :  { %24909 = vmatprep.mubr.f32.mxu1 %v16030_v1  ;;  %v16067_v1 = vld [vmem:[#allocation21 + $0x17c8] sm:$0xff] }
0x1447   :  { %24910 = vmatmul.mubr.f32.gmra.mrb[124].mxu1 %v16031_v35  ;;  %v16068_v35 = vld [vmem:[#allocation21 + $0x17d0] sm:$0xff] }
0x1448   :  { %24912 = vmatprep.mubr.f32.mxu1 %v16032_v47  ;;  %v16069_v47 = vld [vmem:[#allocation21 + $0x17d8] sm:$0xff] }
0x144b   :  { %24913 = vmatmul.mubr.f32.gmra.mrb[126].mxu1 %v16033_v27  ;;  %v16070_v27 = vld [vmem:[#allocation21 + $0x17e0] sm:$0xff] }
0x144c   :  { %24915 = vmatprep.mubr.f32.mxu1 %v16034_v21  ;;  %v16071_v21 = vld [vmem:[#allocation21 + $0x17e8] sm:$0xff] }
0x144f   :  { %24916 = vmatmul.mubr.f32.gmra.mrb[128].mxu1 %v16035_v15  ;;  %v16072_v15 = vld [vmem:[#allocation21 + $0x17f0] sm:$0xff] }
0x1450   :  { %24918 = vmatprep.mubr.f32.mxu1 %v16036_v23  ;;  %v16073_v23 = vld [vmem:[#allocation21 + $0x17f8] sm:$0xff] }
0x1453   :  { %24919 = vmatmul.mubr.f32.gmra.mrb[130].mxu1 %v16037_v4  ;;  %v16671_v4 = vld [vmem:[#allocation21 + $0x1800] sm:$0xff] }
0x1454   :  { %24921 = vmatprep.mubr.f32.mxu1 %v16038_v46  ;;  %v16672_v46 = vld [vmem:[#allocation21 + $0x1808] sm:$0xff] }
0x1457   :  { %24922 = vmatmul.mubr.f32.gmra.mrb[132].mxu1 %v16039_v60  ;;  %v16673_v60 = vld [vmem:[#allocation21 + $0x1810] sm:$0xff] }
0x1458   :  { %24924 = vmatprep.mubr.f32.mxu1 %v16040_v8  ;;  %v16674_v8 = vld [vmem:[#allocation21 + $0x1818] sm:$0xff] }
0x145b   :  { %24925 = vmatmul.mubr.f32.gmra.mrb[134].mxu1 %v16041_v16  ;;  %v16675_v16 = vld [vmem:[#allocation21 + $0x1820] sm:$0xff] }
0x145c   :  { %24927 = vmatprep.mubr.f32.mxu1 %v16042_v25  ;;  %v16676_v25 = vld [vmem:[#allocation21 + $0x1828] sm:$0xff] }
0x145f   :  { %24928 = vmatmul.mubr.f32.gmra.mrb[136].mxu1 %v16043_v22  ;;  %v16677_v22 = vld [vmem:[#allocation21 + $0x1830] sm:$0xff] }
0x1460   :  { %24930 = vmatprep.mubr.f32.mxu1 %v16044_v19  ;;  %v16678_v19 = vld [vmem:[#allocation21 + $0x1838] sm:$0xff] }
0x1463   :  { %24931 = vmatmul.mubr.f32.gmra.mrb[138].mxu1 %v16045_v51  ;;  %v16680_v51 = vld [vmem:[#allocation21 + $0x1848] sm:$0xff] }
0x1464   :  { %24933 = vmatprep.mubr.f32.mxu1 %v16046_v17  ;;  %v16682_v17 = vld [vmem:[#allocation21 + $0x1858] sm:$0xff] }
0x1467   :  { %24934 = vmatmul.mubr.f32.gmra.mrb[140].mxu1 %v16047_v52  ;;  %v16684_v52 = vld [vmem:[#allocation21 + $0x1868] sm:$0xff] }
0x1468   :  { %24936 = vmatprep.mubr.f32.mxu1 %v16048_v37  ;;  %v16686_v37 = vld [vmem:[#allocation21 + $0x1878] sm:$0xff] }
0x146b   :  { %24937 = vmatmul.mubr.f32.gmra.mrb[142].mxu1 %v16049_v28  ;;  %v16688_v28 = vld [vmem:[#allocation21 + $0x1888] sm:$0xff] }
0x146c   :  { %24939 = vmatprep.mubr.f32.mxu1 %v16050_v32  ;;  %v16690_v32 = vld [vmem:[#allocation21 + $0x1898] sm:$0xff] }
0x146f   :  { %24940 = vmatmul.mubr.f32.gmra.mrb[144].mxu1 %v16051_v20  ;;  %v16691_v20 = vld [vmem:[#allocation21 + $0x18a0] sm:$0xff] }
0x1470   :  { %24942 = vmatprep.mubr.f32.mxu1 %v16052_v43  ;;  %v16693_v43 = vld [vmem:[#allocation21 + $0x18b0] sm:$0xff] }
0x1473   :  { %24943 = vmatmul.mubr.f32.gmra.mrb[146].mxu1 %v16053_v5  ;;  %v16694_v5 = vld [vmem:[#allocation21 + $0x18b8] sm:$0xff] }
0x1474   :  { %24945 = vmatprep.mubr.f32.mxu1 %v16054_v38  ;;  %v16695_v38 = vld [vmem:[#allocation21 + $0x18c0] sm:$0xff] }
0x1477   :  { %24946 = vmatmul.mubr.f32.gmra.mrb[148].mxu1 %v16055_v40  ;;  %v16697_v40 = vld [vmem:[#allocation21 + $0x18d0] sm:$0xff] }
0x1478   :  { %24948 = vmatprep.mubr.f32.mxu1 %v16056_v58  ;;  %v16698_v58 = vld [vmem:[#allocation21 + $0x18d8] sm:$0xff] }
0x147b   :  { %24949 = vmatmul.mubr.f32.gmra.mrb[150].mxu1 %v16057_v62  ;;  %v16699_v62 = vld [vmem:[#allocation21 + $0x18e0] sm:$0xff] }
0x147c   :  { %24951 = vmatprep.mubr.f32.mxu1 %v16058_v30  ;;  %v16700_v30 = vld [vmem:[#allocation21 + $0x18e8] sm:$0xff] }
0x147f   :  { %24952 = vmatmul.mubr.f32.gmra.mrb[152].mxu1 %v16059_v7  ;;  %v16701_v7 = vld [vmem:[#allocation21 + $0x18f0] sm:$0xff] }
0x1480   :  { %24954 = vmatprep.mubr.f32.mxu1 %v16060_v34  ;;  %v16702_v34 = vld [vmem:[#allocation21 + $0x18f8] sm:$0xff] }
0x1483   :  { %24955 = vmatmul.mubr.f32.gmra.mrb[154].mxu1 %v16061_v53  ;;  %v16703_v53 = vld [vmem:[#allocation21 + $0x1900] sm:$0xff] }
0x1484   :  { %24957 = vmatprep.mubr.f32.mxu1 %v16062_v29  ;;  %v16704_v29 = vld [vmem:[#allocation21 + $0x1908] sm:$0xff] }
0x1487   :  { %24958 = vmatmul.mubr.f32.gmra.mrb[156].mxu1 %v16063_v42  ;;  %v16705_v42 = vld [vmem:[#allocation21 + $0x1910] sm:$0xff] }
0x1488   :  { %24960 = vmatprep.mubr.f32.mxu1 %v16064_v24  ;;  %v16706_v24 = vld [vmem:[#allocation21 + $0x1918] sm:$0xff] }
0x148b   :  { %24961 = vmatmul.mubr.f32.gmra.mrb[158].mxu1 %v16065_v59  ;;  %v16707_v59 = vld [vmem:[#allocation21 + $0x1920] sm:$0xff] }
0x148c   :  { %24963 = vmatprep.mubr.f32.mxu1 %v16066_v33  ;;  %v16708_v33 = vld [vmem:[#allocation21 + $0x1928] sm:$0xff] }
0x148f   :  { %24964 = vmatmul.mubr.f32.gmra.mrb[160].mxu1 %v16067_v1  ;;  %v16709_v1 = vld [vmem:[#allocation21 + $0x1930] sm:$0xff] }
0x1490   :  { %24966 = vmatprep.mubr.f32.mxu1 %v16068_v35  ;;  %v16710_v35 = vld [vmem:[#allocation21 + $0x1938] sm:$0xff] }
0x1493   :  { %24967 = vmatmul.mubr.f32.gmra.mrb[162].mxu1 %v16069_v47  ;;  %v16711_v47 = vld [vmem:[#allocation21 + $0x1940] sm:$0xff] }
0x1494   :  { %24969 = vmatprep.mubr.f32.mxu1 %v16070_v27  ;;  %v16712_v27 = vld [vmem:[#allocation21 + $0x1948] sm:$0xff] }
0x1497   :  { %24970 = vmatmul.mubr.f32.gmra.mrb[164].mxu1 %v16071_v21  ;;  %v16713_v21 = vld [vmem:[#allocation21 + $0x1950] sm:$0xff] }
0x1498   :  { %24972 = vmatprep.mubr.f32.mxu1 %v16072_v15  ;;  %v16714_v15 = vld [vmem:[#allocation21 + $0x1958] sm:$0xff] }
0x149b   :  { %24973 = vmatmul.mubr.f32.gmra.mrb[166].mxu1 %v16073_v23  ;;  %v16715_v23 = vld [vmem:[#allocation21 + $0x1960] sm:$0xff] }
0x149c   :  { %25033 = vmatprep.mubr.f32.mxu1 %v16671_v4  ;;  %v16716_v4 = vld [vmem:[#allocation21 + $0x1968] sm:$0xff] }
0x149f   :  { %25034 = vmatmul.mubr.f32.vlgmr.msra.gmra.mrb[168].mxu1 %v16672_v46  ;;  %v16717_v46 = vld [vmem:[#allocation21 + $0x1970] sm:$0xff] }
0x14a0   :  { %26322 = vmatpush3.bf16.msra.mxu1 %v30281_v13  ;;  %25036 = vmatprep.mubr.f32.mxu1 %v16673_v60  ;;  %v16679_v13 = vld [vmem:[#allocation21 + $0x1840] sm:$0xff]  ;;  %v16718_v60 = vld [vmem:[#allocation21 + $0x1978] sm:$0xff] }
0x14a1   :  { %26324 = vmatprep.subr.bf16.mxu1 %v30283_v39 }
0x14a3   :  { %25037 = vmatmul.mubr.f32.gmra.mrb[170].mxu1 %v16674_v8  ;;  %v16719_v8 = vld [vmem:[#allocation21 + $0x1980] sm:$0xff] }
0x14a4   :  { %26326 = vmatpush3.bf16.msra.mxu1 %v30283_v39  ;;  %25039 = vmatprep.mubr.f32.mxu1 %v16675_v16  ;;  %v16681_v39 = vld [vmem:[#allocation21 + $0x1850] sm:$0xff]  ;;  %v16720_v16 = vld [vmem:[#allocation21 + $0x1988] sm:$0xff] }
0x14a5   :  { %26328 = vmatprep.subr.bf16.mxu1 %v30285_v12 }
0x14a7   :  { %25040 = vmatmul.mubr.f32.gmra.mrb[172].mxu1 %v16676_v25  ;;  %v16721_v25 = vld [vmem:[#allocation21 + $0x1990] sm:$0xff] }
0x14a8   :  { %26330 = vmatpush3.bf16.msra.mxu1 %v30285_v12  ;;  %25042 = vmatprep.mubr.f32.mxu1 %v16677_v22  ;;  %v16683_v12 = vld [vmem:[#allocation21 + $0x1860] sm:$0xff]  ;;  %v16722_v22 = vld [vmem:[#allocation21 + $0x1998] sm:$0xff] }
0x14a9   :  { %26332 = vmatprep.subr.bf16.mxu1 %v30287_v56 }
0x14ab   :  { %25043 = vmatmul.mubr.f32.gmra.mrb[174].mxu1 %v16678_v19  ;;  %v16723_v19 = vld [vmem:[#allocation21 + $0x19a0] sm:$0xff] }
0x14ac   :  { %26334 = vmatpush3.bf16.msra.mxu1 %v30287_v56  ;;  %25045 = vmatprep.mubr.f32.mxu1 %v16679_v13  ;;  %v16685_v56 = vld [vmem:[#allocation21 + $0x1870] sm:$0xff]  ;;  %v16724_v13 = vld [vmem:[#allocation21 + $0x19a8] sm:$0xff] }
0x14ad   :  { %26336 = vmatprep.subr.bf16.mxu1 %v30289_v54 }
0x14af   :  { %25046 = vmatmul.mubr.f32.gmra.mrb[176].mxu1 %v16680_v51  ;;  %v16725_v51 = vld [vmem:[#allocation21 + $0x19b0] sm:$0xff] }
0x14b0   :  { %26338 = vmatpush3.bf16.msra.mxu1 %v30289_v54  ;;  %25048 = vmatprep.mubr.f32.mxu1 %v16681_v39  ;;  %v16687_v54 = vld [vmem:[#allocation21 + $0x1880] sm:$0xff]  ;;  %v16726_v39 = vld [vmem:[#allocation21 + $0x19b8] sm:$0xff] }
0x14b1   :  { %26340 = vmatprep.subr.bf16.mxu1 %v30291_v61 }
0x14b3   :  { %25049 = vmatmul.mubr.f32.gmra.mrb[178].mxu1 %v16682_v17  ;;  %v16727_v17 = vld [vmem:[#allocation21 + $0x19c0] sm:$0xff] }
0x14b4   :  { %26342 = vmatpush3.bf16.msra.mxu1 %v30291_v61  ;;  %25051 = vmatprep.mubr.f32.mxu1 %v16683_v12  ;;  %v16689_v61 = vld [vmem:[#allocation21 + $0x1890] sm:$0xff]  ;;  %v16728_v12 = vld [vmem:[#allocation21 + $0x19c8] sm:$0xff] }
0x14b5   :  { %26344 = vmatprep.subr.bf16.mxu1 %v30293_v45 }
0x14b7   :  { %25052 = vmatmul.mubr.f32.gmra.mrb[180].mxu1 %v16684_v52  ;;  %v16729_v52 = vld [vmem:[#allocation21 + $0x19d0] sm:$0xff] }
0x14b8   :  { %26346 = vmatpush3.bf16.msra.mxu1 %v30293_v45  ;;  %25054 = vmatprep.mubr.f32.mxu1 %v16685_v56  ;;  %v16692_v45 = vld [vmem:[#allocation21 + $0x18a8] sm:$0xff]  ;;  %v16730_v56 = vld [vmem:[#allocation21 + $0x19d8] sm:$0xff] }
0x14b9   :  { %26348 = vmatprep.subr.bf16.mxu1 %v30295_v9 }
0x14bb   :  { %25055 = vmatmul.mubr.f32.gmra.mrb[118].mxu1 %v16686_v37  ;;  %v16731_v37 = vld [vmem:[#allocation21 + $0x19e0] sm:$0xff] }
0x14bc   :  { %26350 = vmatpush3.bf16.msra.mxu1 %v30295_v9  ;;  %25057 = vmatprep.mubr.f32.mxu1 %v16687_v54  ;;  %v16696_v9 = vld [vmem:[#allocation21 + $0x18c8] sm:$0xff] }
0x14bd   :  { %26352 = vmatprep.subr.bf16.mxu1 %v30297_v57  ;;  %v16732_v54 = vld [vmem:[#allocation21 + $0x19e8] sm:$0xff] }
0x14bf   :  { %25058 = vmatmul.mubr.f32.gmra.mrb[120].mxu1 %v16688_v28  ;;  %v16733_v28 = vld [vmem:[#allocation21 + $0x19f0] sm:$0xff] }
0x14c0   :  { %25060 = vmatprep.mubr.f32.mxu1 %v16689_v61  ;;  %v16734_v61 = vld [vmem:[#allocation21 + $0x19f8] sm:$0xff] }
0x14c3   :  { %25061 = vmatmul.mubr.f32.gmra.mrb[122].mxu1 %v16690_v32  ;;  %v17332_v32 = vld [vmem:[#allocation21 + $0x1a00] sm:$0xff] }
0x14c4   :  { %25063 = vmatprep.mubr.f32.mxu1 %v16691_v20  ;;  %v17333_v20 = vld [vmem:[#allocation21 + $0x1a08] sm:$0xff] }
0x14c7   :  { %25064 = vmatmul.mubr.f32.gmra.mrb[124].mxu1 %v16692_v45  ;;  %v17334_v45 = vld [vmem:[#allocation21 + $0x1a10] sm:$0xff] }
0x14c8   :  { %25066 = vmatprep.mubr.f32.mxu1 %v16693_v43  ;;  %v17335_v43 = vld [vmem:[#allocation21 + $0x1a18] sm:$0xff] }
0x14cb   :  { %25067 = vmatmul.mubr.f32.gmra.mrb[126].mxu1 %v16694_v5  ;;  %v17336_v5 = vld [vmem:[#allocation21 + $0x1a20] sm:$0xff] }
0x14cc   :  { %25069 = vmatprep.mubr.f32.mxu1 %v16695_v38  ;;  %v17337_v38 = vld [vmem:[#allocation21 + $0x1a28] sm:$0xff] }
0x14cf   :  { %25070 = vmatmul.mubr.f32.gmra.mrb[128].mxu1 %v16696_v9  ;;  %v17338_v9 = vld [vmem:[#allocation21 + $0x1a30] sm:$0xff] }
0x14d0   :  { %25072 = vmatprep.mubr.f32.mxu1 %v16697_v40  ;;  %v17339_v40 = vld [vmem:[#allocation21 + $0x1a38] sm:$0xff] }
0x14d3   :  { %25073 = vmatmul.mubr.f32.gmra.mrb[130].mxu1 %v16698_v58  ;;  %v17341_v58 = vld [vmem:[#allocation21 + $0x1a48] sm:$0xff] }
0x14d4   :  { %25075 = vmatprep.mubr.f32.mxu1 %v16699_v62  ;;  %v17343_v62 = vld [vmem:[#allocation21 + $0x1a58] sm:$0xff] }
0x14d7   :  { %25076 = vmatmul.mubr.f32.gmra.mrb[132].mxu1 %v16700_v30  ;;  %v17345_v30 = vld [vmem:[#allocation21 + $0x1a68] sm:$0xff] }
0x14d8   :  { %25078 = vmatprep.mubr.f32.mxu1 %v16701_v7  ;;  %v17347_v7 = vld [vmem:[#allocation21 + $0x1a78] sm:$0xff] }
0x14db   :  { %25079 = vmatmul.mubr.f32.gmra.mrb[134].mxu1 %v16702_v34  ;;  %v17349_v34 = vld [vmem:[#allocation21 + $0x1a88] sm:$0xff] }
0x14dc   :  { %25081 = vmatprep.mubr.f32.mxu1 %v16703_v53  ;;  %v17351_v53 = vld [vmem:[#allocation21 + $0x1a98] sm:$0xff] }
0x14df   :  { %25082 = vmatmul.mubr.f32.gmra.mrb[136].mxu1 %v16704_v29  ;;  %v17352_v29 = vld [vmem:[#allocation21 + $0x1aa0] sm:$0xff] }
0x14e0   :  { %25084 = vmatprep.mubr.f32.mxu1 %v16705_v42  ;;  %v17354_v42 = vld [vmem:[#allocation21 + $0x1ab0] sm:$0xff] }
0x14e3   :  { %25085 = vmatmul.mubr.f32.gmra.mrb[138].mxu1 %v16706_v24  ;;  %v17355_v24 = vld [vmem:[#allocation21 + $0x1ab8] sm:$0xff] }
0x14e4   :  { %25087 = vmatprep.mubr.f32.mxu1 %v16707_v59  ;;  %v17356_v59 = vld [vmem:[#allocation21 + $0x1ac0] sm:$0xff] }
0x14e7   :  { %25088 = vmatmul.mubr.f32.gmra.mrb[140].mxu1 %v16708_v33  ;;  %v17358_v33 = vld [vmem:[#allocation21 + $0x1ad0] sm:$0xff] }
0x14e8   :  { %25090 = vmatprep.mubr.f32.mxu1 %v16709_v1  ;;  %v17359_v1 = vld [vmem:[#allocation21 + $0x1ad8] sm:$0xff] }
0x14eb   :  { %25091 = vmatmul.mubr.f32.gmra.mrb[142].mxu1 %v16710_v35  ;;  %v17360_v35 = vld [vmem:[#allocation21 + $0x1ae0] sm:$0xff] }
0x14ec   :  { %25093 = vmatprep.mubr.f32.mxu1 %v16711_v47  ;;  %v17361_v47 = vld [vmem:[#allocation21 + $0x1ae8] sm:$0xff] }
0x14ef   :  { %25094 = vmatmul.mubr.f32.gmra.mrb[144].mxu1 %v16712_v27  ;;  %v17362_v27 = vld [vmem:[#allocation21 + $0x1af0] sm:$0xff] }
0x14f0   :  { %25096 = vmatprep.mubr.f32.mxu1 %v16713_v21  ;;  %v17363_v21 = vld [vmem:[#allocation21 + $0x1af8] sm:$0xff] }
0x14f3   :  { %25097 = vmatmul.mubr.f32.gmra.mrb[146].mxu1 %v16714_v15  ;;  %v17364_v15 = vld [vmem:[#allocation21 + $0x1b00] sm:$0xff] }
0x14f4   :  { %25099 = vmatprep.mubr.f32.mxu1 %v16715_v23  ;;  %v17365_v23 = vld [vmem:[#allocation21 + $0x1b08] sm:$0xff] }
0x14f7   :  { %25100 = vmatmul.mubr.f32.gmra.mrb[148].mxu1 %v16716_v4  ;;  %v17366_v4 = vld [vmem:[#allocation21 + $0x1b10] sm:$0xff] }
0x14f8   :  { %25102 = vmatprep.mubr.f32.mxu1 %v16717_v46  ;;  %v17367_v46 = vld [vmem:[#allocation21 + $0x1b18] sm:$0xff] }
0x14fb   :  { %25103 = vmatmul.mubr.f32.gmra.mrb[150].mxu1 %v16718_v60  ;;  %v17368_v60 = vld [vmem:[#allocation21 + $0x1b20] sm:$0xff] }
0x14fc   :  { %25105 = vmatprep.mubr.f32.mxu1 %v16719_v8  ;;  %v17369_v8 = vld [vmem:[#allocation21 + $0x1b28] sm:$0xff] }
0x14ff   :  { %25106 = vmatmul.mubr.f32.gmra.mrb[152].mxu1 %v16720_v16  ;;  %v17370_v16 = vld [vmem:[#allocation21 + $0x1b30] sm:$0xff] }
0x1500   :  { %25108 = vmatprep.mubr.f32.mxu1 %v16721_v25  ;;  %v17371_v25 = vld [vmem:[#allocation21 + $0x1b38] sm:$0xff] }
0x1503   :  { %25109 = vmatmul.mubr.f32.gmra.mrb[154].mxu1 %v16722_v22  ;;  %v17372_v22 = vld [vmem:[#allocation21 + $0x1b40] sm:$0xff] }
0x1504   :  { %25111 = vmatprep.mubr.f32.mxu1 %v16723_v19  ;;  %v17373_v19 = vld [vmem:[#allocation21 + $0x1b48] sm:$0xff] }
0x1507   :  { %25112 = vmatmul.mubr.f32.gmra.mrb[156].mxu1 %v16724_v13  ;;  %v17374_v13 = vld [vmem:[#allocation21 + $0x1b50] sm:$0xff] }
0x1508   :  { %25114 = vmatprep.mubr.f32.mxu1 %v16725_v51  ;;  %v17375_v51 = vld [vmem:[#allocation21 + $0x1b58] sm:$0xff] }
0x150b   :  { %25115 = vmatmul.mubr.f32.gmra.mrb[158].mxu1 %v16726_v39  ;;  %v17376_v39 = vld [vmem:[#allocation21 + $0x1b60] sm:$0xff] }
0x150c   :  { %25117 = vmatprep.mubr.f32.mxu1 %v16727_v17  ;;  %v17377_v17 = vld [vmem:[#allocation21 + $0x1b68] sm:$0xff] }
0x150f   :  { %25118 = vmatmul.mubr.f32.gmra.mrb[160].mxu1 %v16728_v12  ;;  %v17378_v12 = vld [vmem:[#allocation21 + $0x1b70] sm:$0xff] }
0x1510   :  { %25120 = vmatprep.mubr.f32.mxu1 %v16729_v52  ;;  %v17379_v52 = vld [vmem:[#allocation21 + $0x1b78] sm:$0xff] }
0x1513   :  { %25121 = vmatmul.mubr.f32.gmra.mrb[162].mxu1 %v16730_v56  ;;  %v17380_v56 = vld [vmem:[#allocation21 + $0x1b80] sm:$0xff] }
0x1514   :  { %25123 = vmatprep.mubr.f32.mxu1 %v16731_v37  ;;  %v17381_v37 = vld [vmem:[#allocation21 + $0x1b88] sm:$0xff] }
0x1517   :  { %25124 = vmatmul.mubr.f32.gmra.mrb[164].mxu1 %v16732_v54  ;;  %v17382_v54 = vld [vmem:[#allocation21 + $0x1b90] sm:$0xff] }
0x1518   :  { %25126 = vmatprep.mubr.f32.mxu1 %v16733_v28  ;;  %v17383_v28 = vld [vmem:[#allocation21 + $0x1b98] sm:$0xff] }
0x151b   :  { %25127 = vmatmul.mubr.f32.gmra.mrb[166].mxu1 %v16734_v61  ;;  %v17384_v61 = vld [vmem:[#allocation21 + $0x1ba0] sm:$0xff] }
0x151c   :  { %25187 = vmatprep.mubr.f32.mxu1 %v17332_v32  ;;  %v17385_v32 = vld [vmem:[#allocation21 + $0x1ba8] sm:$0xff] }
0x151f   :  { %25188 = vmatmul.mubr.f32.vlgmr.msra.gmra.mrb[168].mxu1 %v17333_v20  ;;  %v17386_v20 = vld [vmem:[#allocation21 + $0x1bb0] sm:$0xff] }
0x1520   :  { %26354 = vmatpush3.bf16.msra.mxu1 %v30297_v57  ;;  %25190 = vmatprep.mubr.f32.mxu1 %v17334_v45  ;;  %v17340_v57 = vld [vmem:[#allocation21 + $0x1a40] sm:$0xff]  ;;  %v17387_v45 = vld [vmem:[#allocation21 + $0x1bb8] sm:$0xff] }
0x1521   :  { %26356 = vmatprep.subr.bf16.mxu1 %v30299_v14 }
0x1523   :  { %25191 = vmatmul.mubr.f32.gmra.mrb[170].mxu1 %v17335_v43  ;;  %v17388_v43 = vld [vmem:[#allocation21 + $0x1bc0] sm:$0xff] }
0x1524   :  { %26358 = vmatpush3.bf16.msra.mxu1 %v30299_v14  ;;  %25193 = vmatprep.mubr.f32.mxu1 %v17336_v5  ;;  %v17342_v14 = vld [vmem:[#allocation21 + $0x1a50] sm:$0xff]  ;;  %v17389_v5 = vld [vmem:[#allocation21 + $0x1bc8] sm:$0xff] }
0x1525   :  { %26360 = vmatprep.subr.bf16.mxu1 %v30301_v36 }
0x1527   :  { %25194 = vmatmul.mubr.f32.gmra.mrb[172].mxu1 %v17337_v38  ;;  %v17390_v38 = vld [vmem:[#allocation21 + $0x1bd0] sm:$0xff] }
0x1528   :  { %26362 = vmatpush3.bf16.msra.mxu1 %v30301_v36  ;;  %25196 = vmatprep.mubr.f32.mxu1 %v17338_v9  ;;  %v17344_v36 = vld [vmem:[#allocation21 + $0x1a60] sm:$0xff]  ;;  %v17391_v9 = vld [vmem:[#allocation21 + $0x1bd8] sm:$0xff] }
0x1529   :  { %26364 = vmatprep.subr.bf16.mxu1 %v30303_v50 }
0x152b   :  { %25197 = vmatmul.mubr.f32.gmra.mrb[174].mxu1 %v17339_v40  ;;  %v17392_v40 = vld [vmem:[#allocation21 + $0x1be0] sm:$0xff] }
0x152c   :  { %26366 = vmatpush3.bf16.msra.mxu1 %v30303_v50  ;;  %25199 = vmatprep.mubr.f32.mxu1 %v17340_v57  ;;  %v17346_v50 = vld [vmem:[#allocation21 + $0x1a70] sm:$0xff]  ;;  %v17393_v57 = vld [vmem:[#allocation21 + $0x1be8] sm:$0xff] }
0x152d   :  { %26368 = vmatprep.subr.bf16.mxu1 %v30305_v10 }
0x152f   :  { %25200 = vmatmul.mubr.f32.gmra.mrb[176].mxu1 %v17341_v58  ;;  %v17394_v58 = vld [vmem:[#allocation21 + $0x1bf0] sm:$0xff] }
0x1530   :  { %26370 = vmatpush3.bf16.msra.mxu1 %v30305_v10  ;;  %25202 = vmatprep.mubr.f32.mxu1 %v17342_v14  ;;  %v17348_v10 = vld [vmem:[#allocation21 + $0x1a80] sm:$0xff]  ;;  %v17395_v14 = vld [vmem:[#allocation21 + $0x1bf8] sm:$0xff] }
0x1531   :  { %26372 = vmatprep.subr.bf16.mxu1 %v30307_v3 }
0x1533   :  { %25203 = vmatmul.mubr.f32.gmra.mrb[178].mxu1 %v17343_v62  ;;  %v17993_v62 = vld [vmem:[#allocation21 + $0x1c00] sm:$0xff] }
0x1534   :  { %26374 = vmatpush3.bf16.msra.mxu1 %v30307_v3  ;;  %25205 = vmatprep.mubr.f32.mxu1 %v17344_v36  ;;  %v17350_v3 = vld [vmem:[#allocation21 + $0x1a90] sm:$0xff]  ;;  %v17994_v36 = vld [vmem:[#allocation21 + $0x1c08] sm:$0xff] }
0x1535   :  { %26376 = vmatprep.subr.bf16.mxu1 %v30309_v0 }
0x1537   :  { %25206 = vmatmul.mubr.f32.gmra.mrb[180].mxu1 %v17345_v30  ;;  %v17995_v30 = vld [vmem:[#allocation21 + $0x1c10] sm:$0xff] }
0x1538   :  { %26378 = vmatpush3.bf16.msra.mxu1 %v30309_v0  ;;  %25208 = vmatprep.mubr.f32.mxu1 %v17346_v50  ;;  %v17353_v0 = vld [vmem:[#allocation21 + $0x1aa8] sm:$0xff]  ;;  %v17996_v50 = vld [vmem:[#allocation21 + $0x1c18] sm:$0xff] }
0x1539   :  { %26380 = vmatprep.subr.bf16.mxu1 %v30311_v41 }
0x153b   :  { %25209 = vmatmul.mubr.f32.gmra.mrb[118].mxu1 %v17347_v7  ;;  %v17997_v7 = vld [vmem:[#allocation21 + $0x1c20] sm:$0xff] }
0x153c   :  { %26382 = vmatpush3.bf16.msra.mxu1 %v30311_v41  ;;  %25211 = vmatprep.mubr.f32.mxu1 %v17348_v10  ;;  %v17357_v41 = vld [vmem:[#allocation21 + $0x1ac8] sm:$0xff] }
0x153d   :  { %26384 = vmatprep.subr.bf16.mxu1 %v30313_v31  ;;  %v17998_v10 = vld [vmem:[#allocation21 + $0x1c28] sm:$0xff] }
0x153f   :  { %25212 = vmatmul.mubr.f32.gmra.mrb[120].mxu1 %v17349_v34  ;;  %v17999_v34 = vld [vmem:[#allocation21 + $0x1c30] sm:$0xff] }
0x1540   :  { %25214 = vmatprep.mubr.f32.mxu1 %v17350_v3  ;;  %v18000_v3 = vld [vmem:[#allocation21 + $0x1c38] sm:$0xff] }
0x1543   :  { %25215 = vmatmul.mubr.f32.gmra.mrb[122].mxu1 %v17351_v53  ;;  %v18002_v53 = vld [vmem:[#allocation21 + $0x1c48] sm:$0xff] }
0x1544   :  { %25217 = vmatprep.mubr.f32.mxu1 %v17352_v29  ;;  %v18004_v29 = vld [vmem:[#allocation21 + $0x1c58] sm:$0xff] }
0x1547   :  { %25218 = vmatmul.mubr.f32.gmra.mrb[124].mxu1 %v17353_v0  ;;  %v18006_v0 = vld [vmem:[#allocation21 + $0x1c68] sm:$0xff] }
0x1548   :  { %25220 = vmatprep.mubr.f32.mxu1 %v17354_v42  ;;  %v18008_v42 = vld [vmem:[#allocation21 + $0x1c78] sm:$0xff] }
0x154b   :  { %25221 = vmatmul.mubr.f32.gmra.mrb[126].mxu1 %v17355_v24  ;;  %v18010_v24 = vld [vmem:[#allocation21 + $0x1c88] sm:$0xff] }
0x154c   :  { %25223 = vmatprep.mubr.f32.mxu1 %v17356_v59  ;;  %v18011_v59 = vld [vmem:[#allocation21 + $0x1c90] sm:$0xff] }
0x154f   :  { %25224 = vmatmul.mubr.f32.gmra.mrb[128].mxu1 %v17357_v41  ;;  %v18013_v41 = vld [vmem:[#allocation21 + $0x1ca0] sm:$0xff] }
0x1550   :  { %25226 = vmatprep.mubr.f32.mxu1 %v17358_v33  ;;  %v18014_v33 = vld [vmem:[#allocation21 + $0x1ca8] sm:$0xff] }
0x1553   :  { %25227 = vmatmul.mubr.f32.gmra.mrb[130].mxu1 %v17359_v1  ;;  %v18015_v1 = vld [vmem:[#allocation21 + $0x1cb0] sm:$0xff] }
0x1554   :  { %25229 = vmatprep.mubr.f32.mxu1 %v17360_v35  ;;  %v18017_v35 = vld [vmem:[#allocation21 + $0x1cc0] sm:$0xff] }
0x1557   :  { %25230 = vmatmul.mubr.f32.gmra.mrb[132].mxu1 %v17361_v47  ;;  %v18018_v47 = vld [vmem:[#allocation21 + $0x1cc8] sm:$0xff] }
0x1558   :  { %25232 = vmatprep.mubr.f32.mxu1 %v17362_v27  ;;  %v18019_v27 = vld [vmem:[#allocation21 + $0x1cd0] sm:$0xff] }
0x155b   :  { %25233 = vmatmul.mubr.f32.gmra.mrb[134].mxu1 %v17363_v21  ;;  %v18021_v21 = vld [vmem:[#allocation21 + $0x1ce0] sm:$0xff] }
0x155c   :  { %25235 = vmatprep.mubr.f32.mxu1 %v17364_v15  ;;  %v18022_v15 = vld [vmem:[#allocation21 + $0x1ce8] sm:$0xff] }
0x155f   :  { %25236 = vmatmul.mubr.f32.gmra.mrb[136].mxu1 %v17365_v23  ;;  %v18023_v23 = vld [vmem:[#allocation21 + $0x1cf0] sm:$0xff] }
0x1560   :  { %25238 = vmatprep.mubr.f32.mxu1 %v17366_v4  ;;  %v18024_v4 = vld [vmem:[#allocation21 + $0x1cf8] sm:$0xff] }
0x1563   :  { %25239 = vmatmul.mubr.f32.gmra.mrb[138].mxu1 %v17367_v46  ;;  %v18025_v46 = vld [vmem:[#allocation21 + $0x1d00] sm:$0xff] }
0x1564   :  { %25241 = vmatprep.mubr.f32.mxu1 %v17368_v60  ;;  %v18026_v60 = vld [vmem:[#allocation21 + $0x1d08] sm:$0xff] }
0x1567   :  { %25242 = vmatmul.mubr.f32.gmra.mrb[140].mxu1 %v17369_v8  ;;  %v18027_v8 = vld [vmem:[#allocation21 + $0x1d10] sm:$0xff] }
0x1568   :  { %25244 = vmatprep.mubr.f32.mxu1 %v17370_v16  ;;  %v18028_v16 = vld [vmem:[#allocation21 + $0x1d18] sm:$0xff] }
0x156b   :  { %25245 = vmatmul.mubr.f32.gmra.mrb[142].mxu1 %v17371_v25  ;;  %v18029_v25 = vld [vmem:[#allocation21 + $0x1d20] sm:$0xff] }
0x156c   :  { %25247 = vmatprep.mubr.f32.mxu1 %v17372_v22  ;;  %v18030_v22 = vld [vmem:[#allocation21 + $0x1d28] sm:$0xff] }
0x156f   :  { %25248 = vmatmul.mubr.f32.gmra.mrb[144].mxu1 %v17373_v19  ;;  %v18031_v19 = vld [vmem:[#allocation21 + $0x1d30] sm:$0xff] }
0x1570   :  { %25250 = vmatprep.mubr.f32.mxu1 %v17374_v13  ;;  %v18032_v13 = vld [vmem:[#allocation21 + $0x1d38] sm:$0xff] }
0x1573   :  { %25251 = vmatmul.mubr.f32.gmra.mrb[146].mxu1 %v17375_v51  ;;  %v18033_v51 = vld [vmem:[#allocation21 + $0x1d40] sm:$0xff] }
0x1574   :  { %25253 = vmatprep.mubr.f32.mxu1 %v17376_v39  ;;  %v18034_v39 = vld [vmem:[#allocation21 + $0x1d48] sm:$0xff] }
0x1577   :  { %25254 = vmatmul.mubr.f32.gmra.mrb[148].mxu1 %v17377_v17  ;;  %v18035_v17 = vld [vmem:[#allocation21 + $0x1d50] sm:$0xff] }
0x1578   :  { %25256 = vmatprep.mubr.f32.mxu1 %v17378_v12  ;;  %v18036_v12 = vld [vmem:[#allocation21 + $0x1d58] sm:$0xff] }
0x157b   :  { %25257 = vmatmul.mubr.f32.gmra.mrb[150].mxu1 %v17379_v52  ;;  %v18037_v52 = vld [vmem:[#allocation21 + $0x1d60] sm:$0xff] }
0x157c   :  { %25259 = vmatprep.mubr.f32.mxu1 %v17380_v56  ;;  %v18038_v56 = vld [vmem:[#allocation21 + $0x1d68] sm:$0xff] }
0x157f   :  { %25260 = vmatmul.mubr.f32.gmra.mrb[152].mxu1 %v17381_v37  ;;  %v18039_v37 = vld [vmem:[#allocation21 + $0x1d70] sm:$0xff] }
0x1580   :  { %25262 = vmatprep.mubr.f32.mxu1 %v17382_v54  ;;  %v18040_v54 = vld [vmem:[#allocation21 + $0x1d78] sm:$0xff] }
0x1583   :  { %25263 = vmatmul.mubr.f32.gmra.mrb[154].mxu1 %v17383_v28  ;;  %v18041_v28 = vld [vmem:[#allocation21 + $0x1d80] sm:$0xff] }
0x1584   :  { %25265 = vmatprep.mubr.f32.mxu1 %v17384_v61  ;;  %v18042_v61 = vld [vmem:[#allocation21 + $0x1d88] sm:$0xff] }
0x1587   :  { %25266 = vmatmul.mubr.f32.gmra.mrb[156].mxu1 %v17385_v32  ;;  %v18043_v32 = vld [vmem:[#allocation21 + $0x1d90] sm:$0xff] }
0x1588   :  { %25268 = vmatprep.mubr.f32.mxu1 %v17386_v20  ;;  %v18044_v20 = vld [vmem:[#allocation21 + $0x1d98] sm:$0xff] }
0x158b   :  { %25269 = vmatmul.mubr.f32.gmra.mrb[158].mxu1 %v17387_v45  ;;  %v18045_v45 = vld [vmem:[#allocation21 + $0x1da0] sm:$0xff] }
0x158c   :  { %25271 = vmatprep.mubr.f32.mxu1 %v17388_v43  ;;  %v18046_v43 = vld [vmem:[#allocation21 + $0x1da8] sm:$0xff] }
0x158f   :  { %25272 = vmatmul.mubr.f32.gmra.mrb[160].mxu1 %v17389_v5  ;;  %v18047_v5 = vld [vmem:[#allocation21 + $0x1db0] sm:$0xff] }
0x1590   :  { %25274 = vmatprep.mubr.f32.mxu1 %v17390_v38  ;;  %v18048_v38 = vld [vmem:[#allocation21 + $0x1db8] sm:$0xff] }
0x1593   :  { %25275 = vmatmul.mubr.f32.gmra.mrb[162].mxu1 %v17391_v9  ;;  %v18049_v9 = vld [vmem:[#allocation21 + $0x1dc0] sm:$0xff] }
0x1594   :  { %25277 = vmatprep.mubr.f32.mxu1 %v17392_v40  ;;  %v18050_v40 = vld [vmem:[#allocation21 + $0x1dc8] sm:$0xff] }
0x1597   :  { %25278 = vmatmul.mubr.f32.gmra.mrb[164].mxu1 %v17393_v57  ;;  %v18051_v57 = vld [vmem:[#allocation21 + $0x1dd0] sm:$0xff] }
0x1598   :  { %25280 = vmatprep.mubr.f32.mxu1 %v17394_v58  ;;  %v18052_v58 = vld [vmem:[#allocation21 + $0x1dd8] sm:$0xff] }
0x159b   :  { %25281 = vmatmul.mubr.f32.gmra.mrb[166].mxu1 %v17395_v14  ;;  %v18053_v14 = vld [vmem:[#allocation21 + $0x1de0] sm:$0xff] }
0x159c   :  { %25341 = vmatprep.mubr.f32.mxu1 %v17993_v62  ;;  %v18054_v62 = vld [vmem:[#allocation21 + $0x1de8] sm:$0xff] }
0x159f   :  { %25342 = vmatmul.mubr.f32.vlgmr.msra.gmra.mrb[168].mxu1 %v17994_v36  ;;  %v18055_v36 = vld [vmem:[#allocation21 + $0x1df0] sm:$0xff] }
0x15a0   :  { %26386 = vmatpush3.bf16.msra.mxu1 %v30313_v31  ;;  %25344 = vmatprep.mubr.f32.mxu1 %v17995_v30  ;;  %v18001_v31 = vld [vmem:[#allocation21 + $0x1c40] sm:$0xff]  ;;  %v18056_v30 = vld [vmem:[#allocation21 + $0x1df8] sm:$0xff] }
0x15a1   :  { %26388 = vmatprep.subr.bf16.mxu1 %v30317_v63 }
0x15a3   :  { %25345 = vmatmul.mubr.f32.gmra.mrb[170].mxu1 %v17996_v50  ;;  %v18654_v50 = vld [vmem:[#allocation21 + $0x1e00] sm:$0xff] }
0x15a4   :  { %26390 = vmatpush3.bf16.msra.mxu1 %v30317_v63  ;;  %25347 = vmatprep.mubr.f32.mxu1 %v17997_v7  ;;  %v18003_v63 = vld [vmem:[#allocation21 + $0x1c50] sm:$0xff]  ;;  %v18655_v7 = vld [vmem:[#allocation21 + $0x1e08] sm:$0xff] }
0x15a5   :  { %26392 = vmatprep.subr.bf16.mxu1 %v30321_v48 }
0x15a7   :  { %25348 = vmatmul.mubr.f32.gmra.mrb[172].mxu1 %v17998_v10  ;;  %v18656_v10 = vld [vmem:[#allocation21 + $0x1e10] sm:$0xff] }
0x15a8   :  { %26394 = vmatpush3.bf16.msra.mxu1 %v30321_v48  ;;  %25350 = vmatprep.mubr.f32.mxu1 %v17999_v34  ;;  %v18005_v48 = vld [vmem:[#allocation21 + $0x1c60] sm:$0xff]  ;;  %v18657_v34 = vld [vmem:[#allocation21 + $0x1e18] sm:$0xff] }
0x15a9   :  { %26396 = vmatprep.subr.bf16.mxu1 %v30325_v6 }
0x15ab   :  { %25351 = vmatmul.mubr.f32.gmra.mrb[174].mxu1 %v18000_v3  ;;  %v18658_v3 = vld [vmem:[#allocation21 + $0x1e20] sm:$0xff] }
0x15ac   :  { %26398 = vmatpush3.bf16.msra.mxu1 %v30325_v6  ;;  %25353 = vmatprep.mubr.f32.mxu1 %v18001_v31  ;;  %v18007_v6 = vld [vmem:[#allocation21 + $0x1c70] sm:$0xff]  ;;  %v18659_v31 = vld [vmem:[#allocation21 + $0x1e28] sm:$0xff] }
0x15ad   :  { %26400 = vmatprep.subr.bf16.mxu1 %v30329_v2 }
0x15af   :  { %25354 = vmatmul.mubr.f32.gmra.mrb[176].mxu1 %v18002_v53  ;;  %v18660_v53 = vld [vmem:[#allocation21 + $0x1e30] sm:$0xff] }
0x15b0   :  { %26402 = vmatpush3.bf16.msra.mxu1 %v30329_v2  ;;  %25356 = vmatprep.mubr.f32.mxu1 %v18003_v63  ;;  %v18009_v2 = vld [vmem:[#allocation21 + $0x1c80] sm:$0xff]  ;;  %v18661_v63 = vld [vmem:[#allocation21 + $0x1e38] sm:$0xff] }
0x15b1   :  { %26404 = vmatprep.subr.bf16.mxu1 %v30333_v18 }
0x15b3   :  { %25357 = vmatmul.mubr.f32.gmra.mrb[178].mxu1 %v18004_v29  ;;  %v18662_v29 = vld [vmem:[#allocation21 + $0x1e40] sm:$0xff] }
0x15b4   :  { %26406 = vmatpush3.bf16.msra.mxu1 %v30333_v18  ;;  %25359 = vmatprep.mubr.f32.mxu1 %v18005_v48  ;;  %v18012_v18 = vld [vmem:[#allocation21 + $0x1c98] sm:$0xff]  ;;  %v18663_v48 = vld [vmem:[#allocation21 + $0x1e48] sm:$0xff] }
0x15b5   :  { %26408 = vmatprep.subr.bf16.mxu1 %v30337_v55 }
0x15b7   :  { %25360 = vmatmul.mubr.f32.gmra.mrb[180].mxu1 %v18006_v0  ;;  %v18664_v0 = vld [vmem:[#allocation21 + $0x1e50] sm:$0xff] }
0x15b8   :  { %26410 = vmatpush3.bf16.msra.mxu1 %v30337_v55  ;;  %25362 = vmatprep.mubr.f32.mxu1 %v18007_v6  ;;  %v18016_v55 = vld [vmem:[#allocation21 + $0x1cb8] sm:$0xff] }
0x15b9   :  { %26412 = vmatprep.subr.bf16.mxu1 %v30341_v26  ;;  %v18665_v6 = vld [vmem:[#allocation21 + $0x1e58] sm:$0xff] }
0x15bb   :  { %25363 = vmatmul.mubr.f32.gmra.mrb[118].mxu1 %v18008_v42  ;;  %v18666_v42 = vld [vmem:[#allocation21 + $0x1e60] sm:$0xff] }
0x15bc   :  { %26414 = vmatpush3.bf16.msra.mxu1 %v30341_v26  ;;  %25365 = vmatprep.mubr.f32.mxu1 %v18009_v2  ;;  %v18020_v26 = vld [vmem:[#allocation21 + $0x1cd8] sm:$0xff]  ;;  %v18667_v2 = vld [vmem:[#allocation21 + $0x1e68] sm:$0xff] }
0x15bf   :  { %25366 = vmatmul.mubr.f32.gmra.mrb[120].mxu1 %v18010_v24  ;;  %v18668_v24 = vld [vmem:[#allocation21 + $0x1e70] sm:$0xff] }
0x15c0   :  { %25368 = vmatprep.mubr.f32.mxu1 %v18011_v59  ;;  %v18669_v59 = vld [vmem:[#allocation21 + $0x1e78] sm:$0xff] }
0x15c3   :  { %25369 = vmatmul.mubr.f32.gmra.mrb[122].mxu1 %v18012_v18  ;;  %v18670_v18 = vld [vmem:[#allocation21 + $0x1e80] sm:$0xff] }
0x15c4   :  { %25371 = vmatprep.mubr.f32.mxu1 %v18013_v41  ;;  %v18671_v41 = vld [vmem:[#allocation21 + $0x1e88] sm:$0xff] }
0x15c7   :  { %25372 = vmatmul.mubr.f32.gmra.mrb[124].mxu1 %v18014_v33  ;;  %v18672_v33 = vld [vmem:[#allocation21 + $0x1e90] sm:$0xff] }
0x15c8   :  { %25374 = vmatprep.mubr.f32.mxu1 %v18015_v1  ;;  %v18673_v1 = vld [vmem:[#allocation21 + $0x1e98] sm:$0xff] }
0x15cb   :  { %25375 = vmatmul.mubr.f32.gmra.mrb[126].mxu1 %v18016_v55  ;;  %v18674_v55 = vld [vmem:[#allocation21 + $0x1ea0] sm:$0xff] }
0x15cc   :  { %25377 = vmatprep.mubr.f32.mxu1 %v18017_v35  ;;  %v18675_v35 = vld [vmem:[#allocation21 + $0x1ea8] sm:$0xff] }
0x15cf   :  { %25378 = vmatmul.mubr.f32.gmra.mrb[128].mxu1 %v18018_v47  ;;  %v18676_v47 = vld [vmem:[#allocation21 + $0x1eb0] sm:$0xff] }
0x15d0   :  { %25380 = vmatprep.mubr.f32.mxu1 %v18019_v27  ;;  %v18677_v27 = vld [vmem:[#allocation21 + $0x1eb8] sm:$0xff] }
0x15d3   :  { %25381 = vmatmul.mubr.f32.gmra.mrb[130].mxu1 %v18020_v26  ;;  %v18678_v26 = vld [vmem:[#allocation21 + $0x1ec0] sm:$0xff] }
0x15d4   :  { %25383 = vmatprep.mubr.f32.mxu1 %v18021_v21  ;;  %v18679_v21 = vld [vmem:[#allocation21 + $0x1ec8] sm:$0xff] }
0x15d7   :  { %25384 = vmatmul.mubr.f32.gmra.mrb[132].mxu1 %v18022_v15  ;;  %v18680_v15 = vld [vmem:[#allocation21 + $0x1ed0] sm:$0xff] }
0x15d8   :  { %25386 = vmatprep.mubr.f32.mxu1 %v18023_v23  ;;  %v18681_v23 = vld [vmem:[#allocation21 + $0x1ed8] sm:$0xff] }
0x15db   :  { %25387 = vmatmul.mubr.f32.gmra.mrb[134].mxu1 %v18024_v4  ;;  %v18682_v4 = vld [vmem:[#allocation21 + $0x1ee0] sm:$0xff] }
0x15dc   :  { %25389 = vmatprep.mubr.f32.mxu1 %v18025_v46  ;;  %v18683_v46 = vld [vmem:[#allocation21 + $0x1ee8] sm:$0xff] }
0x15df   :  { %25390 = vmatmul.mubr.f32.gmra.mrb[136].mxu1 %v18026_v60  ;;  %v18684_v60 = vld [vmem:[#allocation21 + $0x1ef0] sm:$0xff] }
0x15e0   :  { %25392 = vmatprep.mubr.f32.mxu1 %v18027_v8  ;;  %v18685_v8 = vld [vmem:[#allocation21 + $0x1ef8] sm:$0xff] }
0x15e3   :  { %25393 = vmatmul.mubr.f32.gmra.mrb[138].mxu1 %v18028_v16  ;;  %v18686_v16 = vld [vmem:[#allocation21 + $0x1f00] sm:$0xff] }
0x15e4   :  { %25395 = vmatprep.mubr.f32.mxu1 %v18029_v25  ;;  %v18687_v25 = vld [vmem:[#allocation21 + $0x1f08] sm:$0xff] }
0x15e7   :  { %25396 = vmatmul.mubr.f32.gmra.mrb[140].mxu1 %v18030_v22  ;;  %v18688_v22 = vld [vmem:[#allocation21 + $0x1f10] sm:$0xff] }
0x15e8   :  { %25398 = vmatprep.mubr.f32.mxu1 %v18031_v19  ;;  %v18689_v19 = vld [vmem:[#allocation21 + $0x1f18] sm:$0xff] }
0x15eb   :  { %25399 = vmatmul.mubr.f32.gmra.mrb[142].mxu1 %v18032_v13  ;;  %v18690_v13 = vld [vmem:[#allocation21 + $0x1f20] sm:$0xff] }
0x15ec   :  { %25401 = vmatprep.mubr.f32.mxu1 %v18033_v51  ;;  %v18691_v51 = vld [vmem:[#allocation21 + $0x1f28] sm:$0xff] }
0x15ef   :  { %25402 = vmatmul.mubr.f32.gmra.mrb[144].mxu1 %v18034_v39  ;;  %v18692_v39 = vld [vmem:[#allocation21 + $0x1f30] sm:$0xff] }
0x15f0   :  { %25404 = vmatprep.mubr.f32.mxu1 %v18035_v17  ;;  %v18693_v17 = vld [vmem:[#allocation21 + $0x1f38] sm:$0xff] }
0x15f3   :  { %25405 = vmatmul.mubr.f32.gmra.mrb[146].mxu1 %v18036_v12  ;;  %v18694_v12 = vld [vmem:[#allocation21 + $0x1f40] sm:$0xff] }
0x15f4   :  { %25407 = vmatprep.mubr.f32.mxu1 %v18037_v52  ;;  %v18695_v52 = vld [vmem:[#allocation21 + $0x1f48] sm:$0xff] }
0x15f7   :  { %25408 = vmatmul.mubr.f32.gmra.mrb[148].mxu1 %v18038_v56  ;;  %v18696_v56 = vld [vmem:[#allocation21 + $0x1f50] sm:$0xff] }
0x15f8   :  { %25410 = vmatprep.mubr.f32.mxu1 %v18039_v37  ;;  %v18697_v37 = vld [vmem:[#allocation21 + $0x1f58] sm:$0xff] }
0x15fb   :  { %25411 = vmatmul.mubr.f32.gmra.mrb[150].mxu1 %v18040_v54  ;;  %v18698_v54 = vld [vmem:[#allocation21 + $0x1f60] sm:$0xff] }
0x15fc   :  { %25413 = vmatprep.mubr.f32.mxu1 %v18041_v28  ;;  %v18699_v28 = vld [vmem:[#allocation21 + $0x1f68] sm:$0xff] }
0x15ff   :  { %25414 = vmatmul.mubr.f32.gmra.mrb[152].mxu1 %v18042_v61  ;;  %v18700_v61 = vld [vmem:[#allocation21 + $0x1f70] sm:$0xff] }
0x1600   :  { %25416 = vmatprep.mubr.f32.mxu1 %v18043_v32  ;;  %v18701_v32 = vld [vmem:[#allocation21 + $0x1f78] sm:$0xff] }
0x1603   :  { %25417 = vmatmul.mubr.f32.gmra.mrb[154].mxu1 %v18044_v20  ;;  %v18702_v20 = vld [vmem:[#allocation21 + $0x1f80] sm:$0xff] }
0x1604   :  { %25419 = vmatprep.mubr.f32.mxu1 %v18045_v45  ;;  %v18703_v45 = vld [vmem:[#allocation21 + $0x1f88] sm:$0xff] }
0x1607   :  { %25420 = vmatmul.mubr.f32.gmra.mrb[156].mxu1 %v18046_v43  ;;  %v18704_v43 = vld [vmem:[#allocation21 + $0x1f90] sm:$0xff] }
0x1608   :  { %25422 = vmatprep.mubr.f32.mxu1 %v18047_v5  ;;  %v18705_v5 = vld [vmem:[#allocation21 + $0x1f98] sm:$0xff] }
0x160b   :  { %25423 = vmatmul.mubr.f32.gmra.mrb[158].mxu1 %v18048_v38  ;;  %v18706_v38 = vld [vmem:[#allocation21 + $0x1fa0] sm:$0xff] }
0x160c   :  { %25425 = vmatprep.mubr.f32.mxu1 %v18049_v9  ;;  %v18707_v9 = vld [vmem:[#allocation21 + $0x1fa8] sm:$0xff] }
0x160f   :  { %25426 = vmatmul.mubr.f32.gmra.mrb[160].mxu1 %v18050_v40  ;;  %v18708_v40 = vld [vmem:[#allocation21 + $0x1fb0] sm:$0xff] }
0x1610   :  { %25428 = vmatprep.mubr.f32.mxu1 %v18051_v57  ;;  %v18709_v57 = vld [vmem:[#allocation21 + $0x1fb8] sm:$0xff] }
0x1613   :  { %25429 = vmatmul.mubr.f32.gmra.mrb[162].mxu1 %v18052_v58  ;;  %v18710_v58 = vld [vmem:[#allocation21 + $0x1fc0] sm:$0xff] }
0x1614   :  { %25431 = vmatprep.mubr.f32.mxu1 %v18053_v14  ;;  %v18711_v14 = vld [vmem:[#allocation21 + $0x1fc8] sm:$0xff] }
0x1617   :  { %25432 = vmatmul.mubr.f32.gmra.mrb[164].mxu1 %v18054_v62  ;;  %v18712_v62 = vld [vmem:[#allocation21 + $0x1fd0] sm:$0xff] }
0x1618   :  { %25434 = vmatprep.mubr.f32.mxu1 %v18055_v36  ;;  %v18713_v36 = vld [vmem:[#allocation21 + $0x1fd8] sm:$0xff] }
0x161b   :  { %25435 = vmatmul.mubr.f32.gmra.mrb[166].mxu1 %v18056_v30  ;;  %v18714_v30 = vld [vmem:[#allocation21 + $0x1fe0] sm:$0xff] }
0x161c   :  { %25495 = vmatprep.mubr.f32.mxu1 %v18654_v50  ;;  %v18715_v50 = vld [vmem:[#allocation21 + $0x1fe8] sm:$0xff] }
0x161f   :  { %25496 = vmatmul.mubr.f32.vlgmr.msra.gmra.mrb[168].mxu1 %v18655_v7  ;;  %v18716_v7 = vld [vmem:[#allocation21 + $0x1ff0] sm:$0xff] }
0x1620   :  { %25498 = vmatprep.mubr.f32.mxu1 %v18656_v10  ;;  %v18717_v10 = vld [vmem:[#allocation21 + $0x1ff8] sm:$0xff] }
0x1623   :  { %25499 = vmatmul.mubr.f32.gmra.mrb[170].mxu1 %v18657_v34  ;;  %v30440_v34 = vld [vmem:[#allocation24] ss:$0 sm:$0xff] }
0x1624   :  { %25501 = vmatprep.mubr.f32.mxu1 %v18658_v3  ;;  %v26451_v3 = vadd.f32 %v30018_v44, %v30440_v34  ;;  %v30907_v44 = vld [vmem:[#allocation84_spill] sm:$0xff] }
0x1627   :  { %25502 = vmatmul.mubr.f32.gmra.mrb[172].mxu1 %v18659_v31  ;;  %v26453_v31 = vadd.f32 %v30440_v34, %v30020_v49  ;;  %v30908_v49 = vld [vmem:[#allocation85_spill] sm:$0xff] }
0x1628   :  { %25504 = vmatprep.mubr.f32.mxu1 %v18660_v53 }
0x162b   :  { %25505 = vmatmul.mubr.f32.gmra.mrb[174].mxu1 %v18661_v63 }
0x162c   :  { %25507 = vmatprep.mubr.f32.mxu1 %v18662_v29 }
0x162f   :  { %25508 = vmatmul.mubr.f32.gmra.mrb[176].mxu1 %v18663_v48 }
0x1630   :  { %25510 = vmatprep.mubr.f32.mxu1 %v18664_v0  ;;  %v26455_v0 = vadd.f32 %v30026_v11, %v30440_v34 }
0x1633   :  { %25511 = vmatmul.mubr.f32.gmra.mrb[178].mxu1 %v18665_v6  ;;  %v30906_v6 = vld [vmem:[#allocation83_spill] sm:$0xff] }
0x1634   :  { %25513 = vmatprep.mubr.f32.mxu1 %v18666_v42  ;;  %v26457_v42 = vadd.f32 %v30440_v34, %v30906_v6 }
0x1637   :  { %25514 = vmatmul.mubr.f32.gmra.mrb[180].mxu1 %v18667_v2 }
0x1638   :  { %25516 = vmatprep.mubr.f32.mxu1 %v18668_v24 }
0x163b   :  { %25517 = vmatmul.mubr.f32.gmra.mrb[118].mxu1 %v18669_v59 }
0x163c   :  { %25519 = vmatprep.mubr.f32.mxu1 %v18670_v18 }
0x163f   :  { %25520 = vmatmul.mubr.f32.gmra.mrb[120].mxu1 %v18671_v41  ;;  %v26459_v41 = vadd.f32 %v30907_v44, %v30440_v34 }
0x1640   :  { %25522 = vmatprep.mubr.f32.mxu1 %v18672_v33  ;;  %v26461_v33 = vadd.f32 %v30440_v34, %v30908_v49 }
0x1643   :  { %25523 = vmatmul.mubr.f32.gmra.mrb[122].mxu1 %v18673_v1 }
0x1644   :  { %25525 = vmatprep.mubr.f32.mxu1 %v18674_v55 }
0x1647   :  { %25526 = vmatmul.mubr.f32.gmra.mrb[124].mxu1 %v18675_v35 }
0x1648   :  { %25528 = vmatprep.mubr.f32.mxu1 %v18676_v47  ;;  %v30909_v47 = vld [vmem:[#allocation86_spill] sm:$0xff] }
0x164b   :  { %25529 = vmatmul.mubr.f32.gmra.mrb[126].mxu1 %v18677_v27  ;;  %v26463_v27 = vadd.f32 %v30909_v47, %v30440_v34 }
0x164c   :  { %25531 = vmatprep.mubr.f32.mxu1 %v18678_v26  ;;  %v30910_v26 = vld [vmem:[#allocation87_spill] sm:$0xff] }
0x164f   :  { %25532 = vmatmul.mubr.f32.gmra.mrb[128].mxu1 %v18679_v21  ;;  %v26465_v21 = vadd.f32 %v30440_v34, %v30910_v26 }
0x1650   :  { %25534 = vmatprep.mubr.f32.mxu1 %v18680_v15 }
0x1653   :  { %25535 = vmatmul.mubr.f32.gmra.mrb[130].mxu1 %v18681_v23 }
0x1654   :  { %25537 = vmatprep.mubr.f32.mxu1 %v18682_v4 }
0x1657   :  { %25538 = vmatmul.mubr.f32.gmra.mrb[132].mxu1 %v18683_v46 }
0x1658   :  { %25540 = vmatprep.mubr.f32.mxu1 %v18684_v60 }
0x165b   :  { %25541 = vmatmul.mubr.f32.gmra.mrb[134].mxu1 %v18685_v8 }
0x165c   :  { %25543 = vmatprep.mubr.f32.mxu1 %v18686_v16  ;;  %v30911_v16 = vld [vmem:[#allocation88_spill] sm:$0xff] }
0x165f   :  { %25544 = vmatmul.mubr.f32.gmra.mrb[136].mxu1 %v18687_v25  ;;  %v26467_v25 = vadd.f32 %v30911_v16, %v30440_v34 }
0x1660   :  { %25546 = vmatprep.mubr.f32.mxu1 %v18688_v22  ;;  %v30912_v22 = vld [vmem:[#allocation89_spill] sm:$0xff] }
0x1663   :  { %25547 = vmatmul.mubr.f32.gmra.mrb[138].mxu1 %v18689_v19  ;;  %v26469_v19 = vadd.f32 %v30440_v34, %v30912_v22 }
0x1664   :  { %25549 = vmatprep.mubr.f32.mxu1 %v18690_v13 }
0x1667   :  { %25550 = vmatmul.mubr.f32.gmra.mrb[140].mxu1 %v18691_v51 }
0x1668   :  { %25552 = vmatprep.mubr.f32.mxu1 %v18692_v39 }
0x166b   :  { %25553 = vmatmul.mubr.f32.gmra.mrb[142].mxu1 %v18693_v17 }
0x166c   :  { %25555 = vmatprep.mubr.f32.mxu1 %v18694_v12 }
0x166f   :  { %25556 = vmatmul.mubr.f32.gmra.mrb[144].mxu1 %v18695_v52 }
0x1670   :  { %25558 = vmatprep.mubr.f32.mxu1 %v18696_v56  ;;  %v30913_v56 = vld [vmem:[#allocation90_spill] sm:$0xff] }
0x1673   :  { %25559 = vmatmul.mubr.f32.gmra.mrb[146].mxu1 %v18697_v37  ;;  %v26471_v37 = vadd.f32 %v30913_v56, %v30440_v34 }
0x1674   :  { %25561 = vmatprep.mubr.f32.mxu1 %v18698_v54  ;;  %v30914_v54 = vld [vmem:[#allocation91_spill] sm:$0xff] }
0x1677   :  { %25562 = vmatmul.mubr.f32.gmra.mrb[148].mxu1 %v18699_v28  ;;  %v26473_v28 = vadd.f32 %v30440_v34, %v30914_v54 }
0x1678   :  { %25564 = vmatprep.mubr.f32.mxu1 %v18700_v61 }
0x167b   :  { %25565 = vmatmul.mubr.f32.gmra.mrb[150].mxu1 %v18701_v32 }
0x167c   :  { %25567 = vmatprep.mubr.f32.mxu1 %v18702_v20 }
0x167f   :  { %25568 = vmatmul.mubr.f32.gmra.mrb[152].mxu1 %v18703_v45 }
0x1680   :  { %25570 = vmatprep.mubr.f32.mxu1 %v18704_v43 }
0x1683   :  { %25571 = vmatmul.mubr.f32.gmra.mrb[154].mxu1 %v18705_v5 }
0x1684   :  { %25573 = vmatprep.mubr.f32.mxu1 %v18706_v38  ;;  %v30915_v38 = vld [vmem:[#allocation92_spill] sm:$0xff] }
0x1687   :  { %25574 = vmatmul.mubr.f32.gmra.mrb[156].mxu1 %v18707_v9  ;;  %v26475_v9 = vadd.f32 %v30915_v38, %v30440_v34 }
0x1688   :  { %25576 = vmatprep.mubr.f32.mxu1 %v18708_v40  ;;  %v30916_v40 = vld [vmem:[#allocation93_spill] sm:$0xff] }
0x168b   :  { %25577 = vmatmul.mubr.f32.gmra.mrb[158].mxu1 %v18709_v57  ;;  %v26477_v57 = vadd.f32 %v30440_v34, %v30916_v40 }
0x168c   :  { %25579 = vmatprep.mubr.f32.mxu1 %v18710_v58 }
0x168f   :  { %25580 = vmatmul.mubr.f32.gmra.mrb[160].mxu1 %v18711_v14 }
0x1690   :  { %25582 = vmatprep.mubr.f32.mxu1 %v18712_v62 }
0x1693   :  { %25583 = vmatmul.mubr.f32.gmra.mrb[162].mxu1 %v18713_v36 }
0x1694   :  { %25585 = vmatprep.mubr.f32.mxu1 %v18714_v30 }
0x1697   :  { %25586 = vmatmul.mubr.f32.gmra.mrb[164].mxu1 %v18715_v50 }
0x1698   :  { %25588 = vmatprep.mubr.f32.mxu1 %v18716_v7  ;;  %v30917_v7 = vld [vmem:[#allocation33_spill] sm:$0xff] }
0x169b   :  { %25589 = vmatmul.mubr.f32.gmra.mrb[166].mxu1 %v18717_v10  ;;  %v26479_v10 = vadd.f32 %v30917_v7, %v30440_v34 }
0x16f2   :  { %v25497_v53 = vpop.f32.mrb[168].mxu1 }
0x16f3   :  { %v26452_v63 = vadd.f32 %v26451_v3, %v25497_v53  ;;  %v18784_v29 = vpop.f32.mrb[169].mxu1  ;;  %v30918_v3 = vld [vmem:[#allocation34_spill] sm:$0xff] }
0x16f4   :  { %v26454_v48 = vadd.f32 %v26453_v31, %v18784_v29  ;;  %v26481_v31 = vadd.f32 %v30440_v34, %v30918_v3 }
0x16f5   :  { %27799 = vtanh.f32 %v26452_v63 }
0x16f6   :  { %27801 = vtanh.f32 %v26454_v48  ;;  %v25500_v2 = vpop.f32.mrb[170].mxu1 }
0x16f7   :  { %v26456_v24 = vadd.f32 %v26455_v0, %v25500_v2  ;;  %v18794_v59 = vpop.f32.mrb[171].mxu1 }
0x16f8   :  { %v26458_v18 = vadd.f32 %v26457_v42, %v18794_v59  ;;  %v30919_v42 = vld [vmem:[#allocation35_spill] sm:$0xff] }
0x16f9   :  { %27803 = vtanh.f32 %v26456_v24  ;;  %v26483_v2 = vadd.f32 %v30919_v42, %v30440_v34  ;;  %v30920_v24 = vld [vmem:[#allocation36_spill] sm:$0xff] }
0x16fa   :  { %27805 = vtanh.f32 %v26458_v18  ;;  %v25503_v1 = vpop.f32.mrb[172].mxu1  ;;  %v26485_v59 = vadd.f32 %v30440_v34, %v30920_v24 }
0x16fb   :  { %v26460_v55 = vadd.f32 %v26459_v41, %v25503_v1  ;;  %v18804_v11 = vpop.f32.mrb[173].mxu1 }
0x16fc   :  { %v26462_v35 = vadd.f32 %v26461_v33, %v18804_v11 }
0x16fd   :  { %27807 = vtanh.f32 %v26460_v55  ;;  %v30921_v55 = vld [vmem:[#allocation37_spill] sm:$0xff] }
0x16fe   :  { %27809 = vtanh.f32 %v26462_v35  ;;  %v25506_v15 = vpop.f32.mrb[174].mxu1  ;;  %v26487_v11 = vadd.f32 %v30921_v55, %v30440_v34  ;;  %v30922_v35 = vld [vmem:[#allocation38_spill] sm:$0xff] }
0x16ff   :  { %v27800_v23 = vpop.eup %27799  ;;  %v26464_v4 = vadd.f32 %v26463_v27, %v25506_v15  ;;  %v18814_v46 = vpop.f32.mrb[175].mxu1  ;;  %v26489_v47 = vadd.f32 %v30440_v34, %v30922_v35 }
0x1700   :  { %v27802_v60 = vpop.eup %27801  ;;  %19233 = vst.msk [vmem:[%s30842_s16 + $0x8] sm:$0xff] %vm19231_vm4, %v27800_v23  ;;  %v26466_v8 = vadd.f32 %v26465_v21, %v18814_v46  ;;  %v30923_v46 = vld [vmem:[#allocation39_spill] sm:$0xff] }
0x1701   :  { %19232 = vst.msk [vmem:[%s30842_s16] sm:$0xff] %vm19231_vm4, %v27802_v60  ;;  %27811 = vtanh.f32 %v26464_v4  ;;  %v26491_v60 = vadd.f32 %v30923_v46, %v30440_v34 }
0x1702   :  { %27813 = vtanh.f32 %v26466_v8  ;;  %v25509_v13 = vpop.f32.mrb[176].mxu1  ;;  %v30924_v8 = vld [vmem:[#allocation40_spill] sm:$0xff] }
0x1703   :  { %v27804_v51 = vpop.eup %27803  ;;  %v26468_v39 = vadd.f32 %v26467_v25, %v25509_v13  ;;  %v18824_v17 = vpop.f32.mrb[177].mxu1  ;;  %v26493_v16 = vadd.f32 %v30440_v34, %v30924_v8 }
0x1704   :  { %v27806_v12 = vpop.eup %27805  ;;  %19235 = vst.msk [vmem:[%s30842_s16 + $0x18] sm:$0xff] %vm19231_vm4, %v27804_v51  ;;  %v26470_v52 = vadd.f32 %v26469_v19, %v18824_v17  ;;  %v30925_v17 = vld [vmem:[#allocation41_spill] sm:$0xff] }
0x1705   :  { %19234 = vst.msk [vmem:[%s30842_s16 + $0x10] sm:$0xff] %vm19231_vm4, %v27806_v12  ;;  %27815 = vtanh.f32 %v26468_v39  ;;  %v26495_v12 = vadd.f32 %v30925_v17, %v30440_v34 }
0x1706   :  { %27817 = vtanh.f32 %v26470_v52  ;;  %v25512_v61 = vpop.f32.mrb[178].mxu1  ;;  %v30926_v52 = vld [vmem:[#allocation42_spill] sm:$0xff] }
0x1707   :  { %v27808_v32 = vpop.eup %27807  ;;  %v26472_v20 = vadd.f32 %v26471_v37, %v25512_v61  ;;  %v18834_v45 = vpop.f32.mrb[179].mxu1  ;;  %v26497_v56 = vadd.f32 %v30440_v34, %v30926_v52 }
0x1708   :  { %v27810_v43 = vpop.eup %27809  ;;  %19237 = vst.msk [vmem:[%s30842_s16 + $0x28] sm:$0xff] %vm19231_vm4, %v27808_v32  ;;  %v26474_v5 = vadd.f32 %v26473_v28, %v18834_v45  ;;  %v30927_v45 = vld [vmem:[#allocation43_spill] sm:$0xff] }
0x1709   :  { %19236 = vst.msk [vmem:[%s30842_s16 + $0x20] sm:$0xff] %vm19231_vm4, %v27810_v43  ;;  %27819 = vtanh.f32 %v26472_v20  ;;  %v26499_v43 = vadd.f32 %v30927_v45, %v30440_v34 }
0x170a   :  { %27821 = vtanh.f32 %v26474_v5  ;;  %v25515_v58 = vpop.f32.mrb[180].mxu1  ;;  %v30928_v5 = vld [vmem:[#allocation44_spill] sm:$0xff] }
0x170b   :  { %v27812_v14 = vpop.eup %27811  ;;  %v26476_v62 = vadd.f32 %v26475_v9, %v25515_v58  ;;  %v18844_v36 = vpop.f32.mrb[181].mxu1  ;;  %v26501_v38 = vadd.f32 %v30440_v34, %v30928_v5 }
0x170c   :  { %v27814_v30 = vpop.eup %27813  ;;  %19239 = vst.msk [vmem:[%s30842_s16 + $0x38] sm:$0xff] %vm19231_vm4, %v27812_v14  ;;  %v26478_v50 = vadd.f32 %v26477_v57, %v18844_v36  ;;  %v30929_v36 = vld [vmem:[#allocation45_spill] sm:$0xff] }
0x170d   :  { %19238 = vst.msk [vmem:[%s30842_s16 + $0x30] sm:$0xff] %vm19231_vm4, %v27814_v30  ;;  %27823 = vtanh.f32 %v26476_v62  ;;  %v26503_v30 = vadd.f32 %v30929_v36, %v30440_v34 }
0x170e   :  { %27825 = vtanh.f32 %v26478_v50  ;;  %v25518_v53 = vpop.f32.mrb[118].mxu1  ;;  %v30930_v50 = vld [vmem:[#allocation46_spill] sm:$0xff] }
0x170f   :  { %v27816_v63 = vpop.eup %27815  ;;  %v26480_v29 = vadd.f32 %v26479_v10, %v25518_v53  ;;  %v18854_v48 = vpop.f32.mrb[119].mxu1  ;;  %v26505_v7 = vadd.f32 %v30440_v34, %v30930_v50 }
0x1710   :  { %v27818_v0 = vpop.eup %27817  ;;  %19241 = vst.msk [vmem:[%s30842_s16 + $0x48] sm:$0xff] %vm19231_vm4, %v27816_v63  ;;  %v26482_v6 = vadd.f32 %v26481_v31, %v18854_v48  ;;  %v30931_v48 = vld [vmem:[#allocation47_spill] sm:$0xff] }
0x1711   :  { %19240 = vst.msk [vmem:[%s30842_s16 + $0x40] sm:$0xff] %vm19231_vm4, %v27818_v0  ;;  %27827 = vtanh.f32 %v26480_v29  ;;  %v26507_v0 = vadd.f32 %v30931_v48, %v30440_v34 }
0x1712   :  { %27829 = vtanh.f32 %v26482_v6  ;;  %v25521_v18 = vpop.f32.mrb[120].mxu1  ;;  %v30932_v6 = vld [vmem:[#allocation48_spill] sm:$0xff] }
0x1713   :  { %v27820_v44 = vpop.eup %27819  ;;  %v26484_v41 = vadd.f32 %v26483_v2, %v25521_v18  ;;  %v18864_v49 = vpop.f32.mrb[121].mxu1  ;;  %v26509_v42 = vadd.f32 %v30440_v34, %v30932_v6 }
0x1714   :  { %v27822_v33 = vpop.eup %27821  ;;  %19243 = vst.msk [vmem:[%s30842_s16 + $0x58] sm:$0xff] %vm19231_vm4, %v27820_v44  ;;  %v26486_v1 = vadd.f32 %v26485_v59, %v18864_v49  ;;  %v30933_v49 = vld [vmem:[#allocation49_spill] sm:$0xff] }
0x1715   :  { %19242 = vst.msk [vmem:[%s30842_s16 + $0x50] sm:$0xff] %vm19231_vm4, %v27822_v33  ;;  %27831 = vtanh.f32 %v26484_v41  ;;  %v26511_v33 = vadd.f32 %v30933_v49, %v30440_v34 }
0x1716   :  { %27833 = vtanh.f32 %v26486_v1  ;;  %v25524_v27 = vpop.f32.mrb[122].mxu1  ;;  %v30934_v1 = vld [vmem:[#allocation50_spill] sm:$0xff] }
0x1717   :  { %v27824_v26 = vpop.eup %27823  ;;  %v26488_v21 = vadd.f32 %v26487_v11, %v25524_v27  ;;  %v18874_v15 = vpop.f32.mrb[123].mxu1  ;;  %v26513_v55 = vadd.f32 %v30440_v34, %v30934_v1 }
0x1718   :  { %v27826_v23 = vpop.eup %27825  ;;  %19245 = vst.msk [vmem:[%s30842_s16 + $0x68] sm:$0xff] %vm19231_vm4, %v27824_v26  ;;  %v26490_v4 = vadd.f32 %v26489_v47, %v18874_v15  ;;  %v30935_v15 = vld [vmem:[#allocation51_spill] sm:$0xff] }
0x1719   :  { %19244 = vst.msk [vmem:[%s30842_s16 + $0x60] sm:$0xff] %vm19231_vm4, %v27826_v23  ;;  %27835 = vtanh.f32 %v26488_v21  ;;  %v26515_v23 = vadd.f32 %v30935_v15, %v30440_v34 }
0x171a   :  { %27837 = vtanh.f32 %v26490_v4  ;;  %v25527_v25 = vpop.f32.mrb[124].mxu1  ;;  %v30936_v4 = vld [vmem:[#allocation52_spill] sm:$0xff] }
0x171b   :  { %v27828_v22 = vpop.eup %27827  ;;  %v26492_v19 = vadd.f32 %v26491_v60, %v25527_v25  ;;  %v18884_v13 = vpop.f32.mrb[125].mxu1  ;;  %v26517_v46 = vadd.f32 %v30440_v34, %v30936_v4 }
0x171c   :  { %v27830_v51 = vpop.eup %27829  ;;  %19247 = vst.msk [vmem:[%s30842_s16 + $0x78] sm:$0xff] %vm19231_vm4, %v27828_v22  ;;  %v26494_v39 = vadd.f32 %v26493_v16, %v18884_v13  ;;  %v30937_v13 = vld [vmem:[#allocation53_spill] sm:$0xff] }
0x171d   :  { %19246 = vst.msk [vmem:[%s30842_s16 + $0x70] sm:$0xff] %vm19231_vm4, %v27830_v51  ;;  %27839 = vtanh.f32 %v26492_v19  ;;  %v26519_v51 = vadd.f32 %v30937_v13, %v30440_v34 }
0x171e   :  { %27841 = vtanh.f32 %v26494_v39  ;;  %v25530_v37 = vpop.f32.mrb[126].mxu1  ;;  %v30938_v39 = vld [vmem:[#allocation54_spill] sm:$0xff] }
0x171f   :  { %v27832_v54 = vpop.eup %27831  ;;  %v26496_v28 = vadd.f32 %v26495_v12, %v25530_v37  ;;  %v18894_v61 = vpop.f32.mrb[127].mxu1  ;;  %v26521_v17 = vadd.f32 %v30440_v34, %v30938_v39 }
0x1720   :  { %v27834_v32 = vpop.eup %27833  ;;  %19249 = vst.msk [vmem:[%s30842_s16 + $0x88] sm:$0xff] %vm19231_vm4, %v27832_v54  ;;  %v26498_v20 = vadd.f32 %v26497_v56, %v18894_v61  ;;  %v30939_v61 = vld [vmem:[#allocation55_spill] sm:$0xff] }
0x1721   :  { %19248 = vst.msk [vmem:[%s30842_s16 + $0x80] sm:$0xff] %vm19231_vm4, %v27834_v32  ;;  %27843 = vtanh.f32 %v26496_v28  ;;  %v26523_v32 = vadd.f32 %v30939_v61, %v30440_v34 }
0x1722   :  { %27845 = vtanh.f32 %v26498_v20  ;;  %v25533_v9 = vpop.f32.mrb[128].mxu1  ;;  %v30940_v20 = vld [vmem:[#allocation56_spill] sm:$0xff] }
0x1723   :  { %v27836_v40 = vpop.eup %27835  ;;  %v26500_v57 = vadd.f32 %v26499_v43, %v25533_v9  ;;  %v18904_v58 = vpop.f32.mrb[129].mxu1  ;;  %v26525_v45 = vadd.f32 %v30440_v34, %v30940_v20 }
0x1724   :  { %v27838_v14 = vpop.eup %27837  ;;  %19251 = vst.msk [vmem:[%s30842_s16 + $0x98] sm:$0xff] %vm19231_vm4, %v27836_v40  ;;  %v26502_v62 = vadd.f32 %v26501_v38, %v18904_v58  ;;  %v30941_v58 = vld [vmem:[#allocation57_spill] sm:$0xff] }
0x1725   :  { %19250 = vst.msk [vmem:[%s30842_s16 + $0x90] sm:$0xff] %vm19231_vm4, %v27838_v14  ;;  %27847 = vtanh.f32 %v26500_v57  ;;  %v26527_v14 = vadd.f32 %v30941_v58, %v30440_v34 }
0x1726   :  { %27849 = vtanh.f32 %v26502_v62  ;;  %v25536_v10 = vpop.f32.mrb[130].mxu1  ;;  %v30942_v62 = vld [vmem:[#allocation58_spill] sm:$0xff] }
0x1727   :  { %v27840_v3 = vpop.eup %27839  ;;  %v26504_v31 = vadd.f32 %v26503_v30, %v25536_v10  ;;  %v18914_v53 = vpop.f32.mrb[131].mxu1  ;;  %v26529_v36 = vadd.f32 %v30440_v34, %v30942_v62 }
0x1728   :  { %v27842_v63 = vpop.eup %27841  ;;  %19253 = vst.msk [vmem:[%s30842_s16 + $0xa8] sm:$0xff] %vm19231_vm4, %v27840_v3  ;;  %v26506_v29 = vadd.f32 %v26505_v7, %v18914_v53  ;;  %v30943_v53 = vld [vmem:[#allocation59_spill] sm:$0xff] }
0x1729   :  { %19252 = vst.msk [vmem:[%s30842_s16 + $0xa0] sm:$0xff] %vm19231_vm4, %v27842_v63  ;;  %27851 = vtanh.f32 %v26504_v31  ;;  %v26531_v63 = vadd.f32 %v30943_v53, %v30440_v34 }
0x172a   :  { %27853 = vtanh.f32 %v26506_v29  ;;  %v25539_v2 = vpop.f32.mrb[132].mxu1  ;;  %v30944_v29 = vld [vmem:[#allocation60_spill] sm:$0xff] }
0x172b   :  { %v27844_v24 = vpop.eup %27843  ;;  %v26508_v59 = vadd.f32 %v26507_v0, %v25539_v2  ;;  %v18924_v18 = vpop.f32.mrb[133].mxu1  ;;  %v26533_v48 = vadd.f32 %v30440_v34, %v30944_v29 }
0x172c   :  { %v27846_v44 = vpop.eup %27845  ;;  %19255 = vst.msk [vmem:[%s30842_s16 + $0xb8] sm:$0xff] %vm19231_vm4, %v27844_v24  ;;  %v26510_v41 = vadd.f32 %v26509_v42, %v18924_v18  ;;  %v30945_v18 = vld [vmem:[#allocation61_spill] sm:$0xff] }
0x172d   :  { %19254 = vst.msk [vmem:[%s30842_s16 + $0xb0] sm:$0xff] %vm19231_vm4, %v27846_v44  ;;  %27855 = vtanh.f32 %v26508_v59  ;;  %v26535_v44 = vadd.f32 %v30945_v18, %v30440_v34 }
0x172e   :  { %27857 = vtanh.f32 %v26510_v41  ;;  %v25542_v11 = vpop.f32.mrb[134].mxu1  ;;  %v30946_v41 = vld [vmem:[#allocation62_spill] sm:$0xff] }
0x172f   :  { %v27848_v35 = vpop.eup %27847  ;;  %v26512_v47 = vadd.f32 %v26511_v33, %v25542_v11  ;;  %v18934_v27 = vpop.f32.mrb[135].mxu1  ;;  %v26537_v49 = vadd.f32 %v30440_v34, %v30946_v41 }
0x1730   :  { %v27850_v26 = vpop.eup %27849  ;;  %19257 = vst.msk [vmem:[%s30842_s16 + $0xc8] sm:$0xff] %vm19231_vm4, %v27848_v35  ;;  %v26514_v21 = vadd.f32 %v26513_v55, %v18934_v27  ;;  %v30947_v27 = vld [vmem:[#allocation63_spill] sm:$0xff] }
0x1731   :  { %19256 = vst.msk [vmem:[%s30842_s16 + $0xc0] sm:$0xff] %vm19231_vm4, %v27850_v26  ;;  %27859 = vtanh.f32 %v26512_v47  ;;  %v26539_v26 = vadd.f32 %v30947_v27, %v30440_v34 }
0x1732   :  { %27861 = vtanh.f32 %v26514_v21  ;;  %v25545_v60 = vpop.f32.mrb[136].mxu1  ;;  %v30948_v21 = vld [vmem:[#allocation64_spill] sm:$0xff] }
0x1733   :  { %v27852_v8 = vpop.eup %27851  ;;  %v26516_v16 = vadd.f32 %v26515_v23, %v25545_v60  ;;  %v18944_v25 = vpop.f32.mrb[137].mxu1  ;;  %v26541_v15 = vadd.f32 %v30440_v34, %v30948_v21 }
0x1734   :  { %v27854_v22 = vpop.eup %27853  ;;  %19259 = vst.msk [vmem:[%s30842_s16 + $0xd8] sm:$0xff] %vm19231_vm4, %v27852_v8  ;;  %v26518_v19 = vadd.f32 %v26517_v46, %v18944_v25  ;;  %v30949_v25 = vld [vmem:[#allocation65_spill] sm:$0xff] }
0x1735   :  { %19258 = vst.msk [vmem:[%s30842_s16 + $0xd0] sm:$0xff] %vm19231_vm4, %v27854_v22  ;;  %27863 = vtanh.f32 %v26516_v16  ;;  %v26543_v22 = vadd.f32 %v30949_v25, %v30440_v34 }
0x1736   :  { %27865 = vtanh.f32 %v26518_v19  ;;  %v25548_v12 = vpop.f32.mrb[138].mxu1  ;;  %v30950_v19 = vld [vmem:[#allocation66_spill] sm:$0xff] }
0x1737   :  { %v27856_v52 = vpop.eup %27855  ;;  %v26520_v56 = vadd.f32 %v26519_v51, %v25548_v12  ;;  %v18954_v37 = vpop.f32.mrb[139].mxu1  ;;  %v26545_v13 = vadd.f32 %v30440_v34, %v30950_v19 }
0x1738   :  { %v27858_v54 = vpop.eup %27857  ;;  %19261 = vst.msk [vmem:[%s30842_s16 + $0xe8] sm:$0xff] %vm19231_vm4, %v27856_v52  ;;  %v26522_v28 = vadd.f32 %v26521_v17, %v18954_v37  ;;  %v30951_v37 = vld [vmem:[#allocation67_spill] sm:$0xff] }
0x1739   :  { %19260 = vst.msk [vmem:[%s30842_s16 + $0xe0] sm:$0xff] %vm19231_vm4, %v27858_v54  ;;  %27867 = vtanh.f32 %v26520_v56  ;;  %v26547_v54 = vadd.f32 %v30951_v37, %v30440_v34 }
0x173a   :  { %27869 = vtanh.f32 %v26522_v28  ;;  %v25551_v43 = vpop.f32.mrb[140].mxu1  ;;  %v30952_v28 = vld [vmem:[#allocation68_spill] sm:$0xff] }
0x173b   :  { %v27860_v5 = vpop.eup %27859  ;;  %v26524_v38 = vadd.f32 %v26523_v32, %v25551_v43  ;;  %v18964_v9 = vpop.f32.mrb[141].mxu1  ;;  %v26549_v61 = vadd.f32 %v30440_v34, %v30952_v28 }
0x173c   :  { %v27862_v40 = vpop.eup %27861  ;;  %19263 = vst.msk [vmem:[%s30842_s16 + $0xf8] sm:$0xff] %vm19231_vm4, %v27860_v5  ;;  %v26526_v57 = vadd.f32 %v26525_v45, %v18964_v9  ;;  %v30953_v9 = vld [vmem:[#allocation69_spill] sm:$0xff] }
0x173d   :  { %19262 = vst.msk [vmem:[%s30842_s16 + $0xf0] sm:$0xff] %vm19231_vm4, %v27862_v40  ;;  %27871 = vtanh.f32 %v26524_v38  ;;  %v26551_v40 = vadd.f32 %v30953_v9, %v30440_v34 }
0x173e   :  { %27873 = vtanh.f32 %v26526_v57  ;;  %v25554_v30 = vpop.f32.mrb[142].mxu1  ;;  %v30954_v57 = vld [vmem:[#allocation70_spill] sm:$0xff] }
0x173f   :  { %v27864_v50 = vpop.eup %27863  ;;  %v26528_v7 = vadd.f32 %v26527_v14, %v25554_v30  ;;  %v18974_v10 = vpop.f32.mrb[143].mxu1  ;;  %v26553_v58 = vadd.f32 %v30440_v34, %v30954_v57 }
0x1740   :  { %v27866_v3 = vpop.eup %27865  ;;  %19265 = vst.msk [vmem:[%s30842_s16 + $0x108] sm:$0xff] %vm19231_vm4, %v27864_v50  ;;  %v26530_v31 = vadd.f32 %v26529_v36, %v18974_v10  ;;  %v30955_v10 = vld [vmem:[#allocation71_spill] sm:$0xff] }
0x1741   :  { %19264 = vst.msk [vmem:[%s30842_s16 + $0x100] sm:$0xff] %vm19231_vm4, %v27866_v3  ;;  %27875 = vtanh.f32 %v26528_v7  ;;  %v26555_v3 = vadd.f32 %v30955_v10, %v30440_v34 }
0x1742   :  { %27877 = vtanh.f32 %v26530_v31  ;;  %v25557_v0 = vpop.f32.mrb[144].mxu1  ;;  %v30956_v31 = vld [vmem:[#allocation72_spill] sm:$0xff] }
0x1743   :  { %v27868_v6 = vpop.eup %27867  ;;  %v26532_v42 = vadd.f32 %v26531_v63, %v25557_v0  ;;  %v18984_v2 = vpop.f32.mrb[145].mxu1  ;;  %v26557_v53 = vadd.f32 %v30440_v34, %v30956_v31 }
0x1744   :  { %v27870_v24 = vpop.eup %27869  ;;  %19267 = vst.msk [vmem:[%s30842_s16 + $0x118] sm:$0xff] %vm19231_vm4, %v27868_v6  ;;  %v26534_v59 = vadd.f32 %v26533_v48, %v18984_v2  ;;  %v30957_v2 = vld [vmem:[#allocation73_spill] sm:$0xff] }
0x1745   :  { %19266 = vst.msk [vmem:[%s30842_s16 + $0x110] sm:$0xff] %vm19231_vm4, %v27870_v24  ;;  %27879 = vtanh.f32 %v26532_v42  ;;  %v26559_v24 = vadd.f32 %v30957_v2, %v30440_v34 }
0x1746   :  { %27881 = vtanh.f32 %v26534_v59  ;;  %v25560_v33 = vpop.f32.mrb[146].mxu1  ;;  %v30958_v59 = vld [vmem:[#allocation74_spill] sm:$0xff] }
0x1747   :  { %v27872_v1 = vpop.eup %27871  ;;  %v26536_v55 = vadd.f32 %v26535_v44, %v25560_v33  ;;  %v18994_v11 = vpop.f32.mrb[147].mxu1  ;;  %v26561_v18 = vadd.f32 %v30440_v34, %v30958_v59 }
0x1748   :  { %v27874_v35 = vpop.eup %27873  ;;  %19269 = vst.msk [vmem:[%s30842_s16 + $0x128] sm:$0xff] %vm19231_vm4, %v27872_v1  ;;  %v26538_v47 = vadd.f32 %v26537_v49, %v18994_v11  ;;  %v30959_v11 = vld [vmem:[#allocation75_spill] sm:$0xff] }
0x1749   :  { %19268 = vst.msk [vmem:[%s30842_s16 + $0x120] sm:$0xff] %vm19231_vm4, %v27874_v35  ;;  %27883 = vtanh.f32 %v26536_v55  ;;  %v26563_v35 = vadd.f32 %v30959_v11, %v30440_v34 }
0x174a   :  { %27885 = vtanh.f32 %v26538_v47  ;;  %v25563_v23 = vpop.f32.mrb[148].mxu1  ;;  %v30960_v47 = vld [vmem:[#allocation76_spill] sm:$0xff] }
0x174b   :  { %v27876_v4 = vpop.eup %27875  ;;  %v26540_v46 = vadd.f32 %v26539_v26, %v25563_v23  ;;  %v19004_v60 = vpop.f32.mrb[149].mxu1  ;;  %v26565_v27 = vadd.f32 %v30440_v34, %v30960_v47 }
0x174c   :  { %v27878_v8 = vpop.eup %27877  ;;  %19271 = vst.msk [vmem:[%s30842_s16 + $0x138] sm:$0xff] %vm19231_vm4, %v27876_v4  ;;  %v26542_v16 = vadd.f32 %v26541_v15, %v19004_v60  ;;  %v30961_v60 = vld [vmem:[#allocation77_spill] sm:$0xff] }
0x174d   :  { %19270 = vst.msk [vmem:[%s30842_s16 + $0x130] sm:$0xff] %vm19231_vm4, %v27878_v8  ;;  %27887 = vtanh.f32 %v26540_v46  ;;  %v26567_v8 = vadd.f32 %v30961_v60, %v30440_v34 }
0x174e   :  { %27889 = vtanh.f32 %v26542_v16  ;;  %v25566_v51 = vpop.f32.mrb[150].mxu1  ;;  %v30962_v16 = vld [vmem:[#allocation78_spill] sm:$0xff] }
0x174f   :  { %v27880_v39 = vpop.eup %27879  ;;  %v26544_v17 = vadd.f32 %v26543_v22, %v25566_v51  ;;  %v19014_v12 = vpop.f32.mrb[151].mxu1  ;;  %v26569_v25 = vadd.f32 %v30440_v34, %v30962_v16 }
0x1750   :  { %v27882_v52 = vpop.eup %27881  ;;  %19273 = vst.msk [vmem:[%s30842_s16 + $0x148] sm:$0xff] %vm19231_vm4, %v27880_v39  ;;  %v26546_v56 = vadd.f32 %v26545_v13, %v19014_v12  ;;  %v30963_v12 = vld [vmem:[#allocation79_spill] sm:$0xff] }
0x1751   :  { %19272 = vst.msk [vmem:[%s30842_s16 + $0x140] sm:$0xff] %vm19231_vm4, %v27882_v52  ;;  %27891 = vtanh.f32 %v26544_v17  ;;  %v26571_v52 = vadd.f32 %v30963_v12, %v30440_v34 }
0x1752   :  { %27893 = vtanh.f32 %v26546_v56  ;;  %v25569_v32 = vpop.f32.mrb[152].mxu1  ;;  %v30964_v56 = vld [vmem:[#allocation80_spill] sm:$0xff] }
0x1753   :  { %v27884_v20 = vpop.eup %27883  ;;  %v26548_v45 = vadd.f32 %v26547_v54, %v25569_v32  ;;  %v19024_v43 = vpop.f32.mrb[153].mxu1  ;;  %v26573_v37 = vadd.f32 %v30440_v34, %v30964_v56 }
0x1754   :  { %v27886_v5 = vpop.eup %27885  ;;  %19275 = vst.msk [vmem:[%s30842_s16 + $0x158] sm:$0xff] %vm19231_vm4, %v27884_v20  ;;  %v26550_v38 = vadd.f32 %v26549_v61, %v19024_v43  ;;  %v30965_v43 = vld [vmem:[#allocation81_spill] sm:$0xff] }
0x1755   :  { %19274 = vst.msk [vmem:[%s30842_s16 + $0x150] sm:$0xff] %vm19231_vm4, %v27886_v5  ;;  %27895 = vtanh.f32 %v26548_v45  ;;  %v26575_v5 = vadd.f32 %v30965_v43, %v30440_v34 }
0x1756   :  { %27897 = vtanh.f32 %v26550_v38  ;;  %v25572_v14 = vpop.f32.mrb[154].mxu1  ;;  %v30966_v38 = vld [vmem:[#allocation82_spill] sm:$0xff] }
0x1757   :  { %v27888_v62 = vpop.eup %27887  ;;  %v26552_v36 = vadd.f32 %v26551_v40, %v25572_v14  ;;  %v19034_v30 = vpop.f32.mrb[155].mxu1  ;;  %v26577_v9 = vadd.f32 %v30440_v34, %v30966_v38 }
0x1758   :  { %v27890_v50 = vpop.eup %27889  ;;  %19277 = vst.msk [vmem:[%s30842_s16 + $0x168] sm:$0xff] %vm19231_vm4, %v27888_v62  ;;  %v26554_v7 = vadd.f32 %v26553_v58, %v19034_v30 }
0x1759   :  { %19276 = vst.msk [vmem:[%s30842_s16 + $0x160] sm:$0xff] %vm19231_vm4, %v27890_v50  ;;  %27899 = vtanh.f32 %v26552_v36 }
0x175a   :  { %27901 = vtanh.f32 %v26554_v7  ;;  %v25575_v63 = vpop.f32.mrb[156].mxu1 }
0x175b   :  { %v27892_v29 = vpop.eup %27891  ;;  %v26556_v48 = vadd.f32 %v26555_v3, %v25575_v63  ;;  %v19044_v0 = vpop.f32.mrb[157].mxu1 }
0x175c   :  { %v27894_v6 = vpop.eup %27893  ;;  %19279 = vst.msk [vmem:[%s30842_s16 + $0x178] sm:$0xff] %vm19231_vm4, %v27892_v29  ;;  %v26558_v42 = vadd.f32 %v26557_v53, %v19044_v0 }
0x175d   :  { %19278 = vst.msk [vmem:[%s30842_s16 + $0x170] sm:$0xff] %vm19231_vm4, %v27894_v6  ;;  %27903 = vtanh.f32 %v26556_v48 }
0x175e   :  { %27905 = vtanh.f32 %v26558_v42  ;;  %v25578_v44 = vpop.f32.mrb[158].mxu1 }
0x175f   :  { %v27896_v41 = vpop.eup %27895  ;;  %v26560_v49 = vadd.f32 %v26559_v24, %v25578_v44  ;;  %v19054_v33 = vpop.f32.mrb[159].mxu1 }
0x1760   :  { %v27898_v1 = vpop.eup %27897  ;;  %19281 = vst.msk [vmem:[%s30842_s16 + $0x188] sm:$0xff] %vm19231_vm4, %v27896_v41  ;;  %v26562_v55 = vadd.f32 %v26561_v18, %v19054_v33 }
0x1761   :  { %19280 = vst.msk [vmem:[%s30842_s16 + $0x180] sm:$0xff] %vm19231_vm4, %v27898_v1  ;;  %27907 = vtanh.f32 %v26560_v49 }
0x1762   :  { %27909 = vtanh.f32 %v26562_v55  ;;  %v25581_v26 = vpop.f32.mrb[160].mxu1 }
0x1763   :  { %v27900_v21 = vpop.eup %27899  ;;  %v26564_v15 = vadd.f32 %v26563_v35, %v25581_v26  ;;  %v19064_v23 = vpop.f32.mrb[161].mxu1 }
0x1764   :  { %v27902_v4 = vpop.eup %27901  ;;  %19283 = vst.msk [vmem:[%s30842_s16 + $0x198] sm:$0xff] %vm19231_vm4, %v27900_v21  ;;  %v26566_v46 = vadd.f32 %v26565_v27, %v19064_v23 }
0x1765   :  { %19282 = vst.msk [vmem:[%s30842_s16 + $0x190] sm:$0xff] %vm19231_vm4, %v27902_v4  ;;  %27911 = vtanh.f32 %v26564_v15 }
0x1766   :  { %27913 = vtanh.f32 %v26566_v46  ;;  %v25584_v22 = vpop.f32.mrb[162].mxu1 }
0x1767   :  { %v27904_v19 = vpop.eup %27903  ;;  %v26568_v13 = vadd.f32 %v26567_v8, %v25584_v22  ;;  %v19074_v51 = vpop.f32.mrb[163].mxu1 }
0x1768   :  { %v27906_v39 = vpop.eup %27905  ;;  %19285 = vst.msk [vmem:[%s30842_s16 + $0x1a8] sm:$0xff] %vm19231_vm4, %v27904_v19  ;;  %v26570_v17 = vadd.f32 %v26569_v25, %v19074_v51 }
0x1769   :  { %19284 = vst.msk [vmem:[%s30842_s16 + $0x1a0] sm:$0xff] %vm19231_vm4, %v27906_v39  ;;  %27915 = vtanh.f32 %v26568_v13 }
0x176a   :  { %27917 = vtanh.f32 %v26570_v17  ;;  %v25587_v54 = vpop.f32.mrb[164].mxu1 }
0x176b   :  { %v27908_v28 = vpop.eup %27907  ;;  %v26572_v61 = vadd.f32 %v26571_v52, %v25587_v54  ;;  %v19084_v32 = vpop.f32.mrb[165].mxu1 }
0x176c   :  { %v27910_v20 = vpop.eup %27909  ;;  %19287 = vst.msk [vmem:[%s30842_s16 + $0x1b8] sm:$0xff] %vm19231_vm4, %v27908_v28  ;;  %v26574_v45 = vadd.f32 %v26573_v37, %v19084_v32 }
0x176d   :  { %19286 = vst.msk [vmem:[%s30842_s16 + $0x1b0] sm:$0xff] %vm19231_vm4, %v27910_v20  ;;  %27919 = vtanh.f32 %v26572_v61 }
0x176e   :  { %27921 = vtanh.f32 %v26574_v45  ;;  %v25590_v40 = vpop.f32.mrb[166].mxu1 }
0x176f   :  { %v27912_v57 = vpop.eup %27911  ;;  %v26576_v58 = vadd.f32 %v26575_v5, %v25590_v40  ;;  %v19094_v14 = vpop.f32.mrb[167].mxu1 }
0x1770   :  { %v27914_v62 = vpop.eup %27913  ;;  %19289 = vst.msk [vmem:[%s30842_s16 + $0x1c8] sm:$0xff] %vm19231_vm4, %v27912_v57  ;;  %v26578_v36 = vadd.f32 %v26577_v9, %v19094_v14 }
0x1771   :  { %19288 = vst.msk [vmem:[%s30842_s16 + $0x1c0] sm:$0xff] %vm19231_vm4, %v27914_v62  ;;  %27923 = vtanh.f32 %v26576_v58 }
0x1772   :  { %27925 = vtanh.f32 %v26578_v36 }
0x1773   :  { %v27916_v34 = vpop.eup %27915 }
0x1774   :  { %v27918_v30 = vpop.eup %27917  ;;  %19291 = vst.msk [vmem:[%s30842_s16 + $0x1d8] sm:$0xff] %vm19231_vm4, %v27916_v34 }
0x1775   :  { %19290 = vst.msk [vmem:[%s30842_s16 + $0x1d0] sm:$0xff] %vm19231_vm4, %v27918_v30 }
0x1777   :  { %v27920_v50 = vpop.eup %27919 }
0x1778   :  { %v27922_v7 = vpop.eup %27921  ;;  %19293 = vst.msk [vmem:[%s30842_s16 + $0x1e8] sm:$0xff] %vm19231_vm4, %v27920_v50 }
0x1779   :  { %19292 = vst.msk [vmem:[%s30842_s16 + $0x1e0] sm:$0xff] %vm19231_vm4, %v27922_v7 }
0x177b   :  { %v27924_v10 = vpop.eup %27923 }
0x177c   :  { %v27926_v3 = vpop.eup %27925  ;;  %19295 = vst.msk [vmem:[%s30842_s16 + $0x1f8] sm:$0xff] %vm19231_vm4, %v27924_v10 }
0x177d   :  { %19294 = vst.msk [vmem:[%s30842_s16 + $0x1f0] sm:$0xff] %vm19231_vm4, %v27926_v3 }
0x177e   :  { %19300 = vsyncpa [#allocation3], 1 }
0x177f   :  { %19301 = vsyncpa [#allocation5], 1 }
0x1780   :  { %19302 = vsyncpa [#allocation8], 1 }
0x1781   :  { %19303 = vsyncpa [#allocation11], 1 }
0x1782   :  { %19304 = vsyncpa [#allocation14], 1 }
0x1783   :  { %19305 = vsyncpa [#allocation17], 1 }
0x1784   :  { %19306 = vsyncpa [#allocation20], 1 }
0x1785   :  { %19307 = vsyncpa [#allocation23], 1 }

</bundles_post_ra>
